<compile_context>
chip_gen: v6e
topology: v6e:2x2x1
jax: 0.10.0
libtpu: 0.0.40
codegen_flags: <defaults>
</compile_context>

<pallas_src>
import jax
import jax.numpy as jnp
import numpy as np
from jax.experimental import pallas as pl
from jax.experimental.pallas import tpu as pltpu

CONV_TN = 3072    # max lane tile for the conv matmuls (spatial dim in lanes)
FC1_TK = 8192     # contraction tile for fc1 (4 grid steps over K=32768)
FC1_TM = 16       # batch rows padded to one bf16 sublane tile (B=2 -> 16)


def _round_up(x, m):
    return ((x + m - 1) // m) * m


# ----------------------------------------------------------------------------
# Pallas kernel 1: conv-as-matmul, lane-dense.
#   (C_out, K) @ (K, tn) + bias(C_out, 1), ReLU.  K is small (75 / 400) and
#   fully resident; the grid tiles only the spatial (lane) dimension.
# ----------------------------------------------------------------------------
def _conv_kernel(w_ref, p_ref, b_ref, o_ref):
    acc = jnp.dot(w_ref[...], p_ref[...], preferred_element_type=jnp.float32)
    o_ref[...] = jnp.maximum(acc + b_ref[...], 0.0).astype(o_ref.dtype)


def conv_matmul(w, patches, b, *, tn_max=CONV_TN):
    """w:(C_out,K) bf16, patches:(K,N) bf16, b:(C_out,1) f32 -> (C_out,N) bf16."""
    c_out, k = w.shape
    k2, n = patches.shape
    assert k == k2
    # Single block if it fits, otherwise lane tiles of tn_max with a ragged
    # tail block (garbage tail columns are masked on the partial write).
    tn = n if n <= tn_max else tn_max
    grid_n = pl.cdiv(n, tn)
    return pl.pallas_call(
        _conv_kernel,
        out_shape=jax.ShapeDtypeStruct((c_out, n), jnp.bfloat16),
        grid_spec=pltpu.PrefetchScalarGridSpec(
            num_scalar_prefetch=0,
            grid=(grid_n,),
            in_specs=[
                pl.BlockSpec((c_out, k), lambda j: (0, 0)),   # weight resident
                pl.BlockSpec((k, tn), lambda j: (0, j)),      # patches, lane-tiled
                pl.BlockSpec((c_out, 1), lambda j: (0, 0)),   # per-row bias
            ],
            out_specs=pl.BlockSpec((c_out, tn), lambda j: (0, j)),
        ),
        compiler_params=pltpu.CompilerParams(
            dimension_semantics=("parallel",)),
    )(w, patches, b)


# ----------------------------------------------------------------------------
# Pallas kernel 2: fc1 matmul, single reduction axis over K.
#   Accumulator in VMEM scratch; bias + ReLU fused into the pl.when finalize.
# ----------------------------------------------------------------------------
def _fc1_kernel(x_ref, w_ref, b_ref, o_ref, acc_ref):
    @pl.when(pl.program_id(0) == 0)
    def _():
        acc_ref[...] = jnp.zeros_like(acc_ref)

    acc_ref[...] += jnp.dot(x_ref[...], w_ref[...],
                            preferred_element_type=jnp.float32)

    @pl.when(pl.program_id(0) == pl.num_programs(0) - 1)
    def _():
        o_ref[...] = jnp.maximum(acc_ref[...] + b_ref[...], 0.0).astype(
            o_ref.dtype)


def fc1_matmul(x, w, b, *, tm=FC1_TM, tk=FC1_TK):
    """x:(B,K) bf16, w:(Kp,128) bf16 pre-padded, b:(1,128) f32 -> (B,128) f32.

    Bias and ReLU are applied inside the kernel finalize.
    """
    bsz, k = x.shape
    kp, n = w.shape
    assert bsz <= tm, f"batch {bsz} exceeds FC1_TM={tm}"
    assert kp % tk == 0
    kb = kp // tk
    # Zero-pad x in both the batch rows and the K tail so padded K rows of the
    # weight multiply zeros (both operands of the padded region stay zero).
    xp = jnp.zeros((tm, kp), jnp.bfloat16).at[:bsz, :k].set(
        x.astype(jnp.bfloat16))
    out = pl.pallas_call(
        _fc1_kernel,
        out_shape=jax.ShapeDtypeStruct((tm, n), jnp.float32),
        grid_spec=pltpu.PrefetchScalarGridSpec(
            num_scalar_prefetch=0,
            grid=(kb,),
            in_specs=[
                pl.BlockSpec((tm, tk), lambda kk: (0, kk)),   # activations
                pl.BlockSpec((tk, n), lambda kk: (kk, 0)),    # weight stream
                pl.BlockSpec((1, n), lambda kk: (0, 0)),      # bias, resident
            ],
            out_specs=pl.BlockSpec((tm, n), lambda kk: (0, 0)),
            scratch_shapes=[pltpu.VMEM((tm, n), jnp.float32)],
        ),
        compiler_params=pltpu.CompilerParams(
            dimension_semantics=("arbitrary",)),
    )(xp, w, b)
    return out[:bsz]


# ----------------------------------------------------------------------------
# JAX glue: im2col on channels-major (C, B, H, W) activations.
#   Rows of the patch matrix are (c, kh, kw) — matching the row-major flatten
#   of the PyTorch OIHW conv weight; columns are (b, oh, ow).
# ----------------------------------------------------------------------------
def _im2col_cf(x, k, stride):
    C, B, H, W = x.shape
    OH = (H - k) // stride + 1
    OW = (W - k) // stride + 1
    cols = []
    for dy in range(k):
        for dx in range(k):
            cols.append(x[:, :, dy:dy + (OH - 1) * stride + 1:stride,
                              dx:dx + (OW - 1) * stride + 1:stride])
    p = jnp.stack(cols, axis=1)                   # (C, k*k, B, OH, OW)
    return p.reshape(C * k * k, B * OH * OW), OH, OW


# ----------------------------------------------------------------------------
# One-time parameter prep: reshape / transpose / pad / cast (hoisted out of
# the per-call path).
# ----------------------------------------------------------------------------
def prepare_params(params):
    def conv_w_prep(w):
        c_out = w.shape[0]
        k = int(np.prod(w.shape[1:]))
        return w.reshape(c_out, k).astype(jnp.bfloat16)   # unpadded (C_out, K)

    d_in = params["fc1_w"].shape[1]                       # 31978
    kp = _round_up(d_in, FC1_TK)                          # 32768
    fc1_w = jnp.zeros((kp, 128), jnp.bfloat16).at[:d_in, :].set(
        params["fc1_w"].T.astype(jnp.bfloat16))

    return {
        "conv1_w": conv_w_prep(params["conv1_w"]),        # (16, 75) bf16
        "conv1_b": params["conv1_b"].reshape(-1, 1),      # (16, 1) f32
        "conv2_w": conv_w_prep(params["conv2_w"]),        # (32, 400) bf16
        "conv2_b": params["conv2_b"].reshape(-1, 1),      # (32, 1) f32
        "fc1_w": fc1_w,                                   # (32768, 128) bf16
        "fc1_b": params["fc1_b"].reshape(1, -1),          # (1, 128) f32
        "fc2_wT": params["fc2_w"].T,                      # (128, 4) f32
        "fc2_b": params["fc2_b"],                         # (4,) f32
    }


# ----------------------------------------------------------------------------
# PolicyNet forward
# ----------------------------------------------------------------------------
def policy_net_forward(fp, img, state):
    """img: (B, 3, 120, 160) NCHW f32, state: (B, 10) f32 -> (B, 4) f32."""
    B = img.shape[0]
    # Channels-major (C, B, H, W) layout: conv matmul outputs are lane-dense
    # and feed the next im2col without any large transpose.
    x = img.astype(jnp.bfloat16).transpose(1, 0, 2, 3)        # (3, B, 120, 160)

    # conv1: Conv2d(3, 16, 5, stride=2) + ReLU
    p1, oh1, ow1 = _im2col_cf(x, 5, 2)                        # (75, B*58*78)
    y1 = conv_matmul(fp["conv1_w"], p1, fp["conv1_b"])        # (16, B*58*78)
    y1 = y1.reshape(16, B, oh1, ow1)

    # conv2: Conv2d(16, 32, 5, stride=2) + ReLU
    p2, oh2, ow2 = _im2col_cf(y1, 5, 2)                       # (400, B*27*37)
    y2 = conv_matmul(fp["conv2_w"], p2, fp["conv2_b"])        # (32, B*27*37)
    y2 = y2.reshape(32, B, oh2, ow2)

    # Tiny layout fix (32,B,27,37)->(B, 32*27*37) to match torch NCHW flatten.
    img_feat = y2.transpose(1, 0, 2, 3).reshape(B, -1)        # (B, 31968) bf16
    xcat = jnp.concatenate([img_feat, state.astype(jnp.bfloat16)], axis=1)

    # fc1: Linear(31978, 128) + ReLU (bias/ReLU fused in the kernel finalize)
    h = fc1_matmul(xcat, fp["fc1_w"], fp["fc1_b"])            # (B, 128) f32
    # fc2: Linear(128, 4) — tiny matvec, plain jnp (a pallas_call is overhead).
    return h @ fp["fc2_wT"] + fp["fc2_b"]


# ----------------------------------------------------------------------------
# Deterministic parameter init (shapes match the PyTorch module)
# ----------------------------------------------------------------------------
def init_params(key):
    conv_out_dim = 32 * 27 * 37  # 31968, from dummy (1, 3, 120, 160)
    ks = jax.random.split(key, 8)

    def w(k, shape, fan_in):
        return jax.random.normal(k, shape, jnp.float32) / np.sqrt(fan_in)

    return {
        "conv1_w": w(ks[0], (16, 3, 5, 5), 3 * 5 * 5),
        "conv1_b": w(ks[1], (16,), 3 * 5 * 5),
        "conv2_w": w(ks[2], (32, 16, 5, 5), 16 * 5 * 5),
        "conv2_b": w(ks[3], (32,), 16 * 5 * 5),
        "fc1_w": w(ks[4], (128, conv_out_dim + 10), conv_out_dim + 10),
        "fc1_b": w(ks[5], (128,), conv_out_dim + 10),
        "fc2_w": w(ks[6], (4, 128), 128),
        "fc2_b": w(ks[7], (4,), 128),
    }


# Pure-JAX f32 reference (XLA conv / matmul) for correctness check.
def _reference_forward(params, img, state):
    def conv2d(x, w, b, stride):
        y = jax.lax.conv_general_dilated(
            x, w, (stride, stride), "VALID",
            dimension_numbers=("NCHW", "OIHW", "NCHW"))
        return y + b.reshape(1, -1, 1, 1)

    y = jax.nn.relu(conv2d(img, params["conv1_w"], params["conv1_b"], 2))
    y = jax.nn.relu(conv2d(y, params["conv2_w"], params["conv2_b"], 2))
    feat = y.reshape(img.shape[0], -1)
    x = jnp.concatenate([feat, state], axis=1)
    h = jax.nn.relu(x @ params["fc1_w"].T + params["fc1_b"])
    return h @ params["fc2_w"].T + params["fc2_b"]


if __name__ == "__main__":
    key = jax.random.PRNGKey(0)
    k_params, k_img, k_state = jax.random.split(key, 3)

    params = init_params(k_params)
    fast_params = prepare_params(params)   # one-time weight layout prep

    B = 2
    img = jax.random.normal(k_img, (B, 3, 120, 160), jnp.float32)
    state = jax.random.normal(k_state, (B, 10), jnp.float32)

    fwd = jax.jit(policy_net_forward)
    out = jax.block_until_ready(fwd(fast_params, img, state))
    assert out.shape == (B, 4), out.shape

    ref = jax.block_until_ready(_reference_forward(params, img, state))
    # bf16 operands (f32 accumulation) through conv1/conv2/fc1 vs. an f32
    # reference: tolerance loosened accordingly.
    np.testing.assert_allclose(np.asarray(out), np.asarray(ref),
                               rtol=4e-2, atol=4e-2)

    print("KERNEL_OK")
</pallas_src>

<mosaic_0001>
module attributes {stable_mosaic.version = 11 : i64} {
  func.func @_conv_kernel(%arg0: i32, %arg1: memref<16x75xbf16, #tpu.memory_space<vmem>>, %arg2: memref<75x3072xbf16, #tpu.memory_space<vmem>>, %arg3: memref<16x1xf32, #tpu.memory_space<vmem>>, %arg4: memref<16x3072xbf16, #tpu.memory_space<vmem>>) attributes {dimension_semantics = [#tpu.dimension_semantics<parallel>], iteration_bounds = array<i64: 3>, scalar_prefetch = 0 : i64, scratch_operands = 0 : i64, tpu.core_type = #tpu.core_type<tc>, window_params = [{pipeline_mode = #tpu.pipeline_mode<synchronous>, transform_indices = @transform_0, window_bounds = array<i64: 16, 75>}, {transform_indices = @transform_1, window_bounds = array<i64: 75, 3072>}, {pipeline_mode = #tpu.pipeline_mode<synchronous>, transform_indices = @transform_2, window_bounds = array<i64: 16, 1>}, {transform_indices = @transform_3, window_bounds = array<i64: 16, 3072>}]} {
    %c0 = arith.constant 0 : index
    %c0_0 = arith.constant 0 : index
    %0 = vector.load %arg1[%c0, %c0_0] : memref<16x75xbf16, #tpu.memory_space<vmem>>, vector<16x75xbf16>
    %c0_1 = arith.constant 0 : index
    %c0_2 = arith.constant 0 : index
    %1 = vector.load %arg2[%c0_1, %c0_2] : memref<75x3072xbf16, #tpu.memory_space<vmem>>, vector<75x3072xbf16>
    %cst = arith.constant dense<0.000000e+00> : vector<16x3072xf32>
    %2 = tpu.matmul %0, %1, %cst {dimension_numbers = #tpu.dot_dimension_numbers<[1], [0], [0], [1], [0, 0, 1, 1], [], []>} : vector<16x75xbf16>, vector<75x3072xbf16>, vector<16x3072xf32> -> vector<16x3072xf32>
    %c0_3 = arith.constant 0 : index
    %c0_4 = arith.constant 0 : index
    %3 = vector.load %arg3[%c0_3, %c0_4] : memref<16x1xf32, #tpu.memory_space<vmem>>, vector<16x1xf32>
    %4 = vector.broadcast %3 : vector<16x1xf32> to vector<16x3072xf32>
    %5 = arith.addf %2, %4 : vector<16x3072xf32>
    %cst_5 = arith.constant 0.000000e+00 : f32
    %6 = vector.broadcast %cst_5 : f32 to vector<16x3072xf32>
    %7 = arith.maximumf %5, %6 : vector<16x3072xf32>
    %8 = arith.truncf %7 : vector<16x3072xf32> to vector<16x3072xbf16>
    %c0_6 = arith.constant 0 : index
    %c0_7 = arith.constant 0 : index
    %9 = vector.load %arg4[%c0_6, %c0_7] : memref<16x3072xbf16, #tpu.memory_space<vmem>>, vector<16x3072xbf16>
    tpu.vector_store %arg4[%c0_6, %c0_7], %8 {strides = array<i32>} : memref<16x3072xbf16, #tpu.memory_space<vmem>>, vector<16x3072xbf16>,
    return
  }
  func.func @transform_0(%arg0: i32) -> (i32, i32) {
    %c0_i32 = arith.constant 0 : i32
    %c0_i32_0 = arith.constant 0 : i32
    %c0_i32_1 = arith.constant 0 : i32
    return %c0_i32, %c0_i32_0 : i32, i32
  }
  func.func @transform_1(%arg0: i32) -> (i32, i32) {
    %c0_i32 = arith.constant 0 : i32
    %c0_i32_0 = arith.constant 0 : i32
    return %c0_i32, %arg0 : i32, i32
  }
  func.func @transform_2(%arg0: i32) -> (i32, i32) {
    %c0_i32 = arith.constant 0 : i32
    %c0_i32_0 = arith.constant 0 : i32
    %c0_i32_1 = arith.constant 0 : i32
    return %c0_i32, %c0_i32_0 : i32, i32
  }
  func.func @transform_3(%arg0: i32) -> (i32, i32) {
    %c0_i32 = arith.constant 0 : i32
    %c0_i32_0 = arith.constant 0 : i32
    return %c0_i32, %arg0 : i32, i32
  }
}

module attributes {stable_mosaic.version = 11 : i64} {
  func.func @_conv_kernel(%arg0: i32, %arg1: memref<32x400xbf16, #tpu.memory_space<vmem>>, %arg2: memref<400x1998xbf16, #tpu.memory_space<vmem>>, %arg3: memref<32x1xf32, #tpu.memory_space<vmem>>, %arg4: memref<32x1998xbf16, #tpu.memory_space<vmem>>) attributes {dimension_semantics = [#tpu.dimension_semantics<parallel>], iteration_bounds = array<i64: 1>, scalar_prefetch = 0 : i64, scratch_operands = 0 : i64, tpu.core_type = #tpu.core_type<tc>, window_params = [{pipeline_mode = #tpu.pipeline_mode<synchronous>, transform_indices = @transform_0, window_bounds = array<i64: 32, 400>}, {transform_indices = @transform_1, window_bounds = array<i64: 400, 1998>}, {pipeline_mode = #tpu.pipeline_mode<synchronous>, transform_indices = @transform_2, window_bounds = array<i64: 32, 1>}, {transform_indices = @transform_3, window_bounds = array<i64: 32, 1998>}]} {
    %c0 = arith.constant 0 : index
    %c0_0 = arith.constant 0 : index
    %0 = vector.load %arg1[%c0, %c0_0] : memref<32x400xbf16, #tpu.memory_space<vmem>>, vector<32x400xbf16>
    %c0_1 = arith.constant 0 : index
    %c0_2 = arith.constant 0 : index
    %1 = vector.load %arg2[%c0_1, %c0_2] : memref<400x1998xbf16, #tpu.memory_space<vmem>>, vector<400x1998xbf16>
    %cst = arith.constant dense<0.000000e+00> : vector<32x1998xf32>
    %2 = tpu.matmul %0, %1, %cst {dimension_numbers = #tpu.dot_dimension_numbers<[1], [0], [0], [1], [0, 0, 1, 1], [], []>} : vector<32x400xbf16>, vector<400x1998xbf16>, vector<32x1998xf32> -> vector<32x1998xf32>
    %c0_3 = arith.constant 0 : index
    %c0_4 = arith.constant 0 : index
    %3 = vector.load %arg3[%c0_3, %c0_4] : memref<32x1xf32, #tpu.memory_space<vmem>>, vector<32x1xf32>
    %4 = vector.broadcast %3 : vector<32x1xf32> to vector<32x1998xf32>
    %5 = arith.addf %2, %4 : vector<32x1998xf32>
    %cst_5 = arith.constant 0.000000e+00 : f32
    %6 = vector.broadcast %cst_5 : f32 to vector<32x1998xf32>
    %7 = arith.maximumf %5, %6 : vector<32x1998xf32>
    %8 = arith.truncf %7 : vector<32x1998xf32> to vector<32x1998xbf16>
    %c0_6 = arith.constant 0 : index
    %c0_7 = arith.constant 0 : index
    %9 = vector.load %arg4[%c0_6, %c0_7] : memref<32x1998xbf16, #tpu.memory_space<vmem>>, vector<32x1998xbf16>
    tpu.vector_store %arg4[%c0_6, %c0_7], %8 {strides = array<i32>} : memref<32x1998xbf16, #tpu.memory_space<vmem>>, vector<32x1998xbf16>,
    return
  }
  func.func @transform_0(%arg0: i32) -> (i32, i32) {
    %c0_i32 = arith.constant 0 : i32
    %c0_i32_0 = arith.constant 0 : i32
    %c0_i32_1 = arith.constant 0 : i32
    return %c0_i32, %c0_i32_0 : i32, i32
  }
  func.func @transform_1(%arg0: i32) -> (i32, i32) {
    %c0_i32 = arith.constant 0 : i32
    %c0_i32_0 = arith.constant 0 : i32
    return %c0_i32, %arg0 : i32, i32
  }
  func.func @transform_2(%arg0: i32) -> (i32, i32) {
    %c0_i32 = arith.constant 0 : i32
    %c0_i32_0 = arith.constant 0 : i32
    %c0_i32_1 = arith.constant 0 : i32
    return %c0_i32, %c0_i32_0 : i32, i32
  }
  func.func @transform_3(%arg0: i32) -> (i32, i32) {
    %c0_i32 = arith.constant 0 : i32
    %c0_i32_0 = arith.constant 0 : i32
    return %c0_i32, %arg0 : i32, i32
  }
}

module attributes {stable_mosaic.version = 11 : i64} {
  func.func @_fc1_kernel(%arg0: i32, %arg1: memref<16x8192xbf16, #tpu.memory_space<vmem>>, %arg2: memref<8192x128xbf16, #tpu.memory_space<vmem>>, %arg3: memref<1x128xf32, #tpu.memory_space<vmem>>, %arg4: memref<16x128xf32, #tpu.memory_space<vmem>>, %arg5: memref<16x128xf32, #tpu.memory_space<vmem>>) attributes {dimension_semantics = [#tpu.dimension_semantics<arbitrary>], iteration_bounds = array<i64: 4>, scalar_prefetch = 0 : i64, scratch_operands = 1 : i64, tpu.core_type = #tpu.core_type<tc>, window_params = [{transform_indices = @transform_0, window_bounds = array<i64: 16, 8192>}, {transform_indices = @transform_1, window_bounds = array<i64: 8192, 128>}, {pipeline_mode = #tpu.pipeline_mode<synchronous>, transform_indices = @transform_2, window_bounds = array<i64: 1, 128>}, {pipeline_mode = #tpu.pipeline_mode<synchronous>, transform_indices = @transform_3, window_bounds = array<i64: 16, 128>}]} {
    %c0_i32 = arith.constant 0 : i32
    %0 = arith.cmpi eq, %arg0, %c0_i32 : i32
    %1 = arith.extui %0 : i1 to i32
    %c0_i32_0 = arith.constant 0 : i32
    %2 = arith.cmpi ne, %1, %c0_i32_0 : i32
    scf.if %2 {
      %cst_9 = arith.constant 0.000000e+00 : f32
      %12 = vector.broadcast %cst_9 : f32 to vector<16x128xf32>
      %c0_10 = arith.constant 0 : index
      %c0_11 = arith.constant 0 : index
      %13 = vector.load %arg5[%c0_10, %c0_11] : memref<16x128xf32, #tpu.memory_space<vmem>>, vector<16x128xf32>
      tpu.vector_store %arg5[%c0_10, %c0_11], %12 {strides = array<i32>} : memref<16x128xf32, #tpu.memory_space<vmem>>, vector<16x128xf32>,
    } else {
    }
    %c0 = arith.constant 0 : index
    %c0_1 = arith.constant 0 : index
    %3 = vector.load %arg5[%c0, %c0_1] : memref<16x128xf32, #tpu.memory_space<vmem>>, vector<16x128xf32>
    %c0_2 = arith.constant 0 : index
    %c0_3 = arith.constant 0 : index
    %4 = vector.load %arg1[%c0_2, %c0_3] : memref<16x8192xbf16, #tpu.memory_space<vmem>>, vector<16x8192xbf16>
    %c0_4 = arith.constant 0 : index
    %c0_5 = arith.constant 0 : index
    %5 = vector.load %arg2[%c0_4, %c0_5] : memref<8192x128xbf16, #tpu.memory_space<vmem>>, vector<8192x128xbf16>
    %cst = arith.constant dense<0.000000e+00> : vector<16x128xf32>
    %6 = tpu.matmul %4, %5, %cst {dimension_numbers = #tpu.dot_dimension_numbers<[1], [0], [0], [1], [0, 0, 1, 1], [], []>} : vector<16x8192xbf16>, vector<8192x128xbf16>, vector<16x128xf32> -> vector<16x128xf32>
    %7 = arith.addf %3, %6 : vector<16x128xf32>
    %c0_6 = arith.constant 0 : index
    %c0_7 = arith.constant 0 : index
    %8 = vector.load %arg5[%c0_6, %c0_7] : memref<16x128xf32, #tpu.memory_space<vmem>>, vector<16x128xf32>
    tpu.vector_store %arg5[%c0_6, %c0_7], %7 {strides = array<i32>} : memref<16x128xf32, #tpu.memory_space<vmem>>, vector<16x128xf32>,
    %c3_i32 = arith.constant 3 : i32
    %9 = arith.cmpi eq, %arg0, %c3_i32 : i32
    %10 = arith.extui %9 : i1 to i32
    %c0_i32_8 = arith.constant 0 : i32
    %11 = arith.cmpi ne, %10, %c0_i32_8 : i32
    scf.if %11 {
      %c0_9 = arith.constant 0 : index
      %c0_10 = arith.constant 0 : index
      %12 = vector.load %arg5[%c0_9, %c0_10] : memref<16x128xf32, #tpu.memory_space<vmem>>, vector<16x128xf32>
      %c0_11 = arith.constant 0 : index
      %c0_12 = arith.constant 0 : index
      %13 = vector.load %arg3[%c0_11, %c0_12] : memref<1x128xf32, #tpu.memory_space<vmem>>, vector<1x128xf32>
      %14 = vector.broadcast %13 : vector<1x128xf32> to vector<16x128xf32>
      %15 = arith.addf %12, %14 : vector<16x128xf32>
      %cst_13 = arith.constant 0.000000e+00 : f32
      %16 = vector.broadcast %cst_13 : f32 to vector<16x128xf32>
      %17 = arith.maximumf %15, %16 : vector<16x128xf32>
      %c0_14 = arith.constant 0 : index
      %c0_15 = arith.constant 0 : index
      %18 = vector.load %arg4[%c0_14, %c0_15] : memref<16x128xf32, #tpu.memory_space<vmem>>, vector<16x128xf32>
      tpu.vector_store %arg4[%c0_14, %c0_15], %17 {strides = array<i32>} : memref<16x128xf32, #tpu.memory_space<vmem>>, vector<16x128xf32>,
    } else {
    }
    return
  }
  func.func @transform_0(%arg0: i32) -> (i32, i32) {
    %c0_i32 = arith.constant 0 : i32
    %c0_i32_0 = arith.constant 0 : i32
    return %c0_i32, %arg0 : i32, i32
  }
  func.func @transform_1(%arg0: i32) -> (i32, i32) {
    %c0_i32 = arith.constant 0 : i32
    %c0_i32_0 = arith.constant 0 : i32
    return %arg0, %c0_i32 : i32, i32
  }
  func.func @transform_2(%arg0: i32) -> (i32, i32) {
    %c0_i32 = arith.constant 0 : i32
    %c0_i32_0 = arith.constant 0 : i32
    %c0_i32_1 = arith.constant 0 : i32
    return %c0_i32, %c0_i32_0 : i32, i32
  }
  func.func @transform_3(%arg0: i32) -> (i32, i32) {
    %c0_i32 = arith.constant 0 : i32
    %c0_i32_0 = arith.constant 0 : i32
    %c0_i32_1 = arith.constant 0 : i32
    return %c0_i32, %c0_i32_0 : i32, i32
  }
}

</mosaic_0001>

<bundles_post_ra>
// kernel: policy_net_forward.3
= control target key start
LH: loop header
LB: loop body
LE: loop exit
PB: predicated region body
PF: predicated region fallthrough
CT: control target
= control target key end

     0   :  { %s3744_s12 = smov 0   ;;  %s3746_s13 = smov 0   ;;  %s5046_s0 = inlined_call_operand.vmem [shape: bf16[16,75], index: 0, kind: input, shape index: {}]   ;;  %s5047_s1 = inlined_call_operand.vmem [shape: bf16[75,9048], index: 1, kind: input, shape index: {}]   ;;  %s5048_s2 = inlined_call_operand.vmem [shape: f32[16,1], index: 2, kind: input, shape index: {}]   ;;  %s5049_s3 = inlined_call_operand.vmem [shape: bf16[16,9048], index: 3, kind: output, shape index: {}]  }
   0x1   :  { %s3748_s14 = smov 0  }
   0x2 LB: > { %s3760_s15 = sadd.s32 4294967295, %s3588_s14   ;;  %s3763_s16 = sadd.s32 1, %s3588_s14   ;;  %s3588_s14 = sphi %s3748_s14, %s5079_s14   ;;  %s3584_s13 = sphi %s3746_s13, %s5078_s13   ;;  %s3580_s12 = sphi %s3744_s12, %s5077_s12  }
   0x3   : > { %s38_s17 = ssub.s32 %s3588_s14, %s3763_s16  ;;  %s41_s18 = sadd.s32 1, %s3584_s13 }
   0x4   : > { %p39_p0 = scmp.eq.s32.totalorder %s38_s17, 0  ;;  %p48_p1 = scmp.ne.s32.totalorder %s3584_s13, %s3580_s12 }
   0x5   : > { %p49_p2 = scmp.eq.s32.totalorder %s3588_s14, 0  ;;  %p99_p3 = scmp.eq.s32.totalorder %s3760_s15, 2 }
   0x6   : > { %s3773_s19 = scalar_select %p39_p0, %s3584_s13, %s41_s18  }
   0x7   : > { %p50_p4 = por %p49_p2, %p48_p1  ;;  %p3775_p5 = por %p99_p3, %p48_p1 }
   0x8   : > { %p2899_p6 = scmp.ge.s32.totalorder %s3588_s14, 3 }
   0xa   : > { %127 = sbr.rel (%p2899_p6) target bundleno = 202 (0xca), region = 24 }
   0xf   : > { %130 = sbr.rel (!%p50_p4) target bundleno = 202 (0xca), region = 28  ;;  %s132_s21 = sand.u32 (%p50_p4), 1, %s3584_s13  }
  0x10   : > { %s135_s22 = smul.u32 (%p50_p4), 24, %s3588_s14 }
  0x11   : > { %s3147_s23 = smul.u32 (%p50_p4), 960, %s132_s21 }
  0x12   : > { %s136_s24 = ssub.s32 (%p50_p4), 71, %s135_s22  ;;  %s3113_s25 = smul.u32 (%p50_p4), 96, %s3588_s14 }
  0x13   : > { %p137_p7 = scmp.lt.s32.totalorder (%p50_p4), %s136_s24, 24  ;;  %s3790_s4 = scalar_lea.vmem (%p50_p4), [#allocation2], %s3147_s23  }
  0x14   : > { %s3786_s28 = scalar_lea.vmem %s5047_s1, %s3113_s25  }
  0x15   : > { %s5081_s24 = smov (!%p137_p7, %s136_s24), 24 }
  0x16   : > { %s139_s29 = smul.u32 640, %s5081_s24  ;;  %s3788_s30 = sshll.u32 %s5081_s24, 2 }
  0x18   : > { %p2903_p8 = scmp.eq.s32.totalorder %s139_s29, 0 }
  0x19   : > { %p147_p9 = scmp.lt.u32.totalorder (!%p2903_p8), %s3788_s30, 8 }
  0x1a   : > { %146 = sbr.rel (%p2903_p8) target bundleno = 202 (0xca), region = 32 }
  0x1f   : > { %150 = sbr.rel (%p147_p9) target bundleno = 184 (0xb8), region = 36  ;;  %s3794_s5 = sand.u32 (!%p147_p9), 7, %s3788_s30  }
  0x20   : > { %p185_p10 = scmp.eq.s32.totalorder (!%p147_p9), %s3794_s5, 0  ;;  %p2904_p11 = scmp.ne.s32.totalorder (!%p147_p9), %s3794_s5, 0 }
  0x24   : > { %188 = sbr.rel (%p2904_p11) target bundleno = 103 (0x67), region = 51  ;;  %s189_s6 = sshrl.u32 (!%p2904_p11), %s3788_s30, 3 }
  0x25   : > { %s3801_s7 = sshrl.u32 (!%p2904_p11), %s189_s6, 3 }
  0x26   : > { %p2905_p12 = scmp.le.s32.totalorder (!%p2904_p11), %s3801_s7, 0 }
  0x29   : > { %2769 = sbr.rel (%p2905_p12) target bundleno = 87 (0x57), region = 229  ;;  %s5051_s8 = smov (!%p2905_p12), %s3790_s4 }
  0x2a   : > { %s5052_s9 = smov (!%p2905_p12), %s3786_s28  ;;  %s3810_s10 = smov (!%p2905_p12), 0  }
  0x2b   : > { %s3812_s11 = smov (!%p2905_p12), 0  }
  0x2e LB: >> { %v202_v0 = vld [vmem:[%s3596_s9] sm:$0xff]  ;;  %v204_v1 = vld [vmem:[%s3596_s9 + $0x8] sm:$0xff]  ;;  %v206_v2 = vld [vmem:[%s3596_s9 + $0x10] sm:$0xff]  ;;  %s362_s17 = sadd.s32 1, %s3600_s10  ;;  %s196_s11 = sadd.s32 1, %s3604_s11   ;;  %s3604_s11 = sphi %s3812_s11, %s196_s11   ;;  %s3600_s10 = sphi %s3810_s10, %s5055_s10   ;;  %s3596_s9 = sphi %s5052_s9, %s5054_s9   ;;  %s3592_s8 = sphi %s5051_s8, %s5053_s8  }
  0x2f   : >> { %203 = vst [vmem:[%s3592_s8] sm:$0xff] %v202_v0  ;;  %205 = vst [vmem:[%s3592_s8 + $0x8] sm:$0xff] %v204_v1  ;;  %v208_v3 = vld [vmem:[%s3596_s9 + $0x18] sm:$0xff]  ;;  %v210_v4 = vld [vmem:[%s3596_s9 + $0x20] sm:$0xff]  ;;  %p363_p13 = scmp.ge.s32.totalorder %s362_s17, %s3801_s7  ;;  %p195_p0 = scmp.ge.s32.totalorder %s196_s11, %s3801_s7 }
  0x30   : >> { %207 = vst [vmem:[%s3592_s8 + $0x10] sm:$0xff] %v206_v2  ;;  %v212_v5 = vld [vmem:[%s3596_s9 + $0x28] sm:$0xff]  ;;  %209 = vst [vmem:[%s3592_s8 + $0x18] sm:$0xff] %v208_v3  ;;  %v214_v6 = vld [vmem:[%s3596_s9 + $0x30] sm:$0xff] }
  0x31   : >> { %211 = vst [vmem:[%s3592_s8 + $0x20] sm:$0xff] %v210_v4  ;;  %213 = vst [vmem:[%s3592_s8 + $0x28] sm:$0xff] %v212_v5  ;;  %v216_v7 = vld [vmem:[%s3596_s9 + $0x38] sm:$0xff]  ;;  %v220_v9 = vld [vmem:[%s3596_s9 + $0x124] sm:$0xff]  ;;  %s5083_s17 = smov (%p363_p13, %s362_s17), 0 }
  0x32   : >> { %v218_v8 = vld [vmem:[%s3596_s9 + $0x11c] sm:$0xff]  ;;  %215 = vst [vmem:[%s3592_s8 + $0x30] sm:$0xff] %v214_v6  ;;  %217 = vst [vmem:[%s3592_s8 + $0x38] sm:$0xff] %v216_v7  ;;  %v222_v10 = vld [vmem:[%s3596_s9 + $0x12c] sm:$0xff]  ;;  %s2906_s18 = sshll.u32 %s5083_s17, 6  ;;  %s5055_s10 = smov %s5083_s17 }
  0x33   : >> { %219 = vst [vmem:[%s3592_s8 + $0x60] sm:$0xff] %v218_v8  ;;  %v224_v11 = vld [vmem:[%s3596_s9 + $0x134] sm:$0xff]  ;;  %221 = vst [vmem:[%s3592_s8 + $0x68] sm:$0xff] %v220_v9  ;;  %v226_v12 = vld [vmem:[%s3596_s9 + $0x13c] sm:$0xff]  ;;  %s3868_s21 = scalar_lea.vmem %s3786_s28, %s2906_s18   ;;  %s3871_s22 = scalar_lea.vmem %s3790_s4, %s2906_s18 [#allocation2]  }
  0x34   : >> { %223 = vst [vmem:[%s3592_s8 + $0x70] sm:$0xff] %v222_v10  ;;  %225 = vst [vmem:[%s3592_s8 + $0x78] sm:$0xff] %v224_v11  ;;  %v228_v13 = vld [vmem:[%s3596_s9 + $0x144] sm:$0xff]  ;;  %v230_v14 = vld [vmem:[%s3596_s9 + $0x14c] sm:$0xff] }
  0x35   : >> { %227 = vst [vmem:[%s3592_s8 + $0x80] sm:$0xff] %v226_v12  ;;  %229 = vst [vmem:[%s3592_s8 + $0x88] sm:$0xff] %v228_v13  ;;  %v232_v15 = vld [vmem:[%s3596_s9 + $0x154] sm:$0xff]  ;;  %v236_v17 = vld [vmem:[%s3596_s9 + $0x240] sm:$0xff] }
  0x36   : >> { %231 = vst [vmem:[%s3592_s8 + $0x90] sm:$0xff] %v230_v14  ;;  %v234_v16 = vld [vmem:[%s3596_s9 + $0x238] sm:$0xff]  ;;  %233 = vst [vmem:[%s3592_s8 + $0x98] sm:$0xff] %v232_v15  ;;  %v238_v18 = vld [vmem:[%s3596_s9 + $0x248] sm:$0xff] }
  0x37   : >> { %235 = vst [vmem:[%s3592_s8 + $0xc0] sm:$0xff] %v234_v16  ;;  %237 = vst [vmem:[%s3592_s8 + $0xc8] sm:$0xff] %v236_v17  ;;  %v240_v19 = vld [vmem:[%s3596_s9 + $0x250] sm:$0xff]  ;;  %v242_v20 = vld [vmem:[%s3596_s9 + $0x258] sm:$0xff] }
  0x38   : >> { %239 = vst [vmem:[%s3592_s8 + $0xd0] sm:$0xff] %v238_v18  ;;  %241 = vst [vmem:[%s3592_s8 + $0xd8] sm:$0xff] %v240_v19  ;;  %v244_v21 = vld [vmem:[%s3596_s9 + $0x260] sm:$0xff]  ;;  %v246_v22 = vld [vmem:[%s3596_s9 + $0x268] sm:$0xff] }
  0x39   : >> { %243 = vst [vmem:[%s3592_s8 + $0xe0] sm:$0xff] %v242_v20  ;;  %v248_v23 = vld [vmem:[%s3596_s9 + $0x270] sm:$0xff]  ;;  %245 = vst [vmem:[%s3592_s8 + $0xe8] sm:$0xff] %v244_v21  ;;  %v252_v25 = vld [vmem:[%s3596_s9 + $0x35c] sm:$0xff] }
  0x3a   : >> { %247 = vst [vmem:[%s3592_s8 + $0xf0] sm:$0xff] %v246_v22  ;;  %249 = vst [vmem:[%s3592_s8 + $0xf8] sm:$0xff] %v248_v23  ;;  %v250_v24 = vld [vmem:[%s3596_s9 + $0x354] sm:$0xff]  ;;  %v254_v26 = vld [vmem:[%s3596_s9 + $0x364] sm:$0xff] }
  0x3b   : >> { %251 = vst [vmem:[%s3592_s8 + $0x120] sm:$0xff] %v250_v24  ;;  %253 = vst [vmem:[%s3592_s8 + $0x128] sm:$0xff] %v252_v25  ;;  %v256_v27 = vld [vmem:[%s3596_s9 + $0x36c] sm:$0xff]  ;;  %v258_v28 = vld [vmem:[%s3596_s9 + $0x374] sm:$0xff] }
  0x3c   : >> { %255 = vst [vmem:[%s3592_s8 + $0x130] sm:$0xff] %v254_v26  ;;  %v260_v29 = vld [vmem:[%s3596_s9 + $0x37c] sm:$0xff]  ;;  %257 = vst [vmem:[%s3592_s8 + $0x138] sm:$0xff] %v256_v27  ;;  %v262_v30 = vld [vmem:[%s3596_s9 + $0x384] sm:$0xff] }
  0x3d   : >> { %259 = vst [vmem:[%s3592_s8 + $0x140] sm:$0xff] %v258_v28  ;;  %261 = vst [vmem:[%s3592_s8 + $0x148] sm:$0xff] %v260_v29  ;;  %v264_v31 = vld [vmem:[%s3596_s9 + $0x38c] sm:$0xff]  ;;  %v268_v33 = vld [vmem:[%s3596_s9 + $0x478] sm:$0xff] }
  0x3e   : >> { %v266_v32 = vld [vmem:[%s3596_s9 + $0x470] sm:$0xff]  ;;  %263 = vst [vmem:[%s3592_s8 + $0x150] sm:$0xff] %v262_v30  ;;  %265 = vst [vmem:[%s3592_s8 + $0x158] sm:$0xff] %v264_v31  ;;  %v270_v34 = vld [vmem:[%s3596_s9 + $0x480] sm:$0xff] }
  0x3f   : >> { %267 = vst [vmem:[%s3592_s8 + $0x180] sm:$0xff] %v266_v32  ;;  %v272_v35 = vld [vmem:[%s3596_s9 + $0x488] sm:$0xff]  ;;  %269 = vst [vmem:[%s3592_s8 + $0x188] sm:$0xff] %v268_v33  ;;  %v274_v36 = vld [vmem:[%s3596_s9 + $0x490] sm:$0xff] }
  0x40   : >> { %271 = vst [vmem:[%s3592_s8 + $0x190] sm:$0xff] %v270_v34  ;;  %273 = vst [vmem:[%s3592_s8 + $0x198] sm:$0xff] %v272_v35  ;;  %v276_v37 = vld [vmem:[%s3596_s9 + $0x498] sm:$0xff]  ;;  %v278_v38 = vld [vmem:[%s3596_s9 + $0x4a0] sm:$0xff] }
  0x41   : >> { %275 = vst [vmem:[%s3592_s8 + $0x1a0] sm:$0xff] %v274_v36  ;;  %277 = vst [vmem:[%s3592_s8 + $0x1a8] sm:$0xff] %v276_v37  ;;  %v280_v39 = vld [vmem:[%s3596_s9 + $0x4a8] sm:$0xff]  ;;  %v284_v41 = vld [vmem:[%s3596_s9 + $0x594] sm:$0xff] }
  0x42   : >> { %279 = vst [vmem:[%s3592_s8 + $0x1b0] sm:$0xff] %v278_v38  ;;  %v282_v40 = vld [vmem:[%s3596_s9 + $0x58c] sm:$0xff]  ;;  %281 = vst [vmem:[%s3592_s8 + $0x1b8] sm:$0xff] %v280_v39  ;;  %v286_v42 = vld [vmem:[%s3596_s9 + $0x59c] sm:$0xff] }
  0x43   : >> { %283 = vst [vmem:[%s3592_s8 + $0x1e0] sm:$0xff] %v282_v40  ;;  %285 = vst [vmem:[%s3592_s8 + $0x1e8] sm:$0xff] %v284_v41  ;;  %v288_v43 = vld [vmem:[%s3596_s9 + $0x5a4] sm:$0xff]  ;;  %v290_v44 = vld [vmem:[%s3596_s9 + $0x5ac] sm:$0xff] }
  0x44   : >> { %287 = vst [vmem:[%s3592_s8 + $0x1f0] sm:$0xff] %v286_v42  ;;  %289 = vst [vmem:[%s3592_s8 + $0x1f8] sm:$0xff] %v288_v43  ;;  %v292_v45 = vld [vmem:[%s3596_s9 + $0x5b4] sm:$0xff]  ;;  %v294_v46 = vld [vmem:[%s3596_s9 + $0x5bc] sm:$0xff] }
  0x45   : >> { %291 = vst [vmem:[%s3592_s8 + $0x200] sm:$0xff] %v290_v44  ;;  %v296_v47 = vld [vmem:[%s3596_s9 + $0x5c4] sm:$0xff]  ;;  %293 = vst [vmem:[%s3592_s8 + $0x208] sm:$0xff] %v292_v45  ;;  %v300_v49 = vld [vmem:[%s3596_s9 + $0x6b0] sm:$0xff] }
  0x46   : >> { %295 = vst [vmem:[%s3592_s8 + $0x210] sm:$0xff] %v294_v46  ;;  %297 = vst [vmem:[%s3592_s8 + $0x218] sm:$0xff] %v296_v47  ;;  %v298_v48 = vld [vmem:[%s3596_s9 + $0x6a8] sm:$0xff]  ;;  %v302_v50 = vld [vmem:[%s3596_s9 + $0x6b8] sm:$0xff] }
  0x47   : >> { %299 = vst [vmem:[%s3592_s8 + $0x240] sm:$0xff] %v298_v48  ;;  %301 = vst [vmem:[%s3592_s8 + $0x248] sm:$0xff] %v300_v49  ;;  %v304_v51 = vld [vmem:[%s3596_s9 + $0x6c0] sm:$0xff]  ;;  %v306_v52 = vld [vmem:[%s3596_s9 + $0x6c8] sm:$0xff] }
  0x48   : >> { %303 = vst [vmem:[%s3592_s8 + $0x250] sm:$0xff] %v302_v50  ;;  %v308_v53 = vld [vmem:[%s3596_s9 + $0x6d0] sm:$0xff]  ;;  %305 = vst [vmem:[%s3592_s8 + $0x258] sm:$0xff] %v304_v51  ;;  %v310_v54 = vld [vmem:[%s3596_s9 + $0x6d8] sm:$0xff] }
  0x49   : >> { %307 = vst [vmem:[%s3592_s8 + $0x260] sm:$0xff] %v306_v52  ;;  %309 = vst [vmem:[%s3592_s8 + $0x268] sm:$0xff] %v308_v53  ;;  %v312_v55 = vld [vmem:[%s3596_s9 + $0x6e0] sm:$0xff]  ;;  %v316_v57 = vld [vmem:[%s3596_s9 + $0x7cc] sm:$0xff] }
  0x4a   : >> { %v314_v56 = vld [vmem:[%s3596_s9 + $0x7c4] sm:$0xff]  ;;  %311 = vst [vmem:[%s3592_s8 + $0x270] sm:$0xff] %v310_v54  ;;  %313 = vst [vmem:[%s3592_s8 + $0x278] sm:$0xff] %v312_v55  ;;  %v318_v58 = vld [vmem:[%s3596_s9 + $0x7d4] sm:$0xff] }
  0x4b   : >> { %315 = vst [vmem:[%s3592_s8 + $0x2a0] sm:$0xff] %v314_v56  ;;  %v320_v59 = vld [vmem:[%s3596_s9 + $0x7dc] sm:$0xff]  ;;  %317 = vst [vmem:[%s3592_s8 + $0x2a8] sm:$0xff] %v316_v57  ;;  %v322_v60 = vld [vmem:[%s3596_s9 + $0x7e4] sm:$0xff] }
  0x4c   : >> { %319 = vst [vmem:[%s3592_s8 + $0x2b0] sm:$0xff] %v318_v58  ;;  %321 = vst [vmem:[%s3592_s8 + $0x2b8] sm:$0xff] %v320_v59  ;;  %v324_v61 = vld [vmem:[%s3596_s9 + $0x7ec] sm:$0xff]  ;;  %v326_v62 = vld [vmem:[%s3596_s9 + $0x7f4] sm:$0xff] }
  0x4d   : >> { %323 = vst [vmem:[%s3592_s8 + $0x2c0] sm:$0xff] %v322_v60  ;;  %325 = vst [vmem:[%s3592_s8 + $0x2c8] sm:$0xff] %v324_v61  ;;  %v328_v63 = vld [vmem:[%s3596_s9 + $0x7fc] sm:$0xff]  ;;  %v332_v1 = vld [vmem:[%s3596_s9 + $0x8e8] sm:$0xff] }
  0x4e   : >> { %327 = vst [vmem:[%s3592_s8 + $0x2d0] sm:$0xff] %v326_v62  ;;  %v330_v0 = vld [vmem:[%s3596_s9 + $0x8e0] sm:$0xff]  ;;  %329 = vst [vmem:[%s3592_s8 + $0x2d8] sm:$0xff] %v328_v63  ;;  %v334_v2 = vld [vmem:[%s3596_s9 + $0x8f0] sm:$0xff] }
  0x4f   : >> { %331 = vst [vmem:[%s3592_s8 + $0x300] sm:$0xff] %v330_v0  ;;  %333 = vst [vmem:[%s3592_s8 + $0x308] sm:$0xff] %v332_v1  ;;  %v336_v3 = vld [vmem:[%s3596_s9 + $0x8f8] sm:$0xff]  ;;  %v338_v4 = vld [vmem:[%s3596_s9 + $0x900] sm:$0xff] }
  0x50   : >> { %335 = vst [vmem:[%s3592_s8 + $0x310] sm:$0xff] %v334_v2  ;;  %337 = vst [vmem:[%s3592_s8 + $0x318] sm:$0xff] %v336_v3  ;;  %v340_v5 = vld [vmem:[%s3596_s9 + $0x908] sm:$0xff]  ;;  %v342_v6 = vld [vmem:[%s3596_s9 + $0x910] sm:$0xff] }
  0x51   : >> { %339 = vst [vmem:[%s3592_s8 + $0x320] sm:$0xff] %v338_v4  ;;  %v344_v7 = vld [vmem:[%s3596_s9 + $0x918] sm:$0xff]  ;;  %341 = vst [vmem:[%s3592_s8 + $0x328] sm:$0xff] %v340_v5  ;;  %v348_v9 = vld [vmem:[%s3596_s9 + $0xa04] sm:$0xff] }
  0x52   : >> { %343 = vst [vmem:[%s3592_s8 + $0x330] sm:$0xff] %v342_v6  ;;  %345 = vst [vmem:[%s3592_s8 + $0x338] sm:$0xff] %v344_v7  ;;  %v346_v8 = vld [vmem:[%s3596_s9 + $0x9fc] sm:$0xff]  ;;  %v350_v10 = vld [vmem:[%s3596_s9 + $0xa0c] sm:$0xff]  ;;  %198 = sbr.rel (!%p195_p0) target bundleno = 46 (0x2e), region = 235 }
  0x53   : >> { %347 = vst [vmem:[%s3592_s8 + $0x360] sm:$0xff] %v346_v8  ;;  %349 = vst [vmem:[%s3592_s8 + $0x368] sm:$0xff] %v348_v9  ;;  %v352_v11 = vld [vmem:[%s3596_s9 + $0xa14] sm:$0xff]  ;;  %v354_v12 = vld [vmem:[%s3596_s9 + $0xa1c] sm:$0xff] }
  0x54   : >> { %351 = vst [vmem:[%s3592_s8 + $0x370] sm:$0xff] %v350_v10  ;;  %v356_v13 = vld [vmem:[%s3596_s9 + $0xa24] sm:$0xff]  ;;  %353 = vst [vmem:[%s3592_s8 + $0x378] sm:$0xff] %v352_v11  ;;  %v358_v14 = vld [vmem:[%s3596_s9 + $0xa2c] sm:$0xff] }
  0x55   : >> { %355 = vst [vmem:[%s3592_s8 + $0x380] sm:$0xff] %v354_v12  ;;  %357 = vst [vmem:[%s3592_s8 + $0x388] sm:$0xff] %v356_v13  ;;  %v360_v15 = vld [vmem:[%s3596_s9 + $0xa34] sm:$0xff]  ;;  %s5054_s9 = smov %s3868_s21 }
  0x56   : >> { %359 = vst [vmem:[%s3592_s8 + $0x390] sm:$0xff] %v358_v14  ;;  %361 = vst [vmem:[%s3592_s8 + $0x398] sm:$0xff] %v360_v15  ;;  %s5053_s8 = smov %s3871_s22 }
  0x57 PF: > { %s4009_s23 = sand.u32 7, %s189_s6   ;;  %s3114_s24 = sshll.u32 %s3801_s7, 10 }
  0x58   : > { %s373_s25 = sshra.s32 %s3114_s24, 4  ;;  %p2911_p1 = scmp.le.s32.totalorder %s4009_s23, 0 }
  0x59   : > { %s4013_s26 = scalar_lea.vmem %s3786_s28, %s373_s25   ;;  %s4016_s27 = scalar_lea.vmem %s3790_s4, %s373_s25 [#allocation2]  }
  0x5a   : > { %2783 = sbr.rel (%p2911_p1) target bundleno = 103 (0x67), region = 240  ;;  %s5056_s29 = smov (!%p2911_p1), %s4016_s27 }
  0x5b   : > { %s5057_s8 = smov (!%p2911_p1), %s4013_s26  ;;  %s4025_s9 = smov (!%p2911_p1), 0  }
  0x5c   : > { %s4027_s10 = smov (!%p2911_p1), 0  }
  0x5f LB: >> { %v389_v16 = vld [vmem:[%s3612_s8] sm:$0xff]  ;;  %v393_v18 = vld [vmem:[%s3612_s8 + $0x238] sm:$0xff]  ;;  %s409_s6 = sadd.s32 1, %s3616_s9  ;;  %v397_v20 = vld [vmem:[%s3612_s8 + $0x470] sm:$0xff]  ;;  %s383_s10 = sadd.s32 1, %s3620_s10   ;;  %s3620_s10 = sphi %s4027_s10, %s383_s10   ;;  %s3616_s9 = sphi %s4025_s9, %s5058_s9   ;;  %s3612_s8 = sphi %s5057_s8, %s414_s8   ;;  %s3608_s29 = sphi %s5056_s29, %s415_s29  }
  0x60   : >> { %v391_v17 = vld [vmem:[%s3612_s8 + $0x11c] sm:$0xff]  ;;  %390 = vst [vmem:[%s3608_s29] sm:$0xff] %v389_v16  ;;  %394 = vst [vmem:[%s3608_s29 + $0xc0] sm:$0xff] %v393_v18  ;;  %v395_v19 = vld [vmem:[%s3612_s8 + $0x354] sm:$0xff]  ;;  %p410_p2 = scmp.ge.s32.totalorder %s409_s6, %s4009_s23  ;;  %p382_p3 = scmp.ge.s32.totalorder %s383_s10, %s4009_s23 }
  0x61   : >> { %392 = vst [vmem:[%s3608_s29 + $0x60] sm:$0xff] %v391_v17  ;;  %v399_v21 = vld [vmem:[%s3612_s8 + $0x58c] sm:$0xff]  ;;  %396 = vst [vmem:[%s3608_s29 + $0x120] sm:$0xff] %v395_v19  ;;  %v403_v23 = vld [vmem:[%s3612_s8 + $0x7c4] sm:$0xff] }
  0x62   : >> { %398 = vst [vmem:[%s3608_s29 + $0x180] sm:$0xff] %v397_v20  ;;  %400 = vst [vmem:[%s3608_s29 + $0x1e0] sm:$0xff] %v399_v21  ;;  %v401_v22 = vld [vmem:[%s3612_s8 + $0x6a8] sm:$0xff]  ;;  %v405_v24 = vld [vmem:[%s3612_s8 + $0x8e0] sm:$0xff]  ;;  %s5085_s6 = smov (%p410_p2, %s409_s6), 0  ;;  %385 = sbr.rel (!%p382_p3) target bundleno = 95 (0x5f), region = 246 }
  0x63   : >> { %402 = vst [vmem:[%s3608_s29 + $0x240] sm:$0xff] %v401_v22  ;;  %404 = vst [vmem:[%s3608_s29 + $0x2a0] sm:$0xff] %v403_v23  ;;  %v407_v25 = vld [vmem:[%s3612_s8 + $0x9fc] sm:$0xff]  ;;  %s2912_s7 = sshll.u32 %s5085_s6, 3  ;;  %s5058_s9 = smov %s5085_s6 }
  0x64   : >> { %406 = vst [vmem:[%s3608_s29 + $0x300] sm:$0xff] %v405_v24  ;;  %408 = vst [vmem:[%s3608_s29 + $0x360] sm:$0xff] %v407_v25  ;;  %s414_s8 = scalar_lea.vmem %s4013_s26, %s2912_s7   ;;  %s415_s29 = scalar_lea.vmem %s4016_s27, %s2912_s7 [#allocation2]  }
  0x67 PF: > { %418 = sbr.rel (%p185_p10) target bundleno = 184 (0xb8), region = 69  ;;  %s420_s11 = ssub.s32 (!%p185_p10), %s3788_s30, %s3794_s5 }
  0x68   : > { %s424_s17 = sshrl.u32 (!%p185_p10), %s3788_s30, 3  ;;  %s4054_s18 = scalar_lea.vmem (!%p185_p10), %s3786_s28, %s420_s11 }
  0x69   : > { %s4057_s21 = scalar_lea.vmem (!%p185_p10), %s3790_s4, %s420_s11 [#allocation2]  ;;  %s4061_s22 = sshrl.u32 (!%p185_p10), %s424_s17, 3 }
  0x6a   : > { %p2914_p4 = scmp.le.s32.totalorder (!%p185_p10), %s4061_s22, 0 }
  0x6c   : > { %2797 = sbr.rel (%p2914_p4) target bundleno = 154 (0x9a), region = 251  ;;  %s5059_s23 = smov (!%p2914_p4), %s3790_s4 }
  0x6d   : > { %s5060_s24 = smov (!%p2914_p4), %s3786_s28  ;;  %s4070_s25 = smov (!%p2914_p4), 0  }
  0x6e   : > { %s4072_s26 = smov (!%p2914_p4), 0  }
  0x71 LB: >> { %v437_v26 = vld [vmem:[%s3628_s24] sm:$0xff]  ;;  %v439_v27 = vld [vmem:[%s3628_s24 + $0x8] sm:$0xff]  ;;  %v441_v28 = vld [vmem:[%s3628_s24 + $0x10] sm:$0xff]  ;;  %s597_s27 = sadd.s32 1, %s3632_s25  ;;  %s431_s26 = sadd.s32 1, %s3636_s26   ;;  %s3636_s26 = sphi %s4072_s26, %s431_s26   ;;  %s3632_s25 = sphi %s4070_s25, %s5063_s25   ;;  %s3628_s24 = sphi %s5060_s24, %s5062_s24   ;;  %s3624_s23 = sphi %s5059_s23, %s5061_s23  }
  0x72   : >> { %438 = vst [vmem:[%s3624_s23] sm:$0xff] %v437_v26  ;;  %440 = vst [vmem:[%s3624_s23 + $0x8] sm:$0xff] %v439_v27  ;;  %v443_v29 = vld [vmem:[%s3628_s24 + $0x18] sm:$0xff]  ;;  %v445_v30 = vld [vmem:[%s3628_s24 + $0x20] sm:$0xff]  ;;  %p598_p6 = scmp.ge.s32.totalorder %s597_s27, %s4061_s22  ;;  %p430_p7 = scmp.ge.s32.totalorder %s431_s26, %s4061_s22 }
  0x73   : >> { %442 = vst [vmem:[%s3624_s23 + $0x10] sm:$0xff] %v441_v28  ;;  %v447_v31 = vld [vmem:[%s3628_s24 + $0x28] sm:$0xff]  ;;  %444 = vst [vmem:[%s3624_s23 + $0x18] sm:$0xff] %v443_v29  ;;  %v449_v32 = vld [vmem:[%s3628_s24 + $0x30] sm:$0xff] }
  0x74   : >> { %446 = vst [vmem:[%s3624_s23 + $0x20] sm:$0xff] %v445_v30  ;;  %448 = vst [vmem:[%s3624_s23 + $0x28] sm:$0xff] %v447_v31  ;;  %v451_v33 = vld [vmem:[%s3628_s24 + $0x38] sm:$0xff]  ;;  %v455_v35 = vld [vmem:[%s3628_s24 + $0x124] sm:$0xff]  ;;  %s5087_s27 = smov (%p598_p6, %s597_s27), 0 }
  0x75   : >> { %v453_v34 = vld [vmem:[%s3628_s24 + $0x11c] sm:$0xff]  ;;  %450 = vst [vmem:[%s3624_s23 + $0x30] sm:$0xff] %v449_v32  ;;  %452 = vst [vmem:[%s3624_s23 + $0x38] sm:$0xff] %v451_v33  ;;  %v457_v36 = vld [vmem:[%s3628_s24 + $0x12c] sm:$0xff]  ;;  %s2915_s29 = sshll.u32 %s5087_s27, 6  ;;  %s5063_s25 = smov %s5087_s27 }
  0x76   : >> { %454 = vst [vmem:[%s3624_s23 + $0x60] sm:$0xff] %v453_v34  ;;  %v459_v37 = vld [vmem:[%s3628_s24 + $0x134] sm:$0xff]  ;;  %456 = vst [vmem:[%s3624_s23 + $0x68] sm:$0xff] %v455_v35  ;;  %v461_v38 = vld [vmem:[%s3628_s24 + $0x13c] sm:$0xff]  ;;  %s4128_s8 = scalar_lea.vmem %s3786_s28, %s2915_s29   ;;  %s4131_s9 = scalar_lea.vmem %s3790_s4, %s2915_s29 [#allocation2]  }
  0x77   : >> { %458 = vst [vmem:[%s3624_s23 + $0x70] sm:$0xff] %v457_v36  ;;  %460 = vst [vmem:[%s3624_s23 + $0x78] sm:$0xff] %v459_v37  ;;  %v463_v39 = vld [vmem:[%s3628_s24 + $0x144] sm:$0xff]  ;;  %v465_v40 = vld [vmem:[%s3628_s24 + $0x14c] sm:$0xff] }
  0x78   : >> { %462 = vst [vmem:[%s3624_s23 + $0x80] sm:$0xff] %v461_v38  ;;  %464 = vst [vmem:[%s3624_s23 + $0x88] sm:$0xff] %v463_v39  ;;  %v467_v41 = vld [vmem:[%s3628_s24 + $0x154] sm:$0xff]  ;;  %v471_v43 = vld [vmem:[%s3628_s24 + $0x240] sm:$0xff] }
  0x79   : >> { %466 = vst [vmem:[%s3624_s23 + $0x90] sm:$0xff] %v465_v40  ;;  %v469_v42 = vld [vmem:[%s3628_s24 + $0x238] sm:$0xff]  ;;  %468 = vst [vmem:[%s3624_s23 + $0x98] sm:$0xff] %v467_v41  ;;  %v473_v44 = vld [vmem:[%s3628_s24 + $0x248] sm:$0xff] }
  0x7a   : >> { %470 = vst [vmem:[%s3624_s23 + $0xc0] sm:$0xff] %v469_v42  ;;  %472 = vst [vmem:[%s3624_s23 + $0xc8] sm:$0xff] %v471_v43  ;;  %v475_v45 = vld [vmem:[%s3628_s24 + $0x250] sm:$0xff]  ;;  %v477_v46 = vld [vmem:[%s3628_s24 + $0x258] sm:$0xff] }
  0x7b   : >> { %474 = vst [vmem:[%s3624_s23 + $0xd0] sm:$0xff] %v473_v44  ;;  %476 = vst [vmem:[%s3624_s23 + $0xd8] sm:$0xff] %v475_v45  ;;  %v479_v47 = vld [vmem:[%s3628_s24 + $0x260] sm:$0xff]  ;;  %v481_v48 = vld [vmem:[%s3628_s24 + $0x268] sm:$0xff] }
  0x7c   : >> { %478 = vst [vmem:[%s3624_s23 + $0xe0] sm:$0xff] %v477_v46  ;;  %v483_v49 = vld [vmem:[%s3628_s24 + $0x270] sm:$0xff]  ;;  %480 = vst [vmem:[%s3624_s23 + $0xe8] sm:$0xff] %v479_v47  ;;  %v487_v51 = vld [vmem:[%s3628_s24 + $0x35c] sm:$0xff] }
  0x7d   : >> { %482 = vst [vmem:[%s3624_s23 + $0xf0] sm:$0xff] %v481_v48  ;;  %484 = vst [vmem:[%s3624_s23 + $0xf8] sm:$0xff] %v483_v49  ;;  %v485_v50 = vld [vmem:[%s3628_s24 + $0x354] sm:$0xff]  ;;  %v489_v52 = vld [vmem:[%s3628_s24 + $0x364] sm:$0xff] }
  0x7e   : >> { %486 = vst [vmem:[%s3624_s23 + $0x120] sm:$0xff] %v485_v50  ;;  %488 = vst [vmem:[%s3624_s23 + $0x128] sm:$0xff] %v487_v51  ;;  %v491_v53 = vld [vmem:[%s3628_s24 + $0x36c] sm:$0xff]  ;;  %v493_v54 = vld [vmem:[%s3628_s24 + $0x374] sm:$0xff] }
  0x7f   : >> { %490 = vst [vmem:[%s3624_s23 + $0x130] sm:$0xff] %v489_v52  ;;  %v495_v55 = vld [vmem:[%s3628_s24 + $0x37c] sm:$0xff]  ;;  %492 = vst [vmem:[%s3624_s23 + $0x138] sm:$0xff] %v491_v53  ;;  %v497_v56 = vld [vmem:[%s3628_s24 + $0x384] sm:$0xff] }
  0x80   : >> { %494 = vst [vmem:[%s3624_s23 + $0x140] sm:$0xff] %v493_v54  ;;  %496 = vst [vmem:[%s3624_s23 + $0x148] sm:$0xff] %v495_v55  ;;  %v499_v57 = vld [vmem:[%s3628_s24 + $0x38c] sm:$0xff]  ;;  %v503_v59 = vld [vmem:[%s3628_s24 + $0x478] sm:$0xff] }
  0x81   : >> { %v501_v58 = vld [vmem:[%s3628_s24 + $0x470] sm:$0xff]  ;;  %498 = vst [vmem:[%s3624_s23 + $0x150] sm:$0xff] %v497_v56  ;;  %500 = vst [vmem:[%s3624_s23 + $0x158] sm:$0xff] %v499_v57  ;;  %v505_v60 = vld [vmem:[%s3628_s24 + $0x480] sm:$0xff] }
  0x82   : >> { %502 = vst [vmem:[%s3624_s23 + $0x180] sm:$0xff] %v501_v58  ;;  %v507_v61 = vld [vmem:[%s3628_s24 + $0x488] sm:$0xff]  ;;  %504 = vst [vmem:[%s3624_s23 + $0x188] sm:$0xff] %v503_v59  ;;  %v509_v62 = vld [vmem:[%s3628_s24 + $0x490] sm:$0xff] }
  0x83   : >> { %506 = vst [vmem:[%s3624_s23 + $0x190] sm:$0xff] %v505_v60  ;;  %508 = vst [vmem:[%s3624_s23 + $0x198] sm:$0xff] %v507_v61  ;;  %v511_v63 = vld [vmem:[%s3628_s24 + $0x498] sm:$0xff]  ;;  %v513_v0 = vld [vmem:[%s3628_s24 + $0x4a0] sm:$0xff] }
  0x84   : >> { %510 = vst [vmem:[%s3624_s23 + $0x1a0] sm:$0xff] %v509_v62  ;;  %512 = vst [vmem:[%s3624_s23 + $0x1a8] sm:$0xff] %v511_v63  ;;  %v515_v1 = vld [vmem:[%s3628_s24 + $0x4a8] sm:$0xff]  ;;  %v519_v3 = vld [vmem:[%s3628_s24 + $0x594] sm:$0xff] }
  0x85   : >> { %514 = vst [vmem:[%s3624_s23 + $0x1b0] sm:$0xff] %v513_v0  ;;  %v517_v2 = vld [vmem:[%s3628_s24 + $0x58c] sm:$0xff]  ;;  %516 = vst [vmem:[%s3624_s23 + $0x1b8] sm:$0xff] %v515_v1  ;;  %v521_v4 = vld [vmem:[%s3628_s24 + $0x59c] sm:$0xff] }
  0x86   : >> { %518 = vst [vmem:[%s3624_s23 + $0x1e0] sm:$0xff] %v517_v2  ;;  %520 = vst [vmem:[%s3624_s23 + $0x1e8] sm:$0xff] %v519_v3  ;;  %v523_v5 = vld [vmem:[%s3628_s24 + $0x5a4] sm:$0xff]  ;;  %v525_v6 = vld [vmem:[%s3628_s24 + $0x5ac] sm:$0xff] }
  0x87   : >> { %522 = vst [vmem:[%s3624_s23 + $0x1f0] sm:$0xff] %v521_v4  ;;  %524 = vst [vmem:[%s3624_s23 + $0x1f8] sm:$0xff] %v523_v5  ;;  %v527_v7 = vld [vmem:[%s3628_s24 + $0x5b4] sm:$0xff]  ;;  %v529_v8 = vld [vmem:[%s3628_s24 + $0x5bc] sm:$0xff] }
  0x88   : >> { %526 = vst [vmem:[%s3624_s23 + $0x200] sm:$0xff] %v525_v6  ;;  %v531_v9 = vld [vmem:[%s3628_s24 + $0x5c4] sm:$0xff]  ;;  %528 = vst [vmem:[%s3624_s23 + $0x208] sm:$0xff] %v527_v7  ;;  %v535_v11 = vld [vmem:[%s3628_s24 + $0x6b0] sm:$0xff] }
  0x89   : >> { %530 = vst [vmem:[%s3624_s23 + $0x210] sm:$0xff] %v529_v8  ;;  %532 = vst [vmem:[%s3624_s23 + $0x218] sm:$0xff] %v531_v9  ;;  %v533_v10 = vld [vmem:[%s3628_s24 + $0x6a8] sm:$0xff]  ;;  %v537_v12 = vld [vmem:[%s3628_s24 + $0x6b8] sm:$0xff] }
  0x8a   : >> { %534 = vst [vmem:[%s3624_s23 + $0x240] sm:$0xff] %v533_v10  ;;  %536 = vst [vmem:[%s3624_s23 + $0x248] sm:$0xff] %v535_v11  ;;  %v539_v13 = vld [vmem:[%s3628_s24 + $0x6c0] sm:$0xff]  ;;  %v541_v14 = vld [vmem:[%s3628_s24 + $0x6c8] sm:$0xff] }
  0x8b   : >> { %538 = vst [vmem:[%s3624_s23 + $0x250] sm:$0xff] %v537_v12  ;;  %v543_v15 = vld [vmem:[%s3628_s24 + $0x6d0] sm:$0xff]  ;;  %540 = vst [vmem:[%s3624_s23 + $0x258] sm:$0xff] %v539_v13  ;;  %v545_v16 = vld [vmem:[%s3628_s24 + $0x6d8] sm:$0xff] }
  0x8c   : >> { %542 = vst [vmem:[%s3624_s23 + $0x260] sm:$0xff] %v541_v14  ;;  %544 = vst [vmem:[%s3624_s23 + $0x268] sm:$0xff] %v543_v15  ;;  %v547_v17 = vld [vmem:[%s3628_s24 + $0x6e0] sm:$0xff]  ;;  %v551_v19 = vld [vmem:[%s3628_s24 + $0x7cc] sm:$0xff] }
  0x8d   : >> { %v549_v18 = vld [vmem:[%s3628_s24 + $0x7c4] sm:$0xff]  ;;  %546 = vst [vmem:[%s3624_s23 + $0x270] sm:$0xff] %v545_v16  ;;  %548 = vst [vmem:[%s3624_s23 + $0x278] sm:$0xff] %v547_v17  ;;  %v553_v20 = vld [vmem:[%s3628_s24 + $0x7d4] sm:$0xff] }
  0x8e   : >> { %550 = vst [vmem:[%s3624_s23 + $0x2a0] sm:$0xff] %v549_v18  ;;  %v555_v21 = vld [vmem:[%s3628_s24 + $0x7dc] sm:$0xff]  ;;  %552 = vst [vmem:[%s3624_s23 + $0x2a8] sm:$0xff] %v551_v19  ;;  %v557_v22 = vld [vmem:[%s3628_s24 + $0x7e4] sm:$0xff] }
  0x8f   : >> { %554 = vst [vmem:[%s3624_s23 + $0x2b0] sm:$0xff] %v553_v20  ;;  %556 = vst [vmem:[%s3624_s23 + $0x2b8] sm:$0xff] %v555_v21  ;;  %v559_v23 = vld [vmem:[%s3628_s24 + $0x7ec] sm:$0xff]  ;;  %v561_v24 = vld [vmem:[%s3628_s24 + $0x7f4] sm:$0xff] }
  0x90   : >> { %558 = vst [vmem:[%s3624_s23 + $0x2c0] sm:$0xff] %v557_v22  ;;  %560 = vst [vmem:[%s3624_s23 + $0x2c8] sm:$0xff] %v559_v23  ;;  %v563_v25 = vld [vmem:[%s3628_s24 + $0x7fc] sm:$0xff]  ;;  %v567_v27 = vld [vmem:[%s3628_s24 + $0x8e8] sm:$0xff] }
  0x91   : >> { %562 = vst [vmem:[%s3624_s23 + $0x2d0] sm:$0xff] %v561_v24  ;;  %v565_v26 = vld [vmem:[%s3628_s24 + $0x8e0] sm:$0xff]  ;;  %564 = vst [vmem:[%s3624_s23 + $0x2d8] sm:$0xff] %v563_v25  ;;  %v569_v28 = vld [vmem:[%s3628_s24 + $0x8f0] sm:$0xff] }
  0x92   : >> { %566 = vst [vmem:[%s3624_s23 + $0x300] sm:$0xff] %v565_v26  ;;  %568 = vst [vmem:[%s3624_s23 + $0x308] sm:$0xff] %v567_v27  ;;  %v571_v29 = vld [vmem:[%s3628_s24 + $0x8f8] sm:$0xff]  ;;  %v573_v30 = vld [vmem:[%s3628_s24 + $0x900] sm:$0xff] }
  0x93   : >> { %570 = vst [vmem:[%s3624_s23 + $0x310] sm:$0xff] %v569_v28  ;;  %572 = vst [vmem:[%s3624_s23 + $0x318] sm:$0xff] %v571_v29  ;;  %v575_v31 = vld [vmem:[%s3628_s24 + $0x908] sm:$0xff]  ;;  %v577_v32 = vld [vmem:[%s3628_s24 + $0x910] sm:$0xff] }
  0x94   : >> { %574 = vst [vmem:[%s3624_s23 + $0x320] sm:$0xff] %v573_v30  ;;  %v579_v33 = vld [vmem:[%s3628_s24 + $0x918] sm:$0xff]  ;;  %576 = vst [vmem:[%s3624_s23 + $0x328] sm:$0xff] %v575_v31  ;;  %v583_v35 = vld [vmem:[%s3628_s24 + $0xa04] sm:$0xff] }
  0x95   : >> { %578 = vst [vmem:[%s3624_s23 + $0x330] sm:$0xff] %v577_v32  ;;  %580 = vst [vmem:[%s3624_s23 + $0x338] sm:$0xff] %v579_v33  ;;  %v581_v34 = vld [vmem:[%s3628_s24 + $0x9fc] sm:$0xff]  ;;  %v585_v36 = vld [vmem:[%s3628_s24 + $0xa0c] sm:$0xff]  ;;  %433 = sbr.rel (!%p430_p7) target bundleno = 113 (0x71), region = 257 }
  0x96   : >> { %582 = vst [vmem:[%s3624_s23 + $0x360] sm:$0xff] %v581_v34  ;;  %584 = vst [vmem:[%s3624_s23 + $0x368] sm:$0xff] %v583_v35  ;;  %v587_v37 = vld [vmem:[%s3628_s24 + $0xa14] sm:$0xff]  ;;  %v589_v38 = vld [vmem:[%s3628_s24 + $0xa1c] sm:$0xff] }
  0x97   : >> { %586 = vst [vmem:[%s3624_s23 + $0x370] sm:$0xff] %v585_v36  ;;  %v591_v39 = vld [vmem:[%s3628_s24 + $0xa24] sm:$0xff]  ;;  %588 = vst [vmem:[%s3624_s23 + $0x378] sm:$0xff] %v587_v37  ;;  %v593_v40 = vld [vmem:[%s3628_s24 + $0xa2c] sm:$0xff] }
  0x98   : >> { %590 = vst [vmem:[%s3624_s23 + $0x380] sm:$0xff] %v589_v38  ;;  %592 = vst [vmem:[%s3624_s23 + $0x388] sm:$0xff] %v591_v39  ;;  %v595_v41 = vld [vmem:[%s3628_s24 + $0xa34] sm:$0xff]  ;;  %s5062_s24 = smov %s4128_s8 }
  0x99   : >> { %594 = vst [vmem:[%s3624_s23 + $0x390] sm:$0xff] %v593_v40  ;;  %596 = vst [vmem:[%s3624_s23 + $0x398] sm:$0xff] %v595_v41  ;;  %s5061_s23 = smov %s4131_s9 }
  0x9a PF: > { %s4269_s10 = sand.u32 7, %s424_s17   ;;  %s3116_s6 = sshll.u32 %s4061_s22, 10 }
  0x9b   : > { %s608_s7 = sshra.s32 %s3116_s6, 4  ;;  %p2920_p8 = scmp.le.s32.totalorder %s4269_s10, 0 }
  0x9c   : > { %s4273_s11 = scalar_lea.vmem %s3786_s28, %s608_s7   ;;  %s4276_s29 = scalar_lea.vmem %s3790_s4, %s608_s7 [#allocation2]  }
  0x9d   : > { %2811 = sbr.rel (%p2920_p8) target bundleno = 170 (0xaa), region = 262  ;;  %s5064_s23 = smov (!%p2920_p8), %s4276_s29 }
  0x9e   : > { %s5065_s24 = smov (!%p2920_p8), %s4273_s11  ;;  %s4285_s25 = smov (!%p2920_p8), 0  }
  0x9f   : > { %s4287_s26 = smov (!%p2920_p8), 0  }
  0xa2 LB: >> { %v624_v42 = vld [vmem:[%s3644_s24] sm:$0xff]  ;;  %v628_v44 = vld [vmem:[%s3644_s24 + $0x238] sm:$0xff]  ;;  %s644_s17 = sadd.s32 1, %s3648_s25  ;;  %v632_v46 = vld [vmem:[%s3644_s24 + $0x470] sm:$0xff]  ;;  %s618_s26 = sadd.s32 1, %s3652_s26   ;;  %s3652_s26 = sphi %s4287_s26, %s618_s26   ;;  %s3648_s25 = sphi %s4285_s25, %s5066_s25   ;;  %s3644_s24 = sphi %s5065_s24, %s649_s24   ;;  %s3640_s23 = sphi %s5064_s23, %s650_s23  }
  0xa3   : >> { %v626_v43 = vld [vmem:[%s3644_s24 + $0x11c] sm:$0xff]  ;;  %625 = vst [vmem:[%s3640_s23] sm:$0xff] %v624_v42  ;;  %629 = vst [vmem:[%s3640_s23 + $0xc0] sm:$0xff] %v628_v44  ;;  %v630_v45 = vld [vmem:[%s3644_s24 + $0x354] sm:$0xff]  ;;  %p645_p9 = scmp.ge.s32.totalorder %s644_s17, %s4269_s10  ;;  %p617_p10 = scmp.ge.s32.totalorder %s618_s26, %s4269_s10 }
  0xa4   : >> { %627 = vst [vmem:[%s3640_s23 + $0x60] sm:$0xff] %v626_v43  ;;  %v634_v47 = vld [vmem:[%s3644_s24 + $0x58c] sm:$0xff]  ;;  %631 = vst [vmem:[%s3640_s23 + $0x120] sm:$0xff] %v630_v45  ;;  %v638_v49 = vld [vmem:[%s3644_s24 + $0x7c4] sm:$0xff] }
  0xa5   : >> { %633 = vst [vmem:[%s3640_s23 + $0x180] sm:$0xff] %v632_v46  ;;  %635 = vst [vmem:[%s3640_s23 + $0x1e0] sm:$0xff] %v634_v47  ;;  %v636_v48 = vld [vmem:[%s3644_s24 + $0x6a8] sm:$0xff]  ;;  %v640_v50 = vld [vmem:[%s3644_s24 + $0x8e0] sm:$0xff]  ;;  %s5089_s17 = smov (%p645_p9, %s644_s17), 0  ;;  %620 = sbr.rel (!%p617_p10) target bundleno = 162 (0xa2), region = 268 }
  0xa6   : >> { %637 = vst [vmem:[%s3640_s23 + $0x240] sm:$0xff] %v636_v48  ;;  %639 = vst [vmem:[%s3640_s23 + $0x2a0] sm:$0xff] %v638_v49  ;;  %v642_v51 = vld [vmem:[%s3644_s24 + $0x9fc] sm:$0xff]  ;;  %s2921_s22 = sshll.u32 %s5089_s17, 3  ;;  %s5066_s25 = smov %s5089_s17 }
  0xa7   : >> { %641 = vst [vmem:[%s3640_s23 + $0x300] sm:$0xff] %v640_v50  ;;  %643 = vst [vmem:[%s3640_s23 + $0x360] sm:$0xff] %v642_v51  ;;  %s649_s24 = scalar_lea.vmem %s4273_s11, %s2921_s22   ;;  %s650_s23 = scalar_lea.vmem %s4276_s29, %s2921_s22 [#allocation2]  }
  0xaa PF: > { %s3718_s27 = smov 1  }
  0xab   : > { %s651_s8 = sshll.u32 %s3718_s27, %s3794_s5 }
  0xac   : > { %s2923_s9 = sadd.s32 4294967295, %s651_s8 }
  0xad   : > { %v661_v52 = vld [vmem:[%s4054_s18] sm:%s2923_s9]  ;;  %v665_v54 = vld [vmem:[%s4054_s18 + $0x238] sm:%s2923_s9] }
  0xae   : > { %v663_v53 = vld [vmem:[%s4054_s18 + $0x11c] sm:%s2923_s9]  ;;  %662 = vst [vmem:[%s4057_s21] sm:%s2923_s9] %v661_v52 }
  0xaf   : > { %664 = vst [vmem:[%s4057_s21 + $0x60] sm:%s2923_s9] %v663_v53  ;;  %v667_v55 = vld [vmem:[%s4054_s18 + $0x354] sm:%s2923_s9] }
  0xb0   : > { %666 = vst [vmem:[%s4057_s21 + $0xc0] sm:%s2923_s9] %v665_v54  ;;  %668 = vst [vmem:[%s4057_s21 + $0x120] sm:%s2923_s9] %v667_v55 }
  0xb1   : > { %v669_v56 = vld [vmem:[%s4054_s18 + $0x470] sm:%s2923_s9]  ;;  %v673_v58 = vld [vmem:[%s4054_s18 + $0x6a8] sm:%s2923_s9] }
  0xb2   : > { %v671_v57 = vld [vmem:[%s4054_s18 + $0x58c] sm:%s2923_s9]  ;;  %670 = vst [vmem:[%s4057_s21 + $0x180] sm:%s2923_s9] %v669_v56 }
  0xb3   : > { %672 = vst [vmem:[%s4057_s21 + $0x1e0] sm:%s2923_s9] %v671_v57  ;;  %v675_v59 = vld [vmem:[%s4054_s18 + $0x7c4] sm:%s2923_s9] }
  0xb4   : > { %674 = vst [vmem:[%s4057_s21 + $0x240] sm:%s2923_s9] %v673_v58  ;;  %676 = vst [vmem:[%s4057_s21 + $0x2a0] sm:%s2923_s9] %v675_v59 }
  0xb5   : > { %v677_v60 = vld [vmem:[%s4054_s18 + $0x8e0] sm:%s2923_s9] }
  0xb6   : > { %v679_v61 = vld [vmem:[%s4054_s18 + $0x9fc] sm:%s2923_s9]  ;;  %678 = vst [vmem:[%s4057_s21 + $0x300] sm:%s2923_s9] %v677_v60 }
  0xb7   : > { %680 = vst [vmem:[%s4057_s21 + $0x360] sm:%s2923_s9] %v679_v61 }
  0xb8 PF: > { %p2924_p11 = scmp.ge.u32.totalorder %s3788_s30, 8 }
  0xb9   : > { %s3719_s5 = smov (!%p2924_p11), 1  }
  0xba   : > { %153 = sbr.rel (%p2924_p11) target bundleno = 202 (0xca), region = 40  ;;  %s154_s18 = sshll.u32 (!%p2924_p11), %s3719_s5, %s3788_s30 }
  0xbb   : > { %s2925_s21 = sadd.s32 (!%p2924_p11), 4294967295, %s154_s18 }
  0xbf   : > { %v164_v62 = vld [vmem:[%s3786_s28] sm:%s2925_s21]  ;;  %v168_v0 = vld [vmem:[%s3786_s28 + $0x238] sm:%s2925_s21] }
  0xc0   : > { %v166_v63 = vld [vmem:[%s3786_s28 + $0x11c] sm:%s2925_s21]  ;;  %165 = vst [vmem:[%s3790_s4] sm:%s2925_s21] %v164_v62 }
  0xc1   : > { %167 = vst [vmem:[%s3790_s4 + $0x60] sm:%s2925_s21] %v166_v63  ;;  %v170_v1 = vld [vmem:[%s3786_s28 + $0x354] sm:%s2925_s21] }
  0xc2   : > { %169 = vst [vmem:[%s3790_s4 + $0xc0] sm:%s2925_s21] %v168_v0  ;;  %171 = vst [vmem:[%s3790_s4 + $0x120] sm:%s2925_s21] %v170_v1 }
  0xc3   : > { %v172_v2 = vld [vmem:[%s3786_s28 + $0x470] sm:%s2925_s21]  ;;  %v176_v4 = vld [vmem:[%s3786_s28 + $0x6a8] sm:%s2925_s21] }
  0xc4   : > { %v174_v3 = vld [vmem:[%s3786_s28 + $0x58c] sm:%s2925_s21]  ;;  %173 = vst [vmem:[%s3790_s4 + $0x180] sm:%s2925_s21] %v172_v2 }
  0xc5   : > { %175 = vst [vmem:[%s3790_s4 + $0x1e0] sm:%s2925_s21] %v174_v3  ;;  %v178_v5 = vld [vmem:[%s3786_s28 + $0x7c4] sm:%s2925_s21] }
  0xc6   : > { %177 = vst [vmem:[%s3790_s4 + $0x240] sm:%s2925_s21] %v176_v4  ;;  %179 = vst [vmem:[%s3790_s4 + $0x2a0] sm:%s2925_s21] %v178_v5 }
  0xc7   : > { %v180_v6 = vld [vmem:[%s3786_s28 + $0x8e0] sm:%s2925_s21] }
  0xc8   : > { %v182_v7 = vld [vmem:[%s3786_s28 + $0x9fc] sm:%s2925_s21]  ;;  %181 = vst [vmem:[%s3790_s4 + $0x300] sm:%s2925_s21] %v180_v6 }
  0xc9   : > { %183 = vst [vmem:[%s3790_s4 + $0x360] sm:%s2925_s21] %v182_v7 }
  0xca PF: > { %p2926_p12 = scmp.ge.s32.totalorder %s3588_s14, 1  ;;  %p683_p13 = scmp.lt.s32.totalorder %s3588_s14, 4 }
  0xcc   : > { %p684_p0 = pnand %p2926_p12, %p683_p13 }
  0xcd   : > { %s690_s30 = sand.u32 (!%p684_p0), 1, %s3580_s12  }
  0xce   : > { %687 = sbr.rel (%p684_p0) target bundleno = 693 (0x2b5), region = 94 }
  0xcf   : > { %s3148_s10 = smul.u32 (!%p684_p0), 960, %s690_s30 }
  0xd0   : > { %s3149_s23 = smul.u32 (!%p684_p0), 192, %s690_s30 }
  0xd1   : > { %s4365_s7 = scalar_lea.vmem (!%p684_p0), [#allocation2], %s3148_s10 }
  0xd2   : > { %s4590_s12 = scalar_lea.vmem (!%p684_p0), [#allocation3], %s3149_s23  }
  0xd3   : > { %vm1442_vm0 = vcmask 1044480   ;;  %vm1443_vm1 = vcmask 1045504   ;;  %v3720_v8 = vmov 65535   ;;  %v3721_v10 = vmov 0   ;;  %v845_v11 = vld [vmem:[%s5048_s2] sm:$0xff]  ;;  %v846_v12 = vld [vmem:[%s5048_s2 + $0x8] sm:$0xff] }
  0xd4   : > { %v1444_v9 = vsel %vm1442_vm0, 4294967295, %v3720_v8  ;;  %1550 = vmatprep.mubr.bf16.mxu0 %v3721_v10  ;;  %1593 = vmatprep.mubr.bf16.mxu1 %v3721_v10  ;;  %v821_v13 = vld [vmem:[%s4365_s7 + $0x300] sm:$0xff]  ;;  %v822_v16 = vld [vmem:[%s4365_s7 + $0x308] sm:$0xff]  ;;  %v823_v51 = vld [vmem:[%s4365_s7 + $0x310] sm:$0xff]  ;;  %vm1438_vm2 = vcmask 613376   ;;  %s2257_s24 = smul.u32 (%p3775_p5), 24, %s3760_s15 }
  0xd5   : > { %3436 = vset.pattern.permute.xlu0 %v3721_v10  ;;  %v833_v14 = vld [vmem:[%s4365_s7 + $0x360] sm:$0x33]  ;;  %v4369_v15 = vsel %vm1443_vm1, %v1444_v9, 0  ;;  %v834_v18 = vld [vmem:[%s4365_s7 + $0x368] sm:$0x33]  ;;  %v824_v54 = vld [vmem:[%s4365_s7 + $0x318] sm:$0xff] }
  0xd6   : > { %849 = vperm.xlu0 %3436, %v845_v11   ;;  %v3025_v17 = vcombine.high %v821_v13, %v833_v14  ;;  %v3024_v19 = vcombine.low %v821_v13, %v833_v14  ;;  %v797_v20 = vld [vmem:[%s4365_s7 + $0x240] sm:$0xff]  ;;  %v3027_v22 = vcombine.high %v822_v16, %v834_v18  ;;  %v3026_v23 = vcombine.low %v822_v16, %v834_v18  ;;  %v798_v24 = vld [vmem:[%s4365_s7 + $0x248] sm:$0xff]  ;;  %v835_v52 = vld [vmem:[%s4365_s7 + $0x370] sm:$0x33]  ;;  %s3142_s25 = smul.u32 (%p3775_p5), 96, %s3760_s15  ;;  %s2258_s26 = ssub.s32 (%p3775_p5), 71, %s2257_s24 }
  0xd7   : > { %v809_v21 = vld [vmem:[%s4365_s7 + $0x2a0] sm:$0xff]  ;;  %v810_v25 = vld [vmem:[%s4365_s7 + $0x2a8] sm:$0xff]  ;;  %v836_v55 = vld [vmem:[%s4365_s7 + $0x378] sm:$0x33]  ;;  %v3029_v59 = vcombine.high %v823_v51, %v835_v52  ;;  %v3028_v63 = vcombine.low %v823_v51, %v835_v52  ;;  %p2259_p1 = scmp.lt.s32.totalorder (%p3775_p5), %s2258_s26, 24 }
  0xd8   : > { %v1450_v26 = vand.u32 %v3025_v17, %v4369_v15  ;;  %v1447_v27 = vand.u32 %v3024_v19, %v4369_v15  ;;  %v3001_v28 = vcombine.high %v797_v20, %v809_v21  ;;  %v1456_v29 = vand.u32 %v3027_v22, %v4369_v15  ;;  %v773_v32 = vld [vmem:[%s4365_s7 + $0x180] sm:$0xff]  ;;  %v774_v34 = vld [vmem:[%s4365_s7 + $0x188] sm:$0xff]  ;;  %v799_v4 = vld [vmem:[%s4365_s7 + $0x250] sm:$0xff]  ;;  %s4663_s27 = scalar_lea.vmem (%p3775_p5), %s5049_s3, %s3142_s25  }
  0xd9   : > { %v1453_v30 = vand.u32 %v3026_v23, %v4369_v15  ;;  %v3003_v31 = vcombine.high %v798_v24, %v810_v25  ;;  %v785_v33 = vld [vmem:[%s4365_s7 + $0x1e0] sm:$0xff]  ;;  %v786_v35 = vld [vmem:[%s4365_s7 + $0x1e8] sm:$0xff]  ;;  %v3000_v36 = vcombine.low %v797_v20, %v809_v21  ;;  %v3002_v37 = vcombine.low %v798_v24, %v810_v25  ;;  %v811_v5 = vld [vmem:[%s4365_s7 + $0x2b0] sm:$0xff] }
  0xda   : > { %854 = vperm.xlu0 %3436, %v846_v12   ;;  %1524 = vmatprep.subr.bf16.mxu0 %v1450_v26  ;;  %v2977_v38 = vcombine.high %v773_v32, %v785_v33  ;;  %v2979_v39 = vcombine.high %v774_v34, %v786_v35  ;;  %v749_v40 = vld [vmem:[%s4365_s7 + $0xc0] sm:$0xff]  ;;  %v750_v42 = vld [vmem:[%s4365_s7 + $0xc8] sm:$0xff]  ;;  %v2976_v44 = vcombine.low %v773_v32, %v785_v33  ;;  %v800_v7 = vld [vmem:[%s4365_s7 + $0x258] sm:$0xff] }
  0xdb   : > { %1567 = vmatprep.subr.bf16.mxu1 %v1456_v29  ;;  %1525 = vmatpush1.bf16.msra.mxu0 %v1447_v27  ;;  %v761_v41 = vld [vmem:[%s4365_s7 + $0x120] sm:$0xff]  ;;  %v762_v43 = vld [vmem:[%s4365_s7 + $0x128] sm:$0xff]  ;;  %v2978_v45 = vcombine.low %v774_v34, %v786_v35  ;;  %v3031_v61 = vcombine.high %v824_v54, %v836_v55  ;;  %v1462_v1 = vand.u32 %v3029_v59, %v4369_v15  ;;  %v812_v8 = vld [vmem:[%s4365_s7 + $0x2b8] sm:$0xff] }
  0xdc   : > { %1568 = vmatpush1.bf16.msra.mxu1 %v1453_v30  ;;  %1526 = vmatprep.subr.bf16.mxu0 %v3001_v28  ;;  %v2953_v46 = vcombine.high %v749_v40, %v761_v41  ;;  %v725_v47 = vld [vmem:[%s4365_s7] sm:$0xff]  ;;  %v2955_v49 = vcombine.high %v750_v42, %v762_v43  ;;  %v726_v50 = vld [vmem:[%s4365_s7 + $0x8] sm:$0xff]  ;;  %v2952_v56 = vcombine.low %v749_v40, %v761_v41  ;;  %v775_v14 = vld [vmem:[%s4365_s7 + $0x190] sm:$0xff] }
  0xdd   : > { %1569 = vmatprep.subr.bf16.mxu1 %v3003_v31  ;;  %v737_v48 = vld [vmem:[%s4365_s7 + $0x60] sm:$0xff]  ;;  %v738_v53 = vld [vmem:[%s4365_s7 + $0x68] sm:$0xff]  ;;  %v2954_v57 = vcombine.low %v750_v42, %v762_v43  ;;  %v3030_v2 = vcombine.low %v824_v54, %v836_v55  ;;  %v1468_v3 = vand.u32 %v3031_v61, %v4369_v15  ;;  %v1459_v9 = vand.u32 %v3028_v63, %v4369_v15  ;;  %v787_v16 = vld [vmem:[%s4365_s7 + $0x1f0] sm:$0xff] }
  0xde   : > { %v2929_v58 = vcombine.high %v725_v47, %v737_v48  ;;  %v2931_v60 = vcombine.high %v726_v50, %v738_v53  ;;  %v2928_v62 = vcombine.low %v725_v47, %v737_v48  ;;  %v2930_v0 = vcombine.low %v726_v50, %v738_v53  ;;  %v4404_v6 = vld [vmem:[%s5046_s0] sm:$0xff]   ;;  %v776_v17 = vld [vmem:[%s4365_s7 + $0x198] sm:$0xff]  ;;  %v830_v24 = vld [vmem:[%s4365_s7 + $0x348] sm:$0xff] }
  0xdf   : > { %1527 = vmatpush1.bf16.msra.mxu0 %v3000_v36  ;;  %v1465_v11 = vand.u32 %v3030_v2, %v4369_v15  ;;  %v3005_v12 = vcombine.high %v799_v4, %v811_v5  ;;  %v3007_v13 = vcombine.high %v800_v7, %v812_v8  ;;  %v788_v18 = vld [vmem:[%s4365_s7 + $0x1f8] sm:$0xff]  ;;  %v3004_v19 = vcombine.low %v799_v4, %v811_v5  ;;  %v829_v20 = vld [vmem:[%s4365_s7 + $0x340] sm:$0xff]  ;;  %v842_v25 = vld [vmem:[%s4365_s7 + $0x3a8] sm:$0x33] }
  0xe0   : > { %1570 = vmatpush1.bf16.msra.mxu1 %v3002_v37  ;;  %1528 = vmatprep.subr.bf16.mxu0 %v2977_v38  ;;  %v3006_v21 = vcombine.low %v800_v7, %v812_v8  ;;  %v2981_v22 = vcombine.high %v775_v14, %v787_v16  ;;  %v841_v23 = vld [vmem:[%s4365_s7 + $0x3a0] sm:$0x33]  ;;  %v2983_v26 = vcombine.high %v776_v17, %v788_v18  ;;  %v751_v27 = vld [vmem:[%s4365_s7 + $0xd0] sm:$0xff]  ;;  %v752_v31 = vld [vmem:[%s4365_s7 + $0xd8] sm:$0xff] }
  0xe1   : > { %1571 = vmatprep.subr.bf16.mxu1 %v2979_v39  ;;  %v763_v28 = vld [vmem:[%s4365_s7 + $0x130] sm:$0xff]  ;;  %v3040_v29 = vcombine.low %v829_v20, %v841_v23  ;;  %v3041_v30 = vcombine.high %v829_v20, %v841_v23  ;;  %v764_v32 = vld [vmem:[%s4365_s7 + $0x138] sm:$0xff]  ;;  %v3042_v33 = vcombine.low %v830_v24, %v842_v25  ;;  %v3043_v34 = vcombine.high %v830_v24, %v842_v25  ;;  %v825_v42 = vld [vmem:[%s4365_s7 + $0x320] sm:$0xff] }
  0xe2   : > { %v2980_v35 = vcombine.low %v775_v14, %v787_v16  ;;  %v2982_v36 = vcombine.low %v776_v17, %v788_v18  ;;  %v727_v37 = vld [vmem:[%s4365_s7 + $0x10] sm:$0xff]  ;;  %v2957_v40 = vcombine.high %v751_v27, %v763_v28  ;;  %v837_v43 = vld [vmem:[%s4365_s7 + $0x380] sm:$0x33]  ;;  %v728_v47 = vld [vmem:[%s4365_s7 + $0x18] sm:$0xff]  ;;  %v2956_v50 = vcombine.low %v751_v27, %v763_v28 }
  0xe3   : > { %1529 = vmatpush1.bf16.msra.mxu0 %v2976_v44  ;;  %v4430_v38 = vand.u32 %v3041_v30, %v4369_v15  ;;  %v4433_v39 = vand.u32 %v3040_v29, %v4369_v15  ;;  %v739_v41 = vld [vmem:[%s4365_s7 + $0x70] sm:$0xff]  ;;  %v4439_v44 = vand.u32 %v3043_v34, %v4369_v15  ;;  %v740_v48 = vld [vmem:[%s4365_s7 + $0x78] sm:$0xff]  ;;  %v838_v51 = vld [vmem:[%s4365_s7 + $0x388] sm:$0x33]  ;;  %v2958_v54 = vcombine.low %v752_v31, %v764_v32 }
  0xe4   : > { %1572 = vmatpush1.bf16.msra.mxu1 %v2978_v45  ;;  %1530 = vmatprep.subr.bf16.mxu0 %v2953_v46  ;;  %v4442_v45 = vand.u32 %v3042_v33, %v4369_v15  ;;  %v2959_v46 = vcombine.high %v752_v31, %v764_v32  ;;  %v831_v52 = vld [vmem:[%s4365_s7 + $0x350] sm:$0xff]  ;;  %v2933_v55 = vcombine.high %v727_v37, %v739_v41  ;;  %v844_v59 = vld [vmem:[%s4365_s7 + $0x3b8] sm:$0x33]  ;;  %v813_v14 = vld [vmem:[%s4365_s7 + $0x2c0] sm:$0xff] }
  0xe5   : > { %1573 = vmatprep.subr.bf16.mxu1 %v2955_v49  ;;  %v826_v49 = vld [vmem:[%s4365_s7 + $0x328] sm:$0xff]  ;;  %v843_v53 = vld [vmem:[%s4365_s7 + $0x3b0] sm:$0x33]  ;;  %v2935_v63 = vcombine.high %v728_v47, %v740_v48  ;;  %v2932_v5 = vcombine.low %v727_v37, %v739_v41  ;;  %v3032_v7 = vcombine.low %v825_v42, %v837_v43  ;;  %v2934_v8 = vcombine.low %v728_v47, %v740_v48  ;;  %v789_v23 = vld [vmem:[%s4365_s7 + $0x200] sm:$0xff] }
  0xe6   : > { %v802_v16 = vld [vmem:[%s4365_s7 + $0x268] sm:$0xff]  ;;  %v753_v30 = vld [vmem:[%s4365_s7 + $0xe0] sm:$0xff]  ;;  %v828_v48 = vld [vmem:[%s4365_s7 + $0x338] sm:$0xff] }
  0xe7   : > { %1531 = vmatpush1.bf16.msra.mxu0 %v2952_v56  ;;  %v3033_v56 = vcombine.high %v825_v42, %v837_v43  ;;  %v814_v17 = vld [vmem:[%s4365_s7 + $0x2c8] sm:$0xff]  ;;  %v1471_v18 = vand.u32 %v3032_v7, %v4369_v15  ;;  %v765_v31 = vld [vmem:[%s4365_s7 + $0x140] sm:$0xff]  ;;  %v827_v43 = vld [vmem:[%s4365_s7 + $0x330] sm:$0xff] }
  0xe8   : > { %1574 = vmatpush1.bf16.msra.mxu1 %v2954_v57  ;;  %1532 = vmatprep.subr.bf16.mxu0 %v2929_v58  ;;  %v3044_v57 = vcombine.low %v831_v52, %v843_v53  ;;  %v832_v58 = vld [vmem:[%s4365_s7 + $0x358] sm:$0xff]  ;;  %v778_v24 = vld [vmem:[%s4365_s7 + $0x1a8] sm:$0xff]  ;;  %v3010_v27 = vcombine.low %v802_v16, %v814_v17  ;;  %v729_v37 = vld [vmem:[%s4365_s7 + $0x20] sm:$0xff] }
  0xe9   : > { %1575 = vmatprep.subr.bf16.mxu1 %v2931_v60  ;;  %v3045_v60 = vcombine.high %v831_v52, %v843_v53  ;;  %v3046_v61 = vcombine.low %v832_v58, %v844_v59  ;;  %v790_v25 = vld [vmem:[%s4365_s7 + $0x208] sm:$0xff] }
  0xea   : > { %v2987_v29 = vcombine.high %v778_v24, %v790_v25  ;;  %v754_v32 = vld [vmem:[%s4365_s7 + $0xe8] sm:$0xff] }
  0xeb   : > { %1533 = vmatpush1.bf16.msra.mxu0 %v2928_v62  ;;  %v3047_v62 = vcombine.high %v832_v58, %v844_v59  ;;  %v4456_v2 = vand.u32 %v3045_v60, %v4369_v15  ;;  %v4462_v4 = vand.u32 %v3046_v61, %v4369_v15  ;;  %v766_v33 = vld [vmem:[%s4365_s7 + $0x148] sm:$0xff] }
  0xec   : > { %1576 = vmatpush1.bf16.msra.mxu1 %v2930_v0  ;;  %1610 = vmatprep.subr.bf16.mxu0 %v1462_v1  ;;  %v3035_v0 = vcombine.high %v826_v49, %v838_v51  ;;  %v4453_v1 = vand.u32 %v3044_v57, %v4369_v15  ;;  %v2963_v41 = vcombine.high %v754_v32, %v766_v33  ;;  %v730_v42 = vld [vmem:[%s4365_s7 + $0x28] sm:$0xff] }
  0xed   : > { %1653 = vmatprep.subr.bf16.mxu1 %v1468_v3  ;;  %v4459_v3 = vand.u32 %v3047_v62, %v4369_v15  ;;  %v742_v47 = vld [vmem:[%s4365_s7 + $0x88] sm:$0xff]  ;;  %v803_v62 = vld [vmem:[%s4365_s7 + $0x270] sm:$0xff] }
  0xee   : > { %3048 = vmatmul.mubr.msk.bf16.vlgmr.msra.gmra.mxu0 %vm1438_vm2, %v4404_v6  ;;  %v2938_v58 = vcombine.low %v730_v42, %v742_v47 }
  0xef   : > { %3049 = vmatmul.mubr.msk.bf16.vlgmr.msra.gmra.mxu1 %vm1438_vm2, %v4404_v6  ;;  %1611 = vmatpush1.bf16.msra.mxu0 %v1459_v9  ;;  %v1474_v9 = vand.u32 %v3033_v56, %v4369_v15 }
  0xf0   : > { %1654 = vmatpush1.bf16.msra.mxu1 %v1465_v11  ;;  %1612 = vmatprep.subr.bf16.mxu0 %v3005_v12  ;;  %v3034_v11 = vcombine.low %v826_v49, %v838_v51  ;;  %v1480_v12 = vand.u32 %v3035_v0, %v4369_v15  ;;  %v840_v49 = vld [vmem:[%s4365_s7 + $0x398] sm:$0x33]  ;;  %v2962_v51 = vcombine.low %v754_v32, %v766_v33 }
  0xf1   : > { %1655 = vmatprep.subr.bf16.mxu1 %v3007_v13  ;;  %1636 = vmatprep.mubr.bf16.mxu0 %v3721_v10  ;;  %v801_v13 = vld [vmem:[%s4365_s7 + $0x260] sm:$0xff]  ;;  %v3038_v60 = vcombine.low %v828_v48, %v840_v49  ;;  %v804_v0 = vld [vmem:[%s4365_s7 + $0x278] sm:$0xff] }
  0xf2   : > { %1679 = vmatprep.mubr.bf16.mxu1 %v3721_v10  ;;  %v3009_v20 = vcombine.high %v801_v13, %v813_v14 }
  0xf3   : > { %1613 = vmatpush1.bf16.msra.mxu0 %v3004_v19  ;;  %v1477_v19 = vand.u32 %v3034_v11, %v4369_v15 }
  0xf4   : > { %1656 = vmatpush1.bf16.msra.mxu1 %v3006_v21  ;;  %1614 = vmatprep.subr.bf16.mxu0 %v2981_v22  ;;  %v3011_v21 = vcombine.high %v802_v16, %v814_v17  ;;  %v777_v22 = vld [vmem:[%s4365_s7 + $0x1a0] sm:$0xff]  ;;  %v792_v16 = vld [vmem:[%s4365_s7 + $0x218] sm:$0xff] }
  0xf5   : > { %1657 = vmatprep.subr.bf16.mxu1 %v2983_v26  ;;  %v3008_v26 = vcombine.low %v801_v13, %v813_v14  ;;  %v2985_v28 = vcombine.high %v777_v22, %v789_v23  ;;  %v2984_v34 = vcombine.low %v777_v22, %v789_v23  ;;  %v791_v13 = vld [vmem:[%s4365_s7 + $0x210] sm:$0xff]  ;;  %v780_v14 = vld [vmem:[%s4365_s7 + $0x1b8] sm:$0xff] }
  0xf6   : > { %v756_v22 = vld [vmem:[%s4365_s7 + $0xf8] sm:$0xff] }
  0xf7   : > { %1615 = vmatpush1.bf16.msra.mxu0 %v2980_v35  ;;  %v2986_v35 = vcombine.low %v778_v24, %v790_v25  ;;  %v768_v23 = vld [vmem:[%s4365_s7 + $0x158] sm:$0xff]  ;;  %v2990_v25 = vcombine.low %v780_v14, %v792_v16 }
  0xf8   : > { %1658 = vmatpush1.bf16.msra.mxu1 %v2982_v36  ;;  %1616 = vmatprep.subr.bf16.mxu0 %v2957_v40  ;;  %v2961_v36 = vcombine.high %v753_v30, %v765_v31  ;;  %v741_v40 = vld [vmem:[%s4365_s7 + $0x80] sm:$0xff]  ;;  %v2966_v33 = vcombine.low %v756_v22, %v768_v23 }
  0xf9   : > { %1659 = vmatprep.subr.bf16.mxu1 %v2959_v46  ;;  %v839_v46 = vld [vmem:[%s4365_s7 + $0x390] sm:$0x33]  ;;  %v2937_v52 = vcombine.high %v729_v37, %v741_v40  ;;  %v2936_v56 = vcombine.low %v729_v37, %v741_v40  ;;  %v805_v40 = vld [vmem:[%s4365_s7 + $0x280] sm:$0xff] }
  0xfa   : > { %v3037_v53 = vcombine.high %v827_v43, %v839_v46  ;;  %v3036_v57 = vcombine.low %v827_v43, %v839_v46  ;;  %v818_v43 = vld [vmem:[%s4365_s7 + $0x2e8] sm:$0xff] }
  0xfb   : > { %1617 = vmatpush1.bf16.msra.mxu0 %v2956_v50  ;;  %v2960_v50 = vcombine.low %v753_v30, %v765_v31  ;;  %v732_v30 = vld [vmem:[%s4365_s7 + $0x38] sm:$0xff] }
  0xfc   : > { %1660 = vmatpush1.bf16.msra.mxu1 %v2958_v54  ;;  %1618 = vmatprep.subr.bf16.mxu0 %v2933_v55  ;;  %v2939_v54 = vcombine.high %v730_v42, %v742_v47  ;;  %v3039_v55 = vcombine.high %v828_v48, %v840_v49  ;;  %v1486_v59 = vand.u32 %v3037_v53, %v4369_v15  ;;  %v744_v31 = vld [vmem:[%s4365_s7 + $0x98] sm:$0xff]  ;;  %v806_v42 = vld [vmem:[%s4365_s7 + $0x288] sm:$0xff]  ;;  %v781_v48 = vld [vmem:[%s4365_s7 + $0x1c0] sm:$0xff] }
  0xfd   : > { %1661 = vmatprep.subr.bf16.mxu1 %v2935_v63  ;;  %v815_v63 = vld [vmem:[%s4365_s7 + $0x2d0] sm:$0xff]  ;;  %v1483_v7 = vand.u32 %v3036_v57, %v4369_v15  ;;  %v2942_v37 = vcombine.low %v732_v30, %v744_v31  ;;  %v3019_v47 = vcombine.high %v806_v42, %v818_v43  ;;  %v793_v49 = vld [vmem:[%s4365_s7 + $0x220] sm:$0xff]  ;;  %v770_v57 = vld [vmem:[%s4365_s7 + $0x168] sm:$0xff] }
  0xfe   : > { %v1492_v61 = vand.u32 %v3039_v55, %v4369_v15  ;;  %v3012_v17 = vcombine.low %v803_v62, %v815_v63  ;;  %v769_v55 = vld [vmem:[%s4365_s7 + $0x160] sm:$0xff] }
  0xff   : > { %1619 = vmatpush1.bf16.msra.mxu0 %v2932_v5  ;;  %v816_v5 = vld [vmem:[%s4365_s7 + $0x2d8] sm:$0xff] }
 0x100   : > { %1662 = vmatpush1.bf16.msra.mxu1 %v2934_v8  ;;  %1696 = vmatprep.subr.bf16.mxu0 %v1474_v9  ;;  %v1489_v8 = vand.u32 %v3038_v60, %v4369_v15  ;;  %v3013_v9 = vcombine.high %v803_v62, %v815_v63  ;;  %v3015_v11 = vcombine.high %v804_v0, %v816_v5  ;;  %v733_v60 = vld [vmem:[%s4365_s7 + $0x40] sm:$0xff]  ;;  %v734_v62 = vld [vmem:[%s4365_s7 + $0x48] sm:$0xff] }
 0x101   : > { %1739 = vmatprep.subr.bf16.mxu1 %v1480_v12  ;;  %v779_v12 = vld [vmem:[%s4365_s7 + $0x1b0] sm:$0xff]  ;;  %v3014_v15 = vcombine.low %v804_v0, %v816_v5  ;;  %v746_v63 = vld [vmem:[%s4365_s7 + $0xa8] sm:$0xff] }
 0x102   : > { %3050 = vmatmul.mubr.msk.bf16.vlgmr.msra.gmra.mxu0 %vm1438_vm2, %v4404_v6  ;;  %v2988_v24 = vcombine.low %v779_v12, %v791_v13 }
 0x103   : > { %3051 = vmatmul.mubr.msk.bf16.vlgmr.msra.gmra.mxu1 %vm1438_vm2, %v4404_v6  ;;  %1697 = vmatpush1.bf16.msra.mxu0 %v1471_v18  ;;  %v2989_v18 = vcombine.high %v779_v12, %v791_v13  ;;  %v807_v12 = vld [vmem:[%s4365_s7 + $0x290] sm:$0xff] }
 0x104   : > { %1740 = vmatpush1.bf16.msra.mxu1 %v1477_v19  ;;  %1698 = vmatprep.subr.bf16.mxu0 %v3009_v20  ;;  %v2991_v19 = vcombine.high %v780_v14, %v792_v16  ;;  %v755_v20 = vld [vmem:[%s4365_s7 + $0xf0] sm:$0xff]  ;;  %v808_v14 = vld [vmem:[%s4365_s7 + $0x298] sm:$0xff] }
 0x105   : > { %1741 = vmatprep.subr.bf16.mxu1 %v3011_v21  ;;  %1722 = vmatprep.mubr.bf16.mxu0 %v3721_v10  ;;  %v767_v21 = vld [vmem:[%s4365_s7 + $0x150] sm:$0xff]  ;;  %v820_v16 = vld [vmem:[%s4365_s7 + $0x2f8] sm:$0xff] }
 0x106   : > { %1765 = vmatprep.mubr.bf16.mxu1 %v3721_v10  ;;  %v2964_v32 = vcombine.low %v755_v20, %v767_v21  ;;  %v819_v13 = vld [vmem:[%s4365_s7 + $0x2f0] sm:$0xff] }
 0x107   : > { %1699 = vmatpush1.bf16.msra.mxu0 %v3008_v26  ;;  %v2965_v26 = vcombine.high %v755_v20, %v767_v21  ;;  %v784_v20 = vld [vmem:[%s4365_s7 + $0x1d8] sm:$0xff] }
 0x108   : > { %1742 = vmatpush1.bf16.msra.mxu1 %v3010_v27  ;;  %1700 = vmatprep.subr.bf16.mxu0 %v2985_v28  ;;  %v2967_v27 = vcombine.high %v756_v22, %v768_v23  ;;  %v731_v28 = vld [vmem:[%s4365_s7 + $0x30] sm:$0xff]  ;;  %v796_v21 = vld [vmem:[%s4365_s7 + $0x238] sm:$0xff] }
 0x109   : > { %1743 = vmatprep.subr.bf16.mxu1 %v2987_v29  ;;  %v743_v29 = vld [vmem:[%s4365_s7 + $0x90] sm:$0xff]  ;;  %v2999_v23 = vcombine.high %v784_v20, %v796_v21 }
 0x10b   : > { %1701 = vmatpush1.bf16.msra.mxu0 %v2984_v34  ;;  %v2941_v34 = vcombine.high %v731_v28, %v743_v29 }
 0x10c   : > { %1744 = vmatpush1.bf16.msra.mxu1 %v2986_v35  ;;  %1702 = vmatprep.subr.bf16.mxu0 %v2961_v36  ;;  %v2943_v35 = vcombine.high %v732_v30, %v744_v31  ;;  %v2940_v36 = vcombine.low %v731_v28, %v743_v29  ;;  %v735_v30 = vld [vmem:[%s4365_s7 + $0x50] sm:$0xff] }
 0x10d   : > { %1745 = vmatprep.subr.bf16.mxu1 %v2963_v41  ;;  %v817_v41 = vld [vmem:[%s4365_s7 + $0x2e0] sm:$0xff]  ;;  %v747_v31 = vld [vmem:[%s4365_s7 + $0xb0] sm:$0xff] }
 0x10e   : > { %v3017_v46 = vcombine.high %v805_v40, %v817_v41 }
 0x10f   : > { %1703 = vmatpush1.bf16.msra.mxu0 %v2960_v50  ;;  %v782_v50 = vld [vmem:[%s4365_s7 + $0x1c8] sm:$0xff] }
 0x110   : > { %1746 = vmatpush1.bf16.msra.mxu1 %v2962_v51  ;;  %1704 = vmatprep.subr.bf16.mxu0 %v2937_v52  ;;  %v794_v51 = vld [vmem:[%s4365_s7 + $0x228] sm:$0xff]  ;;  %v2993_v52 = vcombine.high %v781_v48, %v793_v49 }
 0x111   : > { %1747 = vmatprep.subr.bf16.mxu1 %v2939_v54  ;;  %v2995_v53 = vcombine.high %v782_v50, %v794_v51  ;;  %v757_v54 = vld [vmem:[%s4365_s7 + $0x100] sm:$0xff] }
 0x112   : > { %v2968_v0 = vcombine.low %v757_v54, %v769_v55 }
 0x113   : > { %1705 = vmatpush1.bf16.msra.mxu0 %v2936_v56  ;;  %v758_v56 = vld [vmem:[%s4365_s7 + $0x108] sm:$0xff] }
 0x114   : > { %1748 = vmatpush1.bf16.msra.mxu1 %v2938_v58  ;;  %1782 = vmatprep.subr.bf16.mxu0 %v1486_v59  ;;  %v2969_v58 = vcombine.high %v757_v54, %v769_v55  ;;  %v2971_v59 = vcombine.high %v758_v56, %v770_v57  ;;  %v2970_v5 = vcombine.low %v758_v56, %v770_v57 }
 0x115   : > { %1825 = vmatprep.subr.bf16.mxu1 %v1492_v61  ;;  %v745_v61 = vld [vmem:[%s4365_s7 + $0xa0] sm:$0xff] }
 0x116   : > { %3052 = vmatmul.mubr.msk.bf16.vlgmr.msra.gmra.mxu0 %vm1438_vm2, %v4404_v6 }
 0x117   : > { %3053 = vmatmul.mubr.msk.bf16.vlgmr.msra.gmra.mxu1 %vm1438_vm2, %v4404_v6  ;;  %1783 = vmatpush1.bf16.msra.mxu0 %v1483_v7  ;;  %v2945_v7 = vcombine.high %v733_v60, %v745_v61 }
 0x118   : > { %1826 = vmatpush1.bf16.msra.mxu1 %v1489_v8  ;;  %1784 = vmatprep.subr.bf16.mxu0 %v3013_v9  ;;  %v2947_v8 = vcombine.high %v734_v62, %v746_v63  ;;  %v2944_v9 = vcombine.low %v733_v60, %v745_v61 }
 0x119   : > { %1827 = vmatprep.subr.bf16.mxu1 %v3015_v11  ;;  %1808 = vmatprep.mubr.bf16.mxu0 %v3721_v10  ;;  %v2946_v11 = vcombine.low %v734_v62, %v746_v63 }
 0x11a   : > { %1851 = vmatprep.mubr.bf16.mxu1 %v3721_v10 }
 0x11b   : > { %1785 = vmatpush1.bf16.msra.mxu0 %v3012_v17  ;;  %v3021_v17 = vcombine.high %v807_v12, %v819_v13 }
 0x11c   : > { %1828 = vmatpush1.bf16.msra.mxu1 %v3014_v15  ;;  %1786 = vmatprep.subr.bf16.mxu0 %v2989_v18  ;;  %v3023_v15 = vcombine.high %v808_v14, %v820_v16  ;;  %v783_v18 = vld [vmem:[%s4365_s7 + $0x1d0] sm:$0xff] }
 0x11d   : > { %1829 = vmatprep.subr.bf16.mxu1 %v2991_v19  ;;  %v795_v19 = vld [vmem:[%s4365_s7 + $0x230] sm:$0xff] }
 0x11e   : > { %v2997_v22 = vcombine.high %v783_v18, %v795_v19 }
 0x11f   : > { %1787 = vmatpush1.bf16.msra.mxu0 %v2988_v24  ;;  %v759_v24 = vld [vmem:[%s4365_s7 + $0x110] sm:$0xff] }
 0x120   : > { %1830 = vmatpush1.bf16.msra.mxu1 %v2990_v25  ;;  %1788 = vmatprep.subr.bf16.mxu0 %v2965_v26  ;;  %v771_v25 = vld [vmem:[%s4365_s7 + $0x170] sm:$0xff]  ;;  %v760_v26 = vld [vmem:[%s4365_s7 + $0x118] sm:$0xff] }
 0x121   : > { %1831 = vmatprep.subr.bf16.mxu1 %v2967_v27  ;;  %v772_v27 = vld [vmem:[%s4365_s7 + $0x178] sm:$0xff]  ;;  %v2973_v28 = vcombine.high %v759_v24, %v771_v25 }
 0x122   : > { %v2975_v29 = vcombine.high %v760_v26, %v772_v27 }
 0x123   : > { %1789 = vmatpush1.bf16.msra.mxu0 %v2964_v32  ;;  %v736_v32 = vld [vmem:[%s4365_s7 + $0x58] sm:$0xff] }
 0x124   : > { %1832 = vmatpush1.bf16.msra.mxu1 %v2966_v33  ;;  %1790 = vmatprep.subr.bf16.mxu0 %v2941_v34  ;;  %v748_v33 = vld [vmem:[%s4365_s7 + $0xb8] sm:$0xff]  ;;  %v2972_v34 = vcombine.low %v759_v24, %v771_v25 }
 0x125   : > { %1833 = vmatprep.subr.bf16.mxu1 %v2943_v35  ;;  %v2974_v35 = vcombine.low %v760_v26, %v772_v27 }
 0x127   : > { %1791 = vmatpush1.bf16.msra.mxu0 %v2940_v36  ;;  %v2949_v36 = vcombine.high %v735_v30, %v747_v31 }
 0x128   : > { %1834 = vmatpush1.bf16.msra.mxu1 %v2942_v37  ;;  %1868 = vmatprep.subr.bf16.mxu0 %v4430_v38  ;;  %v3016_v38 = vcombine.low %v805_v40, %v817_v41  ;;  %v2948_v37 = vcombine.low %v735_v30, %v747_v31  ;;  %v2950_v40 = vcombine.low %v736_v32, %v748_v33 }
 0x129   : > { %1911 = vmatprep.subr.bf16.mxu1 %v4439_v44  ;;  %v3018_v44 = vcombine.low %v806_v42, %v818_v43 }
 0x12a   : > { %3054 = vmatmul.mubr.msk.bf16.vlgmr.msra.gmra.mxu0 %vm1438_vm2, %v4404_v6 }
 0x12b   : > { %3055 = vmatmul.mubr.msk.bf16.vlgmr.msra.gmra.mxu1 %vm1438_vm2, %v4404_v6  ;;  %1869 = vmatpush1.bf16.msra.mxu0 %v4433_v39  ;;  %v2992_v39 = vcombine.low %v781_v48, %v793_v49 }
 0x12c   : > { %1912 = vmatpush1.bf16.msra.mxu1 %v4442_v45  ;;  %1870 = vmatprep.subr.bf16.mxu0 %v3017_v46  ;;  %v2994_v45 = vcombine.low %v782_v50, %v794_v51 }
 0x12d   : > { %1913 = vmatprep.subr.bf16.mxu1 %v3019_v47  ;;  %1894 = vmatprep.mubr.bf16.mxu0 %v3721_v10 }
 0x12e   : > { %1937 = vmatprep.mubr.bf16.mxu1 %v3721_v10 }
 0x12f   : > { %1871 = vmatpush1.bf16.msra.mxu0 %v3016_v38 }
 0x130   : > { %1914 = vmatpush1.bf16.msra.mxu1 %v3018_v44  ;;  %1872 = vmatprep.subr.bf16.mxu0 %v2993_v52 }
 0x131   : > { %1915 = vmatprep.subr.bf16.mxu1 %v2995_v53 }
 0x133   : > { %1873 = vmatpush1.bf16.msra.mxu0 %v2992_v39 }
 0x134   : > { %1916 = vmatpush1.bf16.msra.mxu1 %v2994_v45  ;;  %1874 = vmatprep.subr.bf16.mxu0 %v2969_v58 }
 0x135   : > { %1917 = vmatprep.subr.bf16.mxu1 %v2971_v59 }
 0x137   : > { %1875 = vmatpush1.bf16.msra.mxu0 %v2968_v0 }
 0x138   : > { %1918 = vmatpush1.bf16.msra.mxu1 %v2970_v5  ;;  %1876 = vmatprep.subr.bf16.mxu0 %v2945_v7 }
 0x139   : > { %1919 = vmatprep.subr.bf16.mxu1 %v2947_v8 }
 0x13b   : > { %1877 = vmatpush1.bf16.msra.mxu0 %v2944_v9 }
 0x13c   : > { %1920 = vmatpush1.bf16.msra.mxu1 %v2946_v11  ;;  %1954 = vmatprep.subr.bf16.mxu0 %v4456_v2  ;;  %v3020_v2 = vcombine.low %v807_v12, %v819_v13 }
 0x13d   : > { %1997 = vmatprep.subr.bf16.mxu1 %v4459_v3  ;;  %v3022_v3 = vcombine.low %v808_v14, %v820_v16 }
 0x13e   : > { %3056 = vmatmul.mubr.msk.bf16.vlgmr.msra.gmra.mxu0 %vm1438_vm2, %v4404_v6 }
 0x13f   : > { %3057 = vmatmul.mubr.msk.bf16.vlgmr.msra.gmra.mxu1 %vm1438_vm2, %v4404_v6  ;;  %1955 = vmatpush1.bf16.msra.mxu0 %v4453_v1  ;;  %v2996_v1 = vcombine.low %v783_v18, %v795_v19 }
 0x140   : > { %1998 = vmatpush1.bf16.msra.mxu1 %v4462_v4  ;;  %1956 = vmatprep.subr.bf16.mxu0 %v3021_v17  ;;  %v2998_v4 = vcombine.low %v784_v20, %v796_v21 }
 0x141   : > { %1999 = vmatprep.subr.bf16.mxu1 %v3023_v15  ;;  %1980 = vmatprep.mubr.bf16.mxu0 %v3721_v10 }
 0x142   : > { %2023 = vmatprep.mubr.bf16.mxu1 %v3721_v10  ;;  %v2951_v10 = vcombine.high %v736_v32, %v748_v33 }
 0x143   : > { %1957 = vmatpush1.bf16.msra.mxu0 %v3020_v2 }
 0x144   : > { %2000 = vmatpush1.bf16.msra.mxu1 %v3022_v3  ;;  %1958 = vmatprep.subr.bf16.mxu0 %v2997_v22 }
 0x145   : > { %2001 = vmatprep.subr.bf16.mxu1 %v2999_v23 }
 0x147   : > { %1959 = vmatpush1.bf16.msra.mxu0 %v2996_v1 }
 0x148   : > { %2002 = vmatpush1.bf16.msra.mxu1 %v2998_v4  ;;  %1960 = vmatprep.subr.bf16.mxu0 %v2973_v28 }
 0x149   : > { %2003 = vmatprep.subr.bf16.mxu1 %v2975_v29 }
 0x14b   : > { %1961 = vmatpush1.bf16.msra.mxu0 %v2972_v34 }
 0x14c   : > { %2004 = vmatpush1.bf16.msra.mxu1 %v2974_v35  ;;  %1962 = vmatprep.subr.bf16.mxu0 %v2949_v36 }
 0x14d   : > { %2005 = vmatprep.subr.bf16.mxu1 %v2951_v10 }
 0x14f   : > { %1963 = vmatpush1.bf16.msra.mxu0 %v2948_v37 }
 0x150   : > { %2006 = vmatpush1.bf16.msra.mxu1 %v2950_v40 }
 0x151   : > { %v4576_v41 = vpop.permute.xlu0 %849 }
 0x152   : > { %3058 = vmatmul.mubr.msk.bf16.vlgmr.msra.gmra.mxu0 %vm1438_vm2, %v4404_v6 }
 0x153   : > { %3059 = vmatmul.mubr.msk.bf16.vlgmr.msra.gmra.mxu1 %vm1438_vm2, %v4404_v6 }
 0x155   : > { %v4582_v49 = vpop.permute.xlu0 %854 }
 0x1ae   : > { %v1552_v42 = vpop.f32.mrf.mxu0 }
 0x1af   : > { %v1553_v43 = vadd.f32 %v1552_v42, %v4576_v41  ;;  %v1595_v46 = vpop.f32.mrf.mxu1 }
 0x1b0   : > { %v1596_v47 = vadd.f32 %v1595_v46, %v4576_v41  ;;  %v1554_v48 = vpop.f32.mrf.mxu0 }
 0x1b1   : > { %v2034_v50 = vmax.f32 %v1553_v43, 0.0  ;;  %v1555_v51 = vadd.f32 %v1554_v48, %v4576_v41  ;;  %v1597_v38 = vpop.f32.mrf.mxu1 }
 0x1b2   : > { %v2036_v44 = vmax.f32 %v1596_v47, 0.0  ;;  %v1598_v6 = vadd.f32 %v1597_v38, %v4576_v41  ;;  %v1556_v52 = vpop.f32.mrf.mxu0 }
 0x1b3   : > { %v2035_v53 = vmax.f32 %v1555_v51, 0.0  ;;  %v1557_v54 = vadd.f32 %v1556_v52, %v4582_v49  ;;  %v1599_v55 = vpop.f32.mrf.mxu1 }
 0x1b4   : > { %v2037_v56 = vmax.f32 %v1598_v6, 0.0  ;;  %v1600_v57 = vadd.f32 %v1599_v55, %v4582_v49  ;;  %v1558_v39 = vpop.f32.mrf.mxu0 }
 0x1b5   : > { %v3118_v45 = vpack.c.bf16 %v2035_v53, %v2034_v50  ;;  %v1559_v58 = vadd.f32 %v1558_v39, %v4582_v49  ;;  %v1601_v59 = vpop.f32.mrf.mxu1  ;;  %v2058_v62 = vmax.f32 %v1557_v54, 0.0 }
 0x1b6   : > { %v3119_v60 = vpack.c.bf16 %v2037_v56, %v2036_v44  ;;  %v1602_v61 = vadd.f32 %v1601_v59, %v4582_v49  ;;  %v2060_v0 = vmax.f32 %v1600_v57, 0.0 }
 0x1b7   : > { %2226 = vst [vmem:[%s4590_s12] sm:$0xff] %v3118_v45  ;;  %v2059_v63 = vmax.f32 %v1559_v58, 0.0 }
 0x1b8   : > { %2227 = vst [vmem:[%s4590_s12 + $0x8] sm:$0xff] %v3119_v60  ;;  %v2061_v5 = vmax.f32 %v1602_v61, 0.0 }
 0x1b9   : > { %v3130_v7 = vpack.c.bf16 %v2059_v63, %v2058_v62 }
 0x1ba   : > { %v3131_v8 = vpack.c.bf16 %v2061_v5, %v2060_v0 }
 0x1bb   : > { %2238 = vst [vmem:[%s4590_s12 + $0x60] sm:$0xff] %v3130_v7 }
 0x1bc   : > { %2239 = vst [vmem:[%s4590_s12 + $0x68] sm:$0xff] %v3131_v8 }
 0x1c2   : > { %v1638_v9 = vpop.f32.mrf.mxu0 }
 0x1c3   : > { %v1639_v11 = vadd.f32 %v1638_v9, %v4576_v41  ;;  %v1681_v12 = vpop.f32.mrf.mxu1 }
 0x1c4   : > { %v1682_v13 = vadd.f32 %v1681_v12, %v4576_v41  ;;  %v1640_v14 = vpop.f32.mrf.mxu0 }
 0x1c5   : > { %v2038_v16 = vmax.f32 %v1639_v11, 0.0  ;;  %v1641_v17 = vadd.f32 %v1640_v14, %v4576_v41  ;;  %v1683_v15 = vpop.f32.mrf.mxu1 }
 0x1c6   : > { %v2040_v18 = vmax.f32 %v1682_v13, 0.0  ;;  %v1684_v19 = vadd.f32 %v1683_v15, %v4576_v41  ;;  %v1642_v20 = vpop.f32.mrf.mxu0 }
 0x1c7   : > { %v2039_v21 = vmax.f32 %v1641_v17, 0.0  ;;  %v1643_v2 = vadd.f32 %v1642_v20, %v4582_v49  ;;  %v1685_v3 = vpop.f32.mrf.mxu1 }
 0x1c8   : > { %v2041_v22 = vmax.f32 %v1684_v19, 0.0  ;;  %v1686_v23 = vadd.f32 %v1685_v3, %v4582_v49  ;;  %v1644_v24 = vpop.f32.mrf.mxu0 }
 0x1c9   : > { %v3120_v25 = vpack.c.bf16 %v2039_v21, %v2038_v16  ;;  %v1645_v26 = vadd.f32 %v1644_v24, %v4582_v49  ;;  %v1687_v27 = vpop.f32.mrf.mxu1  ;;  %v2062_v28 = vmax.f32 %v1643_v2, 0.0 }
 0x1ca   : > { %v3121_v1 = vpack.c.bf16 %v2041_v22, %v2040_v18  ;;  %v1688_v4 = vadd.f32 %v1687_v27, %v4582_v49  ;;  %v2064_v30 = vmax.f32 %v1686_v23, 0.0 }
 0x1cb   : > { %2228 = vst [vmem:[%s4590_s12 + $0x10] sm:$0xff] %v3120_v25  ;;  %v2063_v29 = vmax.f32 %v1645_v26, 0.0 }
 0x1cc   : > { %2229 = vst [vmem:[%s4590_s12 + $0x18] sm:$0xff] %v3121_v1  ;;  %v2065_v31 = vmax.f32 %v1688_v4, 0.0 }
 0x1cd   : > { %v3132_v32 = vpack.c.bf16 %v2063_v29, %v2062_v28 }
 0x1ce   : > { %v3133_v33 = vpack.c.bf16 %v2065_v31, %v2064_v30 }
 0x1cf   : > { %2240 = vst [vmem:[%s4590_s12 + $0x70] sm:$0xff] %v3132_v32 }
 0x1d0   : > { %2241 = vst [vmem:[%s4590_s12 + $0x78] sm:$0xff] %v3133_v33 }
 0x1d6   : > { %v1724_v34 = vpop.f32.mrf.mxu0 }
 0x1d7   : > { %v1725_v35 = vadd.f32 %v1724_v34, %v4576_v41  ;;  %v1767_v36 = vpop.f32.mrf.mxu1 }
 0x1d8   : > { %v1768_v10 = vadd.f32 %v1767_v36, %v4576_v41  ;;  %v1726_v37 = vpop.f32.mrf.mxu0 }
 0x1d9   : > { %v2042_v40 = vmax.f32 %v1725_v35, 0.0  ;;  %v1727_v42 = vadd.f32 %v1726_v37, %v4576_v41  ;;  %v1769_v43 = vpop.f32.mrf.mxu1 }
 0x1da   : > { %v2044_v46 = vmax.f32 %v1768_v10, 0.0  ;;  %v1770_v47 = vadd.f32 %v1769_v43, %v4576_v41  ;;  %v1728_v48 = vpop.f32.mrf.mxu0 }
 0x1db   : > { %v2043_v50 = vmax.f32 %v1727_v42, 0.0  ;;  %v1729_v51 = vadd.f32 %v1728_v48, %v4582_v49  ;;  %v1771_v38 = vpop.f32.mrf.mxu1 }
 0x1dc   : > { %v2045_v44 = vmax.f32 %v1770_v47, 0.0  ;;  %v1772_v6 = vadd.f32 %v1771_v38, %v4582_v49  ;;  %v1730_v52 = vpop.f32.mrf.mxu0 }
 0x1dd   : > { %v3122_v53 = vpack.c.bf16 %v2043_v50, %v2042_v40  ;;  %v1731_v54 = vadd.f32 %v1730_v52, %v4582_v49  ;;  %v1773_v55 = vpop.f32.mrf.mxu1  ;;  %v2066_v39 = vmax.f32 %v1729_v51, 0.0 }
 0x1de   : > { %v3123_v56 = vpack.c.bf16 %v2045_v44, %v2044_v46  ;;  %v1774_v57 = vadd.f32 %v1773_v55, %v4582_v49  ;;  %v2068_v58 = vmax.f32 %v1772_v6, 0.0 }
 0x1df   : > { %2230 = vst [vmem:[%s4590_s12 + $0x20] sm:$0xff] %v3122_v53  ;;  %v2067_v45 = vmax.f32 %v1731_v54, 0.0 }
 0x1e0   : > { %2231 = vst [vmem:[%s4590_s12 + $0x28] sm:$0xff] %v3123_v56  ;;  %v2069_v59 = vmax.f32 %v1774_v57, 0.0 }
 0x1e1   : > { %v3134_v60 = vpack.c.bf16 %v2067_v45, %v2066_v39 }
 0x1e2   : > { %v3135_v61 = vpack.c.bf16 %v2069_v59, %v2068_v58 }
 0x1e3   : > { %2242 = vst [vmem:[%s4590_s12 + $0x80] sm:$0xff] %v3134_v60 }
 0x1e4   : > { %2243 = vst [vmem:[%s4590_s12 + $0x88] sm:$0xff] %v3135_v61 }
 0x1ea   : > { %v1810_v62 = vpop.f32.mrf.mxu0 }
 0x1eb   : > { %v1811_v63 = vadd.f32 %v1810_v62, %v4576_v41  ;;  %v1853_v0 = vpop.f32.mrf.mxu1 }
 0x1ec   : > { %v1854_v5 = vadd.f32 %v1853_v0, %v4576_v41  ;;  %v1812_v7 = vpop.f32.mrf.mxu0 }
 0x1ed   : > { %v2046_v8 = vmax.f32 %v1811_v63, 0.0  ;;  %v1813_v9 = vadd.f32 %v1812_v7, %v4576_v41  ;;  %v1855_v11 = vpop.f32.mrf.mxu1 }
 0x1ee   : > { %v2048_v12 = vmax.f32 %v1854_v5, 0.0  ;;  %v1856_v13 = vadd.f32 %v1855_v11, %v4576_v41  ;;  %v1814_v14 = vpop.f32.mrf.mxu0 }
 0x1ef   : > { %v2047_v16 = vmax.f32 %v1813_v9, 0.0  ;;  %v1815_v17 = vadd.f32 %v1814_v14, %v4582_v49  ;;  %v1857_v15 = vpop.f32.mrf.mxu1 }
 0x1f0   : > { %v2049_v18 = vmax.f32 %v1856_v13, 0.0  ;;  %v1858_v19 = vadd.f32 %v1857_v15, %v4582_v49  ;;  %v1816_v20 = vpop.f32.mrf.mxu0 }
 0x1f1   : > { %v3124_v21 = vpack.c.bf16 %v2047_v16, %v2046_v8  ;;  %v1817_v2 = vadd.f32 %v1816_v20, %v4582_v49  ;;  %v1859_v3 = vpop.f32.mrf.mxu1  ;;  %v2070_v24 = vmax.f32 %v1815_v17, 0.0 }
 0x1f2   : > { %v3125_v22 = vpack.c.bf16 %v2049_v18, %v2048_v12  ;;  %v1860_v23 = vadd.f32 %v1859_v3, %v4582_v49  ;;  %v2072_v26 = vmax.f32 %v1858_v19, 0.0 }
 0x1f3   : > { %2232 = vst [vmem:[%s4590_s12 + $0x30] sm:$0xff] %v3124_v21  ;;  %v2071_v25 = vmax.f32 %v1817_v2, 0.0 }
 0x1f4   : > { %2233 = vst [vmem:[%s4590_s12 + $0x38] sm:$0xff] %v3125_v22  ;;  %v2073_v27 = vmax.f32 %v1860_v23, 0.0 }
 0x1f5   : > { %v3136_v1 = vpack.c.bf16 %v2071_v25, %v2070_v24 }
 0x1f6   : > { %v3137_v4 = vpack.c.bf16 %v2073_v27, %v2072_v26 }
 0x1f7   : > { %2244 = vst [vmem:[%s4590_s12 + $0x90] sm:$0xff] %v3136_v1 }
 0x1f8   : > { %2245 = vst [vmem:[%s4590_s12 + $0x98] sm:$0xff] %v3137_v4 }
 0x1fe   : > { %v1896_v28 = vpop.f32.mrf.mxu0 }
 0x1ff   : > { %v1897_v29 = vadd.f32 %v1896_v28, %v4576_v41  ;;  %v1939_v30 = vpop.f32.mrf.mxu1 }
 0x200   : > { %v1940_v31 = vadd.f32 %v1939_v30, %v4576_v41  ;;  %v1898_v32 = vpop.f32.mrf.mxu0 }
 0x201   : > { %v2050_v33 = vmax.f32 %v1897_v29, 0.0  ;;  %v1899_v34 = vadd.f32 %v1898_v32, %v4576_v41  ;;  %v1941_v35 = vpop.f32.mrf.mxu1 }
 0x202   : > { %v2052_v36 = vmax.f32 %v1940_v31, 0.0  ;;  %v1942_v10 = vadd.f32 %v1941_v35, %v4576_v41  ;;  %v1900_v37 = vpop.f32.mrf.mxu0 }
 0x203   : > { %v2051_v40 = vmax.f32 %v1899_v34, 0.0  ;;  %v1901_v42 = vadd.f32 %v1900_v37, %v4582_v49  ;;  %v1943_v43 = vpop.f32.mrf.mxu1 }
 0x204   : > { %v2053_v46 = vmax.f32 %v1942_v10, 0.0  ;;  %v1944_v47 = vadd.f32 %v1943_v43, %v4582_v49  ;;  %v1902_v48 = vpop.f32.mrf.mxu0 }
 0x205   : > { %v3126_v50 = vpack.c.bf16 %v2051_v40, %v2050_v33  ;;  %v1903_v51 = vadd.f32 %v1902_v48, %v4582_v49  ;;  %v1945_v38 = vpop.f32.mrf.mxu1  ;;  %v2074_v52 = vmax.f32 %v1901_v42, 0.0 }
 0x206   : > { %v3127_v44 = vpack.c.bf16 %v2053_v46, %v2052_v36  ;;  %v1946_v6 = vadd.f32 %v1945_v38, %v4582_v49  ;;  %v2076_v54 = vmax.f32 %v1944_v47, 0.0 }
 0x207   : > { %2234 = vst [vmem:[%s4590_s12 + $0x40] sm:$0xff] %v3126_v50  ;;  %v2075_v53 = vmax.f32 %v1903_v51, 0.0 }
 0x208   : > { %2235 = vst [vmem:[%s4590_s12 + $0x48] sm:$0xff] %v3127_v44  ;;  %v2077_v55 = vmax.f32 %v1946_v6, 0.0 }
 0x209   : > { %v3138_v56 = vpack.c.bf16 %v2075_v53, %v2074_v52 }
 0x20a   : > { %v3139_v57 = vpack.c.bf16 %v2077_v55, %v2076_v54 }
 0x20b   : > { %2246 = vst [vmem:[%s4590_s12 + $0xa0] sm:$0xff] %v3138_v56 }
 0x20c   : > { %2247 = vst [vmem:[%s4590_s12 + $0xa8] sm:$0xff] %v3139_v57 }
 0x212   : > { %v1982_v39 = vpop.f32.mrf.mxu0 }
 0x213   : > { %v1983_v45 = vadd.f32 %v1982_v39, %v4576_v41  ;;  %v2025_v58 = vpop.f32.mrf.mxu1 }
 0x214   : > { %v2026_v59 = vadd.f32 %v2025_v58, %v4576_v41  ;;  %v1984_v60 = vpop.f32.mrf.mxu0 }
 0x215   : > { %v1985_v61 = vadd.f32 %v1984_v60, %v4576_v41  ;;  %v2027_v62 = vpop.f32.mrf.mxu1  ;;  %v2054_v5 = vmax.f32 %v1983_v45, 0.0 }
 0x216   : > { %v2028_v63 = vadd.f32 %v2027_v62, %v4576_v41  ;;  %v1986_v0 = vpop.f32.mrf.mxu0  ;;  %v2056_v11 = vmax.f32 %v2026_v59, 0.0 }
 0x217   : > { %v2055_v7 = vmax.f32 %v1985_v61, 0.0  ;;  %v1987_v8 = vadd.f32 %v1986_v0, %v4582_v49  ;;  %v2029_v9 = vpop.f32.mrf.mxu1 }
 0x218   : > { %v2057_v12 = vmax.f32 %v2028_v63, 0.0  ;;  %v2030_v13 = vadd.f32 %v2029_v9, %v4582_v49  ;;  %v1988_v14 = vpop.f32.mrf.mxu0 }
 0x219   : > { %v3128_v16 = vpack.c.bf16 %v2055_v7, %v2054_v5  ;;  %v1989_v17 = vadd.f32 %v1988_v14, %v4582_v49  ;;  %v2031_v15 = vpop.f32.mrf.mxu1  ;;  %v2078_v19 = vmax.f32 %v1987_v8, 0.0 }
 0x21a   : > { %v3129_v18 = vpack.c.bf16 %v2057_v12, %v2056_v11  ;;  %v2032_v41 = vadd.f32 %v2031_v15, %v4582_v49  ;;  %v2080_v21 = vmax.f32 %v2030_v13, 0.0 }
 0x21b   : > { %2236 = vst [vmem:[%s4590_s12 + $0x50] sm:$0xff] %v3128_v16  ;;  %v2079_v20 = vmax.f32 %v1989_v17, 0.0 }
 0x21c   : > { %2237 = vst [vmem:[%s4590_s12 + $0x58] sm:$0xff] %v3129_v18  ;;  %v2081_v2 = vmax.f32 %v2032_v41, 0.0  ;;  %2256 = sbr.rel (!%p3775_p5) target bundleno = 693 (0x2b5), region = 102 }
 0x21d   : > { %v3140_v3 = vpack.c.bf16 %v2079_v20, %v2078_v19 }
 0x21e   : > { %v3141_v22 = vpack.c.bf16 %v2081_v2, %v2080_v21 }
 0x21f   : > { %2248 = vst [vmem:[%s4590_s12 + $0xb0] sm:$0xff] %v3140_v3 }
 0x220   : > { %2249 = vst [vmem:[%s4590_s12 + $0xb8] sm:$0xff] %v3141_v22 }
 0x221   : > { %s5091_s26 = smov (!%p2259_p1, %s2258_s26), 24 }
 0x222   : > { %s3084_s8 = sshll.u32 %s5091_s26, 7  ;;  %s4665_s9 = sshll.u32 %s5091_s26, 2 }
 0x223   : > { %p3088_p2 = scmp.eq.s32.totalorder %s3084_s8, 0 }
 0x224   : > { %p2269_p3 = scmp.lt.u32.totalorder (!%p3088_p2), %s4665_s9, 8 }
 0x225   : > { %2268 = sbr.rel (%p3088_p2) target bundleno = 693 (0x2b5), region = 106 }
 0x22a   : > { %2272 = sbr.rel (%p2269_p3) target bundleno = 683 (0x2ab), region = 110  ;;  %s4669_s20 = sand.u32 (!%p2269_p3), 7, %s4665_s9  }
 0x22b   : > { %p2291_p5 = scmp.eq.s32.totalorder (!%p2269_p3), %s4669_s20, 0  ;;  %p3089_p4 = scmp.ne.s32.totalorder (!%p2269_p3), %s4669_s20, 0 }
 0x22f   : > { %2294 = sbr.rel (%p3089_p4) target bundleno = 618 (0x26a), region = 125  ;;  %s2295_s15 = sshrl.u32 (!%p3089_p4), %s4665_s9, 3 }
 0x230   : > { %s4676_s5 = sshrl.u32 (!%p3089_p4), %s2295_s15, 5 }
 0x231   : > { %p3090_p6 = scmp.le.s32.totalorder (!%p3089_p4), %s4676_s5, 0 }
 0x234   : > { %2825 = sbr.rel (%p3090_p6) target bundleno = 602 (0x25a), region = 273  ;;  %s5067_s18 = smov (!%p3090_p6), %s4663_s27 }
 0x235   : > { %s5068_s21 = smov (!%p3090_p6), %s4590_s12  ;;  %s4685_s30 = smov (!%p3090_p6), 0  }
 0x236   : > { %s4687_s10 = smov (!%p3090_p6), 0  }
 0x239 LB: >> { %v2308_v49 = vld [vmem:[%s3660_s21] sm:$0xff]  ;;  %v2310_v23 = vld [vmem:[%s3660_s21 + $0x8] sm:$0xff]  ;;  %v2312_v24 = vld [vmem:[%s3660_s21 + $0x10] sm:$0xff]  ;;  %s2436_s28 = sadd.s32 1, %s3664_s30  ;;  %s2302_s10 = sadd.s32 1, %s3668_s10   ;;  %s3668_s10 = sphi %s4687_s10, %s2302_s10   ;;  %s3664_s30 = sphi %s4685_s30, %s5071_s30   ;;  %s3660_s21 = sphi %s5068_s21, %s5070_s21   ;;  %s3656_s18 = sphi %s5067_s18, %s5069_s18  }
 0x23a   : >> { %2309 = vst [vmem:[%s3656_s18] sm:$0xff] %v2308_v49  ;;  %2311 = vst [vmem:[%s3656_s18 + $0x8] sm:$0xff] %v2310_v23  ;;  %v2314_v25 = vld [vmem:[%s3660_s21 + $0x18] sm:$0xff]  ;;  %v2316_v26 = vld [vmem:[%s3660_s21 + $0x20] sm:$0xff]  ;;  %p2437_p7 = scmp.ge.s32.totalorder %s2436_s28, %s4676_s5  ;;  %p2301_p8 = scmp.ge.s32.totalorder %s2302_s10, %s4676_s5 }
 0x23b   : >> { %2313 = vst [vmem:[%s3656_s18 + $0x10] sm:$0xff] %v2312_v24  ;;  %v2318_v27 = vld [vmem:[%s3660_s21 + $0x28] sm:$0xff]  ;;  %2315 = vst [vmem:[%s3656_s18 + $0x18] sm:$0xff] %v2314_v25  ;;  %v2320_v1 = vld [vmem:[%s3660_s21 + $0x30] sm:$0xff] }
 0x23c   : >> { %2317 = vst [vmem:[%s3656_s18 + $0x20] sm:$0xff] %v2316_v26  ;;  %2319 = vst [vmem:[%s3656_s18 + $0x28] sm:$0xff] %v2318_v27  ;;  %v2322_v4 = vld [vmem:[%s3660_s21 + $0x38] sm:$0xff]  ;;  %v2324_v28 = vld [vmem:[%s3660_s21 + $0x40] sm:$0xff]  ;;  %s5093_s28 = smov (%p2437_p7, %s2436_s28), 0 }
 0x23d   : >> { %2321 = vst [vmem:[%s3656_s18 + $0x30] sm:$0xff] %v2320_v1  ;;  %2323 = vst [vmem:[%s3656_s18 + $0x38] sm:$0xff] %v2322_v4  ;;  %v2326_v29 = vld [vmem:[%s3660_s21 + $0x48] sm:$0xff]  ;;  %v2328_v30 = vld [vmem:[%s3660_s21 + $0x50] sm:$0xff]  ;;  %s3091_s14 = sshll.u32 %s5093_s28, 8  ;;  %s5071_s30 = smov %s5093_s28 }
 0x23e   : >> { %2325 = vst [vmem:[%s3656_s18 + $0x40] sm:$0xff] %v2324_v28  ;;  %v2330_v31 = vld [vmem:[%s3660_s21 + $0x58] sm:$0xff]  ;;  %2327 = vst [vmem:[%s3656_s18 + $0x48] sm:$0xff] %v2326_v29  ;;  %v2332_v32 = vld [vmem:[%s3660_s21 + $0x60] sm:$0xff]  ;;  %s4749_s4 = scalar_lea.vmem %s4590_s12, %s3091_s14 [#allocation3]   ;;  %s4752_s6 = scalar_lea.vmem %s4663_s27, %s3091_s14  }
 0x23f   : >> { %2329 = vst [vmem:[%s3656_s18 + $0x50] sm:$0xff] %v2328_v30  ;;  %2331 = vst [vmem:[%s3656_s18 + $0x58] sm:$0xff] %v2330_v31  ;;  %v2334_v33 = vld [vmem:[%s3660_s21 + $0x68] sm:$0xff]  ;;  %v2336_v34 = vld [vmem:[%s3660_s21 + $0x70] sm:$0xff] }
 0x240   : >> { %2333 = vst [vmem:[%s3656_s18 + $0x60] sm:$0xff] %v2332_v32  ;;  %2335 = vst [vmem:[%s3656_s18 + $0x68] sm:$0xff] %v2334_v33  ;;  %v2338_v35 = vld [vmem:[%s3660_s21 + $0x78] sm:$0xff]  ;;  %v2340_v36 = vld [vmem:[%s3660_s21 + $0x80] sm:$0xff] }
 0x241   : >> { %2337 = vst [vmem:[%s3656_s18 + $0x70] sm:$0xff] %v2336_v34  ;;  %v2342_v10 = vld [vmem:[%s3660_s21 + $0x88] sm:$0xff]  ;;  %2373 = vst [vmem:[%s3656_s18 + $0x11c] sm:$0xff] %v2332_v32  ;;  %v2344_v37 = vld [vmem:[%s3660_s21 + $0x90] sm:$0xff] }
 0x242   : >> { %2375 = vst [vmem:[%s3656_s18 + $0x124] sm:$0xff] %v2334_v33  ;;  %2377 = vst [vmem:[%s3656_s18 + $0x12c] sm:$0xff] %v2336_v34  ;;  %v2346_v40 = vld [vmem:[%s3660_s21 + $0x98] sm:$0xff]  ;;  %v2348_v42 = vld [vmem:[%s3660_s21 + $0xa0] sm:$0xff] }
 0x243   : >> { %2339 = vst [vmem:[%s3656_s18 + $0x78] sm:$0xff] %v2338_v35  ;;  %2341 = vst [vmem:[%s3656_s18 + $0x80] sm:$0xff] %v2340_v36  ;;  %v2350_v43 = vld [vmem:[%s3660_s21 + $0xa8] sm:$0xff]  ;;  %v2352_v46 = vld [vmem:[%s3660_s21 + $0xb0] sm:$0xff] }
 0x244   : >> { %2343 = vst [vmem:[%s3656_s18 + $0x88] sm:$0xff] %v2342_v10  ;;  %2379 = vst [vmem:[%s3656_s18 + $0x134] sm:$0xff] %v2338_v35  ;;  %v2354_v47 = vld [vmem:[%s3660_s21 + $0xb8] sm:$0xff]  ;;  %v2356_v48 = vld [vmem:[%s3660_s21 + $0xc0] sm:$0xff] }
 0x245   : >> { %2381 = vst [vmem:[%s3656_s18 + $0x13c] sm:$0xff] %v2340_v36  ;;  %2383 = vst [vmem:[%s3656_s18 + $0x144] sm:$0xff] %v2342_v10  ;;  %v2358_v50 = vld [vmem:[%s3660_s21 + $0xc8] sm:$0xff]  ;;  %v2360_v51 = vld [vmem:[%s3660_s21 + $0xd0] sm:$0xff] }
 0x246   : >> { %2345 = vst [vmem:[%s3656_s18 + $0x90] sm:$0xff] %v2344_v37  ;;  %2347 = vst [vmem:[%s3656_s18 + $0x98] sm:$0xff] %v2346_v40  ;;  %v2362_v38 = vld [vmem:[%s3660_s21 + $0xd8] sm:$0xff]  ;;  %v2364_v44 = vld [vmem:[%s3660_s21 + $0xe0] sm:$0xff] }
 0x247   : >> { %2349 = vst [vmem:[%s3656_s18 + $0xa0] sm:$0xff] %v2348_v42  ;;  %2385 = vst [vmem:[%s3656_s18 + $0x14c] sm:$0xff] %v2344_v37  ;;  %v2366_v6 = vld [vmem:[%s3660_s21 + $0xe8] sm:$0xff]  ;;  %v2368_v52 = vld [vmem:[%s3660_s21 + $0xf0] sm:$0xff] }
 0x248   : >> { %2387 = vst [vmem:[%s3656_s18 + $0x154] sm:$0xff] %v2346_v40  ;;  %2389 = vst [vmem:[%s3656_s18 + $0x15c] sm:$0xff] %v2348_v42  ;;  %v2370_v53 = vld [vmem:[%s3660_s21 + $0xf8] sm:$0xff]  ;;  %v2412_v54 = vld [vmem:[%s3660_s21 + $0x100] sm:$0xff] }
 0x249   : >> { %2351 = vst [vmem:[%s3656_s18 + $0xa8] sm:$0xff] %v2350_v43  ;;  %2353 = vst [vmem:[%s3656_s18 + $0xb0] sm:$0xff] %v2352_v46  ;;  %v2414_v55 = vld [vmem:[%s3660_s21 + $0x108] sm:$0xff]  ;;  %v2416_v56 = vld [vmem:[%s3660_s21 + $0x110] sm:$0xff] }
 0x24a   : >> { %2355 = vst [vmem:[%s3656_s18 + $0xb8] sm:$0xff] %v2354_v47  ;;  %2391 = vst [vmem:[%s3656_s18 + $0x164] sm:$0xff] %v2350_v43  ;;  %v2418_v57 = vld [vmem:[%s3660_s21 + $0x118] sm:$0xff]  ;;  %v2420_v39 = vld [vmem:[%s3660_s21 + $0x120] sm:$0xff] }
 0x24b   : >> { %2393 = vst [vmem:[%s3656_s18 + $0x16c] sm:$0xff] %v2352_v46  ;;  %2395 = vst [vmem:[%s3656_s18 + $0x174] sm:$0xff] %v2354_v47  ;;  %v2422_v45 = vld [vmem:[%s3660_s21 + $0x128] sm:$0xff]  ;;  %v2424_v58 = vld [vmem:[%s3660_s21 + $0x130] sm:$0xff] }
 0x24c   : >> { %2357 = vst [vmem:[%s3656_s18 + $0xc0] sm:$0xff] %v2356_v48  ;;  %2359 = vst [vmem:[%s3656_s18 + $0xc8] sm:$0xff] %v2358_v50  ;;  %v2426_v59 = vld [vmem:[%s3660_s21 + $0x138] sm:$0xff]  ;;  %v2428_v60 = vld [vmem:[%s3660_s21 + $0x140] sm:$0xff] }
 0x24d   : >> { %2361 = vst [vmem:[%s3656_s18 + $0xd0] sm:$0xff] %v2360_v51  ;;  %2397 = vst [vmem:[%s3656_s18 + $0x17c] sm:$0xff] %v2356_v48  ;;  %v2430_v61 = vld [vmem:[%s3660_s21 + $0x148] sm:$0xff]  ;;  %v2432_v62 = vld [vmem:[%s3660_s21 + $0x150] sm:$0xff] }
 0x24e   : >> { %2399 = vst [vmem:[%s3656_s18 + $0x184] sm:$0xff] %v2358_v50  ;;  %2401 = vst [vmem:[%s3656_s18 + $0x18c] sm:$0xff] %v2360_v51  ;;  %v2434_v63 = vld [vmem:[%s3660_s21 + $0x158] sm:$0xff]  ;;  %s5070_s21 = smov %s4749_s4 }
 0x24f   : >> { %2363 = vst [vmem:[%s3656_s18 + $0xd8] sm:$0xff] %v2362_v38  ;;  %2365 = vst [vmem:[%s3656_s18 + $0xe0] sm:$0xff] %v2364_v44 }
 0x250   : >> { %2367 = vst [vmem:[%s3656_s18 + $0xe8] sm:$0xff] %v2366_v6  ;;  %2403 = vst [vmem:[%s3656_s18 + $0x194] sm:$0xff] %v2362_v38 }
 0x251   : >> { %2405 = vst [vmem:[%s3656_s18 + $0x19c] sm:$0xff] %v2364_v44  ;;  %2407 = vst [vmem:[%s3656_s18 + $0x1a4] sm:$0xff] %v2366_v6 }
 0x252   : >> { %2369 = vst [vmem:[%s3656_s18 + $0xf0] sm:$0xff] %v2368_v52  ;;  %2371 = vst [vmem:[%s3656_s18 + $0xf8] sm:$0xff] %v2370_v53 }
 0x253   : >> { %2409 = vst [vmem:[%s3656_s18 + $0x1ac] sm:$0xff] %v2368_v52  ;;  %2411 = vst [vmem:[%s3656_s18 + $0x1b4] sm:$0xff] %v2370_v53 }
 0x254   : >> { %2413 = vst [vmem:[%s3656_s18 + $0x1bc] sm:$0xff] %v2412_v54  ;;  %2415 = vst [vmem:[%s3656_s18 + $0x1c4] sm:$0xff] %v2414_v55 }
 0x255   : >> { %2417 = vst [vmem:[%s3656_s18 + $0x1cc] sm:$0xff] %v2416_v56  ;;  %2419 = vst [vmem:[%s3656_s18 + $0x1d4] sm:$0xff] %v2418_v57  ;;  %2304 = sbr.rel (!%p2301_p8) target bundleno = 569 (0x239), region = 279 }
 0x256   : >> { %2421 = vst [vmem:[%s3656_s18 + $0x1dc] sm:$0xff] %v2420_v39  ;;  %2423 = vst [vmem:[%s3656_s18 + $0x1e4] sm:$0xff] %v2422_v45 }
 0x257   : >> { %2425 = vst [vmem:[%s3656_s18 + $0x1ec] sm:$0xff] %v2424_v58  ;;  %2427 = vst [vmem:[%s3656_s18 + $0x1f4] sm:$0xff] %v2426_v59 }
 0x258   : >> { %2429 = vst [vmem:[%s3656_s18 + $0x1fc] sm:$0xff] %v2428_v60  ;;  %2431 = vst [vmem:[%s3656_s18 + $0x204] sm:$0xff] %v2430_v61 }
 0x259   : >> { %2433 = vst [vmem:[%s3656_s18 + $0x20c] sm:$0xff] %v2432_v62  ;;  %2435 = vst [vmem:[%s3656_s18 + $0x214] sm:$0xff] %v2434_v63  ;;  %s5069_s18 = smov %s4752_s6 }
 0x25a PF: > { %s4832_s7 = sand.u32 31, %s2295_s15   ;;  %s3143_s11 = sshll.u32 %s4676_s5, 12 }
 0x25b   : > { %s2447_s29 = sshra.s32 %s3143_s11, 4  ;;  %p3096_p9 = scmp.le.s32.totalorder %s4832_s7, 0 }
 0x25c   : > { %s4836_s23 = scalar_lea.vmem %s4590_s12, %s2447_s29 [#allocation3]   ;;  %s2451_s24 = scalar_lea.vmem %s4663_s27, %s2447_s29  }
 0x25d   : > { %2839 = sbr.rel (%p3096_p9) target bundleno = 618 (0x26a), region = 284  ;;  %s3670_s25 = smov (!%p3096_p9), %s2451_s24  }
 0x25e   : > { %s3674_s26 = smov (!%p3096_p9), %s4836_s23   ;;  %s3678_s17 = smov (!%p3096_p9), 0  }
 0x25f   : > { %s3682_s22 = smov (!%p3096_p9), 0  }
 0x262 LB: >> { %v2463_v0 = vld [vmem:[%s3676_s26] sm:$0xff]  ;;  %s2467_s8 = sadd.s32 1, %s3680_s17  ;;  %s2457_s22 = sadd.s32 1, %s3684_s22   ;;  %s3684_s22 = sphi %s3682_s22, %s2457_s22   ;;  %s3680_s17 = sphi %s3678_s17, %s3679_s17   ;;  %s3676_s26 = sphi %s3674_s26, %s2472_s26   ;;  %s3672_s25 = sphi %s3670_s25, %s2473_s25  }
 0x263   : >> { %v2465_v5 = vld [vmem:[%s3676_s26 + $0x60] sm:$0xff]  ;;  %2464 = vst [vmem:[%s3672_s25] sm:$0xff] %v2463_v0  ;;  %p2468_p10 = scmp.ge.s32.totalorder %s2467_s8, %s4832_s7  ;;  %p2456_p11 = scmp.ge.s32.totalorder %s2457_s22, %s4832_s7 }
 0x264   : >> { %2466 = vst [vmem:[%s3672_s25 + $0x11c] sm:$0xff] %v2465_v5 }
 0x265   : >> { %s5095_s8 = smov (%p2468_p10, %s2467_s8), 0  ;;  %2459 = sbr.rel (!%p2456_p11) target bundleno = 610 (0x262), region = 290 }
 0x266   : >> { %s3097_s15 = sshll.u32 %s5095_s8, 3  ;;  %s3679_s17 = smov %s5095_s8  }
 0x267   : >> { %s2472_s26 = scalar_lea.vmem %s4836_s23, %s3097_s15 [#allocation3]   ;;  %s2473_s25 = scalar_lea.vmem %s2451_s24, %s3097_s15  }
 0x26a PF: > { %2476 = sbr.rel (%p2291_p5) target bundleno = 683 (0x2ab), region = 143  ;;  %s2478_s5 = ssub.s32 (!%p2291_p5), %s4665_s9, %s4669_s20 }
 0x26b   : > { %s2482_s18 = sshrl.u32 (!%p2291_p5), %s4665_s9, 3  ;;  %s4850_s21 = scalar_lea.vmem (!%p2291_p5), %s4590_s12, %s2478_s5 [#allocation3] }
 0x26c   : > { %s4853_s30 = scalar_lea.vmem (!%p2291_p5), %s4663_s27, %s2478_s5  ;;  %s4857_s10 = sshrl.u32 (!%p2291_p5), %s2482_s18, 5 }
 0x26d   : > { %p3099_p12 = scmp.le.s32.totalorder (!%p2291_p5), %s4857_s10, 0 }
 0x26f   : > { %2853 = sbr.rel (%p3099_p12) target bundleno = 661 (0x295), region = 295  ;;  %s5072_s28 = smov (!%p3099_p12), %s4663_s27 }
 0x270   : > { %s5073_s14 = smov (!%p3099_p12), %s4590_s12  ;;  %s4866_s4 = smov (!%p3099_p12), 0  }
 0x271   : > { %s4868_s6 = smov (!%p3099_p12), 0  }
 0x274 LB: >> { %v2495_v7 = vld [vmem:[%s3692_s14] sm:$0xff]  ;;  %v2497_v8 = vld [vmem:[%s3692_s14 + $0x8] sm:$0xff]  ;;  %v2499_v9 = vld [vmem:[%s3692_s14 + $0x10] sm:$0xff]  ;;  %s2623_s7 = sadd.s32 1, %s3696_s4  ;;  %s2489_s6 = sadd.s32 1, %s3700_s6   ;;  %s3700_s6 = sphi %s4868_s6, %s2489_s6   ;;  %s3696_s4 = sphi %s4866_s4, %s5076_s4   ;;  %s3692_s14 = sphi %s5073_s14, %s5075_s14   ;;  %s3688_s28 = sphi %s5072_s28, %s5074_s28  }
 0x275   : >> { %2496 = vst [vmem:[%s3688_s28] sm:$0xff] %v2495_v7  ;;  %2498 = vst [vmem:[%s3688_s28 + $0x8] sm:$0xff] %v2497_v8  ;;  %v2501_v11 = vld [vmem:[%s3692_s14 + $0x18] sm:$0xff]  ;;  %v2503_v12 = vld [vmem:[%s3692_s14 + $0x20] sm:$0xff]  ;;  %p2624_p13 = scmp.ge.s32.totalorder %s2623_s7, %s4857_s10  ;;  %p2488_p0 = scmp.ge.s32.totalorder %s2489_s6, %s4857_s10 }
 0x276   : >> { %2500 = vst [vmem:[%s3688_s28 + $0x10] sm:$0xff] %v2499_v9  ;;  %v2505_v13 = vld [vmem:[%s3692_s14 + $0x28] sm:$0xff]  ;;  %2502 = vst [vmem:[%s3688_s28 + $0x18] sm:$0xff] %v2501_v11  ;;  %v2507_v14 = vld [vmem:[%s3692_s14 + $0x30] sm:$0xff] }
 0x277   : >> { %2504 = vst [vmem:[%s3688_s28 + $0x20] sm:$0xff] %v2503_v12  ;;  %2506 = vst [vmem:[%s3688_s28 + $0x28] sm:$0xff] %v2505_v13  ;;  %v2509_v16 = vld [vmem:[%s3692_s14 + $0x38] sm:$0xff]  ;;  %v2511_v17 = vld [vmem:[%s3692_s14 + $0x40] sm:$0xff]  ;;  %s5097_s7 = smov (%p2624_p13, %s2623_s7), 0 }
 0x278   : >> { %2508 = vst [vmem:[%s3688_s28 + $0x30] sm:$0xff] %v2507_v14  ;;  %2510 = vst [vmem:[%s3688_s28 + $0x38] sm:$0xff] %v2509_v16  ;;  %v2513_v15 = vld [vmem:[%s3692_s14 + $0x48] sm:$0xff]  ;;  %v2515_v18 = vld [vmem:[%s3692_s14 + $0x50] sm:$0xff]  ;;  %s3100_s11 = sshll.u32 %s5097_s7, 8  ;;  %s5076_s4 = smov %s5097_s7 }
 0x279   : >> { %2512 = vst [vmem:[%s3688_s28 + $0x40] sm:$0xff] %v2511_v17  ;;  %v2517_v41 = vld [vmem:[%s3692_s14 + $0x58] sm:$0xff]  ;;  %2514 = vst [vmem:[%s3688_s28 + $0x48] sm:$0xff] %v2513_v15  ;;  %v2519_v19 = vld [vmem:[%s3692_s14 + $0x60] sm:$0xff]  ;;  %s4930_s29 = scalar_lea.vmem %s4590_s12, %s3100_s11 [#allocation3]   ;;  %s4933_s23 = scalar_lea.vmem %s4663_s27, %s3100_s11  }
 0x27a   : >> { %2516 = vst [vmem:[%s3688_s28 + $0x50] sm:$0xff] %v2515_v18  ;;  %2518 = vst [vmem:[%s3688_s28 + $0x58] sm:$0xff] %v2517_v41  ;;  %v2521_v20 = vld [vmem:[%s3692_s14 + $0x68] sm:$0xff]  ;;  %v2523_v21 = vld [vmem:[%s3692_s14 + $0x70] sm:$0xff] }
 0x27b   : >> { %2520 = vst [vmem:[%s3688_s28 + $0x60] sm:$0xff] %v2519_v19  ;;  %2522 = vst [vmem:[%s3688_s28 + $0x68] sm:$0xff] %v2521_v20  ;;  %v2525_v2 = vld [vmem:[%s3692_s14 + $0x78] sm:$0xff]  ;;  %v2527_v3 = vld [vmem:[%s3692_s14 + $0x80] sm:$0xff] }
 0x27c   : >> { %2524 = vst [vmem:[%s3688_s28 + $0x70] sm:$0xff] %v2523_v21  ;;  %v2529_v22 = vld [vmem:[%s3692_s14 + $0x88] sm:$0xff]  ;;  %2560 = vst [vmem:[%s3688_s28 + $0x11c] sm:$0xff] %v2519_v19  ;;  %v2531_v49 = vld [vmem:[%s3692_s14 + $0x90] sm:$0xff] }
 0x27d   : >> { %2562 = vst [vmem:[%s3688_s28 + $0x124] sm:$0xff] %v2521_v20  ;;  %2564 = vst [vmem:[%s3688_s28 + $0x12c] sm:$0xff] %v2523_v21  ;;  %v2533_v23 = vld [vmem:[%s3692_s14 + $0x98] sm:$0xff]  ;;  %v2535_v24 = vld [vmem:[%s3692_s14 + $0xa0] sm:$0xff] }
 0x27e   : >> { %2526 = vst [vmem:[%s3688_s28 + $0x78] sm:$0xff] %v2525_v2  ;;  %2528 = vst [vmem:[%s3688_s28 + $0x80] sm:$0xff] %v2527_v3  ;;  %v2537_v25 = vld [vmem:[%s3692_s14 + $0xa8] sm:$0xff]  ;;  %v2539_v26 = vld [vmem:[%s3692_s14 + $0xb0] sm:$0xff] }
 0x27f   : >> { %2530 = vst [vmem:[%s3688_s28 + $0x88] sm:$0xff] %v2529_v22  ;;  %2566 = vst [vmem:[%s3688_s28 + $0x134] sm:$0xff] %v2525_v2  ;;  %v2541_v27 = vld [vmem:[%s3692_s14 + $0xb8] sm:$0xff]  ;;  %v2543_v1 = vld [vmem:[%s3692_s14 + $0xc0] sm:$0xff] }
 0x280   : >> { %2568 = vst [vmem:[%s3688_s28 + $0x13c] sm:$0xff] %v2527_v3  ;;  %2570 = vst [vmem:[%s3688_s28 + $0x144] sm:$0xff] %v2529_v22  ;;  %v2545_v4 = vld [vmem:[%s3692_s14 + $0xc8] sm:$0xff]  ;;  %v2547_v28 = vld [vmem:[%s3692_s14 + $0xd0] sm:$0xff] }
 0x281   : >> { %2532 = vst [vmem:[%s3688_s28 + $0x90] sm:$0xff] %v2531_v49  ;;  %2534 = vst [vmem:[%s3688_s28 + $0x98] sm:$0xff] %v2533_v23  ;;  %v2549_v29 = vld [vmem:[%s3692_s14 + $0xd8] sm:$0xff]  ;;  %v2551_v30 = vld [vmem:[%s3692_s14 + $0xe0] sm:$0xff] }
 0x282   : >> { %2536 = vst [vmem:[%s3688_s28 + $0xa0] sm:$0xff] %v2535_v24  ;;  %2572 = vst [vmem:[%s3688_s28 + $0x14c] sm:$0xff] %v2531_v49  ;;  %v2553_v31 = vld [vmem:[%s3692_s14 + $0xe8] sm:$0xff]  ;;  %v2555_v32 = vld [vmem:[%s3692_s14 + $0xf0] sm:$0xff] }
 0x283   : >> { %2574 = vst [vmem:[%s3688_s28 + $0x154] sm:$0xff] %v2533_v23  ;;  %2576 = vst [vmem:[%s3688_s28 + $0x15c] sm:$0xff] %v2535_v24  ;;  %v2557_v33 = vld [vmem:[%s3692_s14 + $0xf8] sm:$0xff]  ;;  %v2599_v34 = vld [vmem:[%s3692_s14 + $0x100] sm:$0xff] }
 0x284   : >> { %2538 = vst [vmem:[%s3688_s28 + $0xa8] sm:$0xff] %v2537_v25  ;;  %2540 = vst [vmem:[%s3688_s28 + $0xb0] sm:$0xff] %v2539_v26  ;;  %v2601_v35 = vld [vmem:[%s3692_s14 + $0x108] sm:$0xff]  ;;  %v2603_v36 = vld [vmem:[%s3692_s14 + $0x110] sm:$0xff] }
 0x285   : >> { %2542 = vst [vmem:[%s3688_s28 + $0xb8] sm:$0xff] %v2541_v27  ;;  %2578 = vst [vmem:[%s3688_s28 + $0x164] sm:$0xff] %v2537_v25  ;;  %v2605_v10 = vld [vmem:[%s3692_s14 + $0x118] sm:$0xff]  ;;  %v2607_v37 = vld [vmem:[%s3692_s14 + $0x120] sm:$0xff] }
 0x286   : >> { %2580 = vst [vmem:[%s3688_s28 + $0x16c] sm:$0xff] %v2539_v26  ;;  %2582 = vst [vmem:[%s3688_s28 + $0x174] sm:$0xff] %v2541_v27  ;;  %v2609_v40 = vld [vmem:[%s3692_s14 + $0x128] sm:$0xff]  ;;  %v2611_v42 = vld [vmem:[%s3692_s14 + $0x130] sm:$0xff] }
 0x287   : >> { %2544 = vst [vmem:[%s3688_s28 + $0xc0] sm:$0xff] %v2543_v1  ;;  %2546 = vst [vmem:[%s3688_s28 + $0xc8] sm:$0xff] %v2545_v4  ;;  %v2613_v43 = vld [vmem:[%s3692_s14 + $0x138] sm:$0xff]  ;;  %v2615_v46 = vld [vmem:[%s3692_s14 + $0x140] sm:$0xff] }
 0x288   : >> { %2548 = vst [vmem:[%s3688_s28 + $0xd0] sm:$0xff] %v2547_v28  ;;  %2584 = vst [vmem:[%s3688_s28 + $0x17c] sm:$0xff] %v2543_v1  ;;  %v2617_v47 = vld [vmem:[%s3692_s14 + $0x148] sm:$0xff]  ;;  %v2619_v48 = vld [vmem:[%s3692_s14 + $0x150] sm:$0xff] }
 0x289   : >> { %2586 = vst [vmem:[%s3688_s28 + $0x184] sm:$0xff] %v2545_v4  ;;  %2588 = vst [vmem:[%s3688_s28 + $0x18c] sm:$0xff] %v2547_v28  ;;  %v2621_v50 = vld [vmem:[%s3692_s14 + $0x158] sm:$0xff]  ;;  %s5075_s14 = smov %s4930_s29 }
 0x28a   : >> { %2550 = vst [vmem:[%s3688_s28 + $0xd8] sm:$0xff] %v2549_v29  ;;  %2552 = vst [vmem:[%s3688_s28 + $0xe0] sm:$0xff] %v2551_v30 }
 0x28b   : >> { %2554 = vst [vmem:[%s3688_s28 + $0xe8] sm:$0xff] %v2553_v31  ;;  %2590 = vst [vmem:[%s3688_s28 + $0x194] sm:$0xff] %v2549_v29 }
 0x28c   : >> { %2592 = vst [vmem:[%s3688_s28 + $0x19c] sm:$0xff] %v2551_v30  ;;  %2594 = vst [vmem:[%s3688_s28 + $0x1a4] sm:$0xff] %v2553_v31 }
 0x28d   : >> { %2556 = vst [vmem:[%s3688_s28 + $0xf0] sm:$0xff] %v2555_v32  ;;  %2558 = vst [vmem:[%s3688_s28 + $0xf8] sm:$0xff] %v2557_v33 }
 0x28e   : >> { %2596 = vst [vmem:[%s3688_s28 + $0x1ac] sm:$0xff] %v2555_v32  ;;  %2598 = vst [vmem:[%s3688_s28 + $0x1b4] sm:$0xff] %v2557_v33 }
 0x28f   : >> { %2600 = vst [vmem:[%s3688_s28 + $0x1bc] sm:$0xff] %v2599_v34  ;;  %2602 = vst [vmem:[%s3688_s28 + $0x1c4] sm:$0xff] %v2601_v35 }
 0x290   : >> { %2604 = vst [vmem:[%s3688_s28 + $0x1cc] sm:$0xff] %v2603_v36  ;;  %2606 = vst [vmem:[%s3688_s28 + $0x1d4] sm:$0xff] %v2605_v10  ;;  %2491 = sbr.rel (!%p2488_p0) target bundleno = 628 (0x274), region = 301 }
 0x291   : >> { %2608 = vst [vmem:[%s3688_s28 + $0x1dc] sm:$0xff] %v2607_v37  ;;  %2610 = vst [vmem:[%s3688_s28 + $0x1e4] sm:$0xff] %v2609_v40 }
 0x292   : >> { %2612 = vst [vmem:[%s3688_s28 + $0x1ec] sm:$0xff] %v2611_v42  ;;  %2614 = vst [vmem:[%s3688_s28 + $0x1f4] sm:$0xff] %v2613_v43 }
 0x293   : >> { %2616 = vst [vmem:[%s3688_s28 + $0x1fc] sm:$0xff] %v2615_v46  ;;  %2618 = vst [vmem:[%s3688_s28 + $0x204] sm:$0xff] %v2617_v47 }
 0x294   : >> { %2620 = vst [vmem:[%s3688_s28 + $0x20c] sm:$0xff] %v2619_v48  ;;  %2622 = vst [vmem:[%s3688_s28 + $0x214] sm:$0xff] %v2621_v50  ;;  %s5074_s28 = smov %s4933_s23 }
 0x295 PF: > { %s5013_s24 = sand.u32 31, %s2482_s18   ;;  %s3145_s25 = sshll.u32 %s4857_s10, 12 }
 0x296   : > { %s2634_s26 = sshra.s32 %s3145_s25, 4  ;;  %p3105_p1 = scmp.le.s32.totalorder %s5013_s24, 0 }
 0x297   : > { %s5017_s17 = scalar_lea.vmem %s4590_s12, %s2634_s26 [#allocation3]   ;;  %s2638_s22 = scalar_lea.vmem %s4663_s27, %s2634_s26  }
 0x298   : > { %2867 = sbr.rel (%p3105_p1) target bundleno = 677 (0x2a5), region = 306  ;;  %s3702_s8 = smov (!%p3105_p1), %s2638_s22  }
 0x299   : > { %s3706_s15 = smov (!%p3105_p1), %s5017_s17   ;;  %s3710_s5 = smov (!%p3105_p1), 0  }
 0x29a   : > { %s3714_s28 = smov (!%p3105_p1), 0  }
 0x29d LB: >> { %v2650_v51 = vld [vmem:[%s3708_s15] sm:$0xff]  ;;  %s2654_s18 = sadd.s32 1, %s3712_s5  ;;  %s2644_s28 = sadd.s32 1, %s3716_s28   ;;  %s3716_s28 = sphi %s3714_s28, %s2644_s28   ;;  %s3712_s5 = sphi %s3710_s5, %s3711_s5   ;;  %s3708_s15 = sphi %s3706_s15, %s2659_s15   ;;  %s3704_s8 = sphi %s3702_s8, %s2660_s8  }
 0x29e   : >> { %v2652_v38 = vld [vmem:[%s3708_s15 + $0x60] sm:$0xff]  ;;  %2651 = vst [vmem:[%s3704_s8] sm:$0xff] %v2650_v51  ;;  %p2655_p2 = scmp.ge.s32.totalorder %s2654_s18, %s5013_s24  ;;  %p2643_p3 = scmp.ge.s32.totalorder %s2644_s28, %s5013_s24 }
 0x29f   : >> { %2653 = vst [vmem:[%s3704_s8 + $0x11c] sm:$0xff] %v2652_v38 }
 0x2a0   : >> { %s5099_s18 = smov (%p2655_p2, %s2654_s18), 0  ;;  %2646 = sbr.rel (!%p2643_p3) target bundleno = 669 (0x29d), region = 312 }
 0x2a1   : >> { %s3106_s10 = sshll.u32 %s5099_s18, 3  ;;  %s3711_s5 = smov %s5099_s18  }
 0x2a2   : >> { %s2659_s15 = scalar_lea.vmem %s5017_s17, %s3106_s10 [#allocation3]   ;;  %s2660_s8 = scalar_lea.vmem %s2638_s22, %s3106_s10  }
 0x2a5 PF: > { %s3722_s14 = smov 1  }
 0x2a6   : > { %s2661_s4 = sshll.u32 %s3722_s14, %s4669_s20 }
 0x2a7   : > { %s3108_s6 = sadd.s32 4294967295, %s2661_s4 }
 0x2a8   : > { %v2671_v44 = vld [vmem:[%s4850_s21] sm:%s3108_s6] }
 0x2a9   : > { %v2673_v6 = vld [vmem:[%s4850_s21 + $0x60] sm:%s3108_s6]  ;;  %2672 = vst [vmem:[%s4853_s30] sm:%s3108_s6] %v2671_v44 }
 0x2aa   : > { %2674 = vst [vmem:[%s4853_s30 + $0x11c] sm:%s3108_s6] %v2673_v6 }
 0x2ab PF: > { %p3109_p5 = scmp.ge.u32.totalorder %s4665_s9, 8 }
 0x2ac   : > { %s3723_s7 = smov (!%p3109_p5), 1  }
 0x2ad   : > { %2275 = sbr.rel (%p3109_p5) target bundleno = 693 (0x2b5), region = 114  ;;  %s2276_s11 = sshll.u32 (!%p3109_p5), %s3723_s7, %s4665_s9 }
 0x2ae   : > { %s3110_s29 = sadd.s32 (!%p3109_p5), 4294967295, %s2276_s11 }
 0x2b2   : > { %v2286_v52 = vld [vmem:[%s4590_s12] sm:%s3110_s29] }
 0x2b3   : > { %v2288_v53 = vld [vmem:[%s4590_s12 + $0x60] sm:%s3110_s29]  ;;  %2287 = vst [vmem:[%s4663_s27] sm:%s3110_s29] %v2286_v52 }
 0x2b4   : > { %2289 = vst [vmem:[%s4663_s27 + $0x11c] sm:%s3110_s29] %v2288_v53 }
 0x2b5 PF: > { %p10_p4 = scmp.ge.s32.totalorder %s3763_s16, 5   ;;  %s5077_s12 = smov %s3584_s13 }
 0x2b6   : > { %s5078_s13 = smov %s3773_s19  ;;  %s5079_s14 = smov %s3763_s16 }
 0x2b7   :  { %12 = sbr.rel (!%p10_p4) target bundleno = 2 (0x2), region = 323 }

// kernel: policy_net_forward.4
= control target key start
LH: loop header
LB: loop body
LE: loop exit
PB: predicated region body
PF: predicated region fallthrough
CT: control target
= control target key end

     0   :  { %v4154_v26 = vmov 0   ;;  %vm2485_vm0 = vcmask 130048   ;;  %vm3603_vm1 = vcmask 1043456   ;;  %vm3604_vm2 = vcmask 637956   ;;  %s5775_s1 = inlined_call_operand.vmem [shape: bf16[400,1998], index: 1, kind: input, shape index: {}]   ;;  %s5776_s0 = inlined_call_operand.vmem [shape: bf16[32,400], index: 0, kind: input, shape index: {}]   ;;  %s5777_s2 = inlined_call_operand.vmem [shape: f32[32,1], index: 2, kind: input, shape index: {}]   ;;  %s5778_s3 = inlined_call_operand.vmem [shape: bf16[32,1998], index: 3, kind: output, shape index: {}]  }
   0x1   :  { %v135_v0 = vld [vmem:[%s5775_s1 + $0x380] sm:$0xff]  ;;  %4124 = vset.pattern.permute.xlu0 %v4154_v26  ;;  %4125 = vset.pattern.permute.xlu1 %v4154_v26  ;;  %v4238_v36 = vld [vmem:[%s5776_s0 + $0xc] ss:$16 sps:$4 sm:$0xff]   ;;  %vm5747_vm3 = vmor %vm3604_vm2, %vm3603_vm1 }
   0x2   :  { %v143_v1 = vld [vmem:[%s5775_s1 + $0x3c0] sm:$0xff]  ;;  %4043 = vmatprep.mubr.msk.bf16.mxu1 %vm2485_vm0, %v4238_v36 }
   0x3   :  { %v391_v2 = vld [vmem:[%s5775_s1 + $0xb80] sm:$0xff]  ;;  %v3756_v3 = vcombine.high %v135_v0, %v143_v1  ;;  %v3755_v5 = vcombine.low %v135_v0, %v143_v1 }
   0x4   :  { %v399_v4 = vld [vmem:[%s5775_s1 + $0xbc0] sm:$0xff] }
   0x5   :  { %v119_v6 = vld [vmem:[%s5775_s1 + $0x300] sm:$0xff]  ;;  %v4012_v8 = vcombine.high %v391_v2, %v399_v4  ;;  %v4011_v9 = vcombine.low %v391_v2, %v399_v4  ;;  %2492 = vmatprep.subr.bf16.mxu0 %v3756_v3 }
   0x6   :  { %v127_v7 = vld [vmem:[%s5775_s1 + $0x340] sm:$0xff]  ;;  %2493 = vmatpush1.bf16.msra.mxu0 %v3755_v5 }
   0x7   :  { %v3740_v10 = vcombine.high %v119_v6, %v127_v7  ;;  %v375_v11 = vld [vmem:[%s5775_s1 + $0xb00] sm:$0xff]  ;;  %2545 = vmatprep.subr.bf16.mxu1 %v4012_v8  ;;  %v3739_v18 = vcombine.low %v119_v6, %v127_v7 }
   0x8   :  { %v383_v12 = vld [vmem:[%s5775_s1 + $0xb40] sm:$0xff]  ;;  %2546 = vmatpush1.bf16.msra.mxu1 %v4011_v9 }
   0x9   :  { %v103_v13 = vld [vmem:[%s5775_s1 + $0x280] sm:$0xff]  ;;  %v3996_v14 = vcombine.high %v375_v11, %v383_v12  ;;  %2494 = vmatprep.subr.bf16.mxu0 %v3740_v10  ;;  %v3995_v19 = vcombine.low %v375_v11, %v383_v12  ;;  %v136_v11 = vld [vmem:[%s5775_s1 + $0x388] sm:$0xff] }
   0xa   :  { %v111_v15 = vld [vmem:[%s5775_s1 + $0x2c0] sm:$0xff]  ;;  %2495 = vmatpush1.bf16.msra.mxu0 %v3739_v18  ;;  %v144_v12 = vld [vmem:[%s5775_s1 + $0x3c8] sm:$0xff] }
   0xb   :  { %v359_v16 = vld [vmem:[%s5775_s1 + $0xa80] sm:$0xff]  ;;  %v3724_v20 = vcombine.high %v103_v13, %v111_v15  ;;  %2547 = vmatprep.subr.bf16.mxu1 %v3996_v14  ;;  %v3723_v27 = vcombine.low %v103_v13, %v111_v15 }
   0xc   :  { %v367_v17 = vld [vmem:[%s5775_s1 + $0xac0] sm:$0xff]  ;;  %2548 = vmatpush1.bf16.msra.mxu1 %v3995_v19  ;;  %v120_v19 = vld [vmem:[%s5775_s1 + $0x308] sm:$0xff] }
   0xd   :  { %v3980_v21 = vcombine.high %v359_v16, %v367_v17  ;;  %v87_v22 = vld [vmem:[%s5775_s1 + $0x200] sm:$0xff]  ;;  %2496 = vmatprep.subr.bf16.mxu0 %v3724_v20  ;;  %v3979_v28 = vcombine.low %v359_v16, %v367_v17  ;;  %v3758_v16 = vcombine.high %v136_v11, %v144_v12  ;;  %v128_v20 = vld [vmem:[%s5775_s1 + $0x348] sm:$0xff] }
   0xe   :  { %v95_v23 = vld [vmem:[%s5775_s1 + $0x240] sm:$0xff]  ;;  %2497 = vmatpush1.bf16.msra.mxu0 %v3723_v27 }
   0xf   :  { %v343_v24 = vld [vmem:[%s5775_s1 + $0xa00] sm:$0xff]  ;;  %v3708_v29 = vcombine.high %v87_v22, %v95_v23  ;;  %2549 = vmatprep.subr.bf16.mxu1 %v3980_v21  ;;  %v3707_v35 = vcombine.low %v87_v22, %v95_v23  ;;  %v4323_v21 = vld [vmem:[%s5776_s0 + $0x8] ss:$16 sps:$4 sm:$0xff]   ;;  %v3757_v23 = vcombine.low %v136_v11, %v144_v12 }
  0x10   :  { %v351_v25 = vld [vmem:[%s5775_s1 + $0xa40] sm:$0xff]  ;;  %2550 = vmatpush1.bf16.msra.mxu1 %v3979_v28  ;;  %v4334_v28 = vld [vmem:[%s5776_s0 + $0x2c] ss:$16 sps:$4 sm:$0xff]  }
  0x11   :  { %v3964_v30 = vcombine.high %v343_v24, %v351_v25  ;;  %v71_v31 = vld [vmem:[%s5775_s1 + $0x180] sm:$0xff]  ;;  %2498 = vmatprep.subr.bf16.mxu0 %v3708_v29  ;;  %v3963_v37 = vcombine.low %v343_v24, %v351_v25  ;;  %v3742_v25 = vcombine.high %v120_v19, %v128_v20  ;;  %v104_v29 = vld [vmem:[%s5775_s1 + $0x288] sm:$0xff] }
  0x12   :  { %v79_v32 = vld [vmem:[%s5775_s1 + $0x1c0] sm:$0xff]  ;;  %2499 = vmatpush1.bf16.msra.mxu0 %v3707_v35  ;;  %v24_v11 = vld [vmem:[%s5775_s1 + $0x8] sm:$0xff] }
  0x13   :  { %v327_v33 = vld [vmem:[%s5775_s1 + $0x980] sm:$0xff]  ;;  %v3692_v38 = vcombine.high %v71_v31, %v79_v32  ;;  %2551 = vmatprep.subr.bf16.mxu1 %v3964_v30  ;;  %v3691_v44 = vcombine.low %v71_v31, %v79_v32  ;;  %v112_v30 = vld [vmem:[%s5775_s1 + $0x2c8] sm:$0xff]  ;;  %v3741_v32 = vcombine.low %v120_v19, %v128_v20 }
  0x14   :  { %v335_v34 = vld [vmem:[%s5775_s1 + $0x9c0] sm:$0xff]  ;;  %2552 = vmatpush1.bf16.msra.mxu1 %v3963_v37  ;;  %v32_v12 = vld [vmem:[%s5775_s1 + $0x48] sm:$0xff] }
  0x15   :  { %v3948_v39 = vcombine.high %v327_v33, %v335_v34  ;;  %v55_v40 = vld [vmem:[%s5775_s1 + $0x100] sm:$0xff]  ;;  %2500 = vmatprep.subr.bf16.mxu0 %v3692_v38  ;;  %v3947_v45 = vcombine.low %v327_v33, %v335_v34  ;;  %v3726_v34 = vcombine.high %v104_v29, %v112_v30  ;;  %v88_v38 = vld [vmem:[%s5775_s1 + $0x208] sm:$0xff] }
  0x16   :  { %v63_v41 = vld [vmem:[%s5775_s1 + $0x140] sm:$0xff]  ;;  %2501 = vmatpush1.bf16.msra.mxu0 %v3691_v44  ;;  %v384_v19 = vld [vmem:[%s5775_s1 + $0xb48] sm:$0xff] }
  0x17   :  { %v311_v42 = vld [vmem:[%s5775_s1 + $0x900] sm:$0xff]  ;;  %v3676_v46 = vcombine.high %v55_v40, %v63_v41  ;;  %2553 = vmatprep.subr.bf16.mxu1 %v3948_v39  ;;  %v3675_v52 = vcombine.low %v55_v40, %v63_v41  ;;  %v96_v39 = vld [vmem:[%s5775_s1 + $0x248] sm:$0xff] }
  0x18   :  { %v319_v43 = vld [vmem:[%s5775_s1 + $0x940] sm:$0xff]  ;;  %2554 = vmatpush1.bf16.msra.mxu1 %v3947_v45  ;;  %v4360_v41 = vld [vmem:[%s5776_s0 + $0x28] ss:$16 sps:$4 sm:$0xff]   ;;  %v3710_v44 = vcombine.high %v88_v38, %v96_v39 }
  0x19   :  { %v3932_v47 = vcombine.high %v311_v42, %v319_v43  ;;  %v39_v48 = vld [vmem:[%s5775_s1 + $0x80] sm:$0xff]  ;;  %2502 = vmatprep.subr.bf16.mxu0 %v3676_v46  ;;  %v3931_v53 = vcombine.low %v311_v42, %v319_v43  ;;  %v3725_v42 = vcombine.low %v104_v29, %v112_v30  ;;  %v360_v30 = vld [vmem:[%s5775_s1 + $0xa88] sm:$0xff] }
  0x1a   :  { %v47_v49 = vld [vmem:[%s5775_s1 + $0xc0] sm:$0xff]  ;;  %2503 = vmatpush1.bf16.msra.mxu0 %v3675_v52 }
  0x1b   :  { %v295_v50 = vld [vmem:[%s5775_s1 + $0x880] sm:$0xff]  ;;  %v3660_v54 = vcombine.high %v39_v48, %v47_v49  ;;  %2555 = vmatprep.subr.bf16.mxu1 %v3932_v47  ;;  %v3659_v61 = vcombine.low %v39_v48, %v47_v49  ;;  %v72_v47 = vld [vmem:[%s5775_s1 + $0x188] sm:$0xff] }
  0x1c   :  { %v303_v51 = vld [vmem:[%s5775_s1 + $0x8c0] sm:$0xff]  ;;  %2556 = vmatpush1.bf16.msra.mxu1 %v3931_v53  ;;  %v80_v48 = vld [vmem:[%s5775_s1 + $0x1c8] sm:$0xff] }
  0x1d   :  { %v23_v55 = vld [vmem:[%s5775_s1] sm:$0xff]  ;;  %v3916_v56 = vcombine.high %v295_v50, %v303_v51  ;;  %2504 = vmatprep.subr.bf16.mxu0 %v3660_v54  ;;  %v3915_v62 = vcombine.low %v295_v50, %v303_v51  ;;  %v3709_v50 = vcombine.low %v88_v38, %v96_v39  ;;  %v3694_v52 = vcombine.high %v72_v47, %v80_v48  ;;  %v344_v39 = vld [vmem:[%s5775_s1 + $0xa08] sm:$0xff] }
  0x1e   :  { %v31_v57 = vld [vmem:[%s5775_s1 + $0x40] sm:$0xff]  ;;  %2505 = vmatpush1.bf16.msra.mxu0 %v3659_v61  ;;  %v3693_v61 = vcombine.low %v72_v47, %v80_v48 }
  0x1f   :  { %v279_v58 = vld [vmem:[%s5775_s1 + $0x800] sm:$0xff]  ;;  %v3644_v63 = vcombine.high %v23_v55, %v31_v57  ;;  %2557 = vmatprep.subr.bf16.mxu1 %v3916_v56  ;;  %v3643_v5 = vcombine.low %v23_v55, %v31_v57  ;;  %v56_v56 = vld [vmem:[%s5775_s1 + $0x108] sm:$0xff] }
  0x20   :  { %v287_v59 = vld [vmem:[%s5775_s1 + $0x840] sm:$0xff]  ;;  %2558 = vmatpush1.bf16.msra.mxu1 %v3915_v62  ;;  %v64_v57 = vld [vmem:[%s5775_s1 + $0x148] sm:$0xff] }
  0x21   :  { %v4281_v60 = vld [vmem:[%s5776_s0 + $0x4] ss:$16 sps:$4 sm:$0xff]   ;;  %v3900_v0 = vcombine.high %v279_v58, %v287_v59  ;;  %2506 = vmatprep.subr.bf16.mxu0 %v3644_v63  ;;  %v3899_v6 = vcombine.low %v279_v58, %v287_v59  ;;  %v424_v59 = vld [vmem:[%s5777_s2 + $0x8] sm:$0xff]  ;;  %v3678_v63 = vcombine.high %v56_v56, %v64_v57  ;;  %v4433_v20 = vld [vmem:[%s5776_s0] ss:$16 sps:$4 sm:$0xff]  }
  0x22   :  { %v263_v1 = vld [vmem:[%s5775_s1 + $0x780] sm:$0xff]  ;;  %2524 = vmatprep.mubr.bf16.mxu0 %v4281_v60  ;;  %2507 = vmatpush1.bf16.msra.mxu0 %v3643_v5  ;;  %v3677_v5 = vcombine.low %v56_v56, %v64_v57  ;;  %v312_v57 = vld [vmem:[%s5775_s1 + $0x908] sm:$0xff] }
  0x23   :  { %v271_v2 = vld [vmem:[%s5775_s1 + $0x7c0] sm:$0xff]  ;;  %2559 = vmatprep.subr.bf16.mxu1 %v3900_v0 }
  0x24   :  { %v407_v3 = vld [vmem:[%s5775_s1 + $0xc00] sm:$0xff]  ;;  %v3884_v7 = vcombine.high %v263_v1, %v271_v2  ;;  %v3883_v13 = vcombine.low %v263_v1, %v271_v2  ;;  %2560 = vmatpush1.bf16.msra.mxu1 %v3899_v6  ;;  %v40_v2 = vld [vmem:[%s5775_s1 + $0x88] sm:$0xff] }
  0x25   :  { %v415_v4 = vld [vmem:[%s5775_s1 + $0xc40] sm:$0xff] }
  0x26   :  { %v4028_v8 = vcombine.high %v407_v3, %v415_v4  ;;  %v247_v9 = vld [vmem:[%s5775_s1 + $0x700] sm:$0xff]  ;;  %2508 = vmatprep.subr.bf16.mxu0 %v3884_v7  ;;  %v4027_v14 = vcombine.low %v407_v3, %v415_v4  ;;  %v48_v3 = vld [vmem:[%s5775_s1 + $0xc8] sm:$0xff] }
  0x27   :  { %v255_v10 = vld [vmem:[%s5775_s1 + $0x740] sm:$0xff]  ;;  %2509 = vmatpush2.bf16.msra.mxu0 %v3883_v13  ;;  %v3662_v7 = vcombine.high %v40_v2, %v48_v3 }
  0x28   :  { %v3868_v15 = vcombine.high %v247_v9, %v255_v10  ;;  %2575 = vmatprep.subr.bf16.mxu1 %v4028_v8  ;;  %v231_v17 = vld [vmem:[%s5775_s1 + $0x680] sm:$0xff]  ;;  %v3867_v22 = vcombine.low %v247_v9, %v255_v10  ;;  %v392_v8 = vld [vmem:[%s5775_s1 + $0xb88] sm:$0xff]  ;;  %v425_v10 = vld [vmem:[%s5777_s2 + $0x10] sm:$0xff] }
  0x29   :  { %v239_v18 = vld [vmem:[%s5775_s1 + $0x6c0] sm:$0xff]  ;;  %2576 = vmatpush2.bf16.msra.mxu1 %v4027_v14  ;;  %v400_v9 = vld [vmem:[%s5775_s1 + $0xbc8] sm:$0xff]  ;;  %439 = vperm.xlu1 %4125, %v425_v10   ;;  %v426_v14 = vld [vmem:[%s5777_s2 + $0x18] sm:$0xff] }
  0x2a   :  { %2510 = vmatprep.subr.bf16.mxu0 %v3868_v15  ;;  %v3852_v24 = vcombine.high %v231_v17, %v239_v18  ;;  %2598 = vmatprep.subr.bf16.mxu1 %v3758_v16  ;;  %v215_v26 = vld [vmem:[%s5775_s1 + $0x600] sm:$0xff]  ;;  %v3851_v31 = vcombine.low %v231_v17, %v239_v18  ;;  %v3661_v15 = vcombine.low %v40_v2, %v48_v3  ;;  %v376_v18 = vld [vmem:[%s5775_s1 + $0xb08] sm:$0xff] }
  0x2b   :  { %v223_v27 = vld [vmem:[%s5775_s1 + $0x640] sm:$0xff]  ;;  %2511 = vmatpush2.bf16.msra.mxu0 %v3867_v22  ;;  %v4014_v16 = vcombine.high %v392_v8, %v400_v9  ;;  %v3646_v17 = vcombine.high %v24_v11, %v32_v12  ;;  %v264_v22 = vld [vmem:[%s5775_s1 + $0x788] sm:$0xff] }
  0x2c   :  { %2578 = vmatmul.mubr.bf16.vlgmr.msra.gmra.mxu1 %v4323_v21  ;;  %2512 = vmatprep.subr.bf16.mxu0 %v3852_v24  ;;  %v3836_v33 = vcombine.high %v215_v26, %v223_v27  ;;  %v199_v35 = vld [vmem:[%s5775_s1 + $0x580] sm:$0xff]  ;;  %v3835_v40 = vcombine.low %v215_v26, %v223_v27  ;;  %v4013_v24 = vcombine.low %v392_v8, %v400_v9  ;;  %v296_v2 = vld [vmem:[%s5775_s1 + $0x888] sm:$0xff] }
  0x2d   :  { %2599 = vmatpush1.bf16.msra.mxu1 %v3757_v23  ;;  %v207_v37 = vld [vmem:[%s5775_s1 + $0x5c0] sm:$0xff]  ;;  %4044 = vmatprep.mubr.msk.bf16.mxu1 %vm2485_vm0, %v4334_v28  ;;  %v272_v23 = vld [vmem:[%s5775_s1 + $0x7c8] sm:$0xff]  ;;  %v3645_v26 = vcombine.low %v24_v11, %v32_v12  ;;  %v3998_v27 = vcombine.high %v376_v18, %v384_v19 }
  0x2e   :  { %2600 = vmatprep.subr.bf16.mxu1 %v3742_v25  ;;  %v3820_v43 = vcombine.high %v199_v35, %v207_v37  ;;  %v183_v45 = vld [vmem:[%s5775_s1 + $0x500] sm:$0xff]  ;;  %v3819_v49 = vcombine.low %v199_v35, %v207_v37  ;;  %444 = vperm.xlu1 %4125, %v426_v14   ;;  %v3886_v29 = vcombine.high %v264_v22, %v272_v23  ;;  %v304_v3 = vld [vmem:[%s5775_s1 + $0x8c8] sm:$0xff] }
  0x2f   :  { %2513 = vmatpush2.bf16.msra.mxu0 %v3851_v31  ;;  %v191_v46 = vld [vmem:[%s5775_s1 + $0x540] sm:$0xff]  ;;  %v368_v31 = vld [vmem:[%s5775_s1 + $0xac8] sm:$0xff]  ;;  %v3885_v35 = vcombine.low %v264_v22, %v272_v23  ;;  %v3918_v8 = vcombine.high %v296_v2, %v304_v3  ;;  %v3917_v14 = vcombine.low %v296_v2, %v304_v3  ;;  %v73_v2 = vld [vmem:[%s5775_s1 + $0x190] sm:$0xff] }
  0x30   :  { %2514 = vmatprep.subr.bf16.mxu0 %v3836_v33  ;;  %v3804_v51 = vcombine.high %v183_v45, %v191_v46  ;;  %v167_v53 = vld [vmem:[%s5775_s1 + $0x480] sm:$0xff]  ;;  %v3803_v58 = vcombine.low %v183_v45, %v191_v46  ;;  %v256_v33 = vld [vmem:[%s5775_s1 + $0x748] sm:$0xff]  ;;  %v3982_v37 = vcombine.high %v360_v30, %v368_v31  ;;  %v3981_v45 = vcombine.low %v360_v30, %v368_v31  ;;  %v137_v30 = vld [vmem:[%s5775_s1 + $0x390] sm:$0xff] }
  0x31   :  { %2601 = vmatpush1.bf16.msra.mxu1 %v3741_v32  ;;  %v175_v54 = vld [vmem:[%s5775_s1 + $0x4c0] sm:$0xff]  ;;  %v248_v32 = vld [vmem:[%s5775_s1 + $0x708] sm:$0xff]  ;;  %v145_v31 = vld [vmem:[%s5775_s1 + $0x3d0] sm:$0xff] }
  0x32   :  { %2602 = vmatprep.subr.bf16.mxu1 %v3726_v34  ;;  %v423_v55 = vld [vmem:[%s5777_s2] sm:$0xff]  ;;  %v3788_v62 = vcombine.high %v167_v53, %v175_v54  ;;  %v3787_v4 = vcombine.low %v167_v53, %v175_v54  ;;  %v3997_v34 = vcombine.low %v376_v18, %v384_v19  ;;  %v3870_v38 = vcombine.high %v248_v32, %v256_v33  ;;  %v280_v10 = vld [vmem:[%s5775_s1 + $0x808] sm:$0xff]  ;;  %v81_v3 = vld [vmem:[%s5775_s1 + $0x1d0] sm:$0xff] }
  0x33   :  { %2515 = vmatpush2.bf16.msra.mxu0 %v3835_v40  ;;  %429 = vperm.xlu0 %4124, %v423_v55   ;;  %v151_v0 = vld [vmem:[%s5775_s1 + $0x400] sm:$0xff]  ;;  %v352_v40 = vld [vmem:[%s5775_s1 + $0xa48] sm:$0xff]  ;;  %v3869_v46 = vcombine.low %v248_v32, %v256_v33  ;;  %v393_v32 = vld [vmem:[%s5775_s1 + $0xb90] sm:$0xff] }
  0x34   :  { %2588 = vmatmul.mubr.bf16.gmra.mxu1 %v4360_v41  ;;  %2516 = vmatprep.subr.bf16.mxu0 %v3820_v43  ;;  %v159_v1 = vld [vmem:[%s5775_s1 + $0x440] sm:$0xff]  ;;  %v240_v43 = vld [vmem:[%s5775_s1 + $0x6c8] sm:$0xff]  ;;  %v3966_v47 = vcombine.high %v344_v39, %v352_v40  ;;  %v3965_v53 = vcombine.low %v344_v39, %v352_v40  ;;  %v401_v33 = vld [vmem:[%s5775_s1 + $0xbd0] sm:$0xff] }
  0x35   :  { %2603 = vmatpush1.bf16.msra.mxu1 %v3725_v42  ;;  %2630 = vmatprep.mubr.bf16.mxu1 %v4281_v60  ;;  %v3772_v6 = vcombine.high %v151_v0, %v159_v1  ;;  %v3771_v13 = vcombine.low %v151_v0, %v159_v1  ;;  %v4444_v25 = vld [vmem:[%s5776_s0 + $0x24] ss:$16 sps:$4 sm:$0xff]   ;;  %v232_v42 = vld [vmem:[%s5775_s1 + $0x688] sm:$0xff] }
  0x36   :  { %2604 = vmatprep.subr.bf16.mxu1 %v3710_v44  ;;  %v4475_v44 = vld [vmem:[%s5776_s0 + $0x20] ss:$16 sps:$4 sm:$0xff]   ;;  %v3854_v48 = vcombine.high %v232_v42, %v240_v43  ;;  %v3853_v54 = vcombine.low %v232_v42, %v240_v43  ;;  %v288_v11 = vld [vmem:[%s5775_s1 + $0x848] sm:$0xff] }
  0x37   :  { %2517 = vmatpush2.bf16.msra.mxu0 %v3819_v49  ;;  %434 = vperm.xlu0 %4124, %v424_v59   ;;  %v328_v49 = vld [vmem:[%s5775_s1 + $0x988] sm:$0xff]  ;;  %v121_v39 = vld [vmem:[%s5775_s1 + $0x310] sm:$0xff] }
  0x38   :  { %2518 = vmatprep.subr.bf16.mxu0 %v3804_v51  ;;  %v216_v51 = vld [vmem:[%s5775_s1 + $0x608] sm:$0xff]  ;;  %v129_v40 = vld [vmem:[%s5775_s1 + $0x350] sm:$0xff] }
  0x39   :  { %2605 = vmatpush1.bf16.msra.mxu1 %v3709_v50  ;;  %v336_v50 = vld [vmem:[%s5775_s1 + $0x9c8] sm:$0xff]  ;;  %v377_v42 = vld [vmem:[%s5775_s1 + $0xb10] sm:$0xff] }
  0x3a   :  { %2606 = vmatprep.subr.bf16.mxu1 %v3694_v52  ;;  %v224_v52 = vld [vmem:[%s5775_s1 + $0x648] sm:$0xff]  ;;  %v3950_v55 = vcombine.high %v328_v49, %v336_v50  ;;  %v385_v43 = vld [vmem:[%s5775_s1 + $0xb50] sm:$0xff] }
  0x3b   :  { %2519 = vmatpush2.bf16.msra.mxu0 %v3803_v58  ;;  %v3838_v56 = vcombine.high %v216_v51, %v224_v52  ;;  %v320_v58 = vld [vmem:[%s5775_s1 + $0x948] sm:$0xff] }
  0x3c   :  { %2520 = vmatprep.subr.bf16.mxu0 %v3788_v62  ;;  %v200_v59 = vld [vmem:[%s5775_s1 + $0x588] sm:$0xff]  ;;  %v3949_v62 = vcombine.low %v328_v49, %v336_v50  ;;  %v3934_v0 = vcombine.high %v312_v57, %v320_v58  ;;  %v105_v49 = vld [vmem:[%s5775_s1 + $0x290] sm:$0xff] }
  0x3d   :  { %2607 = vmatpush1.bf16.msra.mxu1 %v3693_v61  ;;  %v208_v61 = vld [vmem:[%s5775_s1 + $0x5c8] sm:$0xff]  ;;  %v113_v50 = vld [vmem:[%s5775_s1 + $0x2d0] sm:$0xff] }
  0x3e   :  { %2608 = vmatprep.subr.bf16.mxu1 %v3678_v63  ;;  %v3837_v63 = vcombine.low %v216_v51, %v224_v52  ;;  %v3822_v1 = vcombine.high %v200_v59, %v208_v61  ;;  %v168_v12 = vld [vmem:[%s5775_s1 + $0x488] sm:$0xff]  ;;  %v361_v51 = vld [vmem:[%s5775_s1 + $0xa90] sm:$0xff] }
  0x3f   :  { %2521 = vmatpush2.bf16.msra.mxu0 %v3787_v4  ;;  %v184_v4 = vld [vmem:[%s5775_s1 + $0x508] sm:$0xff]  ;;  %v369_v52 = vld [vmem:[%s5775_s1 + $0xad0] sm:$0xff] }
  0x40   :  { %2522 = vmatprep.subr.bf16.mxu0 %v3772_v6  ;;  %v3933_v6 = vcombine.low %v312_v57, %v320_v58  ;;  %v408_v18 = vld [vmem:[%s5775_s1 + $0xc08] sm:$0xff]  ;;  %v89_v57 = vld [vmem:[%s5775_s1 + $0x210] sm:$0xff] }
  0x41   :  { %2609 = vmatpush1.bf16.msra.mxu1 %v3677_v5  ;;  %v192_v5 = vld [vmem:[%s5775_s1 + $0x548] sm:$0xff]  ;;  %v97_v58 = vld [vmem:[%s5775_s1 + $0x250] sm:$0xff] }
  0x42   :  { %2610 = vmatprep.subr.bf16.mxu1 %v3662_v7  ;;  %v3821_v7 = vcombine.low %v200_v59, %v208_v61  ;;  %v3806_v9 = vcombine.high %v184_v4, %v192_v5  ;;  %v416_v19 = vld [vmem:[%s5775_s1 + $0xc48] sm:$0xff]  ;;  %v345_v59 = vld [vmem:[%s5775_s1 + $0xa10] sm:$0xff] }
  0x43   :  { %2523 = vmatpush2.bf16.msra.mxu0 %v3771_v13  ;;  %v176_v13 = vld [vmem:[%s5775_s1 + $0x4c8] sm:$0xff]  ;;  %v353_v61 = vld [vmem:[%s5775_s1 + $0xa50] sm:$0xff] }
  0x44   :  { %2651 = vmatprep.subr.bf16.mxu0 %v4014_v16  ;;  %v3902_v16 = vcombine.high %v280_v10, %v288_v11  ;;  %v152_v22 = vld [vmem:[%s5775_s1 + $0x408] sm:$0xff] }
  0x45   :  { %2611 = vmatpush1.bf16.msra.mxu1 %v3661_v15  ;;  %v3805_v15 = vcombine.low %v184_v4, %v192_v5  ;;  %v160_v23 = vld [vmem:[%s5775_s1 + $0x448] sm:$0xff]  ;;  %v329_v4 = vld [vmem:[%s5775_s1 + $0x990] sm:$0xff] }
  0x46   :  { %2612 = vmatprep.subr.bf16.mxu1 %v3646_v17  ;;  %2525 = vmatmul.mubr.bf16.vlgmr.msra.gmra.mxu0 %v4433_v20  ;;  %v3790_v17 = vcombine.high %v168_v12, %v176_v13  ;;  %v337_v5 = vld [vmem:[%s5775_s1 + $0x9d0] sm:$0xff] }
  0x47   :  { %2652 = vmatpush1.bf16.msra.mxu0 %v4013_v24  ;;  %2534 = vmatprep.mubr.bf16.mxu0 %v4444_v25  ;;  %v3901_v24 = vcombine.low %v280_v10, %v288_v11  ;;  %v57_v10 = vld [vmem:[%s5775_s1 + $0x110] sm:$0xff] }
  0x48   :  { %2653 = vmatprep.subr.bf16.mxu0 %v3998_v27  ;;  %v4030_v27 = vcombine.high %v408_v18, %v416_v19  ;;  %v65_v11 = vld [vmem:[%s5775_s1 + $0x150] sm:$0xff] }
  0x49   :  { %2613 = vmatpush1.bf16.msra.mxu1 %v3645_v26  ;;  %v3789_v26 = vcombine.low %v168_v12, %v176_v13  ;;  %v313_v12 = vld [vmem:[%s5775_s1 + $0x910] sm:$0xff] }
  0x4a   :  { %2614 = vmatprep.subr.bf16.mxu1 %v3886_v29  ;;  %v3774_v29 = vcombine.high %v152_v22, %v160_v23  ;;  %v321_v13 = vld [vmem:[%s5775_s1 + $0x950] sm:$0xff] }
  0x4b   :  { %2654 = vmatpush1.bf16.msra.mxu0 %v3997_v34  ;;  %v4029_v34 = vcombine.low %v408_v18, %v416_v19  ;;  %v49_v18 = vld [vmem:[%s5775_s1 + $0xd0] sm:$0xff] }
  0x4c   :  { %2655 = vmatprep.subr.bf16.mxu0 %v3982_v37  ;;  %v3760_v37 = vcombine.high %v137_v30, %v145_v31  ;;  %v297_v19 = vld [vmem:[%s5775_s1 + $0x890] sm:$0xff] }
  0x4d   :  { %2615 = vmatpush2.bf16.msra.mxu1 %v3885_v35  ;;  %v3773_v35 = vcombine.low %v152_v22, %v160_v23  ;;  %v305_v22 = vld [vmem:[%s5775_s1 + $0x8d0] sm:$0xff]  ;;  %v3679_v23 = vcombine.low %v57_v10, %v65_v11 }
  0x4e   :  { %2616 = vmatprep.subr.bf16.mxu1 %v3870_v38  ;;  %2535 = vmatmul.mubr.bf16.gmra.mxu0 %v4475_v44  ;;  %v4016_v38 = vcombine.high %v393_v32, %v401_v33 }
  0x4f   :  { %2656 = vmatpush1.bf16.msra.mxu0 %v3981_v45  ;;  %4045 = vmatprep.mubr.msk.bf16.mxu0 %vm2485_vm0, %v4238_v36  ;;  %v3759_v45 = vcombine.low %v137_v30, %v145_v31  ;;  %v33_v30 = vld [vmem:[%s5775_s1 + $0x50] sm:$0xff] }
  0x50   :  { %2657 = vmatprep.subr.bf16.mxu0 %v3966_v47  ;;  %v3744_v47 = vcombine.high %v121_v39, %v129_v40  ;;  %v281_v31 = vld [vmem:[%s5775_s1 + $0x810] sm:$0xff] }
  0x51   :  { %2617 = vmatpush2.bf16.msra.mxu1 %v3869_v46  ;;  %v4015_v46 = vcombine.low %v393_v32, %v401_v33  ;;  %v289_v32 = vld [vmem:[%s5775_s1 + $0x850] sm:$0xff] }
  0x52   :  { %2618 = vmatprep.subr.bf16.mxu1 %v3854_v48  ;;  %v4000_v48 = vcombine.high %v377_v42, %v385_v43 }
  0x53   :  { %2658 = vmatpush1.bf16.msra.mxu0 %v3965_v53  ;;  %v3743_v53 = vcombine.low %v121_v39, %v129_v40  ;;  %v273_v39 = vld [vmem:[%s5775_s1 + $0x7d0] sm:$0xff] }
  0x54   :  { %2659 = vmatprep.subr.bf16.mxu0 %v3950_v55  ;;  %v3728_v55 = vcombine.high %v105_v49, %v113_v50  ;;  %v409_v40 = vld [vmem:[%s5775_s1 + $0xc10] sm:$0xff] }
  0x55   :  { %2619 = vmatpush2.bf16.msra.mxu1 %v3853_v54  ;;  %v3999_v54 = vcombine.low %v377_v42, %v385_v43  ;;  %v417_v42 = vld [vmem:[%s5775_s1 + $0xc50] sm:$0xff] }
  0x56   :  { %2620 = vmatprep.subr.bf16.mxu1 %v3838_v56  ;;  %v3984_v56 = vcombine.high %v361_v51, %v369_v52 }
  0x57   :  { %2660 = vmatpush1.bf16.msra.mxu0 %v3949_v62  ;;  %v3727_v62 = vcombine.low %v105_v49, %v113_v50  ;;  %v257_v49 = vld [vmem:[%s5775_s1 + $0x750] sm:$0xff]  ;;  %v138_v50 = vld [vmem:[%s5775_s1 + $0x398] sm:$0xff] }
  0x58   :  { %2661 = vmatprep.subr.bf16.mxu0 %v3934_v0  ;;  %v3712_v0 = vcombine.high %v89_v57, %v97_v58 }
  0x59   :  { %2621 = vmatpush2.bf16.msra.mxu1 %v3837_v63  ;;  %v3983_v63 = vcombine.low %v361_v51, %v369_v52  ;;  %v146_v51 = vld [vmem:[%s5775_s1 + $0x3d8] sm:$0xff] }
  0x5a   :  { %2622 = vmatprep.subr.bf16.mxu1 %v3822_v1  ;;  %v3968_v1 = vcombine.high %v345_v59, %v353_v61 }
  0x5b   :  { %2662 = vmatpush1.bf16.msra.mxu0 %v3933_v6  ;;  %v3711_v6 = vcombine.low %v89_v57, %v97_v58  ;;  %v241_v57 = vld [vmem:[%s5775_s1 + $0x6d0] sm:$0xff]  ;;  %v122_v58 = vld [vmem:[%s5775_s1 + $0x318] sm:$0xff] }
  0x5c   :  { %2663 = vmatprep.subr.bf16.mxu0 %v3918_v8  ;;  %v3696_v8 = vcombine.high %v73_v2, %v81_v3 }
  0x5d   :  { %2623 = vmatpush2.bf16.msra.mxu1 %v3821_v7  ;;  %v3967_v7 = vcombine.low %v345_v59, %v353_v61  ;;  %v130_v59 = vld [vmem:[%s5775_s1 + $0x358] sm:$0xff] }
  0x5e   :  { %2624 = vmatprep.subr.bf16.mxu1 %v3806_v9  ;;  %v3952_v9 = vcombine.high %v329_v4, %v337_v5 }
  0x5f   :  { %2664 = vmatpush1.bf16.msra.mxu0 %v3917_v14  ;;  %v3695_v14 = vcombine.low %v73_v2, %v81_v3  ;;  %v225_v2 = vld [vmem:[%s5775_s1 + $0x650] sm:$0xff]  ;;  %v106_v3 = vld [vmem:[%s5775_s1 + $0x298] sm:$0xff] }
  0x60   :  { %2665 = vmatprep.subr.bf16.mxu0 %v3902_v16  ;;  %v3680_v16 = vcombine.high %v57_v10, %v65_v11  ;;  %v209_v10 = vld [vmem:[%s5775_s1 + $0x5d0] sm:$0xff]  ;;  %v98_v11 = vld [vmem:[%s5775_s1 + $0x258] sm:$0xff] }
  0x61   :  { %2625 = vmatpush2.bf16.msra.mxu1 %v3805_v15  ;;  %v3951_v15 = vcombine.low %v329_v4, %v337_v5  ;;  %v114_v4 = vld [vmem:[%s5775_s1 + $0x2d8] sm:$0xff] }
  0x62   :  { %2626 = vmatprep.subr.bf16.mxu1 %v3790_v17  ;;  %v3936_v17 = vcombine.high %v313_v12, %v321_v13 }
  0x63   :  { %2666 = vmatpush1.bf16.msra.mxu0 %v3901_v24  ;;  %v3935_v24 = vcombine.low %v313_v12, %v321_v13  ;;  %v3729_v13 = vcombine.low %v106_v3, %v114_v4 }
  0x64   :  { %2681 = vmatprep.subr.bf16.mxu0 %v4030_v27  ;;  %v3920_v27 = vcombine.high %v297_v19, %v305_v22 }
  0x65   :  { %2627 = vmatpush2.bf16.msra.mxu1 %v3789_v26 }
  0x66   :  { %2628 = vmatprep.subr.bf16.mxu1 %v3774_v29  ;;  %v25_v29 = vld [vmem:[%s5775_s1 + $0x10] sm:$0xff] }
  0x67   :  { %2682 = vmatpush2.bf16.msra.mxu0 %v4029_v34  ;;  %v3919_v34 = vcombine.low %v297_v19, %v305_v22  ;;  %v3647_v43 = vcombine.low %v25_v29, %v33_v30 }
  0x68   :  { %2704 = vmatprep.subr.bf16.mxu0 %v3760_v37  ;;  %v3904_v37 = vcombine.high %v281_v31, %v289_v32 }
  0x69   :  { %2629 = vmatpush2.bf16.msra.mxu1 %v3773_v35  ;;  %v3648_v35 = vcombine.high %v25_v29, %v33_v30 }
  0x6a   :  { %2757 = vmatprep.subr.bf16.mxu1 %v4016_v38  ;;  %2684 = vmatmul.mubr.bf16.vlgmr.msra.gmra.mxu0 %v4323_v21  ;;  %v265_v38 = vld [vmem:[%s5775_s1 + $0x790] sm:$0xff] }
  0x6b   :  { %2705 = vmatpush1.bf16.msra.mxu0 %v3759_v45  ;;  %4046 = vmatprep.mubr.msk.bf16.mxu0 %vm2485_vm0, %v4334_v28  ;;  %v3903_v45 = vcombine.low %v281_v31, %v289_v32  ;;  %v3887_v52 = vcombine.low %v265_v38, %v273_v39 }
  0x6c   :  { %2631 = vmatmul.mubr.bf16.vlgmr.msra.gmra.mxu1 %v4433_v20  ;;  %2706 = vmatprep.subr.bf16.mxu0 %v3744_v47  ;;  %v4032_v47 = vcombine.high %v409_v40, %v417_v42 }
  0x6d   :  { %2758 = vmatpush1.bf16.msra.mxu1 %v4015_v46  ;;  %2640 = vmatprep.mubr.bf16.mxu1 %v4444_v25  ;;  %v3888_v46 = vcombine.high %v265_v38, %v273_v39 }
  0x6e   :  { %2759 = vmatprep.subr.bf16.mxu1 %v4000_v48  ;;  %v249_v48 = vld [vmem:[%s5775_s1 + $0x710] sm:$0xff] }
  0x6f   :  { %2707 = vmatpush1.bf16.msra.mxu0 %v3743_v53  ;;  %v4031_v53 = vcombine.low %v409_v40, %v417_v42  ;;  %v3871_v61 = vcombine.low %v249_v48, %v257_v49  ;;  %v394_v42 = vld [vmem:[%s5775_s1 + $0xb98] sm:$0xff] }
  0x70   :  { %2708 = vmatprep.subr.bf16.mxu0 %v3728_v55  ;;  %v3762_v55 = vcombine.high %v138_v50, %v146_v51 }
  0x71   :  { %2760 = vmatpush1.bf16.msra.mxu1 %v3999_v54  ;;  %v3872_v54 = vcombine.high %v249_v48, %v257_v49 }
  0x72   :  { %2761 = vmatprep.subr.bf16.mxu1 %v3984_v56  ;;  %2694 = vmatmul.mubr.bf16.gmra.mxu0 %v4360_v41  ;;  %v233_v56 = vld [vmem:[%s5775_s1 + $0x690] sm:$0xff] }
  0x73   :  { %2709 = vmatpush1.bf16.msra.mxu0 %v3727_v62  ;;  %2736 = vmatprep.mubr.bf16.mxu0 %v4281_v60  ;;  %v3761_v62 = vcombine.low %v138_v50, %v146_v51  ;;  %v3855_v5 = vcombine.low %v233_v56, %v241_v57  ;;  %v378_v51 = vld [vmem:[%s5775_s1 + $0xb18] sm:$0xff] }
  0x74   :  { %2641 = vmatmul.mubr.bf16.gmra.mxu1 %v4475_v44  ;;  %2710 = vmatprep.subr.bf16.mxu0 %v3712_v0  ;;  %v3746_v0 = vcombine.high %v122_v58, %v130_v59 }
  0x75   :  { %2762 = vmatpush1.bf16.msra.mxu1 %v3983_v63  ;;  %4047 = vmatprep.mubr.msk.bf16.mxu1 %vm2485_vm0, %v4238_v36  ;;  %v41_v36 = vld [vmem:[%s5775_s1 + $0x90] sm:$0xff]  ;;  %v3856_v63 = vcombine.high %v233_v56, %v241_v57 }
  0x76   :  { %2763 = vmatprep.subr.bf16.mxu1 %v3968_v1  ;;  %v3664_v26 = vcombine.high %v41_v36, %v49_v18  ;;  %v3663_v33 = vcombine.low %v41_v36, %v49_v18  ;;  %v217_v1 = vld [vmem:[%s5775_s1 + $0x610] sm:$0xff]  ;;  %v82_v36 = vld [vmem:[%s5775_s1 + $0x1d8] sm:$0xff] }
  0x77   :  { %2711 = vmatpush1.bf16.msra.mxu0 %v3711_v6  ;;  %v3745_v6 = vcombine.low %v122_v58, %v130_v59  ;;  %v3839_v12 = vcombine.low %v217_v1, %v225_v2  ;;  %v362_v59 = vld [vmem:[%s5775_s1 + $0xa98] sm:$0xff] }
  0x78   :  { %2712 = vmatprep.subr.bf16.mxu0 %v3696_v8  ;;  %v3730_v8 = vcombine.high %v106_v3, %v114_v4  ;;  %v346_v4 = vld [vmem:[%s5775_s1 + $0xa18] sm:$0xff] }
  0x79   :  { %2764 = vmatpush1.bf16.msra.mxu1 %v3967_v7  ;;  %v3840_v7 = vcombine.high %v217_v1, %v225_v2 }
  0x7a   :  { %2765 = vmatprep.subr.bf16.mxu1 %v3952_v9  ;;  %v201_v9 = vld [vmem:[%s5775_s1 + $0x590] sm:$0xff] }
  0x7b   :  { %2713 = vmatpush1.bf16.msra.mxu0 %v3695_v14  ;;  %v3824_v14 = vcombine.high %v201_v9, %v209_v10  ;;  %v3823_v18 = vcombine.low %v201_v9, %v209_v10 }
  0x7c   :  { %2714 = vmatprep.subr.bf16.mxu0 %v3680_v16  ;;  %v193_v16 = vld [vmem:[%s5775_s1 + $0x550] sm:$0xff] }
  0x7d   :  { %2766 = vmatpush1.bf16.msra.mxu1 %v3951_v15 }
  0x7e   :  { %2767 = vmatprep.subr.bf16.mxu1 %v3936_v17  ;;  %v74_v17 = vld [vmem:[%s5775_s1 + $0x198] sm:$0xff] }
  0x7f   :  { %2715 = vmatpush1.bf16.msra.mxu0 %v3679_v23  ;;  %v3698_v23 = vcombine.high %v74_v17, %v82_v36  ;;  %v3697_v30 = vcombine.low %v74_v17, %v82_v36 }
  0x80   :  { %2716 = vmatprep.subr.bf16.mxu0 %v3664_v26  ;;  %v177_v26 = vld [vmem:[%s5775_s1 + $0x4d0] sm:$0xff] }
  0x81   :  { %2768 = vmatpush1.bf16.msra.mxu1 %v3935_v24  ;;  %v169_v24 = vld [vmem:[%s5775_s1 + $0x490] sm:$0xff] }
  0x82   :  { %2769 = vmatprep.subr.bf16.mxu1 %v3920_v27  ;;  %v66_v27 = vld [vmem:[%s5775_s1 + $0x158] sm:$0xff]  ;;  %v3792_v31 = vcombine.high %v169_v24, %v177_v26 }
  0x83   :  { %2717 = vmatpush1.bf16.msra.mxu0 %v3663_v33  ;;  %v161_v33 = vld [vmem:[%s5775_s1 + $0x450] sm:$0xff] }
  0x84   :  { %2718 = vmatprep.subr.bf16.mxu0 %v3648_v35  ;;  %v50_v35 = vld [vmem:[%s5775_s1 + $0xd8] sm:$0xff] }
  0x85   :  { %2770 = vmatpush1.bf16.msra.mxu1 %v3919_v34  ;;  %v42_v34 = vld [vmem:[%s5775_s1 + $0x98] sm:$0xff] }
  0x86   :  { %2771 = vmatprep.subr.bf16.mxu1 %v3904_v37  ;;  %v3791_v37 = vcombine.low %v169_v24, %v177_v26  ;;  %v3666_v40 = vcombine.high %v42_v34, %v50_v35  ;;  %v3665_v48 = vcombine.low %v42_v34, %v50_v35 }
  0x87   :  { %2719 = vmatpush1.bf16.msra.mxu0 %v3647_v43  ;;  %v402_v43 = vld [vmem:[%s5775_s1 + $0xbd8] sm:$0xff] }
  0x88   :  { %2720 = vmatprep.subr.bf16.mxu0 %v3888_v46  ;;  %v34_v46 = vld [vmem:[%s5775_s1 + $0x58] sm:$0xff]  ;;  %v4018_v49 = vcombine.high %v394_v42, %v402_v43 }
  0x89   :  { %2772 = vmatpush1.bf16.msra.mxu1 %v3903_v45  ;;  %v26_v45 = vld [vmem:[%s5775_s1 + $0x18] sm:$0xff] }
  0x8a   :  { %2787 = vmatprep.subr.bf16.mxu1 %v4032_v47  ;;  %v3650_v50 = vcombine.high %v26_v45, %v34_v46  ;;  %v3649_v56 = vcombine.low %v26_v45, %v34_v46 }
  0x8b   :  { %2721 = vmatpush2.bf16.msra.mxu0 %v3887_v52  ;;  %v386_v52 = vld [vmem:[%s5775_s1 + $0xb58] sm:$0xff] }
  0x8c   :  { %2722 = vmatprep.subr.bf16.mxu0 %v3872_v54  ;;  %v274_v54 = vld [vmem:[%s5775_s1 + $0x7d8] sm:$0xff]  ;;  %v4002_v57 = vcombine.high %v378_v51, %v386_v52 }
  0x8d   :  { %2788 = vmatpush2.bf16.msra.mxu1 %v4031_v53  ;;  %v266_v53 = vld [vmem:[%s5775_s1 + $0x798] sm:$0xff] }
  0x8e   :  { %2810 = vmatprep.subr.bf16.mxu1 %v3762_v55  ;;  %v4017_v55 = vcombine.low %v394_v42, %v402_v43  ;;  %v3890_v58 = vcombine.high %v266_v53, %v274_v54  ;;  %v3889_v1 = vcombine.low %v266_v53, %v274_v54 }
  0x8f   :  { %2723 = vmatpush2.bf16.msra.mxu0 %v3871_v61  ;;  %v370_v61 = vld [vmem:[%s5775_s1 + $0xad8] sm:$0xff] }
  0x90   :  { %2790 = vmatmul.mubr.bf16.vlgmr.msra.gmra.mxu1 %v4323_v21  ;;  %2724 = vmatprep.subr.bf16.mxu0 %v3856_v63  ;;  %v90_v21 = vld [vmem:[%s5775_s1 + $0x218] sm:$0xff]  ;;  %v3986_v2 = vcombine.high %v362_v59, %v370_v61 }
  0x91   :  { %2811 = vmatpush1.bf16.msra.mxu1 %v3761_v62  ;;  %4048 = vmatprep.mubr.msk.bf16.mxu1 %vm2485_vm0, %v4334_v28  ;;  %v3714_v15 = vcombine.high %v90_v21, %v98_v11  ;;  %v185_v28 = vld [vmem:[%s5775_s1 + $0x510] sm:$0xff]  ;;  %v3713_v19 = vcombine.low %v90_v21, %v98_v11  ;;  %v250_v62 = vld [vmem:[%s5775_s1 + $0x718] sm:$0xff] }
  0x92   :  { %2812 = vmatprep.subr.bf16.mxu1 %v3746_v0  ;;  %v3808_v22 = vcombine.high %v185_v28, %v193_v16  ;;  %v3807_v29 = vcombine.low %v185_v28, %v193_v16  ;;  %v258_v63 = vld [vmem:[%s5775_s1 + $0x758] sm:$0xff]  ;;  %v4001_v0 = vcombine.low %v378_v51, %v386_v52 }
  0x93   :  { %2725 = vmatpush2.bf16.msra.mxu0 %v3855_v5  ;;  %v3874_v3 = vcombine.high %v250_v62, %v258_v63  ;;  %v354_v5 = vld [vmem:[%s5775_s1 + $0xa58] sm:$0xff]  ;;  %v3873_v9 = vcombine.low %v250_v62, %v258_v63 }
  0x94   :  { %2726 = vmatprep.subr.bf16.mxu0 %v3840_v7  ;;  %v242_v7 = vld [vmem:[%s5775_s1 + $0x6d8] sm:$0xff]  ;;  %v3970_v10 = vcombine.high %v346_v4, %v354_v5 }
  0x95   :  { %2813 = vmatpush1.bf16.msra.mxu1 %v3745_v6  ;;  %v234_v6 = vld [vmem:[%s5775_s1 + $0x698] sm:$0xff] }
  0x96   :  { %2814 = vmatprep.subr.bf16.mxu1 %v3730_v8  ;;  %v3985_v8 = vcombine.low %v362_v59, %v370_v61  ;;  %v3858_v21 = vcombine.high %v234_v6, %v242_v7  ;;  %v330_v11 = vld [vmem:[%s5775_s1 + $0x998] sm:$0xff]  ;;  %v3857_v16 = vcombine.low %v234_v6, %v242_v7 }
  0x97   :  { %2727 = vmatpush2.bf16.msra.mxu0 %v3839_v12  ;;  %v338_v12 = vld [vmem:[%s5775_s1 + $0x9d8] sm:$0xff] }
  0x98   :  { %2800 = vmatmul.mubr.bf16.gmra.mxu1 %v4360_v41  ;;  %2728 = vmatprep.subr.bf16.mxu0 %v3824_v14  ;;  %v58_v41 = vld [vmem:[%s5775_s1 + $0x118] sm:$0xff]  ;;  %v3954_v17 = vcombine.high %v330_v11, %v338_v12  ;;  %v3953_v24 = vcombine.low %v330_v11, %v338_v12  ;;  %v371_v11 = vld [vmem:[%s5775_s1 + $0xae0] sm:$0xff] }
  0x99   :  { %2815 = vmatpush1.bf16.msra.mxu1 %v3729_v13  ;;  %2842 = vmatprep.mubr.bf16.mxu1 %v4281_v60  ;;  %v3682_v32 = vcombine.high %v58_v41, %v66_v27  ;;  %v153_v60 = vld [vmem:[%s5775_s1 + $0x410] sm:$0xff]  ;;  %v3681_v38 = vcombine.low %v58_v41, %v66_v27  ;;  %v218_v13 = vld [vmem:[%s5775_s1 + $0x618] sm:$0xff] }
  0x9a   :  { %2816 = vmatprep.subr.bf16.mxu1 %v3714_v15  ;;  %v3776_v39 = vcombine.high %v153_v60, %v161_v33  ;;  %v3775_v47 = vcombine.low %v153_v60, %v161_v33  ;;  %v226_v14 = vld [vmem:[%s5775_s1 + $0x658] sm:$0xff]  ;;  %v3969_v15 = vcombine.low %v346_v4, %v354_v5 }
  0x9b   :  { %2729 = vmatpush2.bf16.msra.mxu0 %v3823_v18  ;;  %v4813_v28 = vld [vmem:[%s5776_s0 + $0xc] ss:$16 sps:$4 sm:$0xff]   ;;  %v3842_v36 = vcombine.high %v218_v13, %v226_v14  ;;  %v3841_v26 = vcombine.low %v218_v13, %v226_v14 }
  0x9c   :  { %2730 = vmatprep.subr.bf16.mxu0 %v3808_v22  ;;  %v314_v18 = vld [vmem:[%s5775_s1 + $0x918] sm:$0xff] }
  0x9d   :  { %2817 = vmatpush1.bf16.msra.mxu1 %v3713_v19  ;;  %v322_v19 = vld [vmem:[%s5775_s1 + $0x958] sm:$0xff] }
  0x9e   :  { %2818 = vmatprep.subr.bf16.mxu1 %v3698_v23  ;;  %v202_v22 = vld [vmem:[%s5775_s1 + $0x598] sm:$0xff]  ;;  %v3938_v41 = vcombine.high %v314_v18, %v322_v19  ;;  %v3937_v60 = vcombine.low %v314_v18, %v322_v19 }
  0x9f   :  { %2731 = vmatpush2.bf16.msra.mxu0 %v3807_v29  ;;  %v210_v23 = vld [vmem:[%s5775_s1 + $0x5d8] sm:$0xff] }
  0xa0   :  { %2732 = vmatprep.subr.bf16.mxu0 %v3792_v31  ;;  %v3826_v27 = vcombine.high %v202_v22, %v210_v23  ;;  %v298_v29 = vld [vmem:[%s5775_s1 + $0x898] sm:$0xff]  ;;  %v3825_v33 = vcombine.low %v202_v22, %v210_v23 }
  0xa1   :  { %2819 = vmatpush1.bf16.msra.mxu1 %v3697_v30  ;;  %v306_v30 = vld [vmem:[%s5775_s1 + $0x8d8] sm:$0xff] }
  0xa2   :  { %2820 = vmatprep.subr.bf16.mxu1 %v3682_v32  ;;  %v186_v31 = vld [vmem:[%s5775_s1 + $0x518] sm:$0xff]  ;;  %v3922_v34 = vcombine.high %v298_v29, %v306_v30  ;;  %v3921_v42 = vcombine.low %v298_v29, %v306_v30 }
  0xa3   :  { %2733 = vmatpush2.bf16.msra.mxu0 %v3791_v37  ;;  %v194_v32 = vld [vmem:[%s5775_s1 + $0x558] sm:$0xff] }
  0xa4   :  { %2734 = vmatprep.subr.bf16.mxu0 %v3776_v39  ;;  %v3810_v35 = vcombine.high %v186_v31, %v194_v32  ;;  %v282_v37 = vld [vmem:[%s5775_s1 + $0x818] sm:$0xff]  ;;  %v3809_v43 = vcombine.low %v186_v31, %v194_v32 }
  0xa5   :  { %2821 = vmatpush1.bf16.msra.mxu1 %v3681_v38  ;;  %v290_v38 = vld [vmem:[%s5775_s1 + $0x858] sm:$0xff] }
  0xa6   :  { %2822 = vmatprep.subr.bf16.mxu1 %v3666_v40  ;;  %v170_v39 = vld [vmem:[%s5775_s1 + $0x498] sm:$0xff]  ;;  %v3906_v45 = vcombine.high %v282_v37, %v290_v38  ;;  %v3905_v51 = vcombine.low %v282_v37, %v290_v38  ;;  %v4964_v37 = vld [vmem:[%s5776_s0 + $0x4] ss:$16 sps:$4 sm:$0xff]  }
  0xa7   :  { %2735 = vmatpush2.bf16.msra.mxu0 %v3775_v47  ;;  %v178_v40 = vld [vmem:[%s5775_s1 + $0x4d8] sm:$0xff] }
  0xa8   :  { %2863 = vmatprep.subr.bf16.mxu0 %v4018_v49  ;;  %v3794_v46 = vcombine.high %v170_v39, %v178_v40  ;;  %v410_v47 = vld [vmem:[%s5775_s1 + $0xc18] sm:$0xff]  ;;  %v3793_v52 = vcombine.low %v170_v39, %v178_v40 }
  0xa9   :  { %2823 = vmatpush1.bf16.msra.mxu1 %v3665_v48  ;;  %v418_v48 = vld [vmem:[%s5775_s1 + $0xc58] sm:$0xff] }
  0xaa   :  { %2824 = vmatprep.subr.bf16.mxu1 %v3650_v50  ;;  %2737 = vmatmul.mubr.bf16.vlgmr.msra.gmra.mxu0 %v4433_v20  ;;  %v154_v49 = vld [vmem:[%s5775_s1 + $0x418] sm:$0xff]  ;;  %v4034_v53 = vcombine.high %v410_v47, %v418_v48  ;;  %v4033_v59 = vcombine.low %v410_v47, %v418_v48  ;;  %v307_v47 = vld [vmem:[%s5775_s1 + $0x8e0] sm:$0xff] }
  0xab   :  { %2864 = vmatpush1.bf16.msra.mxu0 %v4017_v55  ;;  %2746 = vmatprep.mubr.bf16.mxu0 %v4444_v25  ;;  %v162_v50 = vld [vmem:[%s5775_s1 + $0x458] sm:$0xff]  ;;  %v139_v55 = vld [vmem:[%s5775_s1 + $0x3a0] sm:$0xff] }
  0xac   :  { %2865 = vmatprep.subr.bf16.mxu0 %v4002_v57  ;;  %v3778_v54 = vcombine.high %v154_v49, %v162_v50  ;;  %v395_v57 = vld [vmem:[%s5775_s1 + $0xba0] sm:$0xff]  ;;  %v3777_v61 = vcombine.low %v154_v49, %v162_v50  ;;  %v4924_v18 = vld [vmem:[%s5776_s0 + $0x2c] ss:$16 sps:$4 sm:$0xff]   ;;  %v4943_v29 = vld [vmem:[%s5776_s0 + $0x28] ss:$16 sps:$4 sm:$0xff]  }
  0xad   :  { %2825 = vmatpush1.bf16.msra.mxu1 %v3649_v56  ;;  %v147_v56 = vld [vmem:[%s5775_s1 + $0x3e0] sm:$0xff] }
  0xae   :  { %2826 = vmatprep.subr.bf16.mxu1 %v3890_v58  ;;  %v403_v58 = vld [vmem:[%s5775_s1 + $0xbe0] sm:$0xff]  ;;  %v3764_v62 = vcombine.high %v139_v55, %v147_v56  ;;  %v3763_v4 = vcombine.low %v139_v55, %v147_v56 }
  0xaf   :  { %2866 = vmatpush1.bf16.msra.mxu0 %v4001_v0  ;;  %v4020_v63 = vcombine.high %v395_v57, %v403_v58  ;;  %v123_v0 = vld [vmem:[%s5775_s1 + $0x320] sm:$0xff]  ;;  %v4019_v5 = vcombine.low %v395_v57, %v403_v58 }
  0xb0   :  { %2867 = vmatprep.subr.bf16.mxu0 %v3986_v2  ;;  %v379_v2 = vld [vmem:[%s5775_s1 + $0xb20] sm:$0xff] }
  0xb1   :  { %2827 = vmatpush2.bf16.msra.mxu1 %v3889_v1  ;;  %v131_v1 = vld [vmem:[%s5775_s1 + $0x360] sm:$0xff] }
  0xb2   :  { %2828 = vmatprep.subr.bf16.mxu1 %v3874_v3  ;;  %2747 = vmatmul.mubr.bf16.gmra.mxu0 %v4475_v44  ;;  %v387_v3 = vld [vmem:[%s5775_s1 + $0xb60] sm:$0xff]  ;;  %v3748_v6 = vcombine.high %v123_v0, %v131_v1  ;;  %v3747_v12 = vcombine.low %v123_v0, %v131_v1 }
  0xb3   :  { %2868 = vmatpush1.bf16.msra.mxu0 %v3985_v8  ;;  %4049 = vmatprep.mubr.msk.bf16.mxu0 %vm2485_vm0, %v4813_v28  ;;  %v4004_v7 = vcombine.high %v379_v2, %v387_v3  ;;  %v107_v8 = vld [vmem:[%s5775_s1 + $0x2a0] sm:$0xff]  ;;  %v4003_v13 = vcombine.low %v379_v2, %v387_v3 }
  0xb4   :  { %2869 = vmatprep.subr.bf16.mxu0 %v3970_v10  ;;  %v4898_v10 = vld [vmem:[%s5776_s0 + $0x8] ss:$16 sps:$4 sm:$0xff]   ;;  %v291_v55 = vld [vmem:[%s5775_s1 + $0x860] sm:$0xff] }
  0xb5   :  { %2829 = vmatpush2.bf16.msra.mxu1 %v3873_v9  ;;  %v115_v9 = vld [vmem:[%s5775_s1 + $0x2e0] sm:$0xff] }
  0xb6   :  { %2830 = vmatprep.subr.bf16.mxu1 %v3858_v21  ;;  %v363_v21 = vld [vmem:[%s5775_s1 + $0xaa0] sm:$0xff]  ;;  %v3732_v14 = vcombine.high %v107_v8, %v115_v9  ;;  %v3731_v19 = vcombine.low %v107_v8, %v115_v9  ;;  %v148_v8 = vld [vmem:[%s5775_s1 + $0x3e8] sm:$0xff] }
  0xb7   :  { %2870 = vmatpush1.bf16.msra.mxu0 %v3969_v15  ;;  %v3988_v15 = vcombine.high %v363_v21, %v371_v11  ;;  %v419_v0 = vld [vmem:[%s5775_s1 + $0xc60] sm:$0xff] }
  0xb8   :  { %2871 = vmatprep.subr.bf16.mxu0 %v3954_v17  ;;  %v99_v17 = vld [vmem:[%s5775_s1 + $0x260] sm:$0xff] }
  0xb9   :  { %2831 = vmatpush2.bf16.msra.mxu1 %v3857_v16  ;;  %v91_v16 = vld [vmem:[%s5775_s1 + $0x220] sm:$0xff] }
  0xba   :  { %2832 = vmatprep.subr.bf16.mxu1 %v3842_v36  ;;  %v355_v36 = vld [vmem:[%s5775_s1 + $0xa60] sm:$0xff]  ;;  %v3716_v22 = vcombine.high %v91_v16, %v99_v17  ;;  %v3715_v30 = vcombine.low %v91_v16, %v99_v17  ;;  %v132_v16 = vld [vmem:[%s5775_s1 + $0x368] sm:$0xff] }
  0xbb   :  { %2872 = vmatpush1.bf16.msra.mxu0 %v3953_v24  ;;  %v75_v24 = vld [vmem:[%s5775_s1 + $0x1a0] sm:$0xff] }
  0xbc   :  { %2873 = vmatprep.subr.bf16.mxu0 %v3938_v41  ;;  %v331_v41 = vld [vmem:[%s5775_s1 + $0x9a0] sm:$0xff] }
  0xbd   :  { %2833 = vmatpush2.bf16.msra.mxu1 %v3841_v26  ;;  %v83_v26 = vld [vmem:[%s5775_s1 + $0x1e0] sm:$0xff] }
  0xbe   :  { %2834 = vmatprep.subr.bf16.mxu1 %v3826_v27  ;;  %v339_v27 = vld [vmem:[%s5775_s1 + $0x9e0] sm:$0xff]  ;;  %v3700_v32 = vcombine.high %v75_v24, %v83_v26  ;;  %v3699_v38 = vcombine.low %v75_v24, %v83_v26  ;;  %v116_v24 = vld [vmem:[%s5775_s1 + $0x2e8] sm:$0xff] }
  0xbf   :  { %2874 = vmatpush1.bf16.msra.mxu0 %v3937_v60  ;;  %v3956_v60 = vcombine.high %v331_v41, %v339_v27  ;;  %v3955_v39 = vcombine.low %v331_v41, %v339_v27 }
  0xc0   :  { %2875 = vmatprep.subr.bf16.mxu0 %v3922_v34  ;;  %v67_v34 = vld [vmem:[%s5775_s1 + $0x160] sm:$0xff] }
  0xc1   :  { %2835 = vmatpush2.bf16.msra.mxu1 %v3825_v33  ;;  %v59_v33 = vld [vmem:[%s5775_s1 + $0x120] sm:$0xff] }
  0xc2   :  { %2836 = vmatprep.subr.bf16.mxu1 %v3810_v35  ;;  %v323_v35 = vld [vmem:[%s5775_s1 + $0x960] sm:$0xff]  ;;  %v3684_v40 = vcombine.high %v59_v33, %v67_v34  ;;  %v3683_v48 = vcombine.low %v59_v33, %v67_v34  ;;  %v100_v33 = vld [vmem:[%s5775_s1 + $0x268] sm:$0xff] }
  0xc3   :  { %2876 = vmatpush1.bf16.msra.mxu0 %v3921_v42 }
  0xc4   :  { %2877 = vmatprep.subr.bf16.mxu0 %v3906_v45  ;;  %v51_v45 = vld [vmem:[%s5775_s1 + $0xe0] sm:$0xff] }
  0xc5   :  { %2837 = vmatpush2.bf16.msra.mxu1 %v3809_v43  ;;  %v43_v43 = vld [vmem:[%s5775_s1 + $0xa0] sm:$0xff] }
  0xc6   :  { %2838 = vmatprep.subr.bf16.mxu1 %v3794_v46  ;;  %v299_v46 = vld [vmem:[%s5775_s1 + $0x8a0] sm:$0xff]  ;;  %v3668_v50 = vcombine.high %v43_v43, %v51_v45  ;;  %v3667_v56 = vcombine.low %v43_v43, %v51_v45  ;;  %v76_v43 = vld [vmem:[%s5775_s1 + $0x1a8] sm:$0xff] }
  0xc7   :  { %2878 = vmatpush1.bf16.msra.mxu0 %v3905_v51  ;;  %v3924_v51 = vcombine.high %v299_v46, %v307_v47  ;;  %v3923_v57 = vcombine.low %v299_v46, %v307_v47  ;;  %v84_v45 = vld [vmem:[%s5775_s1 + $0x1e8] sm:$0xff] }
  0xc8   :  { %2893 = vmatprep.subr.bf16.mxu0 %v4034_v53  ;;  %v35_v53 = vld [vmem:[%s5775_s1 + $0x60] sm:$0xff] }
  0xc9   :  { %2839 = vmatpush2.bf16.msra.mxu1 %v3793_v52  ;;  %v27_v52 = vld [vmem:[%s5775_s1 + $0x20] sm:$0xff] }
  0xca   :  { %2840 = vmatprep.subr.bf16.mxu1 %v3778_v54  ;;  %v283_v54 = vld [vmem:[%s5775_s1 + $0x820] sm:$0xff]  ;;  %v3652_v58 = vcombine.high %v27_v52, %v35_v53  ;;  %v3651_v1 = vcombine.low %v27_v52, %v35_v53  ;;  %v60_v53 = vld [vmem:[%s5775_s1 + $0x128] sm:$0xff] }
  0xcb   :  { %2894 = vmatpush2.bf16.msra.mxu0 %v4033_v59  ;;  %v3908_v59 = vcombine.high %v283_v54, %v291_v55  ;;  %v3907_v2 = vcombine.low %v283_v54, %v291_v55  ;;  %v68_v54 = vld [vmem:[%s5775_s1 + $0x168] sm:$0xff] }
  0xcc   :  { %2916 = vmatprep.subr.bf16.mxu0 %v3764_v62  ;;  %v275_v62 = vld [vmem:[%s5775_s1 + $0x7e0] sm:$0xff] }
  0xcd   :  { %2841 = vmatpush2.bf16.msra.mxu1 %v3777_v61  ;;  %v267_v61 = vld [vmem:[%s5775_s1 + $0x7a0] sm:$0xff] }
  0xce   :  { %2969 = vmatprep.subr.bf16.mxu1 %v4020_v63  ;;  %2896 = vmatmul.mubr.bf16.vlgmr.msra.gmra.mxu0 %v4898_v10  ;;  %v411_v63 = vld [vmem:[%s5775_s1 + $0xc20] sm:$0xff]  ;;  %v3892_v3 = vcombine.high %v267_v61, %v275_v62  ;;  %v3891_v9 = vcombine.low %v267_v61, %v275_v62 }
  0xcf   :  { %2917 = vmatpush1.bf16.msra.mxu0 %v3763_v4  ;;  %4050 = vmatprep.mubr.msk.bf16.mxu0 %vm2485_vm0, %v4924_v18  ;;  %v4036_v4 = vcombine.high %v411_v63, %v419_v0  ;;  %v155_v61 = vld [vmem:[%s5775_s1 + $0x420] sm:$0xff] }
  0xd0   :  { %2843 = vmatmul.mubr.bf16.vlgmr.msra.gmra.mxu1 %v4433_v20  ;;  %2918 = vmatprep.subr.bf16.mxu0 %v3748_v6  ;;  %v347_v20 = vld [vmem:[%s5775_s1 + $0xa20] sm:$0xff] }
  0xd1   :  { %2970 = vmatpush1.bf16.msra.mxu1 %v4019_v5  ;;  %2852 = vmatprep.mubr.bf16.mxu1 %v4444_v25  ;;  %v3987_v25 = vcombine.low %v363_v21, %v371_v11  ;;  %v3972_v23 = vcombine.high %v347_v20, %v355_v36  ;;  %v3971_v31 = vcombine.low %v347_v20, %v355_v36  ;;  %v251_v5 = vld [vmem:[%s5775_s1 + $0x720] sm:$0xff] }
  0xd2   :  { %2971 = vmatprep.subr.bf16.mxu1 %v4004_v7  ;;  %v259_v6 = vld [vmem:[%s5775_s1 + $0x760] sm:$0xff]  ;;  %v140_v7 = vld [vmem:[%s5775_s1 + $0x3a8] sm:$0xff]  ;;  %v4035_v21 = vcombine.low %v411_v63, %v419_v0 }
  0xd3   :  { %2919 = vmatpush1.bf16.msra.mxu0 %v3747_v12  ;;  %v3876_v11 = vcombine.high %v251_v5, %v259_v6  ;;  %v3766_v12 = vcombine.high %v140_v7, %v148_v8  ;;  %v3875_v17 = vcombine.low %v251_v5, %v259_v6  ;;  %v3765_v20 = vcombine.low %v140_v7, %v148_v8  ;;  %v163_v62 = vld [vmem:[%s5775_s1 + $0x460] sm:$0xff]  ;;  %v44_v0 = vld [vmem:[%s5775_s1 + $0xa8] sm:$0xff] }
  0xd4   :  { %2920 = vmatprep.subr.bf16.mxu0 %v3732_v14  ;;  %v243_v14 = vld [vmem:[%s5775_s1 + $0x6e0] sm:$0xff]  ;;  %v396_v6 = vld [vmem:[%s5775_s1 + $0xba8] sm:$0xff] }
  0xd5   :  { %2972 = vmatpush1.bf16.msra.mxu1 %v4003_v13  ;;  %v235_v13 = vld [vmem:[%s5775_s1 + $0x6a0] sm:$0xff]  ;;  %v404_v7 = vld [vmem:[%s5775_s1 + $0xbe8] sm:$0xff] }
  0xd6   :  { %2973 = vmatprep.subr.bf16.mxu1 %v3988_v15  ;;  %2906 = vmatmul.mubr.bf16.gmra.mxu0 %v4943_v29  ;;  %v124_v15 = vld [vmem:[%s5775_s1 + $0x328] sm:$0xff]  ;;  %v3860_v36 = vcombine.high %v235_v13, %v243_v14  ;;  %v3859_v26 = vcombine.low %v235_v13, %v243_v14  ;;  %v3779_v14 = vcombine.low %v155_v61, %v163_v62 }
  0xd7   :  { %2921 = vmatpush1.bf16.msra.mxu0 %v3731_v19  ;;  %2948 = vmatprep.mubr.bf16.mxu0 %v4964_v37  ;;  %v3750_v19 = vcombine.high %v124_v15, %v132_v16  ;;  %v3749_v41 = vcombine.low %v124_v15, %v132_v16 }
  0xd8   :  { %2853 = vmatmul.mubr.bf16.gmra.mxu1 %v4475_v44  ;;  %2922 = vmatprep.subr.bf16.mxu0 %v3716_v22  ;;  %v315_v44 = vld [vmem:[%s5775_s1 + $0x920] sm:$0xff] }
  0xd9   :  { %2974 = vmatpush1.bf16.msra.mxu1 %v3987_v25  ;;  %4051 = vmatprep.mubr.msk.bf16.mxu1 %vm2485_vm0, %v4813_v28  ;;  %v3940_v42 = vcombine.high %v315_v44, %v323_v35  ;;  %v3939_v49 = vcombine.low %v315_v44, %v323_v35  ;;  %v219_v25 = vld [vmem:[%s5775_s1 + $0x620] sm:$0xff] }
  0xda   :  { %2975 = vmatprep.subr.bf16.mxu1 %v3972_v23  ;;  %v227_v22 = vld [vmem:[%s5775_s1 + $0x660] sm:$0xff]  ;;  %v108_v23 = vld [vmem:[%s5775_s1 + $0x2a8] sm:$0xff] }
  0xdb   :  { %2923 = vmatpush1.bf16.msra.mxu0 %v3715_v30  ;;  %v3844_v27 = vcombine.high %v219_v25, %v227_v22  ;;  %v3734_v30 = vcombine.high %v108_v23, %v116_v24  ;;  %v3843_v34 = vcombine.low %v219_v25, %v227_v22  ;;  %v3733_v44 = vcombine.low %v108_v23, %v116_v24  ;;  %v276_v23 = vld [vmem:[%s5775_s1 + $0x7e8] sm:$0xff] }
  0xdc   :  { %2924 = vmatprep.subr.bf16.mxu0 %v3700_v32  ;;  %v211_v32 = vld [vmem:[%s5775_s1 + $0x5e0] sm:$0xff]  ;;  %v380_v24 = vld [vmem:[%s5775_s1 + $0xb28] sm:$0xff] }
  0xdd   :  { %2976 = vmatpush1.bf16.msra.mxu1 %v3971_v31  ;;  %v203_v31 = vld [vmem:[%s5775_s1 + $0x5a0] sm:$0xff] }
  0xde   :  { %2977 = vmatprep.subr.bf16.mxu1 %v3956_v60  ;;  %v92_v60 = vld [vmem:[%s5775_s1 + $0x228] sm:$0xff]  ;;  %v3828_v35 = vcombine.high %v203_v31, %v211_v32  ;;  %v3827_v46 = vcombine.low %v203_v31, %v211_v32  ;;  %v4021_v32 = vcombine.low %v396_v6, %v404_v7 }
  0xdf   :  { %2925 = vmatpush1.bf16.msra.mxu0 %v3699_v38  ;;  %v3718_v38 = vcombine.high %v92_v60, %v100_v33  ;;  %v3717_v47 = vcombine.low %v92_v60, %v100_v33 }
  0xe0   :  { %2926 = vmatprep.subr.bf16.mxu0 %v3684_v40  ;;  %v195_v40 = vld [vmem:[%s5775_s1 + $0x560] sm:$0xff] }
  0xe1   :  { %2978 = vmatpush1.bf16.msra.mxu1 %v3955_v39  ;;  %v187_v39 = vld [vmem:[%s5775_s1 + $0x520] sm:$0xff] }
  0xe2   :  { %2979 = vmatprep.subr.bf16.mxu1 %v3940_v42  ;;  %v3811_v55 = vcombine.low %v187_v39, %v195_v40 }
  0xe3   :  { %2927 = vmatpush1.bf16.msra.mxu0 %v3683_v48  ;;  %v3812_v48 = vcombine.high %v187_v39, %v195_v40 }
  0xe4   :  { %2928 = vmatprep.subr.bf16.mxu0 %v3668_v50  ;;  %v171_v50 = vld [vmem:[%s5775_s1 + $0x4a0] sm:$0xff] }
  0xe5   :  { %2980 = vmatpush1.bf16.msra.mxu1 %v3939_v49  ;;  %v3702_v49 = vcombine.high %v76_v43, %v84_v45 }
  0xe6   :  { %2981 = vmatprep.subr.bf16.mxu1 %v3924_v51  ;;  %v179_v51 = vld [vmem:[%s5775_s1 + $0x4e0] sm:$0xff] }
  0xe7   :  { %2929 = vmatpush1.bf16.msra.mxu0 %v3667_v56  ;;  %v3701_v56 = vcombine.low %v76_v43, %v84_v45  ;;  %v5137_v45 = vld [vmem:[%s5775_s1 + $0x768] sm:$0xff] }
  0xe8   :  { %2930 = vmatprep.subr.bf16.mxu0 %v3652_v58  ;;  %v5080_v58 = vpop.permute.xlu0 %429 }
  0xe9   :  { %2982 = vmatpush1.bf16.msra.mxu1 %v3923_v57  ;;  %v3796_v57 = vcombine.high %v171_v50, %v179_v51 }
  0xea   :  { %2983 = vmatprep.subr.bf16.mxu1 %v3908_v59  ;;  %v3686_v59 = vcombine.high %v60_v53, %v68_v54 }
  0xeb   :  { %2931 = vmatpush1.bf16.msra.mxu0 %v3651_v1  ;;  %v52_v1 = vld [vmem:[%s5775_s1 + $0xe8] sm:$0xff] }
  0xec   :  { %2932 = vmatprep.subr.bf16.mxu0 %v3892_v3  ;;  %v2579_v42 = vpop.f32.mrf.mxu1  ;;  %v3685_v3 = vcombine.low %v60_v53, %v68_v54  ;;  %v3670_v5 = vcombine.high %v44_v0, %v52_v1  ;;  %v5107_v13 = vpop.permute.xlu0 %434  ;;  %v3669_v16 = vcombine.low %v44_v0, %v52_v1  ;;  %v348_v1 = vld [vmem:[%s5775_s1 + $0xa28] sm:$0xff] }
  0xed   :  { %2984 = vmatpush1.bf16.msra.mxu1 %v3907_v2  ;;  %v3795_v2 = vcombine.low %v171_v50, %v179_v51 }
  0xee   :  { %2999 = vmatprep.subr.bf16.mxu1 %v4036_v4  ;;  %v2581_v52 = vpop.f32.mrf.mxu1  ;;  %v3780_v4 = vcombine.high %v155_v61, %v163_v62 }
  0xef   :  { %2933 = vmatpush2.bf16.msra.mxu0 %v3891_v9 }
  0xf0   :  { %2934 = vmatprep.subr.bf16.mxu0 %v3876_v11  ;;  %v2583_v63 = vpop.f32.mrf.mxu1  ;;  %v36_v11 = vld [vmem:[%s5775_s1 + $0x68] sm:$0xff] }
  0xf1   :  { %3000 = vmatpush2.bf16.msra.mxu1 %v4035_v21  ;;  %v28_v21 = vld [vmem:[%s5775_s1 + $0x28] sm:$0xff] }
  0xf2   :  { %3022 = vmatprep.subr.bf16.mxu1 %v3766_v12  ;;  %v2585_v8 = vpop.f32.mrf.mxu1  ;;  %v3654_v22 = vcombine.high %v28_v21, %v36_v11  ;;  %v3653_v33 = vcombine.low %v28_v21, %v36_v11 }
  0xf3   :  { %2935 = vmatpush2.bf16.msra.mxu0 %v3875_v17  ;;  %v4022_v17 = vcombine.high %v396_v6, %v404_v7  ;;  %v236_v6 = vld [vmem:[%s5775_s1 + $0x6a8] sm:$0xff] }
  0xf4   :  { %3002 = vmatmul.mubr.bf16.vlgmr.msra.gmra.mxu1 %v4898_v10  ;;  %2936 = vmatprep.subr.bf16.mxu0 %v3860_v36  ;;  %v2589_v36 = vpop.f32.mrf.mxu1  ;;  %v244_v7 = vld [vmem:[%s5775_s1 + $0x6e8] sm:$0xff] }
  0xf5   :  { %3023 = vmatpush1.bf16.msra.mxu1 %v3765_v20  ;;  %4052 = vmatprep.mubr.msk.bf16.mxu1 %vm2485_vm0, %v4924_v18  ;;  %v5112_v20 = vld [vmem:[%s5775_s1 + $0x7a8] sm:$0xff] }
  0xf6   :  { %3024 = vmatprep.subr.bf16.mxu1 %v3750_v19 }
  0xf7   :  { %2937 = vmatpush2.bf16.msra.mxu0 %v3859_v26  ;;  %v388_v26 = vld [vmem:[%s5775_s1 + $0xb68] sm:$0xff] }
  0xf8   :  { %2938 = vmatprep.subr.bf16.mxu0 %v3844_v27 }
  0xf9   :  { %3025 = vmatpush1.bf16.msra.mxu1 %v3749_v41  ;;  %v5124_v41 = vpop.permute.xlu1 %439 }
  0xfa   :  { %3026 = vmatprep.subr.bf16.mxu1 %v3734_v30 }
  0xfb   :  { %2939 = vmatpush2.bf16.msra.mxu0 %v3843_v34  ;;  %v3894_v34 = vcombine.high %v5112_v20, %v276_v23 }
  0xfc   :  { %3012 = vmatmul.mubr.bf16.gmra.mxu1 %v4943_v29  ;;  %2940 = vmatprep.subr.bf16.mxu0 %v3828_v35  ;;  %v5131_v35 = vld [vmem:[%s5775_s1 + $0x728] sm:$0xff] }
  0xfd   :  { %3027 = vmatpush1.bf16.msra.mxu1 %v3733_v44  ;;  %3054 = vmatprep.mubr.bf16.mxu1 %v4964_v37  ;;  %v4006_v44 = vcombine.high %v380_v24, %v388_v26  ;;  %v5152_v54 = vpop.permute.xlu1 %444 }
  0xfe   :  { %3028 = vmatprep.subr.bf16.mxu1 %v3718_v38  ;;  %v2591_v38 = vpop.f32.mrf.mxu1 }
  0xff   :  { %2941 = vmatpush2.bf16.msra.mxu0 %v3827_v46  ;;  %v364_v46 = vld [vmem:[%s5775_s1 + $0xaa8] sm:$0xff] }
 0x100   :  { %2942 = vmatprep.subr.bf16.mxu0 %v3812_v48  ;;  %v5148_v48 = vld [vmem:[%s5776_s0] ss:$16 sps:$4 sm:$0xff]   ;;  %v2593_v62 = vpop.f32.mrf.mxu1 }
 0x101   :  { %3029 = vmatpush1.bf16.msra.mxu1 %v3717_v47  ;;  %v372_v47 = vld [vmem:[%s5775_s1 + $0xae8] sm:$0xff] }
 0x102   :  { %3030 = vmatprep.subr.bf16.mxu1 %v3702_v49  ;;  %v4005_v49 = vcombine.low %v380_v24, %v388_v26  ;;  %v220_v24 = vld [vmem:[%s5775_s1 + $0x628] sm:$0xff] }
 0x103   :  { %2943 = vmatpush2.bf16.msra.mxu0 %v3811_v55  ;;  %v5157_v55 = vld [vmem:[%s5776_s0 + $0x24] ss:$16 sps:$4 sm:$0xff]   ;;  %v228_v26 = vld [vmem:[%s5775_s1 + $0x668] sm:$0xff] }
 0x104   :  { %2944 = vmatprep.subr.bf16.mxu0 %v3796_v57  ;;  %v3878_v57 = vcombine.high %v5131_v35, %v5137_v45 }
 0x105   :  { %3031 = vmatpush1.bf16.msra.mxu1 %v3701_v56  ;;  %v3893_v56 = vcombine.low %v5112_v20, %v276_v23  ;;  %v3862_v20 = vcombine.high %v236_v6, %v244_v7 }
 0x106   :  { %3032 = vmatprep.subr.bf16.mxu1 %v3686_v59  ;;  %v2526_v9 = vpop.f32.mrf.mxu0  ;;  %v3990_v59 = vcombine.high %v364_v46, %v372_v47 }
 0x107   :  { %v2527_v12 = vadd.f32 %v2526_v9, %v5080_v58  ;;  %2945 = vmatpush2.bf16.msra.mxu0 %v3795_v2  ;;  %v356_v2 = vld [vmem:[%s5775_s1 + $0xa68] sm:$0xff] }
 0x108   :  { %v2528_v15 = vpop.f32.mrf.mxu0  ;;  %2946 = vmatprep.subr.bf16.mxu0 %v3780_v4 }
 0x109   :  { %3033 = vmatpush1.bf16.msra.mxu1 %v3685_v3  ;;  %v2580_v19 = vadd.f32 %v2579_v42, %v2527_v12  ;;  %v2529_v25 = vadd.f32 %v2528_v15, %v5080_v58  ;;  %v3974_v15 = vcombine.high %v348_v1, %v356_v2 }
 0x10a   :  { %3034 = vmatprep.subr.bf16.mxu1 %v3670_v5  ;;  %v2530_v27 = vpop.f32.mrf.mxu0  ;;  %v3989_v5 = vcombine.low %v364_v46, %v372_v47 }
 0x10b   :  { %v2582_v30 = vadd.f32 %v2581_v52, %v2529_v25  ;;  %v2531_v31 = vadd.f32 %v2530_v27, %v5107_v13  ;;  %2947 = vmatpush2.bf16.msra.mxu0 %v3779_v14  ;;  %v3340_v39 = vmax.f32 %v2580_v19, 0.0  ;;  %v3877_v14 = vcombine.low %v5131_v35, %v5137_v45  ;;  %v340_v19 = vld [vmem:[%s5775_s1 + $0x9e8] sm:$0xff]  ;;  %v5201_v27 = vld [vmem:[%s5776_s0 + $0x20] ss:$16 sps:$4 sm:$0xff]  }
 0x10c   :  { %v2532_v60 = vpop.f32.mrf.mxu0  ;;  %3075 = vmatprep.subr.bf16.mxu0 %v4022_v17  ;;  %v2595_v17 = vpop.f32.mrf.mxu1  ;;  %v316_v35 = vld [vmem:[%s5775_s1 + $0x928] sm:$0xff]  ;;  %v3845_v45 = vcombine.low %v220_v24, %v228_v26 }
 0x10d   :  { %3035 = vmatpush1.bf16.msra.mxu1 %v3669_v16  ;;  %v3341_v40 = vmax.f32 %v2582_v30, 0.0  ;;  %v2584_v42 = vadd.f32 %v2583_v63, %v2531_v31  ;;  %v2533_v43 = vadd.f32 %v2532_v60, %v5107_v13  ;;  %v3973_v30 = vcombine.low %v348_v1, %v356_v2 }
 0x10e   :  { %3036 = vmatprep.subr.bf16.mxu1 %v3654_v22  ;;  %2949 = vmatmul.mubr.bf16.vlgmr.msra.gmra.mxu0 %v5148_v48  ;;  %v2536_v50 = vpop.f32.mrf.mxu0 }
 0x10f   :  { %v4091_v51 = vpack.c.bf16 %v3341_v40, %v3340_v39  ;;  %v2586_v52 = vadd.f32 %v2585_v8, %v2533_v43  ;;  %3076 = vmatpush1.bf16.msra.mxu0 %v4021_v32  ;;  %v2537_v53 = vadd.f32 %v2536_v50, %v5124_v41  ;;  %2958 = vmatprep.mubr.bf16.mxu0 %v5157_v55  ;;  %v3356_v63 = vmax.f32 %v2584_v42, 0.0  ;;  %v212_v40 = vld [vmem:[%s5775_s1 + $0x5e8] sm:$0xff] }
 0x110   :  { %3077 = vmatprep.subr.bf16.mxu0 %v4006_v44  ;;  %v2538_v61 = vpop.f32.mrf.mxu0  ;;  %v3846_v44 = vcombine.high %v220_v24, %v228_v26  ;;  %v308_v50 = vld [vmem:[%s5775_s1 + $0x8e8] sm:$0xff] }
 0x111   :  { %3037 = vmatpush1.bf16.msra.mxu1 %v3653_v33  ;;  %3596 = vst [vmem:[%s5778_s3] sm:$0xff] %v4091_v51  ;;  %v3357_v0 = vmax.f32 %v2586_v52, 0.0  ;;  %v2539_v3 = vadd.f32 %v2538_v61, %v5124_v41  ;;  %v2590_v4 = vadd.f32 %v2589_v36, %v2537_v53  ;;  %v332_v36 = vld [vmem:[%s5775_s1 + $0x9a8] sm:$0xff]  ;;  %v3861_v33 = vcombine.low %v236_v6, %v244_v7 }
 0x112   :  { %3038 = vmatprep.subr.bf16.mxu1 %v3894_v34  ;;  %v2540_v8 = vpop.f32.mrf.mxu0  ;;  %v3958_v34 = vcombine.high %v332_v36, %v340_v19  ;;  %v3957_v42 = vcombine.low %v332_v36, %v340_v19  ;;  %v188_v51 = vld [vmem:[%s5775_s1 + $0x528] sm:$0xff] }
 0x113   :  { %v4099_v9 = vpack.c.bf16 %v3357_v0, %v3356_v63  ;;  %3078 = vmatpush1.bf16.msra.mxu0 %v4005_v49  ;;  %v3372_v21 = vmax.f32 %v2590_v4, 0.0  ;;  %v2592_v11 = vadd.f32 %v2591_v38, %v2539_v3  ;;  %v2541_v12 = vadd.f32 %v2540_v8, %v5152_v54  ;;  %v324_v38 = vld [vmem:[%s5775_s1 + $0x968] sm:$0xff] }
 0x114   :  { %3079 = vmatprep.subr.bf16.mxu0 %v3990_v59  ;;  %v2542_v16 = vpop.f32.mrf.mxu0  ;;  %v3942_v46 = vcombine.high %v316_v35, %v324_v38  ;;  %v300_v49 = vld [vmem:[%s5775_s1 + $0x8a8] sm:$0xff]  ;;  %v3941_v53 = vcombine.low %v316_v35, %v324_v38  ;;  %v389_v35 = vld [vmem:[%s5775_s1 + $0xb70] sm:$0xff] }
 0x115   :  { %3039 = vmatpush2.bf16.msra.mxu1 %v3893_v56  ;;  %3607 = vst [vmem:[%s5778_s3 + $0x40] sm:$0xff] %v4099_v9  ;;  %v3373_v25 = vmax.f32 %v2592_v11, 0.0  ;;  %v2543_v22 = vadd.f32 %v2542_v16, %v5152_v54  ;;  %v2594_v23 = vadd.f32 %v2593_v62, %v2541_v12  ;;  %v196_v52 = vld [vmem:[%s5775_s1 + $0x568] sm:$0xff]  ;;  %v3925_v1 = vcombine.low %v300_v49, %v308_v50 }
 0x116   :  { %3040 = vmatprep.subr.bf16.mxu1 %v3878_v57  ;;  %2959 = vmatmul.mubr.bf16.gmra.mxu0 %v5201_v27  ;;  %v3926_v57 = vcombine.high %v300_v49, %v308_v50  ;;  %v3814_v59 = vcombine.high %v188_v51, %v196_v52  ;;  %v284_v61 = vld [vmem:[%s5775_s1 + $0x828] sm:$0xff]  ;;  %v3813_v2 = vcombine.low %v188_v51, %v196_v52  ;;  %v117_v49 = vld [vmem:[%s5775_s1 + $0x2f0] sm:$0xff] }
 0x117   :  { %3080 = vmatpush1.bf16.msra.mxu0 %v3989_v5  ;;  %v4107_v31 = vpack.c.bf16 %v3373_v25, %v3372_v21  ;;  %v3388_v32 = vmax.f32 %v2594_v23, 0.0  ;;  %v2596_v60 = vadd.f32 %v2595_v17, %v2543_v22  ;;  %4053 = vmatprep.mubr.msk.bf16.mxu0 %vm2485_vm0, %v4813_v28  ;;  %v204_v28 = vld [vmem:[%s5775_s1 + $0x5a8] sm:$0xff]  ;;  %v397_v17 = vld [vmem:[%s5775_s1 + $0xbb0] sm:$0xff] }
 0x118   :  { %3081 = vmatprep.subr.bf16.mxu0 %v3974_v15  ;;  %v3830_v47 = vcombine.high %v204_v28, %v212_v40  ;;  %v3829_v56 = vcombine.low %v204_v28, %v212_v40  ;;  %v292_v62 = vld [vmem:[%s5775_s1 + $0x868] sm:$0xff]  ;;  %v149_v15 = vld [vmem:[%s5775_s1 + $0x3f0] sm:$0xff] }
 0x119   :  { %3041 = vmatpush2.bf16.msra.mxu1 %v3877_v14  ;;  %3615 = vst [vmem:[%s5778_s3 + $0x80] sm:$0xff] %v4107_v31  ;;  %v3389_v39 = vmax.f32 %v2596_v60, 0.0  ;;  %v172_v63 = vld [vmem:[%s5775_s1 + $0x4a8] sm:$0xff]  ;;  %v3910_v3 = vcombine.high %v284_v61, %v292_v62  ;;  %v3909_v9 = vcombine.low %v284_v61, %v292_v62  ;;  %v141_v14 = vld [vmem:[%s5775_s1 + $0x3b0] sm:$0xff] }
 0x11a   :  { %3042 = vmatprep.subr.bf16.mxu1 %v3862_v20  ;;  %v180_v0 = vld [vmem:[%s5775_s1 + $0x4e8] sm:$0xff]  ;;  %v405_v20 = vld [vmem:[%s5775_s1 + $0xbf0] sm:$0xff]  ;;  %v3768_v24 = vcombine.high %v141_v14, %v149_v15 }
 0x11b   :  { %3082 = vmatpush1.bf16.msra.mxu0 %v3973_v30  ;;  %v4115_v43 = vpack.c.bf16 %v3389_v39, %v3388_v32  ;;  %v3798_v4 = vcombine.high %v172_v63, %v180_v0  ;;  %v412_v5 = vld [vmem:[%s5775_s1 + $0xc28] sm:$0xff]  ;;  %v3797_v21 = vcombine.low %v172_v63, %v180_v0  ;;  %v4024_v30 = vcombine.high %v397_v17, %v405_v20  ;;  %v125_v31 = vld [vmem:[%s5775_s1 + $0x330] sm:$0xff] }
 0x11c   :  { %3083 = vmatprep.subr.bf16.mxu0 %v3958_v34  ;;  %v420_v6 = vld [vmem:[%s5775_s1 + $0xc68] sm:$0xff]  ;;  %v133_v32 = vld [vmem:[%s5775_s1 + $0x370] sm:$0xff]  ;;  %v3767_v39 = vcombine.low %v141_v14, %v149_v15  ;;  %v4023_v28 = vcombine.low %v397_v17, %v405_v20 }
 0x11d   :  { %3043 = vmatpush2.bf16.msra.mxu1 %v3861_v33  ;;  %3623 = vst [vmem:[%s5778_s3 + $0xc0] sm:$0xff] %v4115_v43  ;;  %v156_v7 = vld [vmem:[%s5775_s1 + $0x428] sm:$0xff]  ;;  %v4038_v11 = vcombine.high %v412_v5, %v420_v6  ;;  %v4037_v19 = vcombine.low %v412_v5, %v420_v6  ;;  %v3751_v62 = vcombine.low %v125_v31, %v133_v32 }
 0x11e   :  { %3044 = vmatprep.subr.bf16.mxu1 %v3846_v44  ;;  %v164_v8 = vld [vmem:[%s5775_s1 + $0x468] sm:$0xff]  ;;  %v381_v44 = vld [vmem:[%s5775_s1 + $0xb30] sm:$0xff] }
 0x11f   :  { %3084 = vmatpush1.bf16.msra.mxu0 %v3957_v42  ;;  %v3782_v12 = vcombine.high %v156_v7, %v164_v8  ;;  %v3781_v23 = vcombine.low %v156_v7, %v164_v8  ;;  %v4008_v51 = vcombine.high %v381_v44, %v389_v35  ;;  %v4007_v63 = vcombine.low %v381_v44, %v389_v35 }
 0x120   :  { %3085 = vmatprep.subr.bf16.mxu0 %v3942_v46  ;;  %v3752_v46 = vcombine.high %v125_v31, %v133_v32 }
 0x121   :  { %3045 = vmatpush2.bf16.msra.mxu1 %v3845_v45 }
 0x122   :  { %3046 = vmatprep.subr.bf16.mxu1 %v3830_v47  ;;  %v5290_v47 = vld [vmem:[%s5775_s1 + $0x2b0] sm:$0xff] }
 0x123   :  { %3086 = vmatpush1.bf16.msra.mxu0 %v3941_v53  ;;  %v3736_v0 = vcombine.high %v5290_v47, %v117_v49  ;;  %v3735_v17 = vcombine.low %v5290_v47, %v117_v49  ;;  %v5354_v47 = vld [vmem:[%s5776_s0 + $0xc] ss:$16 sps:$4 sm:$0xff]   ;;  %v317_v49 = vld [vmem:[%s5775_s1 + $0x930] sm:$0xff] }
 0x124   :  { %3087 = vmatprep.subr.bf16.mxu0 %v3926_v57  ;;  %v365_v57 = vld [vmem:[%s5775_s1 + $0xab0] sm:$0xff] }
 0x125   :  { %3047 = vmatpush2.bf16.msra.mxu1 %v3829_v56 }
 0x126   :  { %3048 = vmatprep.subr.bf16.mxu1 %v3814_v59  ;;  %v373_v59 = vld [vmem:[%s5775_s1 + $0xaf0] sm:$0xff] }
 0x127   :  { %3088 = vmatpush1.bf16.msra.mxu0 %v3925_v1  ;;  %v3992_v7 = vcombine.high %v365_v57, %v373_v59  ;;  %v3991_v20 = vcombine.low %v365_v57, %v373_v59 }
 0x128   :  { %3089 = vmatprep.subr.bf16.mxu0 %v3910_v3 }
 0x129   :  { %3049 = vmatpush2.bf16.msra.mxu1 %v3813_v2 }
 0x12a   :  { %3050 = vmatprep.subr.bf16.mxu1 %v3798_v4  ;;  %v2685_v16 = vpop.f32.mrf.mxu0  ;;  %v101_v4 = vld [vmem:[%s5775_s1 + $0x270] sm:$0xff] }
 0x12b   :  { %3090 = vmatpush1.bf16.msra.mxu0 %v3909_v9 }
 0x12c   :  { %v2632_v36 = vpop.f32.mrf.mxu1  ;;  %v2687_v22 = vpop.f32.mrf.mxu0  ;;  %3105 = vmatprep.subr.bf16.mxu0 %v4038_v11  ;;  %v349_v11 = vld [vmem:[%s5775_s1 + $0xa30] sm:$0xff] }
 0x12d   :  { %v2633_v25 = vadd.f32 %v2632_v36, %v5080_v58  ;;  %3051 = vmatpush2.bf16.msra.mxu1 %v3797_v21 }
 0x12e   :  { %v2634_v26 = vpop.f32.mrf.mxu1  ;;  %3052 = vmatprep.subr.bf16.mxu1 %v3782_v12  ;;  %v2689_v34 = vpop.f32.mrf.mxu0  ;;  %v357_v12 = vld [vmem:[%s5775_s1 + $0xa70] sm:$0xff] }
 0x12f   :  { %v2686_v60 = vadd.f32 %v2685_v16, %v2633_v25  ;;  %v2635_v33 = vadd.f32 %v2634_v26, %v5080_v58  ;;  %3106 = vmatpush2.bf16.msra.mxu0 %v4037_v19  ;;  %v3976_v26 = vcombine.high %v349_v11, %v357_v12 }
 0x130   :  { %v2636_v38 = vpop.f32.mrf.mxu1  ;;  %v2691_v45 = vpop.f32.mrf.mxu0  ;;  %3128 = vmatprep.subr.bf16.mxu0 %v3768_v24 }
 0x131   :  { %v3342_v40 = vmax.f32 %v2686_v60, 0.0  ;;  %v2688_v42 = vadd.f32 %v2687_v22, %v2635_v33  ;;  %v2637_v43 = vadd.f32 %v2636_v38, %v5107_v13  ;;  %3053 = vmatpush2.bf16.msra.mxu1 %v3781_v23  ;;  %v333_v60 = vld [vmem:[%s5775_s1 + $0x9b0] sm:$0xff] }
 0x132   :  { %v2638_v50 = vpop.f32.mrf.mxu1  ;;  %3181 = vmatprep.subr.bf16.mxu1 %v4024_v30  ;;  %3108 = vmatmul.mubr.bf16.vlgmr.msra.gmra.mxu0 %v4898_v10  ;;  %v2695_v61 = vpop.f32.mrf.mxu0  ;;  %v93_v10 = vld [vmem:[%s5775_s1 + $0x230] sm:$0xff] }
 0x133   :  { %v3343_v52 = vmax.f32 %v2688_v42, 0.0  ;;  %v2690_v53 = vadd.f32 %v2689_v34, %v2637_v43  ;;  %v2639_v56 = vadd.f32 %v2638_v50, %v5107_v13  ;;  %3129 = vmatpush1.bf16.msra.mxu0 %v3767_v39  ;;  %4054 = vmatprep.mubr.msk.bf16.mxu0 %vm2485_vm0, %v4924_v18  ;;  %v3720_v36 = vcombine.high %v93_v10, %v101_v4  ;;  %v77_v30 = vld [vmem:[%s5775_s1 + $0x1b0] sm:$0xff] }
 0x134   :  { %3055 = vmatmul.mubr.bf16.vlgmr.msra.gmra.mxu1 %v5148_v48  ;;  %v2642_v1 = vpop.f32.mrf.mxu1  ;;  %3130 = vmatprep.subr.bf16.mxu0 %v3752_v46  ;;  %v2697_v6 = vpop.f32.mrf.mxu0  ;;  %v85_v18 = vld [vmem:[%s5775_s1 + $0x1f0] sm:$0xff]  ;;  %v3719_v38 = vcombine.low %v93_v10, %v101_v4  ;;  %v3975_v39 = vcombine.low %v349_v11, %v357_v12 }
 0x135   :  { %v4092_v2 = vpack.c.bf16 %v3343_v52, %v3342_v40  ;;  %v2692_v3 = vadd.f32 %v2691_v45, %v2639_v56  ;;  %3182 = vmatpush1.bf16.msra.mxu1 %v4023_v28  ;;  %v2643_v5 = vadd.f32 %v2642_v1, %v5124_v41  ;;  %3064 = vmatprep.mubr.bf16.mxu1 %v5157_v55  ;;  %v3358_v9 = vmax.f32 %v2690_v53, 0.0  ;;  %v341_v33 = vld [vmem:[%s5775_s1 + $0x9f0] sm:$0xff] }
 0x136   :  { %3183 = vmatprep.subr.bf16.mxu1 %v4008_v51  ;;  %v2644_v8 = vpop.f32.mrf.mxu1  ;;  %v2699_v16 = vpop.f32.mrf.mxu0  ;;  %v3704_v28 = vcombine.high %v77_v30, %v85_v18  ;;  %v3960_v45 = vcombine.high %v333_v60, %v341_v33  ;;  %v61_v46 = vld [vmem:[%s5775_s1 + $0x130] sm:$0xff]  ;;  %v3703_v52 = vcombine.low %v77_v30, %v85_v18  ;;  %v3959_v53 = vcombine.low %v333_v60, %v341_v33  ;;  %v126_v60 = vld [vmem:[%s5775_s1 + $0x338] sm:$0xff] }
 0x137   :  { %3597 = vst [vmem:[%s5778_s3 + $0x8] sm:$0xff] %v4092_v2  ;;  %v3359_v21 = vmax.f32 %v2692_v3, 0.0  ;;  %v2645_v14 = vadd.f32 %v2644_v8, %v5124_v41  ;;  %v2696_v15 = vadd.f32 %v2695_v61, %v2643_v5  ;;  %3131 = vmatpush1.bf16.msra.mxu0 %v3751_v62  ;;  %v325_v50 = vld [vmem:[%s5775_s1 + $0x970] sm:$0xff]  ;;  %v134_v33 = vld [vmem:[%s5775_s1 + $0x378] sm:$0xff] }
 0x138   :  { %v2646_v19 = vpop.f32.mrf.mxu1  ;;  %3132 = vmatprep.subr.bf16.mxu0 %v3736_v0  ;;  %v2701_v32 = vpop.f32.mrf.mxu0  ;;  %v3944_v59 = vcombine.high %v317_v49, %v325_v50  ;;  %v45_v61 = vld [vmem:[%s5775_s1 + $0xb0] sm:$0xff]  ;;  %v3943_v1 = vcombine.low %v317_v49, %v325_v50 }
 0x139   :  { %v4100_v25 = vpack.c.bf16 %v3359_v21, %v3358_v9  ;;  %3184 = vmatpush1.bf16.msra.mxu1 %v4007_v63  ;;  %v3374_v22 = vmax.f32 %v2696_v15, 0.0  ;;  %v2647_v23 = vadd.f32 %v2646_v19, %v5152_v54  ;;  %v2698_v24 = vadd.f32 %v2697_v6, %v2645_v14  ;;  %v53_v62 = vld [vmem:[%s5775_s1 + $0xf0] sm:$0xff] }
 0x13a   :  { %3185 = vmatprep.subr.bf16.mxu1 %v3992_v7  ;;  %v2648_v31 = vpop.f32.mrf.mxu1  ;;  %3118 = vmatmul.mubr.bf16.gmra.mxu0 %v4943_v29  ;;  %v69_v29 = vld [vmem:[%s5775_s1 + $0x170] sm:$0xff]  ;;  %v3672_v2 = vcombine.high %v45_v61, %v53_v62  ;;  %v3671_v7 = vcombine.low %v45_v61, %v53_v62 }
 0x13b   :  { %3608 = vst [vmem:[%s5778_s3 + $0x48] sm:$0xff] %v4100_v25  ;;  %v3375_v34 = vmax.f32 %v2698_v24, 0.0  ;;  %v2649_v44 = vadd.f32 %v2648_v31, %v5152_v54  ;;  %v2700_v35 = vadd.f32 %v2699_v16, %v2647_v23  ;;  %3133 = vmatpush1.bf16.msra.mxu0 %v3735_v17  ;;  %3160 = vmatprep.mubr.bf16.mxu0 %v4964_v37  ;;  %v301_v37 = vld [vmem:[%s5775_s1 + $0x8b0] sm:$0xff]  ;;  %v150_v23 = vld [vmem:[%s5775_s1 + $0x3f8] sm:$0xff] }
 0x13c   :  { %3065 = vmatmul.mubr.bf16.gmra.mxu1 %v5201_v27  ;;  %3134 = vmatprep.subr.bf16.mxu0 %v3720_v36  ;;  %v3688_v56 = vcombine.high %v61_v46, %v69_v29  ;;  %v309_v63 = vld [vmem:[%s5775_s1 + $0x8f0] sm:$0xff]  ;;  %v3687_v0 = vcombine.low %v61_v46, %v69_v29  ;;  %v3753_v46 = vcombine.low %v126_v60, %v134_v33 }
 0x13d   :  { %3186 = vmatpush1.bf16.msra.mxu1 %v3991_v20  ;;  %v4108_v40 = vpack.c.bf16 %v3375_v34, %v3374_v22  ;;  %v3390_v42 = vmax.f32 %v2700_v35, 0.0  ;;  %v2702_v43 = vadd.f32 %v2701_v32, %v2649_v44  ;;  %4055 = vmatprep.mubr.msk.bf16.mxu1 %vm2485_vm0, %v5354_v47  ;;  %v3928_v3 = vcombine.high %v301_v37, %v309_v63  ;;  %v29_v10 = vld [vmem:[%s5775_s1 + $0x30] sm:$0xff]  ;;  %v142_v22 = vld [vmem:[%s5775_s1 + $0x3b8] sm:$0xff] }
 0x13e   :  { %3187 = vmatprep.subr.bf16.mxu1 %v3976_v26  ;;  %v37_v4 = vld [vmem:[%s5775_s1 + $0x70] sm:$0xff]  ;;  %v3927_v8 = vcombine.low %v301_v37, %v309_v63  ;;  %v3770_v18 = vcombine.high %v142_v22, %v150_v23  ;;  %v3769_v44 = vcombine.low %v142_v22, %v150_v23  ;;  %v54_v22 = vld [vmem:[%s5775_s1 + $0xf8] sm:$0xff] }
 0x13f   :  { %3616 = vst [vmem:[%s5778_s3 + $0x88] sm:$0xff] %v4108_v40  ;;  %v3391_v51 = vmax.f32 %v2702_v43, 0.0  ;;  %3135 = vmatpush1.bf16.msra.mxu0 %v3719_v38  ;;  %v285_v5 = vld [vmem:[%s5775_s1 + $0x830] sm:$0xff]  ;;  %v3656_v9 = vcombine.high %v29_v10, %v37_v4  ;;  %v3655_v16 = vcombine.low %v29_v10, %v37_v4  ;;  %v3754_v38 = vcombine.high %v126_v60, %v134_v33  ;;  %v110_v40 = vld [vmem:[%s5775_s1 + $0x2b8] sm:$0xff] }
 0x140   :  { %3136 = vmatprep.subr.bf16.mxu0 %v3704_v28  ;;  %v293_v6 = vld [vmem:[%s5775_s1 + $0x870] sm:$0xff]  ;;  %v5446_v43 = vld [vmem:[%s5776_s0 + $0x8] ss:$16 sps:$4 sm:$0xff]  }
 0x141   :  { %3188 = vmatpush1.bf16.msra.mxu1 %v3975_v39  ;;  %v4116_v57 = vpack.c.bf16 %v3391_v51, %v3390_v42  ;;  %v3912_v21 = vcombine.high %v285_v5, %v293_v6  ;;  %v269_v11 = vld [vmem:[%s5775_s1 + $0x7b0] sm:$0xff]  ;;  %v3911_v17 = vcombine.low %v285_v5, %v293_v6  ;;  %v118_v42 = vld [vmem:[%s5775_s1 + $0x2f8] sm:$0xff] }
 0x142   :  { %3189 = vmatprep.subr.bf16.mxu1 %v3960_v45  ;;  %v277_v12 = vld [vmem:[%s5775_s1 + $0x7f0] sm:$0xff]  ;;  %v3738_v49 = vcombine.high %v110_v40, %v118_v42  ;;  %v5483_v10 = vld [vmem:[%s5776_s0 + $0x28] ss:$16 sps:$4 sm:$0xff]  }
 0x143   :  { %3624 = vst [vmem:[%s5778_s3 + $0xc8] sm:$0xff] %v4116_v57  ;;  %3137 = vmatpush1.bf16.msra.mxu0 %v3703_v52  ;;  %v413_v14 = vld [vmem:[%s5775_s1 + $0xc30] sm:$0xff]  ;;  %v3896_v20 = vcombine.high %v269_v11, %v277_v12  ;;  %v3895_v24 = vcombine.low %v269_v11, %v277_v12  ;;  %v5458_v52 = vld [vmem:[%s5776_s0 + $0x2c] ss:$16 sps:$4 sm:$0xff]  }
 0x144   :  { %3138 = vmatprep.subr.bf16.mxu0 %v3688_v56  ;;  %v421_v15 = vld [vmem:[%s5775_s1 + $0xc70] sm:$0xff]  ;;  %v102_v56 = vld [vmem:[%s5775_s1 + $0x278] sm:$0xff] }
 0x145   :  { %3190 = vmatpush1.bf16.msra.mxu1 %v3959_v53  ;;  %v4040_v36 = vcombine.high %v413_v14, %v421_v15  ;;  %v253_v19 = vld [vmem:[%s5775_s1 + $0x730] sm:$0xff]  ;;  %v4039_v26 = vcombine.low %v413_v14, %v421_v15  ;;  %v94_v53 = vld [vmem:[%s5775_s1 + $0x238] sm:$0xff] }
 0x146   :  { %3191 = vmatprep.subr.bf16.mxu1 %v3944_v59  ;;  %v261_v25 = vld [vmem:[%s5775_s1 + $0x770] sm:$0xff]  ;;  %v3737_v59 = vcombine.low %v110_v40, %v118_v42  ;;  %v3722_v62 = vcombine.high %v94_v53, %v102_v56  ;;  %v3721_v4 = vcombine.low %v94_v53, %v102_v56  ;;  %v62_v11 = vld [vmem:[%s5775_s1 + $0x138] sm:$0xff] }
 0x147   :  { %3139 = vmatpush1.bf16.msra.mxu0 %v3687_v0  ;;  %v3880_v30 = vcombine.high %v253_v19, %v261_v25  ;;  %v237_v31 = vld [vmem:[%s5775_s1 + $0x6b0] sm:$0xff]  ;;  %v3879_v34 = vcombine.low %v253_v19, %v261_v25  ;;  %v70_v12 = vld [vmem:[%s5775_s1 + $0x178] sm:$0xff] }
 0x148   :  { %3140 = vmatprep.subr.bf16.mxu0 %v3672_v2  ;;  %v245_v32 = vld [vmem:[%s5775_s1 + $0x6f0] sm:$0xff]  ;;  %v86_v2 = vld [vmem:[%s5775_s1 + $0x1f8] sm:$0xff] }
 0x149   :  { %3192 = vmatpush1.bf16.msra.mxu1 %v3943_v1  ;;  %v3864_v35 = vcombine.high %v237_v31, %v245_v32  ;;  %v221_v39 = vld [vmem:[%s5775_s1 + $0x630] sm:$0xff]  ;;  %v3863_v45 = vcombine.low %v237_v31, %v245_v32  ;;  %v78_v1 = vld [vmem:[%s5775_s1 + $0x1b8] sm:$0xff] }
 0x14a   :  { %3193 = vmatprep.subr.bf16.mxu1 %v3928_v3  ;;  %v229_v28 = vld [vmem:[%s5775_s1 + $0x670] sm:$0xff]  ;;  %v3706_v6 = vcombine.high %v78_v1, %v86_v2  ;;  %v3705_v15 = vcombine.low %v78_v1, %v86_v2  ;;  %v46_v25 = vld [vmem:[%s5775_s1 + $0xb8] sm:$0xff] }
 0x14b   :  { %3141 = vmatpush1.bf16.msra.mxu0 %v3671_v7  ;;  %v3848_v29 = vcombine.high %v221_v39, %v229_v28  ;;  %v205_v50 = vld [vmem:[%s5775_s1 + $0x5b0] sm:$0xff]  ;;  %v3847_v57 = vcombine.low %v221_v39, %v229_v28  ;;  %v406_v31 = vld [vmem:[%s5775_s1 + $0xbf8] sm:$0xff]  ;;  %v3673_v39 = vcombine.low %v46_v25, %v54_v22 }
 0x14c   :  { %3142 = vmatprep.subr.bf16.mxu0 %v3656_v9  ;;  %v213_v51 = vld [vmem:[%s5775_s1 + $0x5f0] sm:$0xff]  ;;  %v30_v33 = vld [vmem:[%s5775_s1 + $0x38] sm:$0xff] }
 0x14d   :  { %3194 = vmatpush1.bf16.msra.mxu1 %v3927_v8  ;;  %v3832_v61 = vcombine.high %v205_v50, %v213_v51  ;;  %v189_v37 = vld [vmem:[%s5775_s1 + $0x530] sm:$0xff]  ;;  %v3831_v3 = vcombine.low %v205_v50, %v213_v51  ;;  %v270_v40 = vld [vmem:[%s5775_s1 + $0x7b8] sm:$0xff] }
 0x14e   :  { %3195 = vmatprep.subr.bf16.mxu1 %v3912_v21  ;;  %v197_v63 = vld [vmem:[%s5775_s1 + $0x570] sm:$0xff]  ;;  %v382_v50 = vld [vmem:[%s5775_s1 + $0xb38] sm:$0xff] }
 0x14f   :  { %3143 = vmatpush1.bf16.msra.mxu0 %v3655_v16  ;;  %v3816_v5 = vcombine.high %v189_v37, %v197_v63  ;;  %v173_v7 = vld [vmem:[%s5775_s1 + $0x4b0] sm:$0xff]  ;;  %v3815_v14 = vcombine.low %v189_v37, %v197_v63  ;;  %v390_v51 = vld [vmem:[%s5775_s1 + $0xb78] sm:$0xff] }
 0x150   :  { %3144 = vmatprep.subr.bf16.mxu0 %v3896_v20  ;;  %v2791_v0 = vpop.f32.mrf.mxu1  ;;  %v181_v8 = vld [vmem:[%s5775_s1 + $0x4f0] sm:$0xff]  ;;  %v4010_v63 = vcombine.high %v382_v50, %v390_v51 }
 0x151   :  { %3196 = vmatpush1.bf16.msra.mxu1 %v3911_v17  ;;  %v4150_v9 = vld [vmem:[%s5776_s0 + $0x4] ss:$16 sps:$4 sm:$0xff]   ;;  %v3800_v16 = vcombine.high %v173_v7, %v181_v8  ;;  %v3690_v17 = vcombine.high %v62_v11, %v70_v12  ;;  %v3799_v23 = vcombine.low %v173_v7, %v181_v8  ;;  %v366_v7 = vld [vmem:[%s5775_s1 + $0xab8] sm:$0xff] }
 0x152   :  { %3211 = vmatprep.subr.bf16.mxu1 %v4040_v36  ;;  %v2793_v21 = vpop.f32.mrf.mxu1  ;;  %v157_v20 = vld [vmem:[%s5775_s1 + $0x430] sm:$0xff]  ;;  %v374_v8 = vld [vmem:[%s5775_s1 + $0xaf8] sm:$0xff] }
 0x153   :  { %3145 = vmatpush2.bf16.msra.mxu0 %v3895_v24  ;;  %v165_v36 = vld [vmem:[%s5775_s1 + $0x470] sm:$0xff]  ;;  %v3689_v24 = vcombine.low %v62_v11, %v70_v12 }
 0x154   :  { %3146 = vmatprep.subr.bf16.mxu0 %v3880_v30  ;;  %v2795_v19 = vpop.f32.mrf.mxu1  ;;  %v3674_v30 = vcombine.high %v46_v25, %v54_v22  ;;  %v350_v25 = vld [vmem:[%s5775_s1 + $0xa38] sm:$0xff] }
 0x155   :  { %3212 = vmatpush2.bf16.msra.mxu1 %v4039_v26  ;;  %v3784_v26 = vcombine.high %v157_v20, %v165_v36 }
 0x156   :  { %3234 = vmatprep.subr.bf16.mxu1 %v3770_v18  ;;  %v398_v18 = vld [vmem:[%s5775_s1 + $0xbb8] sm:$0xff]  ;;  %v2797_v32 = vpop.f32.mrf.mxu1 }
 0x157   :  { %3147 = vmatpush2.bf16.msra.mxu0 %v3879_v34  ;;  %v38_v34 = vld [vmem:[%s5775_s1 + $0x78] sm:$0xff]  ;;  %v4026_v28 = vcombine.high %v398_v18, %v406_v31 }
 0x158   :  { %3214 = vmatmul.mubr.bf16.vlgmr.msra.gmra.mxu1 %v5446_v43  ;;  %3148 = vmatprep.subr.bf16.mxu0 %v3864_v35  ;;  %v3783_v35 = vcombine.low %v157_v20, %v165_v36  ;;  %v2801_v42 = vpop.f32.mrf.mxu1 }
 0x159   :  { %3235 = vmatpush1.bf16.msra.mxu1 %v3769_v44  ;;  %4056 = vmatprep.mubr.msk.bf16.mxu1 %vm2485_vm0, %v5458_v52 }
 0x15a   :  { %3236 = vmatprep.subr.bf16.mxu1 %v3754_v38  ;;  %v2803_v1 = vpop.f32.mrf.mxu1 }
 0x15b   :  { %3149 = vmatpush2.bf16.msra.mxu0 %v3863_v45 }
 0x15c   :  { %3150 = vmatprep.subr.bf16.mxu0 %v3848_v29  ;;  %v3658_v29 = vcombine.high %v30_v33, %v38_v34  ;;  %v2805_v36 = vpop.f32.mrf.mxu1 }
 0x15d   :  { %3237 = vmatpush1.bf16.msra.mxu1 %v3753_v46 }
 0x15e   :  { %3238 = vmatprep.subr.bf16.mxu1 %v3738_v49  ;;  %v278_v49 = vld [vmem:[%s5775_s1 + $0x7f8] sm:$0xff] }
 0x15f   :  { %3151 = vmatpush2.bf16.msra.mxu0 %v3847_v57  ;;  %v3898_v37 = vcombine.high %v270_v40, %v278_v49 }
 0x160   :  { %3224 = vmatmul.mubr.bf16.gmra.mxu1 %v5483_v10  ;;  %3152 = vmatprep.subr.bf16.mxu0 %v3832_v61 }
 0x161   :  { %3239 = vmatpush1.bf16.msra.mxu1 %v3737_v59  ;;  %3266 = vmatprep.mubr.bf16.mxu1 %v4150_v9  ;;  %v4025_v59 = vcombine.low %v398_v18, %v406_v31  ;;  %v4009_v9 = vcombine.low %v382_v50, %v390_v51 }
 0x162   :  { %3240 = vmatprep.subr.bf16.mxu1 %v3722_v62  ;;  %v3657_v62 = vcombine.low %v30_v33, %v38_v34 }
 0x163   :  { %3153 = vmatpush2.bf16.msra.mxu0 %v3831_v3 }
 0x164   :  { %3154 = vmatprep.subr.bf16.mxu0 %v3816_v5 }
 0x165   :  { %3241 = vmatpush1.bf16.msra.mxu1 %v3721_v4 }
 0x166   :  { %3242 = vmatprep.subr.bf16.mxu1 %v3706_v6  ;;  %v262_v6 = vld [vmem:[%s5775_s1 + $0x778] sm:$0xff] }
 0x167   :  { %3155 = vmatpush2.bf16.msra.mxu0 %v3815_v14 }
 0x168   :  { %3156 = vmatprep.subr.bf16.mxu0 %v3800_v16 }
 0x169   :  { %3243 = vmatpush1.bf16.msra.mxu1 %v3705_v15  ;;  %v3897_v15 = vcombine.low %v270_v40, %v278_v49  ;;  %v342_v40 = vld [vmem:[%s5775_s1 + $0x9f8] sm:$0xff] }
 0x16a   :  { %3244 = vmatprep.subr.bf16.mxu1 %v3690_v17  ;;  %v2738_v60 = vpop.f32.mrf.mxu0  ;;  %v3994_v17 = vcombine.high %v366_v7, %v374_v8  ;;  %v230_v49 = vld [vmem:[%s5775_s1 + $0x678] sm:$0xff] }
 0x16b   :  { %v2739_v44 = vadd.f32 %v2738_v60, %v5080_v58  ;;  %3157 = vmatpush2.bf16.msra.mxu0 %v3799_v23 }
 0x16c   :  { %v2740_v38 = vpop.f32.mrf.mxu0  ;;  %3158 = vmatprep.subr.bf16.mxu0 %v3784_v26  ;;  %v238_v26 = vld [vmem:[%s5775_s1 + $0x6b8] sm:$0xff] }
 0x16d   :  { %3245 = vmatpush1.bf16.msra.mxu1 %v3689_v24  ;;  %v2792_v45 = vadd.f32 %v2791_v0, %v2739_v44  ;;  %v2741_v46 = vadd.f32 %v2740_v38, %v5080_v58  ;;  %v5543_v0 = vld [vmem:[%s5775_s1 + $0x738] sm:$0xff]  ;;  %v3993_v24 = vcombine.low %v366_v7, %v374_v8  ;;  %v2807_v38 = vpop.f32.mrf.mxu1 }
 0x16e   :  { %3246 = vmatprep.subr.bf16.mxu1 %v3674_v30  ;;  %v2742_v53 = vpop.f32.mrf.mxu0  ;;  %v3882_v16 = vcombine.high %v5543_v0, %v262_v6  ;;  %v246_v30 = vld [vmem:[%s5775_s1 + $0x6f8] sm:$0xff]  ;;  %v3881_v34 = vcombine.low %v5543_v0, %v262_v6 }
 0x16f   :  { %v2794_v56 = vadd.f32 %v2793_v21, %v2741_v46  ;;  %v2743_v57 = vadd.f32 %v2742_v53, %v5107_v13  ;;  %3159 = vmatpush2.bf16.msra.mxu0 %v3783_v35  ;;  %v3344_v2 = vmax.f32 %v2792_v45, 0.0  ;;  %v310_v6 = vld [vmem:[%s5775_s1 + $0x8f8] sm:$0xff] }
 0x170   :  { %v2744_v61 = vpop.f32.mrf.mxu0  ;;  %3287 = vmatprep.subr.bf16.mxu0 %v4026_v28  ;;  %v334_v28 = vld [vmem:[%s5775_s1 + $0x9b8] sm:$0xff] }
 0x171   :  { %3247 = vmatpush1.bf16.msra.mxu1 %v3673_v39  ;;  %v3345_v3 = vmax.f32 %v2794_v56, 0.0  ;;  %v2796_v4 = vadd.f32 %v2795_v19, %v2743_v57  ;;  %v2745_v5 = vadd.f32 %v2744_v61, %v5107_v13  ;;  %v3866_v39 = vcombine.high %v238_v26, %v246_v30  ;;  %v190_v7 = vld [vmem:[%s5775_s1 + $0x538] sm:$0xff] }
 0x172   :  { %3248 = vmatprep.subr.bf16.mxu1 %v3658_v29  ;;  %3161 = vmatmul.mubr.bf16.vlgmr.msra.gmra.mxu0 %v5148_v48  ;;  %v2748_v21 = vpop.f32.mrf.mxu0  ;;  %v222_v29 = vld [vmem:[%s5775_s1 + $0x638] sm:$0xff]  ;;  %v3865_v57 = vcombine.low %v238_v26, %v246_v30  ;;  %v3961_v0 = vcombine.low %v334_v28, %v342_v40 }
 0x173   :  { %v4093_v11 = vpack.c.bf16 %v3345_v3, %v3344_v2  ;;  %v2798_v12 = vadd.f32 %v2797_v32, %v2745_v5  ;;  %3288 = vmatpush1.bf16.msra.mxu0 %v4025_v59  ;;  %v2749_v14 = vadd.f32 %v2748_v21, %v5124_v41  ;;  %3170 = vmatprep.mubr.bf16.mxu0 %v5157_v55  ;;  %v3360_v48 = vmax.f32 %v2796_v4, 0.0  ;;  %v358_v55 = vld [vmem:[%s5775_s1 + $0xa78] sm:$0xff] }
 0x174   :  { %3289 = vmatprep.subr.bf16.mxu0 %v4010_v63  ;;  %v2750_v20 = vpop.f32.mrf.mxu0  ;;  %v3978_v44 = vcombine.high %v350_v25, %v358_v55  ;;  %v3977_v50 = vcombine.low %v350_v25, %v358_v55  ;;  %v3962_v59 = vcombine.high %v334_v28, %v342_v40  ;;  %v3850_v61 = vcombine.high %v222_v29, %v230_v49  ;;  %v214_v63 = vld [vmem:[%s5775_s1 + $0x5f8] sm:$0xff] }
 0x175   :  { %3249 = vmatpush1.bf16.msra.mxu1 %v3657_v62  ;;  %3598 = vst [vmem:[%s5778_s3 + $0x10] sm:$0xff] %v4093_v11  ;;  %v3361_v19 = vmax.f32 %v2798_v12, 0.0  ;;  %v2751_v22 = vadd.f32 %v2750_v20, %v5124_v41  ;;  %v2802_v23 = vadd.f32 %v2801_v42, %v2749_v14  ;;  %v326_v62 = vld [vmem:[%s5775_s1 + $0x978] sm:$0xff]  ;;  %v3849_v2 = vcombine.low %v222_v29, %v230_v49 }
 0x176   :  { %3250 = vmatprep.subr.bf16.mxu1 %v3898_v37  ;;  %v2752_v18 = vpop.f32.mrf.mxu0  ;;  %v302_v5 = vld [vmem:[%s5775_s1 + $0x8b8] sm:$0xff] }
 0x177   :  { %v4101_v31 = vpack.c.bf16 %v3361_v19, %v3360_v48  ;;  %3290 = vmatpush1.bf16.msra.mxu0 %v4009_v9  ;;  %v3376_v32 = vmax.f32 %v2802_v23, 0.0  ;;  %v2753_v60 = vadd.f32 %v2752_v18, %v5152_v54  ;;  %v2804_v33 = vadd.f32 %v2803_v1, %v2751_v22  ;;  %v198_v8 = vld [vmem:[%s5775_s1 + $0x578] sm:$0xff] }
 0x178   :  { %3291 = vmatprep.subr.bf16.mxu0 %v3994_v17  ;;  %v2754_v35 = vpop.f32.mrf.mxu0  ;;  %v3930_v11 = vcombine.high %v302_v5, %v310_v6  ;;  %v3818_v12 = vcombine.high %v190_v7, %v198_v8  ;;  %v286_v14 = vld [vmem:[%s5775_s1 + $0x838] sm:$0xff]  ;;  %v3929_v20 = vcombine.low %v302_v5, %v310_v6 }
 0x179   :  { %3251 = vmatpush2.bf16.msra.mxu1 %v3897_v15  ;;  %3609 = vst [vmem:[%s5778_s3 + $0x50] sm:$0xff] %v4101_v31  ;;  %v3377_v42 = vmax.f32 %v2804_v33, 0.0  ;;  %v2755_v45 = vadd.f32 %v2754_v35, %v5152_v54  ;;  %v2806_v46 = vadd.f32 %v2805_v36, %v2753_v60  ;;  %v294_v15 = vld [vmem:[%s5775_s1 + $0x878] sm:$0xff]  ;;  %v3817_v36 = vcombine.low %v190_v7, %v198_v8 }
 0x17a   :  { %3252 = vmatprep.subr.bf16.mxu1 %v3882_v16  ;;  %3171 = vmatmul.mubr.bf16.gmra.mxu0 %v5201_v27  ;;  %v318_v27 = vld [vmem:[%s5775_s1 + $0x938] sm:$0xff]  ;;  %v3914_v48 = vcombine.high %v286_v14, %v294_v15 }
 0x17b   :  { %3292 = vmatpush1.bf16.msra.mxu0 %v3993_v24  ;;  %v4109_v51 = vpack.c.bf16 %v3377_v42, %v3376_v32  ;;  %v3392_v53 = vmax.f32 %v2806_v46, 0.0  ;;  %v2808_v56 = vadd.f32 %v2807_v38, %v2755_v45  ;;  %4057 = vmatprep.mubr.msk.bf16.mxu0 %vm2485_vm0, %v5354_v47  ;;  %v206_v47 = vld [vmem:[%s5775_s1 + $0x5b8] sm:$0xff]  ;;  %v3946_v3 = vcombine.high %v318_v27, %v326_v62 }
 0x17c   :  { %3293 = vmatprep.subr.bf16.mxu0 %v3978_v44  ;;  %v3834_v4 = vcombine.high %v206_v47, %v214_v63  ;;  %v3945_v9 = vcombine.low %v318_v27, %v326_v62  ;;  %v3833_v21 = vcombine.low %v206_v47, %v214_v63  ;;  %v174_v16 = vld [vmem:[%s5775_s1 + $0x4b8] sm:$0xff]  ;;  %v3913_v24 = vcombine.low %v286_v14, %v294_v15  ;;  %v4152_v62 = vld [vmem:[%s5776_s0 + $0x24] ss:$16 sps:$4 sm:$0xff]   ;;  %v4153_v14 = vld [vmem:[%s5776_s0 + $0x20] ss:$16 sps:$4 sm:$0xff]  }
 0x17d   :  { %3253 = vmatpush2.bf16.msra.mxu1 %v3881_v34  ;;  %3617 = vst [vmem:[%s5778_s3 + $0x90] sm:$0xff] %v4109_v51  ;;  %v3393_v37 = vmax.f32 %v2808_v56, 0.0  ;;  %v182_v17 = vld [vmem:[%s5775_s1 + $0x4f8] sm:$0xff] }
 0x17e   :  { %3254 = vmatprep.subr.bf16.mxu1 %v3866_v39  ;;  %v3802_v19 = vcombine.high %v174_v16, %v182_v17  ;;  %v414_v25 = vld [vmem:[%s5775_s1 + $0xc38] sm:$0xff]  ;;  %v3801_v26 = vcombine.low %v174_v16, %v182_v17 }
 0x17f   :  { %3294 = vmatpush1.bf16.msra.mxu0 %v3977_v50  ;;  %v4117_v1 = vpack.c.bf16 %v3393_v37, %v3392_v53  ;;  %v422_v55 = vld [vmem:[%s5775_s1 + $0xc78] sm:$0xff] }
 0x180   :  { %3295 = vmatprep.subr.bf16.mxu0 %v3962_v59  ;;  %v158_v22 = vld [vmem:[%s5775_s1 + $0x438] sm:$0xff]  ;;  %v4042_v30 = vcombine.high %v414_v25, %v422_v55  ;;  %v4041_v60 = vcombine.low %v414_v25, %v422_v55 }
 0x181   :  { %3255 = vmatpush2.bf16.msra.mxu1 %v3865_v57  ;;  %3625 = vst [vmem:[%s5778_s3 + $0xd0] sm:$0xff] %v4117_v1  ;;  %v166_v23 = vld [vmem:[%s5775_s1 + $0x478] sm:$0xff]  ;;  %v4151_v57 = vld [vmem:[%s5776_s0] ss:$16 sps:$4 sm:$0xff]  }
 0x182   :  { %3256 = vmatprep.subr.bf16.mxu1 %v3850_v61  ;;  %v3786_v18 = vcombine.high %v158_v22, %v166_v23  ;;  %v3785_v44 = vcombine.low %v158_v22, %v166_v23 }
 0x183   :  { %3296 = vmatpush1.bf16.msra.mxu0 %v3961_v0 }
 0x184   :  { %3297 = vmatprep.subr.bf16.mxu0 %v3946_v3 }
 0x185   :  { %3257 = vmatpush2.bf16.msra.mxu1 %v3849_v2 }
 0x186   :  { %3258 = vmatprep.subr.bf16.mxu1 %v3834_v4 }
 0x187   :  { %3298 = vmatpush1.bf16.msra.mxu0 %v3945_v9 }
 0x188   :  { %3299 = vmatprep.subr.bf16.mxu0 %v3930_v11 }
 0x189   :  { %3259 = vmatpush2.bf16.msra.mxu1 %v3833_v21 }
 0x18a   :  { %3260 = vmatprep.subr.bf16.mxu1 %v3818_v12 }
 0x18b   :  { %3300 = vmatpush1.bf16.msra.mxu0 %v3929_v20 }
 0x18c   :  { %3301 = vmatprep.subr.bf16.mxu0 %v3914_v48 }
 0x18d   :  { %3261 = vmatpush2.bf16.msra.mxu1 %v3817_v36 }
 0x18e   :  { %3262 = vmatprep.subr.bf16.mxu1 %v3802_v19  ;;  %v2897_v31 = vpop.f32.mrf.mxu0 }
 0x18f   :  { %3302 = vmatpush1.bf16.msra.mxu0 %v3913_v24 }
 0x190   :  { %v2844_v32 = vpop.f32.mrf.mxu1  ;;  %v2899_v34 = vpop.f32.mrf.mxu0  ;;  %3317 = vmatprep.subr.bf16.mxu0 %v4042_v30 }
 0x191   :  { %v2845_v33 = vadd.f32 %v2844_v32, %v5080_v58  ;;  %3263 = vmatpush2.bf16.msra.mxu1 %v3801_v26 }
 0x192   :  { %v2846_v35 = vpop.f32.mrf.mxu1  ;;  %3264 = vmatprep.subr.bf16.mxu1 %v3786_v18  ;;  %v2901_v28 = vpop.f32.mrf.mxu0 }
 0x193   :  { %v2898_v38 = vadd.f32 %v2897_v31, %v2845_v33  ;;  %v2847_v39 = vadd.f32 %v2846_v35, %v5080_v58  ;;  %3318 = vmatpush2.bf16.msra.mxu0 %v4041_v60 }
 0x194   :  { %v2848_v40 = vpop.f32.mrf.mxu1  ;;  %v2903_v29 = vpop.f32.mrf.mxu0 }
 0x195   :  { %v3346_v42 = vmax.f32 %v2898_v38, 0.0  ;;  %v2900_v45 = vadd.f32 %v2899_v34, %v2847_v39  ;;  %v2849_v46 = vadd.f32 %v2848_v40, %v5107_v13  ;;  %3265 = vmatpush2.bf16.msra.mxu1 %v3785_v44 }
 0x196   :  { %v2850_v49 = vpop.f32.mrf.mxu1  ;;  %3320 = vmatmul.mubr.bf16.vlgmr.msra.gmra.mxu0 %v5446_v43  ;;  %v2907_v56 = vpop.f32.mrf.mxu0 }
 0x197   :  { %v3347_v50 = vmax.f32 %v2900_v45, 0.0  ;;  %v2902_v51 = vadd.f32 %v2901_v28, %v2849_v46  ;;  %v2851_v53 = vadd.f32 %v2850_v49, %v5107_v13  ;;  %4058 = vmatprep.mubr.msk.bf16.mxu0 %vm2485_vm0, %v5458_v52 }
 0x198   :  { %3267 = vmatmul.mubr.bf16.vlgmr.msra.gmra.mxu1 %v4151_v57  ;;  %v2854_v59 = vpop.f32.mrf.mxu1  ;;  %v2909_v43 = vpop.f32.mrf.mxu0 }
 0x199   :  { %v4094_v61 = vpack.c.bf16 %v3347_v50, %v3346_v42  ;;  %v2904_v27 = vadd.f32 %v2903_v29, %v2851_v53  ;;  %3276 = vmatprep.mubr.bf16.mxu1 %v4152_v62  ;;  %v2855_v37 = vadd.f32 %v2854_v59, %v5124_v41  ;;  %v3362_v63 = vmax.f32 %v2902_v51, 0.0 }
 0x19a   :  { %v2856_v47 = vpop.f32.mrf.mxu1  ;;  %v2911_v2 = vpop.f32.mrf.mxu0 }
 0x19b   :  { %3599 = vst [vmem:[%s5778_s3 + $0x18] sm:$0xff] %v4094_v61  ;;  %v3363_v0 = vmax.f32 %v2904_v27, 0.0  ;;  %v2857_v52 = vadd.f32 %v2856_v47, %v5124_v41  ;;  %v2908_v1 = vadd.f32 %v2907_v56, %v2855_v37 }
 0x19c   :  { %v2858_v3 = vpop.f32.mrf.mxu1  ;;  %v2913_v9 = vpop.f32.mrf.mxu0 }
 0x19d   :  { %v4102_v4 = vpack.c.bf16 %v3363_v0, %v3362_v63  ;;  %v3378_v5 = vmax.f32 %v2908_v1, 0.0  ;;  %v2859_v6 = vadd.f32 %v2858_v3, %v5152_v54  ;;  %v2910_v7 = vadd.f32 %v2909_v43, %v2857_v52 }
 0x19e   :  { %v2860_v8 = vpop.f32.mrf.mxu1  ;;  %3330 = vmatmul.mubr.bf16.gmra.mxu0 %v5483_v10 }
 0x19f   :  { %3610 = vst [vmem:[%s5778_s3 + $0x58] sm:$0xff] %v4102_v4  ;;  %v3379_v21 = vmax.f32 %v2910_v7, 0.0  ;;  %v2861_v11 = vadd.f32 %v2860_v8, %v5152_v54  ;;  %v2912_v12 = vadd.f32 %v2911_v2, %v2859_v6 }
 0x1a0   :  { %3277 = vmatmul.mubr.bf16.gmra.mxu1 %v4153_v14 }
 0x1a1   :  { %v4110_v15 = vpack.c.bf16 %v3379_v21, %v3378_v5  ;;  %v3394_v16 = vmax.f32 %v2912_v12, 0.0  ;;  %v2914_v17 = vadd.f32 %v2913_v9, %v2861_v11 }
 0x1a3   :  { %3618 = vst [vmem:[%s5778_s3 + $0x98] sm:$0xff] %v4110_v15  ;;  %v3395_v20 = vmax.f32 %v2914_v17, 0.0 }
 0x1a5   :  { %v4118_v36 = vpack.c.bf16 %v3395_v20, %v3394_v16 }
 0x1a7   :  { %3626 = vst [vmem:[%s5778_s3 + $0xd8] sm:$0xff] %v4118_v36 }
 0x1b4   :  { %v3003_v10 = vpop.f32.mrf.mxu1 }
 0x1b6   :  { %v3005_v48 = vpop.f32.mrf.mxu1 }
 0x1b8   :  { %v3007_v19 = vpop.f32.mrf.mxu1 }
 0x1ba   :  { %v3009_v25 = vpop.f32.mrf.mxu1 }
 0x1bc   :  { %v3013_v24 = vpop.f32.mrf.mxu1 }
 0x1be   :  { %v3015_v33 = vpop.f32.mrf.mxu1 }
 0x1c0   :  { %v3017_v46 = vpop.f32.mrf.mxu1 }
 0x1c2   :  { %v3019_v62 = vpop.f32.mrf.mxu1 }
 0x1ce   :  { %v2950_v55 = vpop.f32.mrf.mxu0 }
 0x1cf   :  { %v2951_v22 = vadd.f32 %v2950_v55, %v5080_v58 }
 0x1d0   :  { %v2952_v23 = vpop.f32.mrf.mxu0 }
 0x1d1   :  { %v3004_v26 = vadd.f32 %v3003_v10, %v2951_v22  ;;  %v2953_v30 = vadd.f32 %v2952_v23, %v5080_v58 }
 0x1d2   :  { %v2954_v18 = vpop.f32.mrf.mxu0 }
 0x1d3   :  { %v3006_v31 = vadd.f32 %v3005_v48, %v2953_v30  ;;  %v2955_v32 = vadd.f32 %v2954_v18, %v5107_v13  ;;  %v3348_v34 = vmax.f32 %v3004_v26, 0.0 }
 0x1d4   :  { %v2956_v60 = vpop.f32.mrf.mxu0 }
 0x1d5   :  { %v3349_v44 = vmax.f32 %v3006_v31, 0.0  ;;  %v3008_v35 = vadd.f32 %v3007_v19, %v2955_v32  ;;  %v2957_v38 = vadd.f32 %v2956_v60, %v5107_v13 }
 0x1d6   :  { %v2960_v39 = vpop.f32.mrf.mxu0 }
 0x1d7   :  { %v4095_v28 = vpack.c.bf16 %v3349_v44, %v3348_v34  ;;  %v3010_v40 = vadd.f32 %v3009_v25, %v2957_v38  ;;  %v2961_v42 = vadd.f32 %v2960_v39, %v5124_v41  ;;  %v3364_v29 = vmax.f32 %v3008_v35, 0.0 }
 0x1d8   :  { %v2962_v45 = vpop.f32.mrf.mxu0 }
 0x1d9   :  { %3600 = vst [vmem:[%s5778_s3 + $0x20] sm:$0xff] %v4095_v28  ;;  %v3365_v49 = vmax.f32 %v3010_v40, 0.0  ;;  %v2963_v50 = vadd.f32 %v2962_v45, %v5124_v41  ;;  %v3014_v51 = vadd.f32 %v3013_v24, %v2961_v42 }
 0x1da   :  { %v2964_v53 = vpop.f32.mrf.mxu0 }
 0x1db   :  { %v4103_v56 = vpack.c.bf16 %v3365_v49, %v3364_v29  ;;  %v3380_v57 = vmax.f32 %v3014_v51, 0.0  ;;  %v2965_v59 = vadd.f32 %v2964_v53, %v5152_v54  ;;  %v3016_v61 = vadd.f32 %v3015_v33, %v2963_v50 }
 0x1dc   :  { %v2966_v27 = vpop.f32.mrf.mxu0 }
 0x1dd   :  { %3611 = vst [vmem:[%s5778_s3 + $0x60] sm:$0xff] %v4103_v56  ;;  %v3381_v37 = vmax.f32 %v3016_v61, 0.0  ;;  %v2967_v43 = vadd.f32 %v2966_v27, %v5152_v54  ;;  %v3018_v47 = vadd.f32 %v3017_v46, %v2965_v59 }
 0x1df   :  { %v4111_v63 = vpack.c.bf16 %v3381_v37, %v3380_v57  ;;  %v3396_v0 = vmax.f32 %v3018_v47, 0.0  ;;  %v3020_v52 = vadd.f32 %v3019_v62, %v2967_v43 }
 0x1e1   :  { %3619 = vst [vmem:[%s5778_s3 + $0xa0] sm:$0xff] %v4111_v63  ;;  %v3397_v1 = vmax.f32 %v3020_v52, 0.0 }
 0x1e3   :  { %v4119_v2 = vpack.c.bf16 %v3397_v1, %v3396_v0 }
 0x1e5   :  { %3627 = vst [vmem:[%s5778_s3 + $0xe0] sm:$0xff] %v4119_v2 }
 0x1f2   :  { %v3109_v3 = vpop.f32.mrf.mxu0 }
 0x1f4   :  { %v3056_v4 = vpop.f32.mrf.mxu1  ;;  %v3111_v6 = vpop.f32.mrf.mxu0 }
 0x1f5   :  { %v3057_v5 = vadd.f32 %v3056_v4, %v5080_v58 }
 0x1f6   :  { %v3058_v7 = vpop.f32.mrf.mxu1  ;;  %v3113_v21 = vpop.f32.mrf.mxu0 }
 0x1f7   :  { %v3110_v8 = vadd.f32 %v3109_v3, %v3057_v5  ;;  %v3059_v9 = vadd.f32 %v3058_v7, %v5080_v58 }
 0x1f8   :  { %v3060_v11 = vpop.f32.mrf.mxu1  ;;  %v3115_v16 = vpop.f32.mrf.mxu0 }
 0x1f9   :  { %v3350_v12 = vmax.f32 %v3110_v8, 0.0  ;;  %v3112_v14 = vadd.f32 %v3111_v6, %v3059_v9  ;;  %v3061_v15 = vadd.f32 %v3060_v11, %v5107_v13 }
 0x1fa   :  { %v3062_v17 = vpop.f32.mrf.mxu1  ;;  %v3119_v48 = vpop.f32.mrf.mxu0 }
 0x1fb   :  { %v3351_v20 = vmax.f32 %v3112_v14, 0.0  ;;  %v3114_v36 = vadd.f32 %v3113_v21, %v3061_v15  ;;  %v3063_v10 = vadd.f32 %v3062_v17, %v5107_v13 }
 0x1fc   :  { %v3066_v19 = vpop.f32.mrf.mxu1  ;;  %v3121_v23 = vpop.f32.mrf.mxu0 }
 0x1fd   :  { %v4096_v25 = vpack.c.bf16 %v3351_v20, %v3350_v12  ;;  %v3116_v55 = vadd.f32 %v3115_v16, %v3063_v10  ;;  %v3067_v22 = vadd.f32 %v3066_v19, %v5124_v41  ;;  %v3366_v26 = vmax.f32 %v3114_v36, 0.0 }
 0x1fe   :  { %v3068_v24 = vpop.f32.mrf.mxu1  ;;  %v3123_v32 = vpop.f32.mrf.mxu0 }
 0x1ff   :  { %3601 = vst [vmem:[%s5778_s3 + $0x28] sm:$0xff] %v4096_v25  ;;  %v3367_v30 = vmax.f32 %v3116_v55, 0.0  ;;  %v3069_v18 = vadd.f32 %v3068_v24, %v5124_v41  ;;  %v3120_v31 = vadd.f32 %v3119_v48, %v3067_v22 }
 0x200   :  { %v3070_v60 = vpop.f32.mrf.mxu1  ;;  %v3125_v39 = vpop.f32.mrf.mxu0 }
 0x201   :  { %v4104_v33 = vpack.c.bf16 %v3367_v30, %v3366_v26  ;;  %v3382_v34 = vmax.f32 %v3120_v31, 0.0  ;;  %v3071_v44 = vadd.f32 %v3070_v60, %v5152_v54  ;;  %v3122_v35 = vadd.f32 %v3121_v23, %v3069_v18 }
 0x202   :  { %v3072_v38 = vpop.f32.mrf.mxu1 }
 0x203   :  { %3612 = vst [vmem:[%s5778_s3 + $0x68] sm:$0xff] %v4104_v33  ;;  %v3383_v28 = vmax.f32 %v3122_v35, 0.0  ;;  %v3073_v40 = vadd.f32 %v3072_v38, %v5152_v54  ;;  %v3124_v42 = vadd.f32 %v3123_v32, %v3071_v44 }
 0x205   :  { %v4112_v45 = vpack.c.bf16 %v3383_v28, %v3382_v34  ;;  %v3398_v46 = vmax.f32 %v3124_v42, 0.0  ;;  %v3126_v29 = vadd.f32 %v3125_v39, %v3073_v40 }
 0x207   :  { %3620 = vst [vmem:[%s5778_s3 + $0xa8] sm:$0xff] %v4112_v45  ;;  %v3399_v49 = vmax.f32 %v3126_v29, 0.0 }
 0x209   :  { %v4120_v50 = vpack.c.bf16 %v3399_v49, %v3398_v46 }
 0x20b   :  { %3628 = vst [vmem:[%s5778_s3 + $0xe8] sm:$0xff] %v4120_v50 }
 0x218   :  { %v3215_v51 = vpop.f32.mrf.mxu1 }
 0x21a   :  { %v3217_v53 = vpop.f32.mrf.mxu1 }
 0x21c   :  { %v3219_v56 = vpop.f32.mrf.mxu1 }
 0x21e   :  { %v3221_v57 = vpop.f32.mrf.mxu1 }
 0x220   :  { %v3225_v62 = vpop.f32.mrf.mxu1 }
 0x222   :  { %v3227_v1 = vpop.f32.mrf.mxu1 }
 0x224   :  { %v3229_v11 = vpop.f32.mrf.mxu1 }
 0x226   :  { %v3231_v25 = vpop.f32.mrf.mxu1 }
 0x232   :  { %v3162_v59 = vpop.f32.mrf.mxu0 }
 0x233   :  { %v3163_v61 = vadd.f32 %v3162_v59, %v5080_v58 }
 0x234   :  { %v3164_v27 = vpop.f32.mrf.mxu0 }
 0x235   :  { %v3216_v37 = vadd.f32 %v3215_v51, %v3163_v61  ;;  %v3165_v43 = vadd.f32 %v3164_v27, %v5080_v58 }
 0x236   :  { %v3166_v47 = vpop.f32.mrf.mxu0 }
 0x237   :  { %v3218_v63 = vadd.f32 %v3217_v53, %v3165_v43  ;;  %v3167_v0 = vadd.f32 %v3166_v47, %v5107_v13  ;;  %v3352_v2 = vmax.f32 %v3216_v37, 0.0 }
 0x238   :  { %v3168_v52 = vpop.f32.mrf.mxu0 }
 0x239   :  { %v3353_v3 = vmax.f32 %v3218_v63, 0.0  ;;  %v3220_v4 = vadd.f32 %v3219_v56, %v3167_v0  ;;  %v3169_v5 = vadd.f32 %v3168_v52, %v5107_v13 }
 0x23a   :  { %v3172_v6 = vpop.f32.mrf.mxu0 }
 0x23b   :  { %v4097_v7 = vpack.c.bf16 %v3353_v3, %v3352_v2  ;;  %v3222_v8 = vadd.f32 %v3221_v57, %v3169_v5  ;;  %v3173_v9 = vadd.f32 %v3172_v6, %v5124_v41  ;;  %v3368_v12 = vmax.f32 %v3220_v4, 0.0 }
 0x23c   :  { %v3174_v21 = vpop.f32.mrf.mxu0 }
 0x23d   :  { %3602 = vst [vmem:[%s5778_s3 + $0x30] sm:$0xff] %v4097_v7  ;;  %v3369_v14 = vmax.f32 %v3222_v8, 0.0  ;;  %v3175_v15 = vadd.f32 %v3174_v21, %v5124_v41  ;;  %v3226_v16 = vadd.f32 %v3225_v62, %v3173_v9 }
 0x23e   :  { %v3176_v17 = vpop.f32.mrf.mxu0 }
 0x23f   :  { %v4105_v20 = vpack.c.bf16 %v3369_v14, %v3368_v12  ;;  %v3384_v36 = vmax.f32 %v3226_v16, 0.0  ;;  %v3177_v10 = vadd.f32 %v3176_v17, %v5152_v54  ;;  %v3228_v48 = vadd.f32 %v3227_v1, %v3175_v15 }
 0x240   :  { %v3178_v19 = vpop.f32.mrf.mxu0 }
 0x241   :  { %3613 = vst [vmem:[%s5778_s3 + $0x70] sm:$0xff] %v4105_v20  ;;  %v3385_v55 = vmax.f32 %v3228_v48, 0.0  ;;  %v3179_v22 = vadd.f32 %v3178_v19, %v5152_v54  ;;  %v3230_v23 = vadd.f32 %v3229_v11, %v3177_v10 }
 0x243   :  { %v4113_v24 = vpack.c.bf16 %v3385_v55, %v3384_v36  ;;  %v3400_v26 = vmax.f32 %v3230_v23, 0.0  ;;  %v3232_v30 = vadd.f32 %v3231_v25, %v3179_v22 }
 0x245   :  { %3621 = vst [vmem:[%s5778_s3 + $0xb0] sm:$0xff] %v4113_v24  ;;  %v3401_v18 = vmax.f32 %v3232_v30, 0.0 }
 0x247   :  { %v4121_v31 = vpack.c.bf16 %v3401_v18, %v3400_v26 }
 0x249   :  { %3629 = vst [vmem:[%s5778_s3 + $0xf0] sm:$0xff] %v4121_v31 }
 0x256   :  { %v3321_v32 = vpop.f32.mrf.mxu0 }
 0x258   :  { %v3268_v60 = vpop.f32.mrf.mxu1  ;;  %v3323_v34 = vpop.f32.mrf.mxu0 }
 0x259   :  { %v3269_v33 = vadd.f32 %v3268_v60, %v5080_v58 }
 0x25a   :  { %v3270_v44 = vpop.f32.mrf.mxu1  ;;  %v3325_v39 = vpop.f32.mrf.mxu0 }
 0x25b   :  { %v3322_v35 = vadd.f32 %v3321_v32, %v3269_v33  ;;  %v3271_v38 = vadd.f32 %v3270_v44, %v5080_v58 }
 0x25c   :  { %v3272_v28 = vpop.f32.mrf.mxu1  ;;  %v3327_v45 = vpop.f32.mrf.mxu0 }
 0x25d   :  { %v3324_v40 = vadd.f32 %v3323_v34, %v3271_v38  ;;  %v3273_v42 = vadd.f32 %v3272_v28, %v5107_v13  ;;  %v3354_v29 = vmax.f32 %v3322_v35, 0.0 }
 0x25e   :  { %v3274_v46 = vpop.f32.mrf.mxu1  ;;  %v3331_v53 = vpop.f32.mrf.mxu0 }
 0x25f   :  { %v3355_v49 = vmax.f32 %v3324_v40, 0.0  ;;  %v3326_v50 = vadd.f32 %v3325_v39, %v3273_v42  ;;  %v3275_v51 = vadd.f32 %v3274_v46, %v5107_v13 }
 0x260   :  { %v3278_v58 = vpop.f32.mrf.mxu1  ;;  %v3333_v27 = vpop.f32.mrf.mxu0 }
 0x261   :  { %v4098_v57 = vpack.c.bf16 %v3355_v49, %v3354_v29  ;;  %v3328_v59 = vadd.f32 %v3327_v45, %v3275_v51  ;;  %v3279_v61 = vadd.f32 %v3278_v58, %v5124_v41  ;;  %v3370_v37 = vmax.f32 %v3326_v50, 0.0 }
 0x262   :  { %v3280_v62 = vpop.f32.mrf.mxu1  ;;  %v3335_v0 = vpop.f32.mrf.mxu0 }
 0x263   :  { %3606 = vst.msk [vmem:[%s5778_s3 + $0x38] sm:$0xff] %vm5747_vm3, %v4098_v57  ;;  %v3371_v13 = vmax.f32 %v3328_v59, 0.0  ;;  %v3332_v43 = vadd.f32 %v3331_v53, %v3279_v61  ;;  %v3281_v47 = vadd.f32 %v3280_v62, %v5124_v41 }
 0x264   :  { %v3282_v63 = vpop.f32.mrf.mxu1  ;;  %v3337_v8 = vpop.f32.mrf.mxu0 }
 0x265   :  { %v4106_v52 = vpack.c.bf16 %v3371_v13, %v3370_v37  ;;  %v3334_v1 = vadd.f32 %v3333_v27, %v3281_v47  ;;  %v3283_v2 = vadd.f32 %v3282_v63, %v5152_v54  ;;  %v3386_v4 = vmax.f32 %v3332_v43, 0.0 }
 0x266   :  { %v3284_v3 = vpop.f32.mrf.mxu1 }
 0x267   :  { %3614 = vst.msk [vmem:[%s5778_s3 + $0x78] sm:$0xff] %vm5747_vm3, %v4106_v52  ;;  %v3387_v5 = vmax.f32 %v3334_v1, 0.0  ;;  %v3336_v6 = vadd.f32 %v3335_v0, %v3283_v2  ;;  %v3285_v7 = vadd.f32 %v3284_v3, %v5152_v54 }
 0x269   :  { %v4114_v41 = vpack.c.bf16 %v3387_v5, %v3386_v4  ;;  %v3338_v9 = vadd.f32 %v3337_v8, %v3285_v7  ;;  %v3402_v21 = vmax.f32 %v3336_v6, 0.0 }
 0x26b   :  { %3622 = vst.msk [vmem:[%s5778_s3 + $0xb8] sm:$0xff] %vm5747_vm3, %v4114_v41  ;;  %v3403_v11 = vmax.f32 %v3338_v9, 0.0 }
 0x26d   :  { %v4122_v12 = vpack.c.bf16 %v3403_v11, %v3402_v21 }
 0x26f   :  { %3630 = vst.msk [vmem:[%s5778_s3 + $0xf8] sm:$0xff] %vm5747_vm3, %v4122_v12 }

// kernel: policy_net_forward.5
= control target key start
LH: loop header
LB: loop body
LE: loop exit
PB: predicated region body
PF: predicated region fallthrough
CT: control target
= control target key end

     0   :  { %s8073_s12 = smov 0   ;;  %s8075_s13 = smov 0   ;;  %s9119_s0 = inlined_call_operand.vmem [shape: bf16[16,32768], index: 0, kind: input, shape index: {}]   ;;  %s9120_s1 = inlined_call_operand.vmem [shape: bf16[32768,128], index: 1, kind: input, shape index: {}]   ;;  %s9121_s2 = inlined_call_operand.vmem [shape: f32[1,128], index: 2, kind: input, shape index: {}]   ;;  %s9122_s3 = inlined_call_operand.vmem [shape: f32[16,128], index: 3, kind: output, shape index: {}]  }
   0x1   :  { %s8077_s14 = smov 0  }
   0x2 LB: > { %s8089_s15 = sadd.s32 4294967295, %s8050_s14   ;;  %s8092_s16 = sadd.s32 1, %s8050_s14   ;;  %s8050_s14 = sphi %s8077_s14, %s9159_s14   ;;  %s8046_s13 = sphi %s8075_s13, %s9158_s13   ;;  %s8042_s12 = sphi %s8073_s12, %s9157_s12  }
   0x3   : > { %s17_s17 = ssub.s32 %s8050_s14, %s8092_s16  ;;  %s20_s18 = sadd.s32 1, %s8046_s13 }
   0x4   : > { %p18_p0 = scmp.eq.s32.totalorder %s17_s17, 0  ;;  %p27_p1 = scmp.ne.s32.totalorder %s8046_s13, %s8042_s12 }
   0x5   : > { %p28_p2 = scmp.eq.s32.totalorder %s8050_s14, 0  ;;  %p6197_p4 = scmp.ge.s32.totalorder %s8050_s14, 4 }
   0x6   : > { %s8101_s19 = scalar_select %p18_p0, %s8046_s13, %s20_s18  }
   0x7   : > { %p29_p3 = por %p28_p2, %p27_p1  ;;  %124 = sbr.rel (%p6197_p4) target bundleno = 48 (0x30), region = 20 }
   0xc   : > { %127 = sbr.rel (!%p29_p3) target bundleno = 48 (0x30), region = 24  ;;  %s129_s20 = sand.u32 (%p29_p3), 1, %s8046_s13  }
   0xd   : > { %s6786_s21 = sshll.u32 (%p29_p3), %s8050_s14, 8  ;;  %s6198_s22 = sshll.u32 (%p29_p3), %s129_s20, 9 }
   0xe   : > { %s8109_s25 = scalar_lea.vmem (%p29_p3), %s9119_s0, %s6786_s21  ;;  %s8114_s26 = scalar_lea.vmem (%p29_p3), [#allocation3], %s6198_s22 }
   0xf   : > { %v147_v0 = vld [vmem:[%s8109_s25] sm:$0xff] (%p29_p3)  ;;  %v149_v1 = vld [vmem:[%s8109_s25 + $0x8] sm:$0xff] (%p29_p3)  ;;  %v151_v2 = vld [vmem:[%s8109_s25 + $0x10] sm:$0xff] (%p29_p3) }
  0x10   : > { %148 = vst [vmem:[%s8114_s26] sm:$0xff] (%p29_p3), %v147_v0  ;;  %150 = vst [vmem:[%s8114_s26 + $0x8] sm:$0xff] (%p29_p3), %v149_v1  ;;  %v153_v3 = vld [vmem:[%s8109_s25 + $0x18] sm:$0xff] (%p29_p3)  ;;  %v155_v4 = vld [vmem:[%s8109_s25 + $0x20] sm:$0xff] (%p29_p3) }
  0x11   : > { %152 = vst [vmem:[%s8114_s26 + $0x10] sm:$0xff] %v151_v2  ;;  %v157_v5 = vld [vmem:[%s8109_s25 + $0x28] sm:$0xff]  ;;  %154 = vst [vmem:[%s8114_s26 + $0x18] sm:$0xff] %v153_v3  ;;  %v159_v6 = vld [vmem:[%s8109_s25 + $0x30] sm:$0xff] }
  0x12   : > { %156 = vst [vmem:[%s8114_s26 + $0x20] sm:$0xff] %v155_v4  ;;  %158 = vst [vmem:[%s8114_s26 + $0x28] sm:$0xff] %v157_v5  ;;  %v161_v7 = vld [vmem:[%s8109_s25 + $0x38] sm:$0xff]  ;;  %v163_v8 = vld [vmem:[%s8109_s25 + $0x40] sm:$0xff] }
  0x13   : > { %160 = vst [vmem:[%s8114_s26 + $0x30] sm:$0xff] %v159_v6  ;;  %162 = vst [vmem:[%s8114_s26 + $0x38] sm:$0xff] %v161_v7  ;;  %v165_v9 = vld [vmem:[%s8109_s25 + $0x48] sm:$0xff]  ;;  %v167_v10 = vld [vmem:[%s8109_s25 + $0x50] sm:$0xff] }
  0x14   : > { %164 = vst [vmem:[%s8114_s26 + $0x40] sm:$0xff] %v163_v8  ;;  %v169_v11 = vld [vmem:[%s8109_s25 + $0x58] sm:$0xff]  ;;  %166 = vst [vmem:[%s8114_s26 + $0x48] sm:$0xff] %v165_v9  ;;  %v171_v12 = vld [vmem:[%s8109_s25 + $0x60] sm:$0xff] }
  0x15   : > { %168 = vst [vmem:[%s8114_s26 + $0x50] sm:$0xff] %v167_v10  ;;  %170 = vst [vmem:[%s8114_s26 + $0x58] sm:$0xff] %v169_v11  ;;  %v173_v13 = vld [vmem:[%s8109_s25 + $0x68] sm:$0xff]  ;;  %v175_v14 = vld [vmem:[%s8109_s25 + $0x70] sm:$0xff] }
  0x16   : > { %172 = vst [vmem:[%s8114_s26 + $0x60] sm:$0xff] %v171_v12  ;;  %174 = vst [vmem:[%s8114_s26 + $0x68] sm:$0xff] %v173_v13  ;;  %v177_v15 = vld [vmem:[%s8109_s25 + $0x78] sm:$0xff]  ;;  %v179_v16 = vld [vmem:[%s8109_s25 + $0x80] sm:$0xff] }
  0x17   : > { %176 = vst [vmem:[%s8114_s26 + $0x70] sm:$0xff] %v175_v14  ;;  %v181_v17 = vld [vmem:[%s8109_s25 + $0x88] sm:$0xff]  ;;  %178 = vst [vmem:[%s8114_s26 + $0x78] sm:$0xff] %v177_v15  ;;  %v183_v18 = vld [vmem:[%s8109_s25 + $0x90] sm:$0xff] }
  0x18   : > { %180 = vst [vmem:[%s8114_s26 + $0x80] sm:$0xff] %v179_v16  ;;  %182 = vst [vmem:[%s8114_s26 + $0x88] sm:$0xff] %v181_v17  ;;  %v185_v19 = vld [vmem:[%s8109_s25 + $0x98] sm:$0xff]  ;;  %v187_v20 = vld [vmem:[%s8109_s25 + $0xa0] sm:$0xff] }
  0x19   : > { %184 = vst [vmem:[%s8114_s26 + $0x90] sm:$0xff] %v183_v18  ;;  %186 = vst [vmem:[%s8114_s26 + $0x98] sm:$0xff] %v185_v19  ;;  %v189_v21 = vld [vmem:[%s8109_s25 + $0xa8] sm:$0xff]  ;;  %v191_v22 = vld [vmem:[%s8109_s25 + $0xb0] sm:$0xff] }
  0x1a   : > { %188 = vst [vmem:[%s8114_s26 + $0xa0] sm:$0xff] %v187_v20  ;;  %v193_v23 = vld [vmem:[%s8109_s25 + $0xb8] sm:$0xff]  ;;  %190 = vst [vmem:[%s8114_s26 + $0xa8] sm:$0xff] %v189_v21  ;;  %v195_v24 = vld [vmem:[%s8109_s25 + $0xc0] sm:$0xff] }
  0x1b   : > { %192 = vst [vmem:[%s8114_s26 + $0xb0] sm:$0xff] %v191_v22  ;;  %194 = vst [vmem:[%s8114_s26 + $0xb8] sm:$0xff] %v193_v23  ;;  %v197_v25 = vld [vmem:[%s8109_s25 + $0xc8] sm:$0xff]  ;;  %v199_v26 = vld [vmem:[%s8109_s25 + $0xd0] sm:$0xff] }
  0x1c   : > { %196 = vst [vmem:[%s8114_s26 + $0xc0] sm:$0xff] %v195_v24  ;;  %198 = vst [vmem:[%s8114_s26 + $0xc8] sm:$0xff] %v197_v25  ;;  %v201_v27 = vld [vmem:[%s8109_s25 + $0xd8] sm:$0xff]  ;;  %v203_v28 = vld [vmem:[%s8109_s25 + $0xe0] sm:$0xff] }
  0x1d   : > { %200 = vst [vmem:[%s8114_s26 + $0xd0] sm:$0xff] %v199_v26  ;;  %v205_v29 = vld [vmem:[%s8109_s25 + $0xe8] sm:$0xff]  ;;  %202 = vst [vmem:[%s8114_s26 + $0xd8] sm:$0xff] %v201_v27  ;;  %v207_v30 = vld [vmem:[%s8109_s25 + $0xf0] sm:$0xff] }
  0x1e   : > { %204 = vst [vmem:[%s8114_s26 + $0xe0] sm:$0xff] %v203_v28  ;;  %206 = vst [vmem:[%s8114_s26 + $0xe8] sm:$0xff] %v205_v29  ;;  %v209_v31 = vld [vmem:[%s8109_s25 + $0xf8] sm:$0xff]  ;;  %v211_v32 = vld [vmem:[%s8109_s25 + $0x400] sm:$0xff] }
  0x1f   : > { %208 = vst [vmem:[%s8114_s26 + $0xf0] sm:$0xff] %v207_v30  ;;  %210 = vst [vmem:[%s8114_s26 + $0xf8] sm:$0xff] %v209_v31  ;;  %v213_v33 = vld [vmem:[%s8109_s25 + $0x408] sm:$0xff]  ;;  %v215_v34 = vld [vmem:[%s8109_s25 + $0x410] sm:$0xff] }
  0x20   : > { %212 = vst [vmem:[%s8114_s26 + $0x100] sm:$0xff] %v211_v32  ;;  %v217_v35 = vld [vmem:[%s8109_s25 + $0x418] sm:$0xff]  ;;  %214 = vst [vmem:[%s8114_s26 + $0x108] sm:$0xff] %v213_v33  ;;  %v219_v36 = vld [vmem:[%s8109_s25 + $0x420] sm:$0xff] }
  0x21   : > { %216 = vst [vmem:[%s8114_s26 + $0x110] sm:$0xff] %v215_v34  ;;  %218 = vst [vmem:[%s8114_s26 + $0x118] sm:$0xff] %v217_v35  ;;  %v221_v37 = vld [vmem:[%s8109_s25 + $0x428] sm:$0xff]  ;;  %v223_v38 = vld [vmem:[%s8109_s25 + $0x430] sm:$0xff] }
  0x22   : > { %220 = vst [vmem:[%s8114_s26 + $0x120] sm:$0xff] %v219_v36  ;;  %222 = vst [vmem:[%s8114_s26 + $0x128] sm:$0xff] %v221_v37  ;;  %v225_v39 = vld [vmem:[%s8109_s25 + $0x438] sm:$0xff]  ;;  %v227_v40 = vld [vmem:[%s8109_s25 + $0x440] sm:$0xff] }
  0x23   : > { %224 = vst [vmem:[%s8114_s26 + $0x130] sm:$0xff] %v223_v38  ;;  %v229_v41 = vld [vmem:[%s8109_s25 + $0x448] sm:$0xff]  ;;  %226 = vst [vmem:[%s8114_s26 + $0x138] sm:$0xff] %v225_v39  ;;  %v231_v42 = vld [vmem:[%s8109_s25 + $0x450] sm:$0xff] }
  0x24   : > { %228 = vst [vmem:[%s8114_s26 + $0x140] sm:$0xff] %v227_v40  ;;  %230 = vst [vmem:[%s8114_s26 + $0x148] sm:$0xff] %v229_v41  ;;  %v233_v43 = vld [vmem:[%s8109_s25 + $0x458] sm:$0xff]  ;;  %v235_v44 = vld [vmem:[%s8109_s25 + $0x460] sm:$0xff] }
  0x25   : > { %232 = vst [vmem:[%s8114_s26 + $0x150] sm:$0xff] %v231_v42  ;;  %234 = vst [vmem:[%s8114_s26 + $0x158] sm:$0xff] %v233_v43  ;;  %v237_v45 = vld [vmem:[%s8109_s25 + $0x468] sm:$0xff]  ;;  %v239_v46 = vld [vmem:[%s8109_s25 + $0x470] sm:$0xff] }
  0x26   : > { %236 = vst [vmem:[%s8114_s26 + $0x160] sm:$0xff] %v235_v44  ;;  %v241_v47 = vld [vmem:[%s8109_s25 + $0x478] sm:$0xff]  ;;  %238 = vst [vmem:[%s8114_s26 + $0x168] sm:$0xff] %v237_v45  ;;  %v243_v48 = vld [vmem:[%s8109_s25 + $0x480] sm:$0xff] }
  0x27   : > { %240 = vst [vmem:[%s8114_s26 + $0x170] sm:$0xff] %v239_v46  ;;  %242 = vst [vmem:[%s8114_s26 + $0x178] sm:$0xff] %v241_v47  ;;  %v245_v49 = vld [vmem:[%s8109_s25 + $0x488] sm:$0xff]  ;;  %v247_v50 = vld [vmem:[%s8109_s25 + $0x490] sm:$0xff] }
  0x28   : > { %244 = vst [vmem:[%s8114_s26 + $0x180] sm:$0xff] %v243_v48  ;;  %246 = vst [vmem:[%s8114_s26 + $0x188] sm:$0xff] %v245_v49  ;;  %v249_v51 = vld [vmem:[%s8109_s25 + $0x498] sm:$0xff]  ;;  %v251_v52 = vld [vmem:[%s8109_s25 + $0x4a0] sm:$0xff] }
  0x29   : > { %248 = vst [vmem:[%s8114_s26 + $0x190] sm:$0xff] %v247_v50  ;;  %v253_v53 = vld [vmem:[%s8109_s25 + $0x4a8] sm:$0xff]  ;;  %250 = vst [vmem:[%s8114_s26 + $0x198] sm:$0xff] %v249_v51  ;;  %v255_v54 = vld [vmem:[%s8109_s25 + $0x4b0] sm:$0xff] }
  0x2a   : > { %252 = vst [vmem:[%s8114_s26 + $0x1a0] sm:$0xff] %v251_v52  ;;  %254 = vst [vmem:[%s8114_s26 + $0x1a8] sm:$0xff] %v253_v53  ;;  %v257_v55 = vld [vmem:[%s8109_s25 + $0x4b8] sm:$0xff]  ;;  %v259_v56 = vld [vmem:[%s8109_s25 + $0x4c0] sm:$0xff] }
  0x2b   : > { %256 = vst [vmem:[%s8114_s26 + $0x1b0] sm:$0xff] %v255_v54  ;;  %258 = vst [vmem:[%s8114_s26 + $0x1b8] sm:$0xff] %v257_v55  ;;  %v261_v57 = vld [vmem:[%s8109_s25 + $0x4c8] sm:$0xff]  ;;  %v263_v58 = vld [vmem:[%s8109_s25 + $0x4d0] sm:$0xff] }
  0x2c   : > { %260 = vst [vmem:[%s8114_s26 + $0x1c0] sm:$0xff] %v259_v56  ;;  %v265_v59 = vld [vmem:[%s8109_s25 + $0x4d8] sm:$0xff]  ;;  %262 = vst [vmem:[%s8114_s26 + $0x1c8] sm:$0xff] %v261_v57  ;;  %v267_v60 = vld [vmem:[%s8109_s25 + $0x4e0] sm:$0xff] }
  0x2d   : > { %264 = vst [vmem:[%s8114_s26 + $0x1d0] sm:$0xff] %v263_v58  ;;  %266 = vst [vmem:[%s8114_s26 + $0x1d8] sm:$0xff] %v265_v59  ;;  %v269_v61 = vld [vmem:[%s8109_s25 + $0x4e8] sm:$0xff]  ;;  %v271_v62 = vld [vmem:[%s8109_s25 + $0x4f0] sm:$0xff] }
  0x2e   : > { %268 = vst [vmem:[%s8114_s26 + $0x1e0] sm:$0xff] %v267_v60  ;;  %270 = vst [vmem:[%s8114_s26 + $0x1e8] sm:$0xff] %v269_v61  ;;  %v273_v63 = vld [vmem:[%s8109_s25 + $0x4f8] sm:$0xff] }
  0x2f   : > { %272 = vst [vmem:[%s8114_s26 + $0x1f0] sm:$0xff] %v271_v62  ;;  %274 = vst [vmem:[%s8114_s26 + $0x1f8] sm:$0xff] %v273_v63 }
  0x30 PF: > { %p6201_p5 = scmp.ge.s32.totalorder %s8050_s14, 1  ;;  %p288_p6 = scmp.lt.s32.totalorder %s8050_s14, 5 }
  0x32   : > { %p289_p7 = pnand %p6201_p5, %p288_p6 }
  0x34   : > { %292 = sbr.rel (%p289_p7) target bundleno = 802 (0x322), region = 51 }
  0x39   : > { %s295_s27 = sand.u32 1, %s8042_s12   ;;  %s6203_s28 = sshll.u32 %s8089_s15, 10 }
  0x3a   : > { %s6202_s29 = sshll.u32 %s295_s27, 9  ;;  %p320_p8 = scmp.lt.s32.totalorder %s6203_s28, 4095 }
  0x3b   : > { %s8250_s7 = scalar_lea.vmem [#allocation3], %s6202_s29  ;;  %p6205_p9 = scmp.ne.s32.totalorder %s8089_s15, 0 }
  0x3c   : > { %s9161_s28 = smov (!%p320_p8, %s6203_s28), 4095 }
  0x3d   : > { %s6204_s30 = sshll.u32 %s9161_s28, 2  ;;  %329 = sbr.rel (%p6205_p9) target bundleno = 68 (0x44), region = 59 }
  0x3e   : > { %s8248_s6 = scalar_lea.vmem %s9120_s1, %s6204_s30 }
  0x42   : > { %v8052_v0 = vmov 0.0  }
  0x43   : > { %330 = vst [vmem:[#allocation2] sm:$0xff] %v8052_v0  ;;  %331 = vst [vmem:[#allocation2 + $0x8] sm:$0xff] %v8052_v0 }
  0x44 PF: > { %v7516_v1 = vld [vmem:[%s8248_s6 + $0x78] sm:$0xff]   ;;  %v7520_v5 = vld [vmem:[%s8248_s6 + $0x70] sm:$0xff]   ;;  %v7524_v9 = vld [vmem:[%s8248_s6 + $0x68] sm:$0xff]   ;;  %p6782_p10 = scmp.ne.s32.totalorder %s8089_s15, 3 }
  0x45   : > { %v7517_v2 = vld [vmem:[%s8248_s6 + $0xf8] sm:$0xff]   ;;  %6787 = vmatprep.subr.bf16.mxu0 %v7516_v1  ;;  %v7521_v6 = vld [vmem:[%s8248_s6 + $0xf0] sm:$0xff]   ;;  %v7525_v10 = vld [vmem:[%s8248_s6 + $0xe8] sm:$0xff]  }
  0x46   : > { %v7518_v3 = vld [vmem:[%s8248_s6 + $0x38] sm:$0xff]   ;;  %6809 = vmatprep.subr.bf16.mxu1 %v7517_v2  ;;  %v7522_v7 = vld [vmem:[%s8248_s6 + $0x30] sm:$0xff]   ;;  %v7526_v11 = vld [vmem:[%s8248_s6 + $0x28] sm:$0xff]  }
  0x47   : > { %v7519_v4 = vld [vmem:[%s8248_s6 + $0xb8] sm:$0xff]   ;;  %6788 = vmatpush3.bf16.msra.mxu0 %v7518_v3  ;;  %v7523_v8 = vld [vmem:[%s8248_s6 + $0xb0] sm:$0xff]   ;;  %v7527_v12 = vld [vmem:[%s8248_s6 + $0xa8] sm:$0xff]  }
  0x48   : > { %6810 = vmatpush3.bf16.msra.mxu1 %v7519_v4  ;;  %6789 = vmatprep.subr.bf16.mxu0 %v7520_v5  ;;  %v7528_v13 = vld [vmem:[%s8248_s6 + $0x60] sm:$0xff]   ;;  %v7532_v17 = vld [vmem:[%s8248_s6 + $0x58] sm:$0xff]   ;;  %v7536_v21 = vld [vmem:[%s8248_s6 + $0x50] sm:$0xff]  }
  0x49   : > { %6811 = vmatprep.subr.bf16.mxu1 %v7521_v6  ;;  %v7529_v14 = vld [vmem:[%s8248_s6 + $0xe0] sm:$0xff]   ;;  %v7533_v18 = vld [vmem:[%s8248_s6 + $0xd8] sm:$0xff]   ;;  %v7537_v22 = vld [vmem:[%s8248_s6 + $0xd0] sm:$0xff]  }
  0x4a   : > { %v7530_v15 = vld [vmem:[%s8248_s6 + $0x20] sm:$0xff]   ;;  %v7534_v19 = vld [vmem:[%s8248_s6 + $0x18] sm:$0xff]   ;;  %v7538_v23 = vld [vmem:[%s8248_s6 + $0x10] sm:$0xff]  }
  0x4b   : > { %6790 = vmatpush3.bf16.msra.mxu0 %v7522_v7  ;;  %v7531_v16 = vld [vmem:[%s8248_s6 + $0xa0] sm:$0xff]   ;;  %v7535_v20 = vld [vmem:[%s8248_s6 + $0x98] sm:$0xff]   ;;  %v7539_v24 = vld [vmem:[%s8248_s6 + $0x90] sm:$0xff]  }
  0x4c   : > { %6812 = vmatpush3.bf16.msra.mxu1 %v7523_v8  ;;  %6791 = vmatprep.subr.bf16.mxu0 %v7524_v9  ;;  %v7540_v25 = vld [vmem:[%s8248_s6 + $0x48] sm:$0xff]   ;;  %v7544_v29 = vld [vmem:[%s8248_s6 + $0x40] sm:$0xff]   ;;  %v334_v33 = vld [vmem:[%s8250_s7] sm:$0xff] }
  0x4d   : > { %6813 = vmatprep.subr.bf16.mxu1 %v7525_v10  ;;  %v7541_v26 = vld [vmem:[%s8248_s6 + $0xc8] sm:$0xff]   ;;  %v7545_v30 = vld [vmem:[%s8248_s6 + $0xc0] sm:$0xff]   ;;  %v366_v34 = vld [vmem:[%s8250_s7 + $0x100] sm:$0xff] }
  0x4e   : > { %v7542_v27 = vld [vmem:[%s8248_s6 + $0x8] sm:$0xff]   ;;  %v7546_v31 = vld [vmem:[%s8248_s6] sm:$0xff]   ;;  %v335_v35 = vld [vmem:[%s8250_s7 + $0x8] sm:$0xff]  ;;  %v6206_v36 = vcombine.low %v334_v33, %v366_v34  ;;  %v6207_v37 = vcombine.high %v334_v33, %v366_v34 }
  0x4f   : > { %6792 = vmatpush3.bf16.msra.mxu0 %v7526_v11  ;;  %v7543_v28 = vld [vmem:[%s8248_s6 + $0x88] sm:$0xff]   ;;  %v7547_v32 = vld [vmem:[%s8248_s6 + $0x80] sm:$0xff]   ;;  %v367_v38 = vld [vmem:[%s8250_s7 + $0x108] sm:$0xff] }
  0x50   : > { %6814 = vmatpush3.bf16.msra.mxu1 %v7527_v12  ;;  %6793 = vmatprep.subr.bf16.mxu0 %v7528_v13  ;;  %v6208_v39 = vcombine.low %v335_v35, %v367_v38  ;;  %v6209_v40 = vcombine.high %v335_v35, %v367_v38  ;;  %v7548_v41 = vld [vmem:[%s8248_s6 + $0x178] sm:$0xff]   ;;  %v7552_v45 = vld [vmem:[%s8248_s6 + $0x170] sm:$0xff]   ;;  %v7556_v49 = vld [vmem:[%s8248_s6 + $0x168] sm:$0xff]  }
  0x51   : > { %6815 = vmatprep.subr.bf16.mxu1 %v7529_v14  ;;  %4846 = vmatprep.mubr.bf16.mxu0 %v6207_v37  ;;  %v7549_v42 = vld [vmem:[%s8248_s6 + $0x1f8] sm:$0xff]   ;;  %v7553_v46 = vld [vmem:[%s8248_s6 + $0x1f0] sm:$0xff]   ;;  %v7557_v50 = vld [vmem:[%s8248_s6 + $0x1e8] sm:$0xff]  }
  0x52   : > { %4887 = vmatprep.mubr.bf16.mxu1 %v6209_v40  ;;  %v7550_v43 = vld [vmem:[%s8248_s6 + $0x138] sm:$0xff]   ;;  %v7554_v47 = vld [vmem:[%s8248_s6 + $0x130] sm:$0xff]   ;;  %v7558_v51 = vld [vmem:[%s8248_s6 + $0x128] sm:$0xff]  }
  0x53   : > { %6794 = vmatpush3.bf16.msra.mxu0 %v7530_v15  ;;  %v7551_v44 = vld [vmem:[%s8248_s6 + $0x1b8] sm:$0xff]   ;;  %v7555_v48 = vld [vmem:[%s8248_s6 + $0x1b0] sm:$0xff]   ;;  %v7559_v52 = vld [vmem:[%s8248_s6 + $0x1a8] sm:$0xff]  }
  0x54   : > { %6816 = vmatpush3.bf16.msra.mxu1 %v7531_v16  ;;  %6795 = vmatprep.subr.bf16.mxu0 %v7532_v17  ;;  %v7560_v53 = vld [vmem:[%s8248_s6 + $0x160] sm:$0xff]   ;;  %v7564_v57 = vld [vmem:[%s8248_s6 + $0x158] sm:$0xff]   ;;  %v7568_v61 = vld [vmem:[%s8248_s6 + $0x150] sm:$0xff]  }
  0x55   : > { %6817 = vmatprep.subr.bf16.mxu1 %v7533_v18  ;;  %v7561_v54 = vld [vmem:[%s8248_s6 + $0x1e0] sm:$0xff]   ;;  %v7565_v58 = vld [vmem:[%s8248_s6 + $0x1d8] sm:$0xff]   ;;  %v7569_v62 = vld [vmem:[%s8248_s6 + $0x1d0] sm:$0xff]  }
  0x56   : > { %v7562_v55 = vld [vmem:[%s8248_s6 + $0x120] sm:$0xff]   ;;  %v7566_v59 = vld [vmem:[%s8248_s6 + $0x118] sm:$0xff]   ;;  %v7570_v63 = vld [vmem:[%s8248_s6 + $0x110] sm:$0xff]  }
  0x57   : > { %6796 = vmatpush3.bf16.msra.mxu0 %v7534_v19  ;;  %v7563_v56 = vld [vmem:[%s8248_s6 + $0x1a0] sm:$0xff]   ;;  %v7567_v60 = vld [vmem:[%s8248_s6 + $0x198] sm:$0xff]   ;;  %v7571_v0 = vld [vmem:[%s8248_s6 + $0x190] sm:$0xff]  }
  0x58   : > { %6818 = vmatpush3.bf16.msra.mxu1 %v7535_v20  ;;  %6797 = vmatprep.subr.bf16.mxu0 %v7536_v21  ;;  %v7572_v1 = vld [vmem:[%s8248_s6 + $0x148] sm:$0xff]   ;;  %v7576_v5 = vld [vmem:[%s8248_s6 + $0x140] sm:$0xff]   ;;  %v7580_v17 = vld [vmem:[%s8248_s6 + $0x278] sm:$0xff]  }
  0x59   : > { %6819 = vmatprep.subr.bf16.mxu1 %v7537_v22  ;;  %v7573_v2 = vld [vmem:[%s8248_s6 + $0x1c8] sm:$0xff]   ;;  %v7577_v6 = vld [vmem:[%s8248_s6 + $0x1c0] sm:$0xff]   ;;  %v7581_v18 = vld [vmem:[%s8248_s6 + $0x2f8] sm:$0xff]  }
  0x5a   : > { %v7574_v3 = vld [vmem:[%s8248_s6 + $0x108] sm:$0xff]   ;;  %v7578_v7 = vld [vmem:[%s8248_s6 + $0x100] sm:$0xff]   ;;  %v7582_v19 = vld [vmem:[%s8248_s6 + $0x238] sm:$0xff]  }
  0x5b   : > { %6798 = vmatpush3.bf16.msra.mxu0 %v7538_v23  ;;  %v7575_v4 = vld [vmem:[%s8248_s6 + $0x188] sm:$0xff]   ;;  %v7579_v8 = vld [vmem:[%s8248_s6 + $0x180] sm:$0xff]   ;;  %v7583_v20 = vld [vmem:[%s8248_s6 + $0x2b8] sm:$0xff]  }
  0x5c   : > { %6820 = vmatpush3.bf16.msra.mxu1 %v7539_v24  ;;  %6799 = vmatprep.subr.bf16.mxu0 %v7540_v25  ;;  %v336_v9 = vld [vmem:[%s8250_s7 + $0x10] sm:$0xff]  ;;  %v337_v13 = vld [vmem:[%s8250_s7 + $0x18] sm:$0xff]  ;;  %v7584_v21 = vld [vmem:[%s8248_s6 + $0x270] sm:$0xff]  }
  0x5d   : > { %6821 = vmatprep.subr.bf16.mxu1 %v7541_v26  ;;  %v368_v10 = vld [vmem:[%s8250_s7 + $0x110] sm:$0xff]  ;;  %v369_v14 = vld [vmem:[%s8250_s7 + $0x118] sm:$0xff]  ;;  %v7585_v22 = vld [vmem:[%s8248_s6 + $0x2f0] sm:$0xff]  }
  0x5e   : > { %v6210_v11 = vcombine.low %v336_v9, %v368_v10  ;;  %v6211_v12 = vcombine.high %v336_v9, %v368_v10  ;;  %v6212_v15 = vcombine.low %v337_v13, %v369_v14  ;;  %v6213_v16 = vcombine.high %v337_v13, %v369_v14  ;;  %v7586_v23 = vld [vmem:[%s8248_s6 + $0x230] sm:$0xff]   ;;  %v7588_v25 = vld [vmem:[%s8248_s6 + $0x268] sm:$0xff]   ;;  %v7596_v33 = vld [vmem:[%s8248_s6 + $0x258] sm:$0xff]  }
  0x5f   : > { %6800 = vmatpush3.bf16.msra.mxu0 %v7542_v27  ;;  %v7587_v24 = vld [vmem:[%s8248_s6 + $0x2b0] sm:$0xff]   ;;  %v7589_v26 = vld [vmem:[%s8248_s6 + $0x2e8] sm:$0xff]   ;;  %v7597_v34 = vld [vmem:[%s8248_s6 + $0x2d8] sm:$0xff]  }
  0x60   : > { %6822 = vmatpush3.bf16.msra.mxu1 %v7543_v28  ;;  %6801 = vmatprep.subr.bf16.mxu0 %v7544_v29  ;;  %v7590_v27 = vld [vmem:[%s8248_s6 + $0x228] sm:$0xff]   ;;  %v7592_v29 = vld [vmem:[%s8248_s6 + $0x260] sm:$0xff]   ;;  %v7598_v35 = vld [vmem:[%s8248_s6 + $0x218] sm:$0xff]  }
  0x61   : > { %6823 = vmatprep.subr.bf16.mxu1 %v7545_v30  ;;  %v7591_v28 = vld [vmem:[%s8248_s6 + $0x2a8] sm:$0xff]   ;;  %v7593_v30 = vld [vmem:[%s8248_s6 + $0x2e0] sm:$0xff]   ;;  %v7600_v37 = vld [vmem:[%s8248_s6 + $0x250] sm:$0xff]  }
  0x62   : > { %v7601_v38 = vld [vmem:[%s8248_s6 + $0x2d0] sm:$0xff]   ;;  %v7628_v9 = vld [vmem:[%s8248_s6 + $0x358] sm:$0xff]  }
  0x63   : > { %6802 = vmatpush3.bf16.msra.mxu0 %v7546_v31  ;;  %v7594_v31 = vld [vmem:[%s8248_s6 + $0x220] sm:$0xff]   ;;  %v7603_v40 = vld [vmem:[%s8248_s6 + $0x290] sm:$0xff]   ;;  %v7629_v10 = vld [vmem:[%s8248_s6 + $0x3d8] sm:$0xff]  }
  0x64   : > { %6824 = vmatpush3.bf16.msra.mxu1 %v7547_v32  ;;  %6831 = vmatprep.subr.bf16.mxu0 %v7548_v41  ;;  %v7595_v32 = vld [vmem:[%s8248_s6 + $0x2a0] sm:$0xff]   ;;  %v7604_v41 = vld [vmem:[%s8248_s6 + $0x248] sm:$0xff]   ;;  %v7632_v13 = vld [vmem:[%s8248_s6 + $0x350] sm:$0xff]  }
  0x65   : > { %6853 = vmatprep.subr.bf16.mxu1 %v7549_v42  ;;  %v7605_v42 = vld [vmem:[%s8248_s6 + $0x2c8] sm:$0xff]   ;;  %v7633_v14 = vld [vmem:[%s8248_s6 + $0x3d0] sm:$0xff]  }
  0x66   : > { %4847 = vmatmul.mubr.bf16.vlgmr.msra.gmra.mxu0 %v6206_v36  ;;  %v7599_v36 = vld [vmem:[%s8248_s6 + $0x298] sm:$0xff]  }
  0x67   : > { %4888 = vmatmul.mubr.bf16.vlgmr.msra.gmra.mxu1 %v6208_v39  ;;  %6832 = vmatpush3.bf16.msra.mxu0 %v7550_v43  ;;  %v7602_v39 = vld [vmem:[%s8248_s6 + $0x210] sm:$0xff]   ;;  %v7606_v43 = vld [vmem:[%s8248_s6 + $0x208] sm:$0xff]  }
  0x68   : > { %6854 = vmatpush3.bf16.msra.mxu1 %v7551_v44  ;;  %6833 = vmatprep.subr.bf16.mxu0 %v7552_v45  ;;  %v7607_v44 = vld [vmem:[%s8248_s6 + $0x288] sm:$0xff]   ;;  %v7608_v45 = vld [vmem:[%s8248_s6 + $0x240] sm:$0xff]  }
  0x69   : > { %6855 = vmatprep.subr.bf16.mxu1 %v7553_v46  ;;  %4928 = vmatprep.mubr.bf16.mxu0 %v6211_v12  ;;  %v7609_v46 = vld [vmem:[%s8248_s6 + $0x2c0] sm:$0xff]   ;;  %v7631_v12 = vld [vmem:[%s8248_s6 + $0x398] sm:$0xff]  }
  0x6a   : > { %4969 = vmatprep.mubr.bf16.mxu1 %v6213_v16  ;;  %v7635_v16 = vld [vmem:[%s8248_s6 + $0x390] sm:$0xff]  }
  0x6b   : > { %6834 = vmatpush3.bf16.msra.mxu0 %v7554_v47  ;;  %v7610_v47 = vld [vmem:[%s8248_s6 + $0x200] sm:$0xff]  }
  0x6c   : > { %6856 = vmatpush3.bf16.msra.mxu1 %v7555_v48  ;;  %6835 = vmatprep.subr.bf16.mxu0 %v7556_v49  ;;  %v7611_v48 = vld [vmem:[%s8248_s6 + $0x280] sm:$0xff]   ;;  %v338_v49 = vld [vmem:[%s8250_s7 + $0x20] sm:$0xff] }
  0x6d   : > { %6857 = vmatprep.subr.bf16.mxu1 %v7557_v50  ;;  %v370_v50 = vld [vmem:[%s8250_s7 + $0x120] sm:$0xff] }
  0x6f   : > { %6836 = vmatpush3.bf16.msra.mxu0 %v7558_v51  ;;  %v339_v51 = vld [vmem:[%s8250_s7 + $0x28] sm:$0xff] }
  0x70   : > { %6858 = vmatpush3.bf16.msra.mxu1 %v7559_v52  ;;  %6837 = vmatprep.subr.bf16.mxu0 %v7560_v53  ;;  %v371_v52 = vld [vmem:[%s8250_s7 + $0x128] sm:$0xff]  ;;  %v6214_v53 = vcombine.low %v338_v49, %v370_v50 }
  0x71   : > { %6859 = vmatprep.subr.bf16.mxu1 %v7561_v54  ;;  %v6215_v54 = vcombine.high %v338_v49, %v370_v50  ;;  %v7660_v49 = vld [vmem:[%s8248_s6 + $0x458] sm:$0xff]  }
  0x72   : > { %v7661_v50 = vld [vmem:[%s8248_s6 + $0x4d8] sm:$0xff]  }
  0x73   : > { %6838 = vmatpush3.bf16.msra.mxu0 %v7562_v55  ;;  %v6216_v55 = vcombine.low %v339_v51, %v371_v52 }
  0x74   : > { %6860 = vmatpush3.bf16.msra.mxu1 %v7563_v56  ;;  %6839 = vmatprep.subr.bf16.mxu0 %v7564_v57  ;;  %v6217_v56 = vcombine.high %v339_v51, %v371_v52  ;;  %v7612_v57 = vld [vmem:[%s8248_s6 + $0x378] sm:$0xff]  }
  0x75   : > { %6861 = vmatprep.subr.bf16.mxu1 %v7565_v58  ;;  %v7613_v58 = vld [vmem:[%s8248_s6 + $0x3f8] sm:$0xff]  }
  0x76   : > { %v7662_v51 = vld [vmem:[%s8248_s6 + $0x418] sm:$0xff]  }
  0x77   : > { %6840 = vmatpush3.bf16.msra.mxu0 %v7566_v59  ;;  %v7614_v59 = vld [vmem:[%s8248_s6 + $0x338] sm:$0xff]  }
  0x78   : > { %6862 = vmatpush3.bf16.msra.mxu1 %v7567_v60  ;;  %6841 = vmatprep.subr.bf16.mxu0 %v7568_v61  ;;  %v7615_v60 = vld [vmem:[%s8248_s6 + $0x3b8] sm:$0xff]   ;;  %v7616_v61 = vld [vmem:[%s8248_s6 + $0x370] sm:$0xff]  }
  0x79   : > { %6863 = vmatprep.subr.bf16.mxu1 %v7569_v62  ;;  %v7617_v62 = vld [vmem:[%s8248_s6 + $0x3f0] sm:$0xff]   ;;  %v7663_v52 = vld [vmem:[%s8248_s6 + $0x498] sm:$0xff]  }
  0x7b   : > { %6842 = vmatpush3.bf16.msra.mxu0 %v7570_v63  ;;  %v7618_v63 = vld [vmem:[%s8248_s6 + $0x330] sm:$0xff]  }
  0x7c   : > { %6864 = vmatpush3.bf16.msra.mxu1 %v7571_v0  ;;  %6843 = vmatprep.subr.bf16.mxu0 %v7572_v1  ;;  %v7619_v0 = vld [vmem:[%s8248_s6 + $0x3b0] sm:$0xff]   ;;  %v7620_v1 = vld [vmem:[%s8248_s6 + $0x368] sm:$0xff]  }
  0x7d   : > { %6865 = vmatprep.subr.bf16.mxu1 %v7573_v2  ;;  %v7621_v2 = vld [vmem:[%s8248_s6 + $0x3e8] sm:$0xff]  }
  0x7f   : > { %6844 = vmatpush3.bf16.msra.mxu0 %v7574_v3  ;;  %v7622_v3 = vld [vmem:[%s8248_s6 + $0x328] sm:$0xff]  }
  0x80   : > { %6866 = vmatpush3.bf16.msra.mxu1 %v7575_v4  ;;  %6845 = vmatprep.subr.bf16.mxu0 %v7576_v5  ;;  %v7623_v4 = vld [vmem:[%s8248_s6 + $0x3a8] sm:$0xff]   ;;  %v7624_v5 = vld [vmem:[%s8248_s6 + $0x360] sm:$0xff]  }
  0x81   : > { %6867 = vmatprep.subr.bf16.mxu1 %v7577_v6  ;;  %v7625_v6 = vld [vmem:[%s8248_s6 + $0x3e0] sm:$0xff]  }
  0x83   : > { %6846 = vmatpush3.bf16.msra.mxu0 %v7578_v7  ;;  %v7626_v7 = vld [vmem:[%s8248_s6 + $0x320] sm:$0xff]  }
  0x84   : > { %6868 = vmatpush3.bf16.msra.mxu1 %v7579_v8  ;;  %6875 = vmatprep.subr.bf16.mxu0 %v7580_v17  ;;  %v7627_v8 = vld [vmem:[%s8248_s6 + $0x3a0] sm:$0xff]   ;;  %v7636_v17 = vld [vmem:[%s8248_s6 + $0x348] sm:$0xff]  }
  0x85   : > { %6897 = vmatprep.subr.bf16.mxu1 %v7581_v18  ;;  %v7637_v18 = vld [vmem:[%s8248_s6 + $0x3c8] sm:$0xff]  }
  0x86   : > { %4929 = vmatmul.mubr.bf16.vlgmr.msra.gmra.mxu0 %v6210_v11  ;;  %v7630_v11 = vld [vmem:[%s8248_s6 + $0x318] sm:$0xff]  }
  0x87   : > { %4970 = vmatmul.mubr.bf16.vlgmr.msra.gmra.mxu1 %v6212_v15  ;;  %6876 = vmatpush3.bf16.msra.mxu0 %v7582_v19  ;;  %v7634_v15 = vld [vmem:[%s8248_s6 + $0x310] sm:$0xff]   ;;  %v7638_v19 = vld [vmem:[%s8248_s6 + $0x308] sm:$0xff]  }
  0x88   : > { %6898 = vmatpush3.bf16.msra.mxu1 %v7583_v20  ;;  %6877 = vmatprep.subr.bf16.mxu0 %v7584_v21  ;;  %v7639_v20 = vld [vmem:[%s8248_s6 + $0x388] sm:$0xff]   ;;  %v7640_v21 = vld [vmem:[%s8248_s6 + $0x340] sm:$0xff]  }
  0x89   : > { %6899 = vmatprep.subr.bf16.mxu1 %v7585_v22  ;;  %5010 = vmatprep.mubr.bf16.mxu0 %v6215_v54  ;;  %v7641_v22 = vld [vmem:[%s8248_s6 + $0x3c0] sm:$0xff]   ;;  %v7665_v54 = vld [vmem:[%s8248_s6 + $0x4d0] sm:$0xff]  }
  0x8a   : > { %5051 = vmatprep.mubr.bf16.mxu1 %v6217_v56  ;;  %v7667_v56 = vld [vmem:[%s8248_s6 + $0x490] sm:$0xff]  }
  0x8b   : > { %6878 = vmatpush3.bf16.msra.mxu0 %v7586_v23  ;;  %v7642_v23 = vld [vmem:[%s8248_s6 + $0x300] sm:$0xff]  }
  0x8c   : > { %6900 = vmatpush3.bf16.msra.mxu1 %v7587_v24  ;;  %6879 = vmatprep.subr.bf16.mxu0 %v7588_v25  ;;  %v7643_v24 = vld [vmem:[%s8248_s6 + $0x380] sm:$0xff]  }
  0x8d   : > { %6901 = vmatprep.subr.bf16.mxu1 %v7589_v26  ;;  %v340_v25 = vld [vmem:[%s8250_s7 + $0x30] sm:$0xff] }
  0x8e   : > { %v372_v26 = vld [vmem:[%s8250_s7 + $0x130] sm:$0xff] }
  0x8f   : > { %6880 = vmatpush3.bf16.msra.mxu0 %v7590_v27  ;;  %v341_v27 = vld [vmem:[%s8250_s7 + $0x38] sm:$0xff] }
  0x90   : > { %6902 = vmatpush3.bf16.msra.mxu1 %v7591_v28  ;;  %6881 = vmatprep.subr.bf16.mxu0 %v7592_v29  ;;  %v6218_v28 = vcombine.low %v340_v25, %v372_v26  ;;  %v6219_v29 = vcombine.high %v340_v25, %v372_v26  ;;  %v7692_v25 = vld [vmem:[%s8248_s6 + $0x558] sm:$0xff]  }
  0x91   : > { %6903 = vmatprep.subr.bf16.mxu1 %v7593_v30  ;;  %v373_v30 = vld [vmem:[%s8250_s7 + $0x138] sm:$0xff]  ;;  %v7693_v26 = vld [vmem:[%s8248_s6 + $0x5d8] sm:$0xff]  }
  0x93   : > { %6882 = vmatpush3.bf16.msra.mxu0 %v7594_v31  ;;  %v6220_v31 = vcombine.low %v341_v27, %v373_v30 }
  0x94   : > { %6904 = vmatpush3.bf16.msra.mxu1 %v7595_v32  ;;  %6883 = vmatprep.subr.bf16.mxu0 %v7596_v33  ;;  %v6221_v32 = vcombine.high %v341_v27, %v373_v30  ;;  %v7644_v33 = vld [vmem:[%s8248_s6 + $0x478] sm:$0xff]   ;;  %v7697_v30 = vld [vmem:[%s8248_s6 + $0x5d0] sm:$0xff]  }
  0x95   : > { %6905 = vmatprep.subr.bf16.mxu1 %v7597_v34  ;;  %v7645_v34 = vld [vmem:[%s8248_s6 + $0x4f8] sm:$0xff]  }
  0x96   : > { %v7694_v27 = vld [vmem:[%s8248_s6 + $0x518] sm:$0xff]  }
  0x97   : > { %6884 = vmatpush3.bf16.msra.mxu0 %v7598_v35  ;;  %v7646_v35 = vld [vmem:[%s8248_s6 + $0x438] sm:$0xff]  }
  0x98   : > { %6906 = vmatpush3.bf16.msra.mxu1 %v7599_v36  ;;  %6885 = vmatprep.subr.bf16.mxu0 %v7600_v37  ;;  %v7647_v36 = vld [vmem:[%s8248_s6 + $0x4b8] sm:$0xff]   ;;  %v7648_v37 = vld [vmem:[%s8248_s6 + $0x470] sm:$0xff]  }
  0x99   : > { %6907 = vmatprep.subr.bf16.mxu1 %v7601_v38  ;;  %v7649_v38 = vld [vmem:[%s8248_s6 + $0x4f0] sm:$0xff]  }
  0x9b   : > { %6886 = vmatpush3.bf16.msra.mxu0 %v7602_v39  ;;  %v7650_v39 = vld [vmem:[%s8248_s6 + $0x430] sm:$0xff]  }
  0x9c   : > { %6908 = vmatpush3.bf16.msra.mxu1 %v7603_v40  ;;  %6887 = vmatprep.subr.bf16.mxu0 %v7604_v41  ;;  %v7651_v40 = vld [vmem:[%s8248_s6 + $0x4b0] sm:$0xff]   ;;  %v7652_v41 = vld [vmem:[%s8248_s6 + $0x468] sm:$0xff]  }
  0x9d   : > { %6909 = vmatprep.subr.bf16.mxu1 %v7605_v42  ;;  %v7653_v42 = vld [vmem:[%s8248_s6 + $0x4e8] sm:$0xff]  }
  0x9f   : > { %6888 = vmatpush3.bf16.msra.mxu0 %v7606_v43  ;;  %v7654_v43 = vld [vmem:[%s8248_s6 + $0x428] sm:$0xff]  }
  0xa0   : > { %6910 = vmatpush3.bf16.msra.mxu1 %v7607_v44  ;;  %6889 = vmatprep.subr.bf16.mxu0 %v7608_v45  ;;  %v7655_v44 = vld [vmem:[%s8248_s6 + $0x4a8] sm:$0xff]   ;;  %v7656_v45 = vld [vmem:[%s8248_s6 + $0x460] sm:$0xff]  }
  0xa1   : > { %6911 = vmatprep.subr.bf16.mxu1 %v7609_v46  ;;  %v7657_v46 = vld [vmem:[%s8248_s6 + $0x4e0] sm:$0xff]  }
  0xa3   : > { %6890 = vmatpush3.bf16.msra.mxu0 %v7610_v47  ;;  %v7658_v47 = vld [vmem:[%s8248_s6 + $0x420] sm:$0xff]  }
  0xa4   : > { %6912 = vmatpush3.bf16.msra.mxu1 %v7611_v48  ;;  %6919 = vmatprep.subr.bf16.mxu0 %v7612_v57  ;;  %v7659_v48 = vld [vmem:[%s8248_s6 + $0x4a0] sm:$0xff]   ;;  %v7668_v57 = vld [vmem:[%s8248_s6 + $0x448] sm:$0xff]  }
  0xa5   : > { %6941 = vmatprep.subr.bf16.mxu1 %v7613_v58  ;;  %v7669_v58 = vld [vmem:[%s8248_s6 + $0x4c8] sm:$0xff]  }
  0xa6   : > { %5011 = vmatmul.mubr.bf16.vlgmr.msra.gmra.mxu0 %v6214_v53  ;;  %v7664_v53 = vld [vmem:[%s8248_s6 + $0x450] sm:$0xff]  }
  0xa7   : > { %5052 = vmatmul.mubr.bf16.vlgmr.msra.gmra.mxu1 %v6216_v55  ;;  %6920 = vmatpush3.bf16.msra.mxu0 %v7614_v59  ;;  %v7666_v55 = vld [vmem:[%s8248_s6 + $0x410] sm:$0xff]   ;;  %v7670_v59 = vld [vmem:[%s8248_s6 + $0x408] sm:$0xff]  }
  0xa8   : > { %6942 = vmatpush3.bf16.msra.mxu1 %v7615_v60  ;;  %6921 = vmatprep.subr.bf16.mxu0 %v7616_v61  ;;  %v7671_v60 = vld [vmem:[%s8248_s6 + $0x488] sm:$0xff]   ;;  %v7672_v61 = vld [vmem:[%s8248_s6 + $0x440] sm:$0xff]  }
  0xa9   : > { %6943 = vmatprep.subr.bf16.mxu1 %v7617_v62  ;;  %5092 = vmatprep.mubr.bf16.mxu0 %v6219_v29  ;;  %v7673_v62 = vld [vmem:[%s8248_s6 + $0x4c0] sm:$0xff]   ;;  %v7696_v29 = vld [vmem:[%s8248_s6 + $0x550] sm:$0xff]  }
  0xaa   : > { %5133 = vmatprep.mubr.bf16.mxu1 %v6221_v32  ;;  %v7699_v32 = vld [vmem:[%s8248_s6 + $0x590] sm:$0xff]  }
  0xab   : > { %6922 = vmatpush3.bf16.msra.mxu0 %v7618_v63  ;;  %v7674_v63 = vld [vmem:[%s8248_s6 + $0x400] sm:$0xff]  }
  0xac   : > { %6944 = vmatpush3.bf16.msra.mxu1 %v7619_v0  ;;  %6923 = vmatprep.subr.bf16.mxu0 %v7620_v1  ;;  %v7675_v0 = vld [vmem:[%s8248_s6 + $0x480] sm:$0xff]   ;;  %v342_v1 = vld [vmem:[%s8250_s7 + $0x40] sm:$0xff] }
  0xad   : > { %6945 = vmatprep.subr.bf16.mxu1 %v7621_v2  ;;  %v374_v2 = vld [vmem:[%s8250_s7 + $0x140] sm:$0xff] }
  0xaf   : > { %6924 = vmatpush3.bf16.msra.mxu0 %v7622_v3  ;;  %v6222_v3 = vcombine.low %v342_v1, %v374_v2 }
  0xb0   : > { %6946 = vmatpush3.bf16.msra.mxu1 %v7623_v4  ;;  %6925 = vmatprep.subr.bf16.mxu0 %v7624_v5  ;;  %v6223_v4 = vcombine.high %v342_v1, %v374_v2  ;;  %v343_v5 = vld [vmem:[%s8250_s7 + $0x48] sm:$0xff] }
  0xb1   : > { %6947 = vmatprep.subr.bf16.mxu1 %v7625_v6  ;;  %v375_v6 = vld [vmem:[%s8250_s7 + $0x148] sm:$0xff] }
  0xb2   : > { %v7724_v1 = vld [vmem:[%s8248_s6 + $0x658] sm:$0xff]  }
  0xb3   : > { %6926 = vmatpush3.bf16.msra.mxu0 %v7626_v7  ;;  %v6224_v7 = vcombine.low %v343_v5, %v375_v6  ;;  %v7725_v2 = vld [vmem:[%s8248_s6 + $0x6d8] sm:$0xff]  }
  0xb4   : > { %6948 = vmatpush3.bf16.msra.mxu1 %v7627_v8  ;;  %6927 = vmatprep.subr.bf16.mxu0 %v7628_v9  ;;  %v6225_v8 = vcombine.high %v343_v5, %v375_v6  ;;  %v7676_v9 = vld [vmem:[%s8248_s6 + $0x578] sm:$0xff]   ;;  %v7728_v5 = vld [vmem:[%s8248_s6 + $0x650] sm:$0xff]  }
  0xb5   : > { %6949 = vmatprep.subr.bf16.mxu1 %v7629_v10  ;;  %v7677_v10 = vld [vmem:[%s8248_s6 + $0x5f8] sm:$0xff]   ;;  %v7729_v6 = vld [vmem:[%s8248_s6 + $0x6d0] sm:$0xff]  }
  0xb7   : > { %6928 = vmatpush3.bf16.msra.mxu0 %v7630_v11  ;;  %v7678_v11 = vld [vmem:[%s8248_s6 + $0x538] sm:$0xff]  }
  0xb8   : > { %6950 = vmatpush3.bf16.msra.mxu1 %v7631_v12  ;;  %6929 = vmatprep.subr.bf16.mxu0 %v7632_v13  ;;  %v7679_v12 = vld [vmem:[%s8248_s6 + $0x5b8] sm:$0xff]   ;;  %v7680_v13 = vld [vmem:[%s8248_s6 + $0x570] sm:$0xff]  }
  0xb9   : > { %6951 = vmatprep.subr.bf16.mxu1 %v7633_v14  ;;  %v7681_v14 = vld [vmem:[%s8248_s6 + $0x5f0] sm:$0xff]  }
  0xbb   : > { %6930 = vmatpush3.bf16.msra.mxu0 %v7634_v15  ;;  %v7682_v15 = vld [vmem:[%s8248_s6 + $0x530] sm:$0xff]  }
  0xbc   : > { %6952 = vmatpush3.bf16.msra.mxu1 %v7635_v16  ;;  %6931 = vmatprep.subr.bf16.mxu0 %v7636_v17  ;;  %v7683_v16 = vld [vmem:[%s8248_s6 + $0x5b0] sm:$0xff]   ;;  %v7684_v17 = vld [vmem:[%s8248_s6 + $0x568] sm:$0xff]  }
  0xbd   : > { %6953 = vmatprep.subr.bf16.mxu1 %v7637_v18  ;;  %v7685_v18 = vld [vmem:[%s8248_s6 + $0x5e8] sm:$0xff]  }
  0xbf   : > { %6932 = vmatpush3.bf16.msra.mxu0 %v7638_v19  ;;  %v7686_v19 = vld [vmem:[%s8248_s6 + $0x528] sm:$0xff]  }
  0xc0   : > { %6954 = vmatpush3.bf16.msra.mxu1 %v7639_v20  ;;  %6933 = vmatprep.subr.bf16.mxu0 %v7640_v21  ;;  %v7687_v20 = vld [vmem:[%s8248_s6 + $0x5a8] sm:$0xff]   ;;  %v7688_v21 = vld [vmem:[%s8248_s6 + $0x560] sm:$0xff]  }
  0xc1   : > { %6955 = vmatprep.subr.bf16.mxu1 %v7641_v22  ;;  %v7689_v22 = vld [vmem:[%s8248_s6 + $0x5e0] sm:$0xff]  }
  0xc3   : > { %6934 = vmatpush3.bf16.msra.mxu0 %v7642_v23  ;;  %v7690_v23 = vld [vmem:[%s8248_s6 + $0x520] sm:$0xff]  }
  0xc4   : > { %6956 = vmatpush3.bf16.msra.mxu1 %v7643_v24  ;;  %6963 = vmatprep.subr.bf16.mxu0 %v7644_v33  ;;  %v7691_v24 = vld [vmem:[%s8248_s6 + $0x5a0] sm:$0xff]   ;;  %v7700_v33 = vld [vmem:[%s8248_s6 + $0x548] sm:$0xff]  }
  0xc5   : > { %6985 = vmatprep.subr.bf16.mxu1 %v7645_v34  ;;  %v7701_v34 = vld [vmem:[%s8248_s6 + $0x5c8] sm:$0xff]  }
  0xc6   : > { %5093 = vmatmul.mubr.bf16.vlgmr.msra.gmra.mxu0 %v6218_v28  ;;  %v7695_v28 = vld [vmem:[%s8248_s6 + $0x598] sm:$0xff]  }
  0xc7   : > { %5134 = vmatmul.mubr.bf16.vlgmr.msra.gmra.mxu1 %v6220_v31  ;;  %6964 = vmatpush3.bf16.msra.mxu0 %v7646_v35  ;;  %v7698_v31 = vld [vmem:[%s8248_s6 + $0x510] sm:$0xff]   ;;  %v7702_v35 = vld [vmem:[%s8248_s6 + $0x508] sm:$0xff]  }
  0xc8   : > { %6986 = vmatpush3.bf16.msra.mxu1 %v7647_v36  ;;  %6965 = vmatprep.subr.bf16.mxu0 %v7648_v37  ;;  %v7703_v36 = vld [vmem:[%s8248_s6 + $0x588] sm:$0xff]   ;;  %v7704_v37 = vld [vmem:[%s8248_s6 + $0x540] sm:$0xff]  }
  0xc9   : > { %6987 = vmatprep.subr.bf16.mxu1 %v7649_v38  ;;  %5174 = vmatprep.mubr.bf16.mxu0 %v6223_v4  ;;  %v7705_v38 = vld [vmem:[%s8248_s6 + $0x5c0] sm:$0xff]   ;;  %v7727_v4 = vld [vmem:[%s8248_s6 + $0x698] sm:$0xff]  }
  0xca   : > { %5215 = vmatprep.mubr.bf16.mxu1 %v6225_v8  ;;  %v7731_v8 = vld [vmem:[%s8248_s6 + $0x690] sm:$0xff]  }
  0xcb   : > { %6966 = vmatpush3.bf16.msra.mxu0 %v7650_v39  ;;  %v7706_v39 = vld [vmem:[%s8248_s6 + $0x500] sm:$0xff]  }
  0xcc   : > { %6988 = vmatpush3.bf16.msra.mxu1 %v7651_v40  ;;  %6967 = vmatprep.subr.bf16.mxu0 %v7652_v41  ;;  %v7707_v40 = vld [vmem:[%s8248_s6 + $0x580] sm:$0xff]  }
  0xcd   : > { %6989 = vmatprep.subr.bf16.mxu1 %v7653_v42  ;;  %v344_v41 = vld [vmem:[%s8250_s7 + $0x50] sm:$0xff] }
  0xce   : > { %v376_v42 = vld [vmem:[%s8250_s7 + $0x150] sm:$0xff] }
  0xcf   : > { %6968 = vmatpush3.bf16.msra.mxu0 %v7654_v43  ;;  %v345_v43 = vld [vmem:[%s8250_s7 + $0x58] sm:$0xff] }
  0xd0   : > { %6990 = vmatpush3.bf16.msra.mxu1 %v7655_v44  ;;  %6969 = vmatprep.subr.bf16.mxu0 %v7656_v45  ;;  %v377_v44 = vld [vmem:[%s8250_s7 + $0x158] sm:$0xff]  ;;  %v6226_v45 = vcombine.low %v344_v41, %v376_v42 }
  0xd1   : > { %6991 = vmatprep.subr.bf16.mxu1 %v7657_v46  ;;  %v6227_v46 = vcombine.high %v344_v41, %v376_v42  ;;  %v7756_v41 = vld [vmem:[%s8248_s6 + $0x758] sm:$0xff]  }
  0xd2   : > { %v7757_v42 = vld [vmem:[%s8248_s6 + $0x7d8] sm:$0xff]  }
  0xd3   : > { %6970 = vmatpush3.bf16.msra.mxu0 %v7658_v47  ;;  %v6228_v47 = vcombine.low %v345_v43, %v377_v44 }
  0xd4   : > { %6992 = vmatpush3.bf16.msra.mxu1 %v7659_v48  ;;  %6971 = vmatprep.subr.bf16.mxu0 %v7660_v49  ;;  %v6229_v48 = vcombine.high %v345_v43, %v377_v44  ;;  %v7708_v49 = vld [vmem:[%s8248_s6 + $0x678] sm:$0xff]  }
  0xd5   : > { %6993 = vmatprep.subr.bf16.mxu1 %v7661_v50  ;;  %v7709_v50 = vld [vmem:[%s8248_s6 + $0x6f8] sm:$0xff]  }
  0xd6   : > { %v7758_v43 = vld [vmem:[%s8248_s6 + $0x718] sm:$0xff]  }
  0xd7   : > { %6972 = vmatpush3.bf16.msra.mxu0 %v7662_v51  ;;  %v7710_v51 = vld [vmem:[%s8248_s6 + $0x638] sm:$0xff]  }
  0xd8   : > { %6994 = vmatpush3.bf16.msra.mxu1 %v7663_v52  ;;  %6973 = vmatprep.subr.bf16.mxu0 %v7664_v53  ;;  %v7711_v52 = vld [vmem:[%s8248_s6 + $0x6b8] sm:$0xff]   ;;  %v7712_v53 = vld [vmem:[%s8248_s6 + $0x670] sm:$0xff]  }
  0xd9   : > { %6995 = vmatprep.subr.bf16.mxu1 %v7665_v54  ;;  %v7713_v54 = vld [vmem:[%s8248_s6 + $0x6f0] sm:$0xff]   ;;  %v7759_v44 = vld [vmem:[%s8248_s6 + $0x798] sm:$0xff]  }
  0xdb   : > { %6974 = vmatpush3.bf16.msra.mxu0 %v7666_v55  ;;  %v7714_v55 = vld [vmem:[%s8248_s6 + $0x630] sm:$0xff]  }
  0xdc   : > { %6996 = vmatpush3.bf16.msra.mxu1 %v7667_v56  ;;  %6975 = vmatprep.subr.bf16.mxu0 %v7668_v57  ;;  %v7715_v56 = vld [vmem:[%s8248_s6 + $0x6b0] sm:$0xff]   ;;  %v7716_v57 = vld [vmem:[%s8248_s6 + $0x668] sm:$0xff]  }
  0xdd   : > { %6997 = vmatprep.subr.bf16.mxu1 %v7669_v58  ;;  %v7717_v58 = vld [vmem:[%s8248_s6 + $0x6e8] sm:$0xff]  }
  0xdf   : > { %6976 = vmatpush3.bf16.msra.mxu0 %v7670_v59  ;;  %v7718_v59 = vld [vmem:[%s8248_s6 + $0x628] sm:$0xff]  }
  0xe0   : > { %6998 = vmatpush3.bf16.msra.mxu1 %v7671_v60  ;;  %6977 = vmatprep.subr.bf16.mxu0 %v7672_v61  ;;  %v7719_v60 = vld [vmem:[%s8248_s6 + $0x6a8] sm:$0xff]   ;;  %v7720_v61 = vld [vmem:[%s8248_s6 + $0x660] sm:$0xff]  }
  0xe1   : > { %6999 = vmatprep.subr.bf16.mxu1 %v7673_v62  ;;  %v7721_v62 = vld [vmem:[%s8248_s6 + $0x6e0] sm:$0xff]  }
  0xe3   : > { %6978 = vmatpush3.bf16.msra.mxu0 %v7674_v63  ;;  %v7722_v63 = vld [vmem:[%s8248_s6 + $0x620] sm:$0xff]  }
  0xe4   : > { %7000 = vmatpush3.bf16.msra.mxu1 %v7675_v0  ;;  %7007 = vmatprep.subr.bf16.mxu0 %v7676_v9  ;;  %v7723_v0 = vld [vmem:[%s8248_s6 + $0x6a0] sm:$0xff]   ;;  %v7732_v9 = vld [vmem:[%s8248_s6 + $0x648] sm:$0xff]  }
  0xe5   : > { %7029 = vmatprep.subr.bf16.mxu1 %v7677_v10  ;;  %v7733_v10 = vld [vmem:[%s8248_s6 + $0x6c8] sm:$0xff]  }
  0xe6   : > { %5175 = vmatmul.mubr.bf16.vlgmr.msra.gmra.mxu0 %v6222_v3  ;;  %v7726_v3 = vld [vmem:[%s8248_s6 + $0x618] sm:$0xff]  }
  0xe7   : > { %5216 = vmatmul.mubr.bf16.vlgmr.msra.gmra.mxu1 %v6224_v7  ;;  %7008 = vmatpush3.bf16.msra.mxu0 %v7678_v11  ;;  %v7730_v7 = vld [vmem:[%s8248_s6 + $0x610] sm:$0xff]   ;;  %v7734_v11 = vld [vmem:[%s8248_s6 + $0x608] sm:$0xff]  }
  0xe8   : > { %7030 = vmatpush3.bf16.msra.mxu1 %v7679_v12  ;;  %7009 = vmatprep.subr.bf16.mxu0 %v7680_v13  ;;  %v7735_v12 = vld [vmem:[%s8248_s6 + $0x688] sm:$0xff]   ;;  %v7736_v13 = vld [vmem:[%s8248_s6 + $0x640] sm:$0xff]  }
  0xe9   : > { %7031 = vmatprep.subr.bf16.mxu1 %v7681_v14  ;;  %5256 = vmatprep.mubr.bf16.mxu0 %v6227_v46  ;;  %v7737_v14 = vld [vmem:[%s8248_s6 + $0x6c0] sm:$0xff]   ;;  %v7761_v46 = vld [vmem:[%s8248_s6 + $0x7d0] sm:$0xff]  }
  0xea   : > { %5297 = vmatprep.mubr.bf16.mxu1 %v6229_v48  ;;  %v7763_v48 = vld [vmem:[%s8248_s6 + $0x790] sm:$0xff]  }
  0xeb   : > { %7010 = vmatpush3.bf16.msra.mxu0 %v7682_v15  ;;  %v7738_v15 = vld [vmem:[%s8248_s6 + $0x600] sm:$0xff]  }
  0xec   : > { %7032 = vmatpush3.bf16.msra.mxu1 %v7683_v16  ;;  %7011 = vmatprep.subr.bf16.mxu0 %v7684_v17  ;;  %v7739_v16 = vld [vmem:[%s8248_s6 + $0x680] sm:$0xff]   ;;  %v346_v17 = vld [vmem:[%s8250_s7 + $0x60] sm:$0xff] }
  0xed   : > { %7033 = vmatprep.subr.bf16.mxu1 %v7685_v18  ;;  %v378_v18 = vld [vmem:[%s8250_s7 + $0x160] sm:$0xff] }
  0xef   : > { %7012 = vmatpush3.bf16.msra.mxu0 %v7686_v19  ;;  %v347_v19 = vld [vmem:[%s8250_s7 + $0x68] sm:$0xff] }
  0xf0   : > { %7034 = vmatpush3.bf16.msra.mxu1 %v7687_v20  ;;  %7013 = vmatprep.subr.bf16.mxu0 %v7688_v21  ;;  %v6230_v20 = vcombine.low %v346_v17, %v378_v18  ;;  %v6231_v21 = vcombine.high %v346_v17, %v378_v18  ;;  %v7788_v17 = vld [vmem:[%s8248_s6 + $0x858] sm:$0xff]  }
  0xf1   : > { %7035 = vmatprep.subr.bf16.mxu1 %v7689_v22  ;;  %v379_v22 = vld [vmem:[%s8250_s7 + $0x168] sm:$0xff] }
  0xf2   : > { %v7789_v18 = vld [vmem:[%s8248_s6 + $0x8d8] sm:$0xff]  }
  0xf3   : > { %7014 = vmatpush3.bf16.msra.mxu0 %v7690_v23  ;;  %v6232_v23 = vcombine.low %v347_v19, %v379_v22 }
  0xf4   : > { %7036 = vmatpush3.bf16.msra.mxu1 %v7691_v24  ;;  %7015 = vmatprep.subr.bf16.mxu0 %v7692_v25  ;;  %v6233_v24 = vcombine.high %v347_v19, %v379_v22  ;;  %v7740_v25 = vld [vmem:[%s8248_s6 + $0x778] sm:$0xff]   ;;  %v7793_v22 = vld [vmem:[%s8248_s6 + $0x8d0] sm:$0xff]  }
  0xf5   : > { %7037 = vmatprep.subr.bf16.mxu1 %v7693_v26  ;;  %v7741_v26 = vld [vmem:[%s8248_s6 + $0x7f8] sm:$0xff]  }
  0xf6   : > { %v7790_v19 = vld [vmem:[%s8248_s6 + $0x818] sm:$0xff]  }
  0xf7   : > { %7016 = vmatpush3.bf16.msra.mxu0 %v7694_v27  ;;  %v7742_v27 = vld [vmem:[%s8248_s6 + $0x738] sm:$0xff]  }
  0xf8   : > { %7038 = vmatpush3.bf16.msra.mxu1 %v7695_v28  ;;  %7017 = vmatprep.subr.bf16.mxu0 %v7696_v29  ;;  %v7743_v28 = vld [vmem:[%s8248_s6 + $0x7b8] sm:$0xff]   ;;  %v7744_v29 = vld [vmem:[%s8248_s6 + $0x770] sm:$0xff]  }
  0xf9   : > { %7039 = vmatprep.subr.bf16.mxu1 %v7697_v30  ;;  %v7745_v30 = vld [vmem:[%s8248_s6 + $0x7f0] sm:$0xff]  }
  0xfb   : > { %7018 = vmatpush3.bf16.msra.mxu0 %v7698_v31  ;;  %v7746_v31 = vld [vmem:[%s8248_s6 + $0x730] sm:$0xff]  }
  0xfc   : > { %7040 = vmatpush3.bf16.msra.mxu1 %v7699_v32  ;;  %7019 = vmatprep.subr.bf16.mxu0 %v7700_v33  ;;  %v7747_v32 = vld [vmem:[%s8248_s6 + $0x7b0] sm:$0xff]   ;;  %v7748_v33 = vld [vmem:[%s8248_s6 + $0x768] sm:$0xff]  }
  0xfd   : > { %7041 = vmatprep.subr.bf16.mxu1 %v7701_v34  ;;  %v7749_v34 = vld [vmem:[%s8248_s6 + $0x7e8] sm:$0xff]  }
  0xff   : > { %7020 = vmatpush3.bf16.msra.mxu0 %v7702_v35  ;;  %v7750_v35 = vld [vmem:[%s8248_s6 + $0x728] sm:$0xff]  }
 0x100   : > { %7042 = vmatpush3.bf16.msra.mxu1 %v7703_v36  ;;  %7021 = vmatprep.subr.bf16.mxu0 %v7704_v37  ;;  %v7751_v36 = vld [vmem:[%s8248_s6 + $0x7a8] sm:$0xff]   ;;  %v7752_v37 = vld [vmem:[%s8248_s6 + $0x760] sm:$0xff]  }
 0x101   : > { %7043 = vmatprep.subr.bf16.mxu1 %v7705_v38  ;;  %v7753_v38 = vld [vmem:[%s8248_s6 + $0x7e0] sm:$0xff]  }
 0x103   : > { %7022 = vmatpush3.bf16.msra.mxu0 %v7706_v39  ;;  %v7754_v39 = vld [vmem:[%s8248_s6 + $0x720] sm:$0xff]  }
 0x104   : > { %7044 = vmatpush3.bf16.msra.mxu1 %v7707_v40  ;;  %7051 = vmatprep.subr.bf16.mxu0 %v7708_v49  ;;  %v7755_v40 = vld [vmem:[%s8248_s6 + $0x7a0] sm:$0xff]   ;;  %v7764_v49 = vld [vmem:[%s8248_s6 + $0x748] sm:$0xff]  }
 0x105   : > { %7073 = vmatprep.subr.bf16.mxu1 %v7709_v50  ;;  %v7765_v50 = vld [vmem:[%s8248_s6 + $0x7c8] sm:$0xff]  }
 0x106   : > { %5257 = vmatmul.mubr.bf16.vlgmr.msra.gmra.mxu0 %v6226_v45  ;;  %v7760_v45 = vld [vmem:[%s8248_s6 + $0x750] sm:$0xff]  }
 0x107   : > { %5298 = vmatmul.mubr.bf16.vlgmr.msra.gmra.mxu1 %v6228_v47  ;;  %7052 = vmatpush3.bf16.msra.mxu0 %v7710_v51  ;;  %v7762_v47 = vld [vmem:[%s8248_s6 + $0x710] sm:$0xff]   ;;  %v7766_v51 = vld [vmem:[%s8248_s6 + $0x708] sm:$0xff]  }
 0x108   : > { %7074 = vmatpush3.bf16.msra.mxu1 %v7711_v52  ;;  %7053 = vmatprep.subr.bf16.mxu0 %v7712_v53  ;;  %v7767_v52 = vld [vmem:[%s8248_s6 + $0x788] sm:$0xff]   ;;  %v7768_v53 = vld [vmem:[%s8248_s6 + $0x740] sm:$0xff]  }
 0x109   : > { %7075 = vmatprep.subr.bf16.mxu1 %v7713_v54  ;;  %5338 = vmatprep.mubr.bf16.mxu0 %v6231_v21  ;;  %v7769_v54 = vld [vmem:[%s8248_s6 + $0x7c0] sm:$0xff]   ;;  %v7792_v21 = vld [vmem:[%s8248_s6 + $0x850] sm:$0xff]  }
 0x10a   : > { %5379 = vmatprep.mubr.bf16.mxu1 %v6233_v24  ;;  %v7795_v24 = vld [vmem:[%s8248_s6 + $0x890] sm:$0xff]  }
 0x10b   : > { %7054 = vmatpush3.bf16.msra.mxu0 %v7714_v55  ;;  %v7770_v55 = vld [vmem:[%s8248_s6 + $0x700] sm:$0xff]  }
 0x10c   : > { %7076 = vmatpush3.bf16.msra.mxu1 %v7715_v56  ;;  %7055 = vmatprep.subr.bf16.mxu0 %v7716_v57  ;;  %v7771_v56 = vld [vmem:[%s8248_s6 + $0x780] sm:$0xff]  }
 0x10d   : > { %7077 = vmatprep.subr.bf16.mxu1 %v7717_v58  ;;  %v348_v57 = vld [vmem:[%s8250_s7 + $0x70] sm:$0xff] }
 0x10e   : > { %v380_v58 = vld [vmem:[%s8250_s7 + $0x170] sm:$0xff] }
 0x10f   : > { %7056 = vmatpush3.bf16.msra.mxu0 %v7718_v59  ;;  %v6234_v59 = vcombine.low %v348_v57, %v380_v58 }
 0x110   : > { %7078 = vmatpush3.bf16.msra.mxu1 %v7719_v60  ;;  %7057 = vmatprep.subr.bf16.mxu0 %v7720_v61  ;;  %v6235_v60 = vcombine.high %v348_v57, %v380_v58  ;;  %v349_v61 = vld [vmem:[%s8250_s7 + $0x78] sm:$0xff]  ;;  %v7820_v57 = vld [vmem:[%s8248_s6 + $0x958] sm:$0xff]  }
 0x111   : > { %7079 = vmatprep.subr.bf16.mxu1 %v7721_v62  ;;  %v381_v62 = vld [vmem:[%s8250_s7 + $0x178] sm:$0xff]  ;;  %v7821_v58 = vld [vmem:[%s8248_s6 + $0x9d8] sm:$0xff]  }
 0x113   : > { %7058 = vmatpush3.bf16.msra.mxu0 %v7722_v63  ;;  %v6236_v63 = vcombine.low %v349_v61, %v381_v62 }
 0x114   : > { %7080 = vmatpush3.bf16.msra.mxu1 %v7723_v0  ;;  %7059 = vmatprep.subr.bf16.mxu0 %v7724_v1  ;;  %v6237_v0 = vcombine.high %v349_v61, %v381_v62  ;;  %v7772_v1 = vld [vmem:[%s8248_s6 + $0x878] sm:$0xff]   ;;  %v7824_v61 = vld [vmem:[%s8248_s6 + $0x950] sm:$0xff]  }
 0x115   : > { %7081 = vmatprep.subr.bf16.mxu1 %v7725_v2  ;;  %v7773_v2 = vld [vmem:[%s8248_s6 + $0x8f8] sm:$0xff]   ;;  %v7825_v62 = vld [vmem:[%s8248_s6 + $0x9d0] sm:$0xff]  }
 0x117   : > { %7060 = vmatpush3.bf16.msra.mxu0 %v7726_v3  ;;  %v7774_v3 = vld [vmem:[%s8248_s6 + $0x838] sm:$0xff]  }
 0x118   : > { %7082 = vmatpush3.bf16.msra.mxu1 %v7727_v4  ;;  %7061 = vmatprep.subr.bf16.mxu0 %v7728_v5  ;;  %v7775_v4 = vld [vmem:[%s8248_s6 + $0x8b8] sm:$0xff]   ;;  %v7776_v5 = vld [vmem:[%s8248_s6 + $0x870] sm:$0xff]  }
 0x119   : > { %7083 = vmatprep.subr.bf16.mxu1 %v7729_v6  ;;  %v7777_v6 = vld [vmem:[%s8248_s6 + $0x8f0] sm:$0xff]  }
 0x11b   : > { %7062 = vmatpush3.bf16.msra.mxu0 %v7730_v7  ;;  %v7778_v7 = vld [vmem:[%s8248_s6 + $0x830] sm:$0xff]  }
 0x11c   : > { %7084 = vmatpush3.bf16.msra.mxu1 %v7731_v8  ;;  %7063 = vmatprep.subr.bf16.mxu0 %v7732_v9  ;;  %v7779_v8 = vld [vmem:[%s8248_s6 + $0x8b0] sm:$0xff]   ;;  %v7780_v9 = vld [vmem:[%s8248_s6 + $0x868] sm:$0xff]  }
 0x11d   : > { %7085 = vmatprep.subr.bf16.mxu1 %v7733_v10  ;;  %v7781_v10 = vld [vmem:[%s8248_s6 + $0x8e8] sm:$0xff]  }
 0x11f   : > { %7064 = vmatpush3.bf16.msra.mxu0 %v7734_v11  ;;  %v7782_v11 = vld [vmem:[%s8248_s6 + $0x828] sm:$0xff]  }
 0x120   : > { %7086 = vmatpush3.bf16.msra.mxu1 %v7735_v12  ;;  %7065 = vmatprep.subr.bf16.mxu0 %v7736_v13  ;;  %v7783_v12 = vld [vmem:[%s8248_s6 + $0x8a8] sm:$0xff]   ;;  %v7784_v13 = vld [vmem:[%s8248_s6 + $0x860] sm:$0xff]  }
 0x121   : > { %7087 = vmatprep.subr.bf16.mxu1 %v7737_v14  ;;  %v7785_v14 = vld [vmem:[%s8248_s6 + $0x8e0] sm:$0xff]  }
 0x123   : > { %7066 = vmatpush3.bf16.msra.mxu0 %v7738_v15  ;;  %v7786_v15 = vld [vmem:[%s8248_s6 + $0x820] sm:$0xff]  }
 0x124   : > { %7088 = vmatpush3.bf16.msra.mxu1 %v7739_v16  ;;  %7095 = vmatprep.subr.bf16.mxu0 %v7740_v25  ;;  %v7787_v16 = vld [vmem:[%s8248_s6 + $0x8a0] sm:$0xff]   ;;  %v7796_v25 = vld [vmem:[%s8248_s6 + $0x848] sm:$0xff]  }
 0x125   : > { %7117 = vmatprep.subr.bf16.mxu1 %v7741_v26  ;;  %v7797_v26 = vld [vmem:[%s8248_s6 + $0x8c8] sm:$0xff]  }
 0x126   : > { %5339 = vmatmul.mubr.bf16.vlgmr.msra.gmra.mxu0 %v6230_v20  ;;  %v7791_v20 = vld [vmem:[%s8248_s6 + $0x898] sm:$0xff]  }
 0x127   : > { %5380 = vmatmul.mubr.bf16.vlgmr.msra.gmra.mxu1 %v6232_v23  ;;  %7096 = vmatpush3.bf16.msra.mxu0 %v7742_v27  ;;  %v7794_v23 = vld [vmem:[%s8248_s6 + $0x810] sm:$0xff]   ;;  %v7798_v27 = vld [vmem:[%s8248_s6 + $0x808] sm:$0xff]  }
 0x128   : > { %7118 = vmatpush3.bf16.msra.mxu1 %v7743_v28  ;;  %7097 = vmatprep.subr.bf16.mxu0 %v7744_v29  ;;  %v7799_v28 = vld [vmem:[%s8248_s6 + $0x888] sm:$0xff]   ;;  %v7800_v29 = vld [vmem:[%s8248_s6 + $0x840] sm:$0xff]  }
 0x129   : > { %7119 = vmatprep.subr.bf16.mxu1 %v7745_v30  ;;  %5420 = vmatprep.mubr.bf16.mxu0 %v6235_v60  ;;  %v7801_v30 = vld [vmem:[%s8248_s6 + $0x8c0] sm:$0xff]   ;;  %v7823_v60 = vld [vmem:[%s8248_s6 + $0x998] sm:$0xff]  }
 0x12a   : > { %5461 = vmatprep.mubr.bf16.mxu1 %v6237_v0  ;;  %v7827_v0 = vld [vmem:[%s8248_s6 + $0x990] sm:$0xff]  }
 0x12b   : > { %7098 = vmatpush3.bf16.msra.mxu0 %v7746_v31  ;;  %v7802_v31 = vld [vmem:[%s8248_s6 + $0x800] sm:$0xff]  }
 0x12c   : > { %7120 = vmatpush3.bf16.msra.mxu1 %v7747_v32  ;;  %7099 = vmatprep.subr.bf16.mxu0 %v7748_v33  ;;  %v7803_v32 = vld [vmem:[%s8248_s6 + $0x880] sm:$0xff]   ;;  %v350_v33 = vld [vmem:[%s8250_s7 + $0x80] sm:$0xff] }
 0x12d   : > { %7121 = vmatprep.subr.bf16.mxu1 %v7749_v34  ;;  %v382_v34 = vld [vmem:[%s8250_s7 + $0x180] sm:$0xff] }
 0x12f   : > { %7100 = vmatpush3.bf16.msra.mxu0 %v7750_v35  ;;  %v351_v35 = vld [vmem:[%s8250_s7 + $0x88] sm:$0xff] }
 0x130   : > { %7122 = vmatpush3.bf16.msra.mxu1 %v7751_v36  ;;  %7101 = vmatprep.subr.bf16.mxu0 %v7752_v37  ;;  %v383_v36 = vld [vmem:[%s8250_s7 + $0x188] sm:$0xff]  ;;  %v6238_v37 = vcombine.low %v350_v33, %v382_v34 }
 0x131   : > { %7123 = vmatprep.subr.bf16.mxu1 %v7753_v38  ;;  %v6239_v38 = vcombine.high %v350_v33, %v382_v34  ;;  %v7852_v33 = vld [vmem:[%s8248_s6 + $0xa58] sm:$0xff]  }
 0x132   : > { %v7853_v34 = vld [vmem:[%s8248_s6 + $0xad8] sm:$0xff]  }
 0x133   : > { %7102 = vmatpush3.bf16.msra.mxu0 %v7754_v39  ;;  %v6240_v39 = vcombine.low %v351_v35, %v383_v36 }
 0x134   : > { %7124 = vmatpush3.bf16.msra.mxu1 %v7755_v40  ;;  %7103 = vmatprep.subr.bf16.mxu0 %v7756_v41  ;;  %v6241_v40 = vcombine.high %v351_v35, %v383_v36  ;;  %v7804_v41 = vld [vmem:[%s8248_s6 + $0x978] sm:$0xff]  }
 0x135   : > { %7125 = vmatprep.subr.bf16.mxu1 %v7757_v42  ;;  %v7805_v42 = vld [vmem:[%s8248_s6 + $0x9f8] sm:$0xff]  }
 0x136   : > { %v7854_v35 = vld [vmem:[%s8248_s6 + $0xa18] sm:$0xff]  }
 0x137   : > { %7104 = vmatpush3.bf16.msra.mxu0 %v7758_v43  ;;  %v7806_v43 = vld [vmem:[%s8248_s6 + $0x938] sm:$0xff]  }
 0x138   : > { %7126 = vmatpush3.bf16.msra.mxu1 %v7759_v44  ;;  %7105 = vmatprep.subr.bf16.mxu0 %v7760_v45  ;;  %v7807_v44 = vld [vmem:[%s8248_s6 + $0x9b8] sm:$0xff]   ;;  %v7808_v45 = vld [vmem:[%s8248_s6 + $0x970] sm:$0xff]  }
 0x139   : > { %7127 = vmatprep.subr.bf16.mxu1 %v7761_v46  ;;  %v7809_v46 = vld [vmem:[%s8248_s6 + $0x9f0] sm:$0xff]   ;;  %v7855_v36 = vld [vmem:[%s8248_s6 + $0xa98] sm:$0xff]  }
 0x13b   : > { %7106 = vmatpush3.bf16.msra.mxu0 %v7762_v47  ;;  %v7810_v47 = vld [vmem:[%s8248_s6 + $0x930] sm:$0xff]  }
 0x13c   : > { %7128 = vmatpush3.bf16.msra.mxu1 %v7763_v48  ;;  %7107 = vmatprep.subr.bf16.mxu0 %v7764_v49  ;;  %v7811_v48 = vld [vmem:[%s8248_s6 + $0x9b0] sm:$0xff]   ;;  %v7812_v49 = vld [vmem:[%s8248_s6 + $0x968] sm:$0xff]  }
 0x13d   : > { %7129 = vmatprep.subr.bf16.mxu1 %v7765_v50  ;;  %v7813_v50 = vld [vmem:[%s8248_s6 + $0x9e8] sm:$0xff]  }
 0x13f   : > { %7108 = vmatpush3.bf16.msra.mxu0 %v7766_v51  ;;  %v7814_v51 = vld [vmem:[%s8248_s6 + $0x928] sm:$0xff]  }
 0x140   : > { %7130 = vmatpush3.bf16.msra.mxu1 %v7767_v52  ;;  %7109 = vmatprep.subr.bf16.mxu0 %v7768_v53  ;;  %v7815_v52 = vld [vmem:[%s8248_s6 + $0x9a8] sm:$0xff]   ;;  %v7816_v53 = vld [vmem:[%s8248_s6 + $0x960] sm:$0xff]  }
 0x141   : > { %7131 = vmatprep.subr.bf16.mxu1 %v7769_v54  ;;  %v7817_v54 = vld [vmem:[%s8248_s6 + $0x9e0] sm:$0xff]  }
 0x143   : > { %7110 = vmatpush3.bf16.msra.mxu0 %v7770_v55  ;;  %v7818_v55 = vld [vmem:[%s8248_s6 + $0x920] sm:$0xff]  }
 0x144   : > { %7132 = vmatpush3.bf16.msra.mxu1 %v7771_v56  ;;  %7139 = vmatprep.subr.bf16.mxu0 %v7772_v1  ;;  %v7819_v56 = vld [vmem:[%s8248_s6 + $0x9a0] sm:$0xff]   ;;  %v7828_v1 = vld [vmem:[%s8248_s6 + $0x948] sm:$0xff]  }
 0x145   : > { %7161 = vmatprep.subr.bf16.mxu1 %v7773_v2  ;;  %v7829_v2 = vld [vmem:[%s8248_s6 + $0x9c8] sm:$0xff]  }
 0x146   : > { %5421 = vmatmul.mubr.bf16.vlgmr.msra.gmra.mxu0 %v6234_v59  ;;  %v7822_v59 = vld [vmem:[%s8248_s6 + $0x918] sm:$0xff]  }
 0x147   : > { %5462 = vmatmul.mubr.bf16.vlgmr.msra.gmra.mxu1 %v6236_v63  ;;  %7140 = vmatpush3.bf16.msra.mxu0 %v7774_v3  ;;  %v7826_v63 = vld [vmem:[%s8248_s6 + $0x910] sm:$0xff]   ;;  %v7830_v3 = vld [vmem:[%s8248_s6 + $0x908] sm:$0xff]  }
 0x148   : > { %7162 = vmatpush3.bf16.msra.mxu1 %v7775_v4  ;;  %7141 = vmatprep.subr.bf16.mxu0 %v7776_v5  ;;  %v7831_v4 = vld [vmem:[%s8248_s6 + $0x988] sm:$0xff]   ;;  %v7832_v5 = vld [vmem:[%s8248_s6 + $0x940] sm:$0xff]  }
 0x149   : > { %7163 = vmatprep.subr.bf16.mxu1 %v7777_v6  ;;  %5502 = vmatprep.mubr.bf16.mxu0 %v6239_v38  ;;  %v7833_v6 = vld [vmem:[%s8248_s6 + $0x9c0] sm:$0xff]   ;;  %v7857_v38 = vld [vmem:[%s8248_s6 + $0xad0] sm:$0xff]  }
 0x14a   : > { %5543 = vmatprep.mubr.bf16.mxu1 %v6241_v40  ;;  %v7859_v40 = vld [vmem:[%s8248_s6 + $0xa90] sm:$0xff]  }
 0x14b   : > { %7142 = vmatpush3.bf16.msra.mxu0 %v7778_v7  ;;  %v7834_v7 = vld [vmem:[%s8248_s6 + $0x900] sm:$0xff]  }
 0x14c   : > { %7164 = vmatpush3.bf16.msra.mxu1 %v7779_v8  ;;  %7143 = vmatprep.subr.bf16.mxu0 %v7780_v9  ;;  %v7835_v8 = vld [vmem:[%s8248_s6 + $0x980] sm:$0xff]  }
 0x14d   : > { %7165 = vmatprep.subr.bf16.mxu1 %v7781_v10  ;;  %v352_v9 = vld [vmem:[%s8250_s7 + $0x90] sm:$0xff] }
 0x14e   : > { %v384_v10 = vld [vmem:[%s8250_s7 + $0x190] sm:$0xff] }
 0x14f   : > { %7144 = vmatpush3.bf16.msra.mxu0 %v7782_v11  ;;  %v353_v11 = vld [vmem:[%s8250_s7 + $0x98] sm:$0xff] }
 0x150   : > { %7166 = vmatpush3.bf16.msra.mxu1 %v7783_v12  ;;  %7145 = vmatprep.subr.bf16.mxu0 %v7784_v13  ;;  %v6242_v12 = vcombine.low %v352_v9, %v384_v10  ;;  %v6243_v13 = vcombine.high %v352_v9, %v384_v10  ;;  %v7884_v9 = vld [vmem:[%s8248_s6 + $0xb58] sm:$0xff]  }
 0x151   : > { %7167 = vmatprep.subr.bf16.mxu1 %v7785_v14  ;;  %v385_v14 = vld [vmem:[%s8250_s7 + $0x198] sm:$0xff]  ;;  %v7885_v10 = vld [vmem:[%s8248_s6 + $0xbd8] sm:$0xff]  }
 0x153   : > { %7146 = vmatpush3.bf16.msra.mxu0 %v7786_v15  ;;  %v6244_v15 = vcombine.low %v353_v11, %v385_v14 }
 0x154   : > { %7168 = vmatpush3.bf16.msra.mxu1 %v7787_v16  ;;  %7147 = vmatprep.subr.bf16.mxu0 %v7788_v17  ;;  %v6245_v16 = vcombine.high %v353_v11, %v385_v14  ;;  %v7836_v17 = vld [vmem:[%s8248_s6 + $0xa78] sm:$0xff]   ;;  %v7889_v14 = vld [vmem:[%s8248_s6 + $0xbd0] sm:$0xff]  }
 0x155   : > { %7169 = vmatprep.subr.bf16.mxu1 %v7789_v18  ;;  %v7837_v18 = vld [vmem:[%s8248_s6 + $0xaf8] sm:$0xff]  }
 0x156   : > { %v7886_v11 = vld [vmem:[%s8248_s6 + $0xb18] sm:$0xff]  }
 0x157   : > { %7148 = vmatpush3.bf16.msra.mxu0 %v7790_v19  ;;  %v7838_v19 = vld [vmem:[%s8248_s6 + $0xa38] sm:$0xff]  }
 0x158   : > { %7170 = vmatpush3.bf16.msra.mxu1 %v7791_v20  ;;  %7149 = vmatprep.subr.bf16.mxu0 %v7792_v21  ;;  %v7839_v20 = vld [vmem:[%s8248_s6 + $0xab8] sm:$0xff]   ;;  %v7840_v21 = vld [vmem:[%s8248_s6 + $0xa70] sm:$0xff]  }
 0x159   : > { %7171 = vmatprep.subr.bf16.mxu1 %v7793_v22  ;;  %v7841_v22 = vld [vmem:[%s8248_s6 + $0xaf0] sm:$0xff]  }
 0x15b   : > { %7150 = vmatpush3.bf16.msra.mxu0 %v7794_v23  ;;  %v7842_v23 = vld [vmem:[%s8248_s6 + $0xa30] sm:$0xff]  }
 0x15c   : > { %7172 = vmatpush3.bf16.msra.mxu1 %v7795_v24  ;;  %7151 = vmatprep.subr.bf16.mxu0 %v7796_v25  ;;  %v7843_v24 = vld [vmem:[%s8248_s6 + $0xab0] sm:$0xff]   ;;  %v7844_v25 = vld [vmem:[%s8248_s6 + $0xa68] sm:$0xff]  }
 0x15d   : > { %7173 = vmatprep.subr.bf16.mxu1 %v7797_v26  ;;  %v7845_v26 = vld [vmem:[%s8248_s6 + $0xae8] sm:$0xff]  }
 0x15f   : > { %7152 = vmatpush3.bf16.msra.mxu0 %v7798_v27  ;;  %v7846_v27 = vld [vmem:[%s8248_s6 + $0xa28] sm:$0xff]  }
 0x160   : > { %7174 = vmatpush3.bf16.msra.mxu1 %v7799_v28  ;;  %7153 = vmatprep.subr.bf16.mxu0 %v7800_v29  ;;  %v7847_v28 = vld [vmem:[%s8248_s6 + $0xaa8] sm:$0xff]   ;;  %v7848_v29 = vld [vmem:[%s8248_s6 + $0xa60] sm:$0xff]  }
 0x161   : > { %7175 = vmatprep.subr.bf16.mxu1 %v7801_v30  ;;  %v7849_v30 = vld [vmem:[%s8248_s6 + $0xae0] sm:$0xff]  }
 0x163   : > { %7154 = vmatpush3.bf16.msra.mxu0 %v7802_v31  ;;  %v7850_v31 = vld [vmem:[%s8248_s6 + $0xa20] sm:$0xff]  }
 0x164   : > { %7176 = vmatpush3.bf16.msra.mxu1 %v7803_v32  ;;  %7183 = vmatprep.subr.bf16.mxu0 %v7804_v41  ;;  %v7851_v32 = vld [vmem:[%s8248_s6 + $0xaa0] sm:$0xff]   ;;  %v7860_v41 = vld [vmem:[%s8248_s6 + $0xa48] sm:$0xff]  }
 0x165   : > { %7205 = vmatprep.subr.bf16.mxu1 %v7805_v42  ;;  %v7861_v42 = vld [vmem:[%s8248_s6 + $0xac8] sm:$0xff]  }
 0x166   : > { %5503 = vmatmul.mubr.bf16.vlgmr.msra.gmra.mxu0 %v6238_v37  ;;  %v7856_v37 = vld [vmem:[%s8248_s6 + $0xa50] sm:$0xff]  }
 0x167   : > { %5544 = vmatmul.mubr.bf16.vlgmr.msra.gmra.mxu1 %v6240_v39  ;;  %7184 = vmatpush3.bf16.msra.mxu0 %v7806_v43  ;;  %v7858_v39 = vld [vmem:[%s8248_s6 + $0xa10] sm:$0xff]   ;;  %v7862_v43 = vld [vmem:[%s8248_s6 + $0xa08] sm:$0xff]  }
 0x168   : > { %7206 = vmatpush3.bf16.msra.mxu1 %v7807_v44  ;;  %7185 = vmatprep.subr.bf16.mxu0 %v7808_v45  ;;  %v7863_v44 = vld [vmem:[%s8248_s6 + $0xa88] sm:$0xff]   ;;  %v7864_v45 = vld [vmem:[%s8248_s6 + $0xa40] sm:$0xff]  }
 0x169   : > { %7207 = vmatprep.subr.bf16.mxu1 %v7809_v46  ;;  %5584 = vmatprep.mubr.bf16.mxu0 %v6243_v13  ;;  %v7865_v46 = vld [vmem:[%s8248_s6 + $0xac0] sm:$0xff]   ;;  %v7888_v13 = vld [vmem:[%s8248_s6 + $0xb50] sm:$0xff]  }
 0x16a   : > { %5625 = vmatprep.mubr.bf16.mxu1 %v6245_v16  ;;  %v7891_v16 = vld [vmem:[%s8248_s6 + $0xb90] sm:$0xff]  }
 0x16b   : > { %7186 = vmatpush3.bf16.msra.mxu0 %v7810_v47  ;;  %v7866_v47 = vld [vmem:[%s8248_s6 + $0xa00] sm:$0xff]  }
 0x16c   : > { %7208 = vmatpush3.bf16.msra.mxu1 %v7811_v48  ;;  %7187 = vmatprep.subr.bf16.mxu0 %v7812_v49  ;;  %v7867_v48 = vld [vmem:[%s8248_s6 + $0xa80] sm:$0xff]   ;;  %v354_v49 = vld [vmem:[%s8250_s7 + $0xa0] sm:$0xff] }
 0x16d   : > { %7209 = vmatprep.subr.bf16.mxu1 %v7813_v50  ;;  %v386_v50 = vld [vmem:[%s8250_s7 + $0x1a0] sm:$0xff] }
 0x16f   : > { %7188 = vmatpush3.bf16.msra.mxu0 %v7814_v51  ;;  %v6246_v51 = vcombine.low %v354_v49, %v386_v50 }
 0x170   : > { %7210 = vmatpush3.bf16.msra.mxu1 %v7815_v52  ;;  %7189 = vmatprep.subr.bf16.mxu0 %v7816_v53  ;;  %v6247_v52 = vcombine.high %v354_v49, %v386_v50  ;;  %v355_v53 = vld [vmem:[%s8250_s7 + $0xa8] sm:$0xff] }
 0x171   : > { %7211 = vmatprep.subr.bf16.mxu1 %v7817_v54  ;;  %v387_v54 = vld [vmem:[%s8250_s7 + $0x1a8] sm:$0xff] }
 0x172   : > { %v7916_v49 = vld [vmem:[%s8248_s6 + $0xc58] sm:$0xff]  }
 0x173   : > { %7190 = vmatpush3.bf16.msra.mxu0 %v7818_v55  ;;  %v6248_v55 = vcombine.low %v355_v53, %v387_v54  ;;  %v7917_v50 = vld [vmem:[%s8248_s6 + $0xcd8] sm:$0xff]  }
 0x174   : > { %7212 = vmatpush3.bf16.msra.mxu1 %v7819_v56  ;;  %7191 = vmatprep.subr.bf16.mxu0 %v7820_v57  ;;  %v6249_v56 = vcombine.high %v355_v53, %v387_v54  ;;  %v7868_v57 = vld [vmem:[%s8248_s6 + $0xb78] sm:$0xff]   ;;  %v7920_v53 = vld [vmem:[%s8248_s6 + $0xc50] sm:$0xff]  }
 0x175   : > { %7213 = vmatprep.subr.bf16.mxu1 %v7821_v58  ;;  %v7869_v58 = vld [vmem:[%s8248_s6 + $0xbf8] sm:$0xff]   ;;  %v7921_v54 = vld [vmem:[%s8248_s6 + $0xcd0] sm:$0xff]  }
 0x177   : > { %7192 = vmatpush3.bf16.msra.mxu0 %v7822_v59  ;;  %v7870_v59 = vld [vmem:[%s8248_s6 + $0xb38] sm:$0xff]  }
 0x178   : > { %7214 = vmatpush3.bf16.msra.mxu1 %v7823_v60  ;;  %7193 = vmatprep.subr.bf16.mxu0 %v7824_v61  ;;  %v7871_v60 = vld [vmem:[%s8248_s6 + $0xbb8] sm:$0xff]   ;;  %v7872_v61 = vld [vmem:[%s8248_s6 + $0xb70] sm:$0xff]  }
 0x179   : > { %7215 = vmatprep.subr.bf16.mxu1 %v7825_v62  ;;  %v7873_v62 = vld [vmem:[%s8248_s6 + $0xbf0] sm:$0xff]  }
 0x17b   : > { %7194 = vmatpush3.bf16.msra.mxu0 %v7826_v63  ;;  %v7874_v63 = vld [vmem:[%s8248_s6 + $0xb30] sm:$0xff]  }
 0x17c   : > { %7216 = vmatpush3.bf16.msra.mxu1 %v7827_v0  ;;  %7195 = vmatprep.subr.bf16.mxu0 %v7828_v1  ;;  %v7875_v0 = vld [vmem:[%s8248_s6 + $0xbb0] sm:$0xff]   ;;  %v7876_v1 = vld [vmem:[%s8248_s6 + $0xb68] sm:$0xff]  }
 0x17d   : > { %7217 = vmatprep.subr.bf16.mxu1 %v7829_v2  ;;  %v7877_v2 = vld [vmem:[%s8248_s6 + $0xbe8] sm:$0xff]  }
 0x17f   : > { %7196 = vmatpush3.bf16.msra.mxu0 %v7830_v3  ;;  %v7878_v3 = vld [vmem:[%s8248_s6 + $0xb28] sm:$0xff]  }
 0x180   : > { %7218 = vmatpush3.bf16.msra.mxu1 %v7831_v4  ;;  %7197 = vmatprep.subr.bf16.mxu0 %v7832_v5  ;;  %v7879_v4 = vld [vmem:[%s8248_s6 + $0xba8] sm:$0xff]   ;;  %v7880_v5 = vld [vmem:[%s8248_s6 + $0xb60] sm:$0xff]  }
 0x181   : > { %7219 = vmatprep.subr.bf16.mxu1 %v7833_v6  ;;  %v7881_v6 = vld [vmem:[%s8248_s6 + $0xbe0] sm:$0xff]  }
 0x183   : > { %7198 = vmatpush3.bf16.msra.mxu0 %v7834_v7  ;;  %v7882_v7 = vld [vmem:[%s8248_s6 + $0xb20] sm:$0xff]  }
 0x184   : > { %7220 = vmatpush3.bf16.msra.mxu1 %v7835_v8  ;;  %7227 = vmatprep.subr.bf16.mxu0 %v7836_v17  ;;  %v7883_v8 = vld [vmem:[%s8248_s6 + $0xba0] sm:$0xff]   ;;  %v7892_v17 = vld [vmem:[%s8248_s6 + $0xb48] sm:$0xff]  }
 0x185   : > { %7249 = vmatprep.subr.bf16.mxu1 %v7837_v18  ;;  %v7893_v18 = vld [vmem:[%s8248_s6 + $0xbc8] sm:$0xff]  }
 0x186   : > { %5585 = vmatmul.mubr.bf16.vlgmr.msra.gmra.mxu0 %v6242_v12  ;;  %v7887_v12 = vld [vmem:[%s8248_s6 + $0xb98] sm:$0xff]  }
 0x187   : > { %5626 = vmatmul.mubr.bf16.vlgmr.msra.gmra.mxu1 %v6244_v15  ;;  %7228 = vmatpush3.bf16.msra.mxu0 %v7838_v19  ;;  %v7890_v15 = vld [vmem:[%s8248_s6 + $0xb10] sm:$0xff]   ;;  %v7894_v19 = vld [vmem:[%s8248_s6 + $0xb08] sm:$0xff]  }
 0x188   : > { %7250 = vmatpush3.bf16.msra.mxu1 %v7839_v20  ;;  %7229 = vmatprep.subr.bf16.mxu0 %v7840_v21  ;;  %v7895_v20 = vld [vmem:[%s8248_s6 + $0xb88] sm:$0xff]   ;;  %v7896_v21 = vld [vmem:[%s8248_s6 + $0xb40] sm:$0xff]  }
 0x189   : > { %7251 = vmatprep.subr.bf16.mxu1 %v7841_v22  ;;  %5666 = vmatprep.mubr.bf16.mxu0 %v6247_v52  ;;  %v7897_v22 = vld [vmem:[%s8248_s6 + $0xbc0] sm:$0xff]   ;;  %v7919_v52 = vld [vmem:[%s8248_s6 + $0xc98] sm:$0xff]  }
 0x18a   : > { %5707 = vmatprep.mubr.bf16.mxu1 %v6249_v56  ;;  %v7923_v56 = vld [vmem:[%s8248_s6 + $0xc90] sm:$0xff]  }
 0x18b   : > { %7230 = vmatpush3.bf16.msra.mxu0 %v7842_v23  ;;  %v7898_v23 = vld [vmem:[%s8248_s6 + $0xb00] sm:$0xff]  }
 0x18c   : > { %7252 = vmatpush3.bf16.msra.mxu1 %v7843_v24  ;;  %7231 = vmatprep.subr.bf16.mxu0 %v7844_v25  ;;  %v7899_v24 = vld [vmem:[%s8248_s6 + $0xb80] sm:$0xff]  }
 0x18d   : > { %7253 = vmatprep.subr.bf16.mxu1 %v7845_v26  ;;  %v356_v25 = vld [vmem:[%s8250_s7 + $0xb0] sm:$0xff] }
 0x18e   : > { %v388_v26 = vld [vmem:[%s8250_s7 + $0x1b0] sm:$0xff] }
 0x18f   : > { %7232 = vmatpush3.bf16.msra.mxu0 %v7846_v27  ;;  %v357_v27 = vld [vmem:[%s8250_s7 + $0xb8] sm:$0xff] }
 0x190   : > { %7254 = vmatpush3.bf16.msra.mxu1 %v7847_v28  ;;  %7233 = vmatprep.subr.bf16.mxu0 %v7848_v29  ;;  %v389_v28 = vld [vmem:[%s8250_s7 + $0x1b8] sm:$0xff]  ;;  %v6250_v29 = vcombine.low %v356_v25, %v388_v26 }
 0x191   : > { %7255 = vmatprep.subr.bf16.mxu1 %v7849_v30  ;;  %v6251_v30 = vcombine.high %v356_v25, %v388_v26  ;;  %v7948_v25 = vld [vmem:[%s8248_s6 + $0xd58] sm:$0xff]  }
 0x192   : > { %v7949_v26 = vld [vmem:[%s8248_s6 + $0xdd8] sm:$0xff]  }
 0x193   : > { %7234 = vmatpush3.bf16.msra.mxu0 %v7850_v31  ;;  %v6252_v31 = vcombine.low %v357_v27, %v389_v28 }
 0x194   : > { %7256 = vmatpush3.bf16.msra.mxu1 %v7851_v32  ;;  %7235 = vmatprep.subr.bf16.mxu0 %v7852_v33  ;;  %v6253_v32 = vcombine.high %v357_v27, %v389_v28  ;;  %v7900_v33 = vld [vmem:[%s8248_s6 + $0xc78] sm:$0xff]  }
 0x195   : > { %7257 = vmatprep.subr.bf16.mxu1 %v7853_v34  ;;  %v7901_v34 = vld [vmem:[%s8248_s6 + $0xcf8] sm:$0xff]  }
 0x196   : > { %v7950_v27 = vld [vmem:[%s8248_s6 + $0xd18] sm:$0xff]  }
 0x197   : > { %7236 = vmatpush3.bf16.msra.mxu0 %v7854_v35  ;;  %v7902_v35 = vld [vmem:[%s8248_s6 + $0xc38] sm:$0xff]  }
 0x198   : > { %7258 = vmatpush3.bf16.msra.mxu1 %v7855_v36  ;;  %7237 = vmatprep.subr.bf16.mxu0 %v7856_v37  ;;  %v7903_v36 = vld [vmem:[%s8248_s6 + $0xcb8] sm:$0xff]   ;;  %v7904_v37 = vld [vmem:[%s8248_s6 + $0xc70] sm:$0xff]  }
 0x199   : > { %7259 = vmatprep.subr.bf16.mxu1 %v7857_v38  ;;  %v7905_v38 = vld [vmem:[%s8248_s6 + $0xcf0] sm:$0xff]   ;;  %v7951_v28 = vld [vmem:[%s8248_s6 + $0xd98] sm:$0xff]  }
 0x19b   : > { %7238 = vmatpush3.bf16.msra.mxu0 %v7858_v39  ;;  %v7906_v39 = vld [vmem:[%s8248_s6 + $0xc30] sm:$0xff]  }
 0x19c   : > { %7260 = vmatpush3.bf16.msra.mxu1 %v7859_v40  ;;  %7239 = vmatprep.subr.bf16.mxu0 %v7860_v41  ;;  %v7907_v40 = vld [vmem:[%s8248_s6 + $0xcb0] sm:$0xff]   ;;  %v7908_v41 = vld [vmem:[%s8248_s6 + $0xc68] sm:$0xff]  }
 0x19d   : > { %7261 = vmatprep.subr.bf16.mxu1 %v7861_v42  ;;  %v7909_v42 = vld [vmem:[%s8248_s6 + $0xce8] sm:$0xff]  }
 0x19f   : > { %7240 = vmatpush3.bf16.msra.mxu0 %v7862_v43  ;;  %v7910_v43 = vld [vmem:[%s8248_s6 + $0xc28] sm:$0xff]  }
 0x1a0   : > { %7262 = vmatpush3.bf16.msra.mxu1 %v7863_v44  ;;  %7241 = vmatprep.subr.bf16.mxu0 %v7864_v45  ;;  %v7911_v44 = vld [vmem:[%s8248_s6 + $0xca8] sm:$0xff]   ;;  %v7912_v45 = vld [vmem:[%s8248_s6 + $0xc60] sm:$0xff]  }
 0x1a1   : > { %7263 = vmatprep.subr.bf16.mxu1 %v7865_v46  ;;  %v7913_v46 = vld [vmem:[%s8248_s6 + $0xce0] sm:$0xff]  }
 0x1a3   : > { %7242 = vmatpush3.bf16.msra.mxu0 %v7866_v47  ;;  %v7914_v47 = vld [vmem:[%s8248_s6 + $0xc20] sm:$0xff]  }
 0x1a4   : > { %7264 = vmatpush3.bf16.msra.mxu1 %v7867_v48  ;;  %7271 = vmatprep.subr.bf16.mxu0 %v7868_v57  ;;  %v7915_v48 = vld [vmem:[%s8248_s6 + $0xca0] sm:$0xff]   ;;  %v7924_v57 = vld [vmem:[%s8248_s6 + $0xc48] sm:$0xff]  }
 0x1a5   : > { %7293 = vmatprep.subr.bf16.mxu1 %v7869_v58  ;;  %v7925_v58 = vld [vmem:[%s8248_s6 + $0xcc8] sm:$0xff]  }
 0x1a6   : > { %5667 = vmatmul.mubr.bf16.vlgmr.msra.gmra.mxu0 %v6246_v51  ;;  %v7918_v51 = vld [vmem:[%s8248_s6 + $0xc18] sm:$0xff]  }
 0x1a7   : > { %5708 = vmatmul.mubr.bf16.vlgmr.msra.gmra.mxu1 %v6248_v55  ;;  %7272 = vmatpush3.bf16.msra.mxu0 %v7870_v59  ;;  %v7922_v55 = vld [vmem:[%s8248_s6 + $0xc10] sm:$0xff]   ;;  %v7926_v59 = vld [vmem:[%s8248_s6 + $0xc08] sm:$0xff]  }
 0x1a8   : > { %7294 = vmatpush3.bf16.msra.mxu1 %v7871_v60  ;;  %7273 = vmatprep.subr.bf16.mxu0 %v7872_v61  ;;  %v7927_v60 = vld [vmem:[%s8248_s6 + $0xc88] sm:$0xff]   ;;  %v7928_v61 = vld [vmem:[%s8248_s6 + $0xc40] sm:$0xff]  }
 0x1a9   : > { %7295 = vmatprep.subr.bf16.mxu1 %v7873_v62  ;;  %5748 = vmatprep.mubr.bf16.mxu0 %v6251_v30  ;;  %v7929_v62 = vld [vmem:[%s8248_s6 + $0xcc0] sm:$0xff]   ;;  %v7953_v30 = vld [vmem:[%s8248_s6 + $0xdd0] sm:$0xff]  }
 0x1aa   : > { %5789 = vmatprep.mubr.bf16.mxu1 %v6253_v32  ;;  %v7955_v32 = vld [vmem:[%s8248_s6 + $0xd90] sm:$0xff]  }
 0x1ab   : > { %7274 = vmatpush3.bf16.msra.mxu0 %v7874_v63  ;;  %v7930_v63 = vld [vmem:[%s8248_s6 + $0xc00] sm:$0xff]  }
 0x1ac   : > { %7296 = vmatpush3.bf16.msra.mxu1 %v7875_v0  ;;  %7275 = vmatprep.subr.bf16.mxu0 %v7876_v1  ;;  %v7931_v0 = vld [vmem:[%s8248_s6 + $0xc80] sm:$0xff]   ;;  %v358_v1 = vld [vmem:[%s8250_s7 + $0xc0] sm:$0xff] }
 0x1ad   : > { %7297 = vmatprep.subr.bf16.mxu1 %v7877_v2  ;;  %v390_v2 = vld [vmem:[%s8250_s7 + $0x1c0] sm:$0xff] }
 0x1af   : > { %7276 = vmatpush3.bf16.msra.mxu0 %v7878_v3  ;;  %v359_v3 = vld [vmem:[%s8250_s7 + $0xc8] sm:$0xff] }
 0x1b0   : > { %7298 = vmatpush3.bf16.msra.mxu1 %v7879_v4  ;;  %7277 = vmatprep.subr.bf16.mxu0 %v7880_v5  ;;  %v6254_v4 = vcombine.low %v358_v1, %v390_v2  ;;  %v6255_v5 = vcombine.high %v358_v1, %v390_v2  ;;  %v7980_v1 = vld [vmem:[%s8248_s6 + $0xe58] sm:$0xff]  }
 0x1b1   : > { %7299 = vmatprep.subr.bf16.mxu1 %v7881_v6  ;;  %v391_v6 = vld [vmem:[%s8250_s7 + $0x1c8] sm:$0xff] }
 0x1b2   : > { %v7981_v2 = vld [vmem:[%s8248_s6 + $0xed8] sm:$0xff]  }
 0x1b3   : > { %7278 = vmatpush3.bf16.msra.mxu0 %v7882_v7  ;;  %v6256_v7 = vcombine.low %v359_v3, %v391_v6 }
 0x1b4   : > { %7300 = vmatpush3.bf16.msra.mxu1 %v7883_v8  ;;  %7279 = vmatprep.subr.bf16.mxu0 %v7884_v9  ;;  %v6257_v8 = vcombine.high %v359_v3, %v391_v6  ;;  %v7932_v9 = vld [vmem:[%s8248_s6 + $0xd78] sm:$0xff]   ;;  %v7985_v6 = vld [vmem:[%s8248_s6 + $0xed0] sm:$0xff]  }
 0x1b5   : > { %7301 = vmatprep.subr.bf16.mxu1 %v7885_v10  ;;  %v7933_v10 = vld [vmem:[%s8248_s6 + $0xdf8] sm:$0xff]  }
 0x1b6   : > { %v7982_v3 = vld [vmem:[%s8248_s6 + $0xe18] sm:$0xff]  }
 0x1b7   : > { %7280 = vmatpush3.bf16.msra.mxu0 %v7886_v11  ;;  %v7934_v11 = vld [vmem:[%s8248_s6 + $0xd38] sm:$0xff]  }
 0x1b8   : > { %7302 = vmatpush3.bf16.msra.mxu1 %v7887_v12  ;;  %7281 = vmatprep.subr.bf16.mxu0 %v7888_v13  ;;  %v7935_v12 = vld [vmem:[%s8248_s6 + $0xdb8] sm:$0xff]   ;;  %v7936_v13 = vld [vmem:[%s8248_s6 + $0xd70] sm:$0xff]  }
 0x1b9   : > { %7303 = vmatprep.subr.bf16.mxu1 %v7889_v14  ;;  %v7937_v14 = vld [vmem:[%s8248_s6 + $0xdf0] sm:$0xff]  }
 0x1bb   : > { %7282 = vmatpush3.bf16.msra.mxu0 %v7890_v15  ;;  %v7938_v15 = vld [vmem:[%s8248_s6 + $0xd30] sm:$0xff]  }
 0x1bc   : > { %7304 = vmatpush3.bf16.msra.mxu1 %v7891_v16  ;;  %7283 = vmatprep.subr.bf16.mxu0 %v7892_v17  ;;  %v7939_v16 = vld [vmem:[%s8248_s6 + $0xdb0] sm:$0xff]   ;;  %v7940_v17 = vld [vmem:[%s8248_s6 + $0xd68] sm:$0xff]  }
 0x1bd   : > { %7305 = vmatprep.subr.bf16.mxu1 %v7893_v18  ;;  %v7941_v18 = vld [vmem:[%s8248_s6 + $0xde8] sm:$0xff]  }
 0x1bf   : > { %7284 = vmatpush3.bf16.msra.mxu0 %v7894_v19  ;;  %v7942_v19 = vld [vmem:[%s8248_s6 + $0xd28] sm:$0xff]  }
 0x1c0   : > { %7306 = vmatpush3.bf16.msra.mxu1 %v7895_v20  ;;  %7285 = vmatprep.subr.bf16.mxu0 %v7896_v21  ;;  %v7943_v20 = vld [vmem:[%s8248_s6 + $0xda8] sm:$0xff]   ;;  %v7944_v21 = vld [vmem:[%s8248_s6 + $0xd60] sm:$0xff]  }
 0x1c1   : > { %7307 = vmatprep.subr.bf16.mxu1 %v7897_v22  ;;  %v7945_v22 = vld [vmem:[%s8248_s6 + $0xde0] sm:$0xff]  }
 0x1c3   : > { %7286 = vmatpush3.bf16.msra.mxu0 %v7898_v23  ;;  %v7946_v23 = vld [vmem:[%s8248_s6 + $0xd20] sm:$0xff]  }
 0x1c4   : > { %7308 = vmatpush3.bf16.msra.mxu1 %v7899_v24  ;;  %7315 = vmatprep.subr.bf16.mxu0 %v7900_v33  ;;  %v7947_v24 = vld [vmem:[%s8248_s6 + $0xda0] sm:$0xff]   ;;  %v7956_v33 = vld [vmem:[%s8248_s6 + $0xd48] sm:$0xff]  }
 0x1c5   : > { %7337 = vmatprep.subr.bf16.mxu1 %v7901_v34  ;;  %v7957_v34 = vld [vmem:[%s8248_s6 + $0xdc8] sm:$0xff]  }
 0x1c6   : > { %5749 = vmatmul.mubr.bf16.vlgmr.msra.gmra.mxu0 %v6250_v29  ;;  %v7952_v29 = vld [vmem:[%s8248_s6 + $0xd50] sm:$0xff]  }
 0x1c7   : > { %5790 = vmatmul.mubr.bf16.vlgmr.msra.gmra.mxu1 %v6252_v31  ;;  %7316 = vmatpush3.bf16.msra.mxu0 %v7902_v35  ;;  %v7954_v31 = vld [vmem:[%s8248_s6 + $0xd10] sm:$0xff]   ;;  %v7958_v35 = vld [vmem:[%s8248_s6 + $0xd08] sm:$0xff]  }
 0x1c8   : > { %7338 = vmatpush3.bf16.msra.mxu1 %v7903_v36  ;;  %7317 = vmatprep.subr.bf16.mxu0 %v7904_v37  ;;  %v7959_v36 = vld [vmem:[%s8248_s6 + $0xd88] sm:$0xff]   ;;  %v7960_v37 = vld [vmem:[%s8248_s6 + $0xd40] sm:$0xff]  }
 0x1c9   : > { %7339 = vmatprep.subr.bf16.mxu1 %v7905_v38  ;;  %5830 = vmatprep.mubr.bf16.mxu0 %v6255_v5  ;;  %v7961_v38 = vld [vmem:[%s8248_s6 + $0xdc0] sm:$0xff]   ;;  %v7984_v5 = vld [vmem:[%s8248_s6 + $0xe50] sm:$0xff]  }
 0x1ca   : > { %5871 = vmatprep.mubr.bf16.mxu1 %v6257_v8  ;;  %v7987_v8 = vld [vmem:[%s8248_s6 + $0xe90] sm:$0xff]  }
 0x1cb   : > { %7318 = vmatpush3.bf16.msra.mxu0 %v7906_v39  ;;  %v7962_v39 = vld [vmem:[%s8248_s6 + $0xd00] sm:$0xff]  }
 0x1cc   : > { %7340 = vmatpush3.bf16.msra.mxu1 %v7907_v40  ;;  %7319 = vmatprep.subr.bf16.mxu0 %v7908_v41  ;;  %v7963_v40 = vld [vmem:[%s8248_s6 + $0xd80] sm:$0xff]  }
 0x1cd   : > { %7341 = vmatprep.subr.bf16.mxu1 %v7909_v42  ;;  %v360_v41 = vld [vmem:[%s8250_s7 + $0xd0] sm:$0xff] }
 0x1ce   : > { %v392_v42 = vld [vmem:[%s8250_s7 + $0x1d0] sm:$0xff] }
 0x1cf   : > { %7320 = vmatpush3.bf16.msra.mxu0 %v7910_v43  ;;  %v6258_v43 = vcombine.low %v360_v41, %v392_v42 }
 0x1d0   : > { %7342 = vmatpush3.bf16.msra.mxu1 %v7911_v44  ;;  %7321 = vmatprep.subr.bf16.mxu0 %v7912_v45  ;;  %v6259_v44 = vcombine.high %v360_v41, %v392_v42  ;;  %v361_v45 = vld [vmem:[%s8250_s7 + $0xd8] sm:$0xff]  ;;  %v8809_v41 = vpop.f32.mrf.mxu0  ;;  %v8012_v42 = vld [vmem:[%s8248_s6 + $0xf58] sm:$0xff]  }
 0x1d1   : > { %7343 = vmatprep.subr.bf16.mxu1 %v7913_v46  ;;  %v393_v46 = vld [vmem:[%s8250_s7 + $0x1d8] sm:$0xff] }
 0x1d3   : > { %7322 = vmatpush3.bf16.msra.mxu0 %v7914_v47  ;;  %v6260_v47 = vcombine.low %v361_v45, %v393_v46 }
 0x1d4   : > { %7344 = vmatpush3.bf16.msra.mxu1 %v7915_v48  ;;  %7323 = vmatprep.subr.bf16.mxu0 %v7916_v49  ;;  %v6261_v48 = vcombine.high %v361_v45, %v393_v46  ;;  %v7964_v49 = vld [vmem:[%s8248_s6 + $0xe78] sm:$0xff]   ;;  %v8814_v45 = vpop.f32.mrf.mxu1 }
 0x1d5   : > { %7345 = vmatprep.subr.bf16.mxu1 %v7917_v50  ;;  %v7965_v50 = vld [vmem:[%s8248_s6 + $0xef8] sm:$0xff]  }
 0x1d6   : > { %v8015_v46 = vld [vmem:[%s8248_s6 + $0xf98] sm:$0xff]  }
 0x1d7   : > { %7324 = vmatpush3.bf16.msra.mxu0 %v7918_v51  ;;  %v7966_v51 = vld [vmem:[%s8248_s6 + $0xe38] sm:$0xff]  }
 0x1d8   : > { %7346 = vmatpush3.bf16.msra.mxu1 %v7919_v52  ;;  %7325 = vmatprep.subr.bf16.mxu0 %v7920_v53  ;;  %v7967_v52 = vld [vmem:[%s8248_s6 + $0xeb8] sm:$0xff]   ;;  %v7968_v53 = vld [vmem:[%s8248_s6 + $0xe70] sm:$0xff]  }
 0x1d9   : > { %7347 = vmatprep.subr.bf16.mxu1 %v7921_v54  ;;  %v7969_v54 = vld [vmem:[%s8248_s6 + $0xef0] sm:$0xff]  }
 0x1db   : > { %7326 = vmatpush3.bf16.msra.mxu0 %v7922_v55  ;;  %v7970_v55 = vld [vmem:[%s8248_s6 + $0xe30] sm:$0xff]  }
 0x1dc   : > { %7348 = vmatpush3.bf16.msra.mxu1 %v7923_v56  ;;  %7327 = vmatprep.subr.bf16.mxu0 %v7924_v57  ;;  %v7971_v56 = vld [vmem:[%s8248_s6 + $0xeb0] sm:$0xff]   ;;  %v7972_v57 = vld [vmem:[%s8248_s6 + $0xe68] sm:$0xff]  }
 0x1dd   : > { %7349 = vmatprep.subr.bf16.mxu1 %v7925_v58  ;;  %v7973_v58 = vld [vmem:[%s8248_s6 + $0xee8] sm:$0xff]  }
 0x1df   : > { %7328 = vmatpush3.bf16.msra.mxu0 %v7926_v59  ;;  %v7974_v59 = vld [vmem:[%s8248_s6 + $0xe28] sm:$0xff]  }
 0x1e0   : > { %7350 = vmatpush3.bf16.msra.mxu1 %v7927_v60  ;;  %7329 = vmatprep.subr.bf16.mxu0 %v7928_v61  ;;  %v7975_v60 = vld [vmem:[%s8248_s6 + $0xea8] sm:$0xff]   ;;  %v7976_v61 = vld [vmem:[%s8248_s6 + $0xe60] sm:$0xff]  }
 0x1e1   : > { %7351 = vmatprep.subr.bf16.mxu1 %v7929_v62  ;;  %v7977_v62 = vld [vmem:[%s8248_s6 + $0xee0] sm:$0xff]  }
 0x1e3   : > { %7330 = vmatpush3.bf16.msra.mxu0 %v7930_v63  ;;  %v7978_v63 = vld [vmem:[%s8248_s6 + $0xe20] sm:$0xff]  }
 0x1e4   : > { %7352 = vmatpush3.bf16.msra.mxu1 %v7931_v0  ;;  %7359 = vmatprep.subr.bf16.mxu0 %v7932_v9  ;;  %v7979_v0 = vld [vmem:[%s8248_s6 + $0xea0] sm:$0xff]   ;;  %v7988_v9 = vld [vmem:[%s8248_s6 + $0xe48] sm:$0xff]  }
 0x1e5   : > { %7381 = vmatprep.subr.bf16.mxu1 %v7933_v10  ;;  %v7989_v10 = vld [vmem:[%s8248_s6 + $0xec8] sm:$0xff]  }
 0x1e6   : > { %5831 = vmatmul.mubr.bf16.vlgmr.msra.gmra.mxu0 %v6254_v4  ;;  %v7983_v4 = vld [vmem:[%s8248_s6 + $0xe98] sm:$0xff]  }
 0x1e7   : > { %5872 = vmatmul.mubr.bf16.vlgmr.msra.gmra.mxu1 %v6256_v7  ;;  %7360 = vmatpush3.bf16.msra.mxu0 %v7934_v11  ;;  %v7986_v7 = vld [vmem:[%s8248_s6 + $0xe10] sm:$0xff]   ;;  %v7990_v11 = vld [vmem:[%s8248_s6 + $0xe08] sm:$0xff]  }
 0x1e8   : > { %7382 = vmatpush3.bf16.msra.mxu1 %v7935_v12  ;;  %7361 = vmatprep.subr.bf16.mxu0 %v7936_v13  ;;  %v7991_v12 = vld [vmem:[%s8248_s6 + $0xe88] sm:$0xff]   ;;  %v7992_v13 = vld [vmem:[%s8248_s6 + $0xe40] sm:$0xff]  }
 0x1e9   : > { %7383 = vmatprep.subr.bf16.mxu1 %v7937_v14  ;;  %5912 = vmatprep.mubr.bf16.mxu0 %v6259_v44  ;;  %v7993_v14 = vld [vmem:[%s8248_s6 + $0xec0] sm:$0xff]   ;;  %v8014_v44 = vld [vmem:[%s8248_s6 + $0xf18] sm:$0xff]  }
 0x1ea   : > { %5953 = vmatprep.mubr.bf16.mxu1 %v6261_v48  ;;  %v8016_v48 = vld [vmem:[%s8248_s6 + $0xf50] sm:$0xff]  }
 0x1eb   : > { %7362 = vmatpush3.bf16.msra.mxu0 %v7938_v15  ;;  %v7994_v15 = vld [vmem:[%s8248_s6 + $0xe00] sm:$0xff]  }
 0x1ec   : > { %7384 = vmatpush3.bf16.msra.mxu1 %v7939_v16  ;;  %7363 = vmatprep.subr.bf16.mxu0 %v7940_v17  ;;  %v7995_v16 = vld [vmem:[%s8248_s6 + $0xe80] sm:$0xff]   ;;  %v362_v17 = vld [vmem:[%s8250_s7 + $0xe0] sm:$0xff] }
 0x1ed   : > { %7385 = vmatprep.subr.bf16.mxu1 %v7941_v18  ;;  %v394_v18 = vld [vmem:[%s8250_s7 + $0x1e0] sm:$0xff] }
 0x1ef   : > { %7364 = vmatpush3.bf16.msra.mxu0 %v7942_v19  ;;  %v363_v19 = vld [vmem:[%s8250_s7 + $0xe8] sm:$0xff] }
 0x1f0   : > { %7386 = vmatpush3.bf16.msra.mxu1 %v7943_v20  ;;  %7365 = vmatprep.subr.bf16.mxu0 %v7944_v21  ;;  %v395_v20 = vld [vmem:[%s8250_s7 + $0x1e8] sm:$0xff]  ;;  %v6262_v21 = vcombine.low %v362_v17, %v394_v18 }
 0x1f1   : > { %7387 = vmatprep.subr.bf16.mxu1 %v7945_v22  ;;  %v6263_v22 = vcombine.high %v362_v17, %v394_v18 }
 0x1f3   : > { %7366 = vmatpush3.bf16.msra.mxu0 %v7946_v23  ;;  %v6264_v23 = vcombine.low %v363_v19, %v395_v20 }
 0x1f4   : > { %7388 = vmatpush3.bf16.msra.mxu1 %v7947_v24  ;;  %7367 = vmatprep.subr.bf16.mxu0 %v7948_v25  ;;  %v6265_v24 = vcombine.high %v363_v19, %v395_v20  ;;  %v7996_v25 = vld [vmem:[%s8248_s6 + $0xf78] sm:$0xff]  }
 0x1f5   : > { %7389 = vmatprep.subr.bf16.mxu1 %v7949_v26  ;;  %v7997_v26 = vld [vmem:[%s8248_s6 + $0xff8] sm:$0xff]  }
 0x1f7   : > { %7368 = vmatpush3.bf16.msra.mxu0 %v7950_v27  ;;  %v7998_v27 = vld [vmem:[%s8248_s6 + $0xf38] sm:$0xff]  }
 0x1f8   : > { %7390 = vmatpush3.bf16.msra.mxu1 %v7951_v28  ;;  %7369 = vmatprep.subr.bf16.mxu0 %v7952_v29  ;;  %v7999_v28 = vld [vmem:[%s8248_s6 + $0xfb8] sm:$0xff]   ;;  %v8000_v29 = vld [vmem:[%s8248_s6 + $0xf70] sm:$0xff]  }
 0x1f9   : > { %7391 = vmatprep.subr.bf16.mxu1 %v7953_v30  ;;  %v8001_v30 = vld [vmem:[%s8248_s6 + $0xff0] sm:$0xff]  }
 0x1fb   : > { %7370 = vmatpush3.bf16.msra.mxu0 %v7954_v31  ;;  %v8002_v31 = vld [vmem:[%s8248_s6 + $0xf30] sm:$0xff]  }
 0x1fc   : > { %7392 = vmatpush3.bf16.msra.mxu1 %v7955_v32  ;;  %7371 = vmatprep.subr.bf16.mxu0 %v7956_v33  ;;  %v8003_v32 = vld [vmem:[%s8248_s6 + $0xfb0] sm:$0xff]   ;;  %v8004_v33 = vld [vmem:[%s8248_s6 + $0xf68] sm:$0xff]  }
 0x1fd   : > { %7393 = vmatprep.subr.bf16.mxu1 %v7957_v34  ;;  %v8005_v34 = vld [vmem:[%s8248_s6 + $0xfe8] sm:$0xff]  }
 0x1ff   : > { %7372 = vmatpush3.bf16.msra.mxu0 %v7958_v35  ;;  %v8006_v35 = vld [vmem:[%s8248_s6 + $0xf28] sm:$0xff]  }
 0x200   : > { %7394 = vmatpush3.bf16.msra.mxu1 %v7959_v36  ;;  %7373 = vmatprep.subr.bf16.mxu0 %v7960_v37  ;;  %v8007_v36 = vld [vmem:[%s8248_s6 + $0xfa8] sm:$0xff]   ;;  %v8008_v37 = vld [vmem:[%s8248_s6 + $0xf60] sm:$0xff]  }
 0x201   : > { %7395 = vmatprep.subr.bf16.mxu1 %v7961_v38  ;;  %v8009_v38 = vld [vmem:[%s8248_s6 + $0xfe0] sm:$0xff]  }
 0x203   : > { %7374 = vmatpush3.bf16.msra.mxu0 %v7962_v39  ;;  %v8010_v39 = vld [vmem:[%s8248_s6 + $0xf20] sm:$0xff]  }
 0x204   : > { %7396 = vmatpush3.bf16.msra.mxu1 %v7963_v40  ;;  %7403 = vmatprep.subr.bf16.mxu0 %v7964_v49  ;;  %v8011_v40 = vld [vmem:[%s8248_s6 + $0xfa0] sm:$0xff]   ;;  %v8017_v49 = vld [vmem:[%s8248_s6 + $0xfd0] sm:$0xff]  }
 0x205   : > { %7425 = vmatprep.subr.bf16.mxu1 %v7965_v50  ;;  %v8018_v50 = vld [vmem:[%s8248_s6 + $0xf10] sm:$0xff]  }
 0x206   : > { %5913 = vmatmul.mubr.bf16.vlgmr.msra.gmra.mxu0 %v6258_v43  ;;  %v8013_v43 = vld [vmem:[%s8248_s6 + $0xfd8] sm:$0xff]  }
 0x207   : > { %5954 = vmatmul.mubr.bf16.vlgmr.msra.gmra.mxu1 %v6260_v47  ;;  %7404 = vmatpush3.bf16.msra.mxu0 %v7966_v51  ;;  %v8817_v47 = vpop.f32.mrf.mxu0  ;;  %v8822_v51 = vpop.f32.mrf.mxu1 }
 0x208   : > { %7426 = vmatpush3.bf16.msra.mxu1 %v7967_v52  ;;  %7405 = vmatprep.subr.bf16.mxu0 %v7968_v53  ;;  %v8019_v52 = vld [vmem:[%s8248_s6 + $0xf90] sm:$0xff]  }
 0x209   : > { %7427 = vmatprep.subr.bf16.mxu1 %v7969_v54  ;;  %5994 = vmatprep.mubr.bf16.mxu0 %v6263_v22  ;;  %v8825_v53 = vpop.f32.mrf.mxu0  ;;  %v8020_v54 = vld [vmem:[%s8248_s6 + $0xf48] sm:$0xff]  }
 0x20a   : > { %6035 = vmatprep.mubr.bf16.mxu1 %v6265_v24 }
 0x20b   : > { %7406 = vmatpush3.bf16.msra.mxu0 %v7970_v55  ;;  %v8021_v55 = vld [vmem:[%s8248_s6 + $0xfc8] sm:$0xff]  }
 0x20c   : > { %7428 = vmatpush3.bf16.msra.mxu1 %v7971_v56  ;;  %7407 = vmatprep.subr.bf16.mxu0 %v7972_v57  ;;  %v8022_v56 = vld [vmem:[%s8248_s6 + $0xf08] sm:$0xff]   ;;  %v8830_v57 = vpop.f32.mrf.mxu1 }
 0x20d   : > { %7429 = vmatprep.subr.bf16.mxu1 %v7973_v58  ;;  %v8023_v58 = vld [vmem:[%s8248_s6 + $0xf88] sm:$0xff]  }
 0x20f   : > { %7408 = vmatpush3.bf16.msra.mxu0 %v7974_v59  ;;  %v8833_v59 = vpop.f32.mrf.mxu0 }
 0x210   : > { %7430 = vmatpush3.bf16.msra.mxu1 %v7975_v60  ;;  %7409 = vmatprep.subr.bf16.mxu0 %v7976_v61  ;;  %v8024_v60 = vld [vmem:[%s8248_s6 + $0xf40] sm:$0xff]  }
 0x211   : > { %7431 = vmatprep.subr.bf16.mxu1 %v7977_v62  ;;  %v8025_v61 = vld [vmem:[%s8248_s6 + $0xfc0] sm:$0xff]   ;;  %v8837_v62 = vpop.f32.mrf.mxu0 }
 0x213   : > { %7410 = vmatpush3.bf16.msra.mxu0 %v7978_v63  ;;  %v8026_v63 = vld [vmem:[%s8248_s6 + $0xf00] sm:$0xff]  }
 0x214   : > { %7432 = vmatpush3.bf16.msra.mxu1 %v7979_v0  ;;  %7411 = vmatprep.subr.bf16.mxu0 %v7980_v1  ;;  %v8840_v0 = vpop.f32.mrf.mxu1  ;;  %v8027_v1 = vld [vmem:[%s8248_s6 + $0xf80] sm:$0xff]  }
 0x215   : > { %7433 = vmatprep.subr.bf16.mxu1 %v7981_v2  ;;  %v364_v2 = vld [vmem:[%s8250_s7 + $0xf0] sm:$0xff] }
 0x217   : > { %7412 = vmatpush3.bf16.msra.mxu0 %v7982_v3  ;;  %v396_v3 = vld [vmem:[%s8250_s7 + $0x1f0] sm:$0xff] }
 0x218   : > { %7434 = vmatpush3.bf16.msra.mxu1 %v7983_v4  ;;  %7413 = vmatprep.subr.bf16.mxu0 %v7984_v5  ;;  %v365_v4 = vld [vmem:[%s8250_s7 + $0xf8] sm:$0xff]  ;;  %v8846_v5 = vpop.f32.mrf.mxu1 }
 0x219   : > { %7435 = vmatprep.subr.bf16.mxu1 %v7985_v6  ;;  %v6266_v6 = vcombine.low %v364_v2, %v396_v3 }
 0x21b   : > { %7414 = vmatpush3.bf16.msra.mxu0 %v7986_v7  ;;  %v6267_v7 = vcombine.high %v364_v2, %v396_v3 }
 0x21c   : > { %7436 = vmatpush3.bf16.msra.mxu1 %v7987_v8  ;;  %7415 = vmatprep.subr.bf16.mxu0 %v7988_v9  ;;  %v397_v8 = vld [vmem:[%s8250_s7 + $0x1f8] sm:$0xff]  ;;  %v8849_v9 = vpop.f32.mrf.mxu0 }
 0x21d   : > { %7437 = vmatprep.subr.bf16.mxu1 %v7989_v10  ;;  %v6268_v10 = vcombine.low %v365_v4, %v397_v8 }
 0x21f   : > { %7416 = vmatpush3.bf16.msra.mxu0 %v7990_v11  ;;  %v6269_v11 = vcombine.high %v365_v4, %v397_v8 }
 0x220   : > { %7438 = vmatpush3.bf16.msra.mxu1 %v7991_v12  ;;  %7417 = vmatprep.subr.bf16.mxu0 %v7992_v13  ;;  %v8851_v12 = vpop.f32.mrf.mxu1  ;;  %v8853_v13 = vpop.f32.mrf.mxu0 }
 0x221   : > { %7439 = vmatprep.subr.bf16.mxu1 %v7993_v14 }
 0x222   : > { %v8855_v14 = vpop.f32.mrf.mxu1 }
 0x223   : > { %7418 = vmatpush3.bf16.msra.mxu0 %v7994_v15  ;;  %v8857_v15 = vpop.f32.mrf.mxu0 }
 0x224   : > { %7440 = vmatpush3.bf16.msra.mxu1 %v7995_v16  ;;  %7447 = vmatprep.subr.bf16.mxu0 %v7996_v25  ;;  %v8861_v17 = vpop.f32.mrf.mxu1 }
 0x225   : > { %7469 = vmatprep.subr.bf16.mxu1 %v7997_v26  ;;  %v8859_v16 = vpop.f32.mrf.mxu0 }
 0x226   : > { %5995 = vmatmul.mubr.bf16.vlgmr.msra.gmra.mxu0 %v6262_v21  ;;  %v8863_v18 = vpop.f32.mrf.mxu1 }
 0x227   : > { %6036 = vmatmul.mubr.bf16.vlgmr.msra.gmra.mxu1 %v6264_v23  ;;  %7448 = vmatpush3.bf16.msra.mxu0 %v7998_v27  ;;  %v8865_v19 = vpop.f32.mrf.mxu0 }
 0x228   : > { %7470 = vmatpush3.bf16.msra.mxu1 %v7999_v28  ;;  %7449 = vmatprep.subr.bf16.mxu0 %v8000_v29  ;;  %v8867_v20 = vpop.f32.mrf.mxu1 }
 0x229   : > { %7471 = vmatprep.subr.bf16.mxu1 %v8001_v30  ;;  %6076 = vmatprep.mubr.bf16.mxu0 %v6267_v7  ;;  %v8869_v21 = vpop.f32.mrf.mxu0 }
 0x22a   : > { %6117 = vmatprep.mubr.bf16.mxu1 %v6269_v11  ;;  %v8871_v22 = vpop.f32.mrf.mxu1 }
 0x22b   : > { %7450 = vmatpush3.bf16.msra.mxu0 %v8002_v31  ;;  %v8873_v23 = vpop.f32.mrf.mxu0 }
 0x22c   : > { %7472 = vmatpush3.bf16.msra.mxu1 %v8003_v32  ;;  %7451 = vmatprep.subr.bf16.mxu0 %v8004_v33  ;;  %v8877_v25 = vpop.f32.mrf.mxu1 }
 0x22d   : > { %7473 = vmatprep.subr.bf16.mxu1 %v8005_v34  ;;  %v8875_v24 = vpop.f32.mrf.mxu0 }
 0x22e   : > { %v8879_v26 = vpop.f32.mrf.mxu1 }
 0x22f   : > { %7452 = vmatpush3.bf16.msra.mxu0 %v8006_v35  ;;  %v8881_v27 = vpop.f32.mrf.mxu0 }
 0x230   : > { %7474 = vmatpush3.bf16.msra.mxu1 %v8007_v36  ;;  %7453 = vmatprep.subr.bf16.mxu0 %v8008_v37  ;;  %v8883_v28 = vpop.f32.mrf.mxu1 }
 0x231   : > { %7475 = vmatprep.subr.bf16.mxu1 %v8009_v38  ;;  %v8885_v29 = vpop.f32.mrf.mxu0 }
 0x232   : > { %v8887_v30 = vpop.f32.mrf.mxu1 }
 0x233   : > { %7454 = vmatpush3.bf16.msra.mxu0 %v8010_v39  ;;  %v8889_v31 = vpop.f32.mrf.mxu0 }
 0x234   : > { %7476 = vmatpush3.bf16.msra.mxu1 %v8011_v40  ;;  %7455 = vmatprep.subr.bf16.mxu0 %v8012_v42  ;;  %v8893_v33 = vpop.f32.mrf.mxu1 }
 0x235   : > { %7477 = vmatprep.subr.bf16.mxu1 %v8013_v43  ;;  %v8891_v32 = vpop.f32.mrf.mxu0 }
 0x236   : > { %v8895_v34 = vpop.f32.mrf.mxu1 }
 0x237   : > { %7456 = vmatpush3.bf16.msra.mxu0 %v8014_v44  ;;  %v8897_v35 = vpop.f32.mrf.mxu0 }
 0x238   : > { %7478 = vmatpush3.bf16.msra.mxu1 %v8015_v46  ;;  %7457 = vmatprep.subr.bf16.mxu0 %v8016_v48  ;;  %v8899_v36 = vpop.f32.mrf.mxu1 }
 0x239   : > { %7479 = vmatprep.subr.bf16.mxu1 %v8017_v49  ;;  %v8901_v37 = vpop.f32.mrf.mxu0 }
 0x23a   : > { %v8903_v38 = vpop.f32.mrf.mxu1 }
 0x23b   : > { %7458 = vmatpush3.bf16.msra.mxu0 %v8018_v50  ;;  %v8905_v39 = vpop.f32.mrf.mxu0 }
 0x23c   : > { %7480 = vmatpush3.bf16.msra.mxu1 %v8019_v52  ;;  %7459 = vmatprep.subr.bf16.mxu0 %v8020_v54  ;;  %v8909_v42 = vpop.f32.mrf.mxu1 }
 0x23d   : > { %7481 = vmatprep.subr.bf16.mxu1 %v8021_v55  ;;  %v8907_v40 = vpop.f32.mrf.mxu0 }
 0x23e   : > { %v8911_v43 = vpop.f32.mrf.mxu1 }
 0x23f   : > { %7460 = vmatpush3.bf16.msra.mxu0 %v8022_v56  ;;  %v8913_v44 = vpop.f32.mrf.mxu0 }
 0x240   : > { %7482 = vmatpush3.bf16.msra.mxu1 %v8023_v58  ;;  %7461 = vmatprep.subr.bf16.mxu0 %v8024_v60  ;;  %v8915_v46 = vpop.f32.mrf.mxu1 }
 0x241   : > { %7483 = vmatprep.subr.bf16.mxu1 %v8025_v61  ;;  %v8917_v48 = vpop.f32.mrf.mxu0 }
 0x242   : > { %v8919_v49 = vpop.f32.mrf.mxu1 }
 0x243   : > { %7462 = vmatpush3.bf16.msra.mxu0 %v8026_v63  ;;  %v8921_v50 = vpop.f32.mrf.mxu0 }
 0x244   : > { %7484 = vmatpush3.bf16.msra.mxu1 %v8027_v1  ;;  %v8925_v54 = vpop.f32.mrf.mxu1 }
 0x245   : > { %v8923_v52 = vpop.f32.mrf.mxu0 }
 0x246   : > { %6077 = vmatmul.mubr.bf16.vlgmr.msra.gmra.mxu0 %v6266_v6  ;;  %v8927_v55 = vpop.f32.mrf.mxu1 }
 0x247   : > { %6118 = vmatmul.mubr.bf16.vlgmr.msra.gmra.mxu1 %v6268_v10  ;;  %v8929_v56 = vpop.f32.mrf.mxu0 }
 0x248   : > { %v8931_v58 = vpop.f32.mrf.mxu1 }
 0x249   : > { %v8933_v60 = vpop.f32.mrf.mxu0 }
 0x24a   : > { %v8935_v61 = vpop.f32.mrf.mxu1 }
 0x24b   : > { %9123 = vst [vmem:[#allocation4_spill] sm:$0xff] %v8935_v61  ;;  %v8937_v63 = vpop.f32.mrf.mxu0 }
 0x24c   : > { %9124 = vst [vmem:[#allocation5_spill] sm:$0xff] %v8937_v63  ;;  %v8941_v2 = vpop.f32.mrf.mxu1 }
 0x24d   : > { %v8939_v1 = vpop.f32.mrf.mxu0  ;;  %9126 = vst [vmem:[#allocation7_spill] sm:$0xff] %v8941_v2 }
 0x24e   : > { %9125 = vst [vmem:[#allocation6_spill] sm:$0xff] %v8939_v1  ;;  %v8943_v3 = vpop.f32.mrf.mxu1 }
 0x24f   : > { %9127 = vst [vmem:[#allocation8_spill] sm:$0xff] %v8943_v3  ;;  %v8945_v4 = vpop.f32.mrf.mxu0 }
 0x250   : > { %9128 = vst [vmem:[#allocation9_spill] sm:$0xff] %v8945_v4  ;;  %v8947_v6 = vpop.f32.mrf.mxu1 }
 0x251   : > { %9129 = vst [vmem:[#allocation10_spill] sm:$0xff] %v8947_v6  ;;  %v8949_v7 = vpop.f32.mrf.mxu0 }
 0x252   : > { %9130 = vst [vmem:[#allocation11_spill] sm:$0xff] %v8949_v7  ;;  %v8951_v8 = vpop.f32.mrf.mxu1 }
 0x253   : > { %9131 = vst [vmem:[#allocation12_spill] sm:$0xff] %v8951_v8  ;;  %v8953_v10 = vpop.f32.mrf.mxu0  ;;  %v6805_v8 = vadd.f32 %v8817_v47, %v8809_v41  ;;  %v6852_v47 = vadd.f32 %v8857_v15, %v8853_v13  ;;  %v6896_v13 = vadd.f32 %v8873_v23, %v8869_v21  ;;  %v6940_v21 = vadd.f32 %v8889_v31, %v8885_v29 }
 0x254   : > { %v8957_v61 = vpop.f32.mrf.mxu1 }
 0x255   : > { %v8955_v11 = vpop.f32.mrf.mxu0  ;;  %9133 = vst [vmem:[#allocation14_spill] sm:$0xff] %v8957_v61  ;;  %v6827_v61 = vadd.f32 %v8822_v51, %v8814_v45  ;;  %v6871_v45 = vadd.f32 %v8851_v12, %v8846_v5  ;;  %v6915_v12 = vadd.f32 %v8867_v20, %v8863_v18  ;;  %v6959_v20 = vadd.f32 %v8883_v28, %v8879_v26 }
 0x256   : > { %9132 = vst [vmem:[#allocation13_spill] sm:$0xff] %v8955_v11  ;;  %v8959_v63 = vpop.f32.mrf.mxu1  ;;  %v7003_v26 = vadd.f32 %v8899_v36, %v8895_v34  ;;  %v6984_v28 = vadd.f32 %v8905_v39, %v8901_v37  ;;  %v7047_v36 = vadd.f32 %v8915_v46, %v8911_v43  ;;  %v7028_v37 = vadd.f32 %v8921_v50, %v8917_v48  ;;  %v9140_v46 = vld [vmem:[#allocation5_spill] sm:$0xff] }
 0x257   : > { %9134 = vst [vmem:[#allocation15_spill] sm:$0xff] %v8959_v63  ;;  %v8961_v1 = vpop.f32.mrf.mxu0  ;;  %v6849_v63 = vadd.f32 %v8849_v9, %v8837_v62  ;;  %v7091_v43 = vadd.f32 %v8931_v58, %v8927_v55  ;;  %v7072_v48 = vadd.f32 %v9140_v46, %v8933_v60 }
 0x258   : > { %v8963_v2 = vpop.f32.mrf.mxu1 }
 0x259   : > { %9135 = vst [vmem:[#allocation16_spill] sm:$0xff] %v8963_v2  ;;  %v8965_v3 = vpop.f32.mrf.mxu0  ;;  %v9147_v55 = vld [vmem:[#allocation11_spill] sm:$0xff] }
 0x25a   : > { %9136 = vst [vmem:[#allocation17_spill] sm:$0xff] %v8965_v3  ;;  %v8967_v4 = vpop.f32.mrf.mxu1  ;;  %v7116_v58 = vadd.f32 %v8953_v10, %v9147_v55 }
 0x25b   : > { %9137 = vst [vmem:[#allocation18_spill] sm:$0xff] %v8967_v4  ;;  %v8969_v6 = vpop.f32.mrf.mxu0  ;;  %v4890_v4 = vadd.f32 %v6827_v61, %v6805_v8  ;;  %v6893_v61 = vadd.f32 %v8865_v19, %v8859_v16  ;;  %v6937_v16 = vadd.f32 %v8881_v27, %v8875_v24  ;;  %v6981_v24 = vadd.f32 %v8897_v35, %v8891_v32 }
 0x25c   : > { %9138 = vst [vmem:[#allocation19_spill] sm:$0xff] %v8969_v6  ;;  %v8977_v11 = vpop.f32.mrf.mxu1  ;;  %v6808_v6 = vadd.f32 %v8833_v59, %v8825_v53  ;;  %v7025_v35 = vadd.f32 %v8913_v44, %v8907_v40  ;;  %v7069_v44 = vadd.f32 %v8929_v56, %v8923_v52 }
 0x25d   : > { %v8971_v7 = vpop.f32.mrf.mxu0  ;;  %v4931_v41 = vadd.f32 %v6849_v63, %v4890_v4 }
 0x25e   : > { %9139 = vst [vmem:[#allocation20_spill] sm:$0xff] %v8971_v7  ;;  %v8981_v2 = vpop.f32.mrf.mxu1  ;;  %v6830_v7 = vadd.f32 %v8840_v0, %v8830_v57  ;;  %v6874_v0 = vadd.f32 %v8861_v17, %v8855_v14  ;;  %v6918_v17 = vadd.f32 %v8877_v25, %v8871_v22  ;;  %v6962_v22 = vadd.f32 %v8893_v33, %v8887_v30 }
 0x25f   : > { %v8983_v3 = vpop.f32.mrf.mxu0  ;;  %v4972_v8 = vadd.f32 %v6871_v45, %v4931_v41  ;;  %v7006_v33 = vadd.f32 %v8909_v42, %v8903_v38  ;;  %v7050_v38 = vadd.f32 %v8925_v54, %v8919_v49  ;;  %v9145_v54 = vld [vmem:[#allocation8_spill] sm:$0xff] }
 0x260   : > { %v8993_v51 = vpop.f32.mrf.mxu1  ;;  %v4893_v9 = vadd.f32 %v6830_v7, %v6808_v6 }
 0x261   : > { %v8995_v62 = vpop.f32.mrf.mxu0  ;;  %v5013_v5 = vadd.f32 %v6893_v61, %v4972_v8 }
 0x262   : > { %v4934_v53 = vadd.f32 %v6852_v47, %v4893_v9  ;;  %v8999_v59 = vpop.f32.mrf.mxu1 }
 0x263   : > { %v9001_v57 = vpop.f32.mrf.mxu0  ;;  %v5054_v4 = vadd.f32 %v6915_v12, %v5013_v5 }
 0x264   : > { %v4975_v63 = vadd.f32 %v6874_v0, %v4934_v53  ;;  %v9013_v19 = vpop.f32.mrf.mxu1 }
 0x265   : > { %v5095_v18 = vadd.f32 %v6937_v16, %v5054_v4  ;;  %v9142_v16 = vld [vmem:[#allocation9_spill] sm:$0xff] }
 0x266   : > { %v9009_v15 = vpop.f32.mrf.mxu0  ;;  %v5016_v6 = vadd.f32 %v6896_v13, %v4975_v63  ;;  %v9141_v63 = vld [vmem:[#allocation6_spill] sm:$0xff] }
 0x267   : > { %v9015_v7 = vpop.f32.mrf.mxu1  ;;  %v5136_v45 = vadd.f32 %v6959_v20, %v5095_v18  ;;  %v7113_v4 = vadd.f32 %v9142_v16, %v9141_v63  ;;  %v9143_v20 = vld [vmem:[#allocation4_spill] sm:$0xff]  ;;  %v9156_v16 = vld [vmem:[#allocation18_spill] sm:$0xff] }
 0x268   : > { %v9017_v14 = vpop.f32.mrf.mxu0  ;;  %v5057_v23 = vadd.f32 %v6918_v17, %v5016_v6 }
 0x269   : > { %v9027_v27 = vpop.f32.mrf.mxu1  ;;  %v5177_v25 = vadd.f32 %v6981_v24, %v5136_v45  ;;  %v9146_v24 = vld [vmem:[#allocation10_spill] sm:$0xff] }
 0x26a   : > { %v9029_v41 = vpop.f32.mrf.mxu0  ;;  %v5098_v47 = vadd.f32 %v6940_v21, %v5057_v23  ;;  %v9144_v21 = vld [vmem:[#allocation7_spill] sm:$0xff]  ;;  %v7135_v45 = vadd.f32 %v9146_v24, %v9145_v54 }
 0x26b   : > { %v9037_v29 = vpop.f32.mrf.mxu1  ;;  %v5218_v61 = vadd.f32 %v7003_v26, %v5177_v25  ;;  %v7094_v23 = vadd.f32 %v9144_v21, %v9143_v20  ;;  %v7204_v20 = vadd.f32 %v9001_v57, %v8995_v62 }
 0x26c   : > { %v9039_v31 = vpop.f32.mrf.mxu0  ;;  %v5139_v32 = vadd.f32 %v6962_v22, %v5098_v47  ;;  %v9148_v22 = vld [vmem:[#allocation13_spill] sm:$0xff] }
 0x26d   : > { %v9045_v30 = vpop.f32.mrf.mxu1  ;;  %v5259_v34 = vadd.f32 %v7025_v35, %v5218_v61  ;;  %v7157_v25 = vadd.f32 %v8961_v1, %v9148_v22  ;;  %v9149_v61 = vld [vmem:[#allocation12_spill] sm:$0xff] }
 0x26e   : > { %v5180_v8 = vadd.f32 %v6984_v28, %v5139_v32 }
 0x26f   : > { %v5300_v0 = vadd.f32 %v7047_v36, %v5259_v34  ;;  %v9151_v36 = vld [vmem:[#allocation15_spill] sm:$0xff] }
 0x270   : > { %v5221_v40 = vadd.f32 %v7006_v33, %v5180_v8  ;;  %v9150_v8 = vld [vmem:[#allocation14_spill] sm:$0xff] }
 0x271   : > { %v5341_v42 = vadd.f32 %v7069_v44, %v5300_v0  ;;  %v7138_v33 = vadd.f32 %v9150_v8, %v9149_v61  ;;  %v9153_v44 = vld [vmem:[#allocation17_spill] sm:$0xff]  ;;  %v9154_v0 = vld [vmem:[#allocation19_spill] sm:$0xff] }
 0x272   : > { %v5262_v5 = vadd.f32 %v7028_v37, %v5221_v40  ;;  %v9152_v37 = vld [vmem:[#allocation16_spill] sm:$0xff] }
 0x273   : > { %v5382_v56 = vadd.f32 %v7091_v43, %v5341_v42  ;;  %v7179_v40 = vadd.f32 %v9152_v37, %v9151_v36  ;;  %v9155_v43 = vld [vmem:[#allocation20_spill] sm:$0xff] }
 0x274   : > { %v5303_v50 = vadd.f32 %v7050_v38, %v5262_v5  ;;  %v7160_v5 = vadd.f32 %v9154_v0, %v9153_v44  ;;  %v7201_v1 = vadd.f32 %v8983_v3, %v9155_v43 }
 0x275   : > { %v5423_v49 = vadd.f32 %v7113_v4, %v5382_v56  ;;  %v7182_v4 = vadd.f32 %v8977_v11, %v9156_v16  ;;  %v7226_v11 = vadd.f32 %v9013_v19, %v8999_v59 }
 0x276   : > { %v5344_v17 = vadd.f32 %v7072_v48, %v5303_v50 }
 0x277   : > { %v5464_v32 = vadd.f32 %v7135_v45, %v5423_v49  ;;  %v7245_v49 = vadd.f32 %v9017_v14, %v9009_v15 }
 0x278   : > { %v5385_v47 = vadd.f32 %v7094_v23, %v5344_v17  ;;  %v7223_v17 = vadd.f32 %v8993_v51, %v8981_v2  ;;  %v7267_v2 = vadd.f32 %v9027_v27, %v9015_v7  ;;  %v7248_v51 = vadd.f32 %v9039_v31, %v9029_v41 }
 0x279   : > { %v5505_v34 = vadd.f32 %v7157_v25, %v5464_v32  ;;  %v7270_v25 = vadd.f32 %v9045_v30, %v9037_v29 }
 0x27a   : > { %v5426_v35 = vadd.f32 %v7116_v58, %v5385_v47 }
 0x27b   : > { %v5546_v46 = vadd.f32 %v7179_v40, %v5505_v34 }
 0x27c   : > { %v5467_v42 = vadd.f32 %v7138_v33, %v5426_v35 }
 0x27d   : > { %v5587_v56 = vadd.f32 %v7201_v1, %v5546_v46 }
 0x27e   : > { %v5508_v48 = vadd.f32 %v7160_v5, %v5467_v42 }
 0x27f   : > { %v5628_v54 = vadd.f32 %v7223_v17, %v5587_v56 }
 0x280   : > { %v5549_v23 = vadd.f32 %v7182_v4, %v5508_v48 }
 0x281   : > { %v5669_v58 = vadd.f32 %v7245_v49, %v5628_v54 }
 0x282   : > { %v5590_v24 = vadd.f32 %v7204_v20, %v5549_v23 }
 0x283   : > { %v5710_v14 = vadd.f32 %v7267_v2, %v5669_v58 }
 0x284   : > { %v5631_v62 = vadd.f32 %v7226_v11, %v5590_v24 }
 0x286   : > { %v9043_v9 = vpop.f32.mrf.mxu0  ;;  %v5672_v22 = vadd.f32 %v7248_v51, %v5631_v62 }
 0x287   : > { %v9053_v39 = vpop.f32.mrf.mxu1 }
 0x288   : > { %v7288_v53 = vpop.f32.mrf.mxu0  ;;  %v5713_v7 = vadd.f32 %v7270_v25, %v5672_v22 }
 0x289   : > { %v7310_v12 = vpop.f32.mrf.mxu1  ;;  %v7289_v57 = vadd.f32 %v7288_v53, %v9043_v9 }
 0x28a   : > { %v7290_v13 = vpop.f32.mrf.mxu0  ;;  %v7311_v59 = vadd.f32 %v7310_v12, %v9053_v39 }
 0x28b   : > { %v7312_v6 = vpop.f32.mrf.mxu1  ;;  %v5751_v32 = vadd.f32 %v7289_v57, %v5710_v14 }
 0x28c   : > { %v7291_v52 = vpop.f32.mrf.mxu0 }
 0x28d   : > { %v7313_v60 = vpop.f32.mrf.mxu1  ;;  %v7292_v19 = vadd.f32 %v7291_v52, %v7290_v13  ;;  %v5792_v41 = vadd.f32 %v7311_v59, %v5751_v32 }
 0x28e   : > { %v7314_v9 = vadd.f32 %v7313_v60, %v7312_v6 }
 0x28f   : > { %v5754_v31 = vadd.f32 %v7292_v19, %v5713_v7 }
 0x291   : > { %v5795_v44 = vadd.f32 %v7314_v9, %v5754_v31 }
 0x2a6   : > { %v7331_v18 = vpop.f32.mrf.mxu0 }
 0x2a7   : > { %v7353_v26 = vpop.f32.mrf.mxu1 }
 0x2a8   : > { %v7332_v28 = vpop.f32.mrf.mxu0 }
 0x2a9   : > { %v7354_v10 = vpop.f32.mrf.mxu1  ;;  %v7333_v27 = vadd.f32 %v7332_v28, %v7331_v18 }
 0x2aa   : > { %v7334_v38 = vpop.f32.mrf.mxu0  ;;  %v7355_v34 = vadd.f32 %v7354_v10, %v7353_v26 }
 0x2ab   : > { %v7356_v50 = vpop.f32.mrf.mxu1  ;;  %v5833_v53 = vadd.f32 %v7333_v27, %v5792_v41 }
 0x2ac   : > { %v7335_v63 = vpop.f32.mrf.mxu0 }
 0x2ad   : > { %v7357_v3 = vpop.f32.mrf.mxu1  ;;  %v7336_v36 = vadd.f32 %v7335_v63, %v7334_v38  ;;  %v5874_v30 = vadd.f32 %v7355_v34, %v5833_v53 }
 0x2ae   : > { %v7358_v13 = vadd.f32 %v7357_v3, %v7356_v50 }
 0x2af   : > { %v5836_v0 = vadd.f32 %v7336_v36, %v5795_v44 }
 0x2b1   : > { %v5877_v28 = vadd.f32 %v7358_v13, %v5836_v0 }
 0x2c6   : > { %v7375_v21 = vpop.f32.mrf.mxu0 }
 0x2c7   : > { %v7397_v45 = vpop.f32.mrf.mxu1 }
 0x2c8   : > { %v7376_v55 = vpop.f32.mrf.mxu0 }
 0x2c9   : > { %v7398_v47 = vpop.f32.mrf.mxu1  ;;  %v7377_v29 = vadd.f32 %v7376_v55, %v7375_v21 }
 0x2ca   : > { %v7378_v15 = vpop.f32.mrf.mxu0  ;;  %v7399_v5 = vadd.f32 %v7398_v47, %v7397_v45  ;;  %v332_v45 = vld [vmem:[#allocation2] sm:$0xff] }
 0x2cb   : > { %v7400_v35 = vpop.f32.mrf.mxu1  ;;  %v5915_v52 = vadd.f32 %v7377_v29, %v5874_v30 }
 0x2cc   : > { %v7379_v61 = vpop.f32.mrf.mxu0 }
 0x2cd   : > { %v7401_v33 = vpop.f32.mrf.mxu1  ;;  %v7380_v18 = vadd.f32 %v7379_v61, %v7378_v15  ;;  %v5956_v6 = vadd.f32 %v7399_v5, %v5915_v52  ;;  %v333_v15 = vld [vmem:[#allocation2 + $0x8] sm:$0xff] }
 0x2ce   : > { %v7402_v26 = vadd.f32 %v7401_v33, %v7400_v35 }
 0x2cf   : > { %v5918_v60 = vadd.f32 %v7380_v18, %v5877_v28 }
 0x2d1   : > { %v5959_v16 = vadd.f32 %v7402_v26, %v5918_v60 }
 0x2e6   : > { %v7419_v8 = vpop.f32.mrf.mxu0 }
 0x2e7   : > { %v7441_v37 = vpop.f32.mrf.mxu1 }
 0x2e8   : > { %v7420_v40 = vpop.f32.mrf.mxu0 }
 0x2e9   : > { %v7442_v39 = vpop.f32.mrf.mxu1  ;;  %v7421_v42 = vadd.f32 %v7420_v40, %v7419_v8 }
 0x2ea   : > { %v7422_v12 = vpop.f32.mrf.mxu0  ;;  %v7443_v38 = vadd.f32 %v7442_v39, %v7441_v37 }
 0x2eb   : > { %v7444_v43 = vpop.f32.mrf.mxu1  ;;  %v5997_v10 = vadd.f32 %v7421_v42, %v5956_v6 }
 0x2ec   : > { %v7423_v1 = vpop.f32.mrf.mxu0 }
 0x2ed   : > { %v7424_v46 = vadd.f32 %v7423_v1, %v7422_v12  ;;  %v7445_v48 = vpop.f32.mrf.mxu1  ;;  %v6038_v17 = vadd.f32 %v7443_v38, %v5997_v10 }
 0x2ee   : > { %v7446_v49 = vadd.f32 %v7445_v48, %v7444_v43 }
 0x2ef   : > { %v6000_v50 = vadd.f32 %v7424_v46, %v5959_v16 }
 0x2f1   : > { %v6041_v11 = vadd.f32 %v7446_v49, %v6000_v50 }
 0x306   : > { %v7463_v63 = vpop.f32.mrf.mxu0 }
 0x307   : > { %v7485_v4 = vpop.f32.mrf.mxu1 }
 0x308   : > { %v7464_v56 = vpop.f32.mrf.mxu0 }
 0x309   : > { %v7465_v20 = vadd.f32 %v7464_v56, %v7463_v63  ;;  %v7486_v21 = vpop.f32.mrf.mxu1 }
 0x30a   : > { %v7466_v23 = vpop.f32.mrf.mxu0  ;;  %v7487_v54 = vadd.f32 %v7486_v21, %v7485_v4 }
 0x30b   : > { %v6079_v3 = vadd.f32 %v7465_v20, %v6038_v17  ;;  %v7488_v24 = vpop.f32.mrf.mxu1 }
 0x30c   : > { %v7467_v55 = vpop.f32.mrf.mxu0 }
 0x30d   : > { %v6120_v58 = vadd.f32 %v7487_v54, %v6079_v3  ;;  %v7468_v2 = vadd.f32 %v7467_v55, %v7466_v23  ;;  %v7489_v51 = vpop.f32.mrf.mxu1 }
 0x30e   : > { %v7490_v47 = vadd.f32 %v7489_v51, %v7488_v24 }
 0x30f   : > { %v6126_v62 = vadd.f32 %v6120_v58, %v332_v45  ;;  %v6082_v57 = vadd.f32 %v7468_v2, %v6041_v11 }
 0x311   : > { %6128 = vst [vmem:[#allocation2] sm:$0xff] %v6126_v62  ;;  %v6123_v14 = vadd.f32 %v7490_v47, %v6082_v57  ;;  %6133 = sbr.rel (%p6782_p10) target bundleno = 802 (0x322), region = 63 }
 0x313   : > { %v6127_v22 = vadd.f32 %v6123_v14, %v333_v15 }
 0x315   : > { %6129 = vst [vmem:[#allocation2 + $0x8] sm:$0xff] %v6127_v22 }
 0x316   : > { %v6783_v32 = vld [vmem:[%s9121_s2] ss:$0 sm:$0xff] }
 0x318   : > { %v6134_v25 = vld [vmem:[#allocation2] sm:$0xff] }
 0x319   : > { %v6143_v19 = vadd.f32 %v6783_v32, %v6134_v25 }
 0x31b   : > { %v6145_v61 = vmax.f32 %v6143_v19, 0.0 }
 0x31c   : > { %v6135_v59 = vld [vmem:[#allocation2 + $0x8] sm:$0xff] }
 0x31d   : > { %v6144_v35 = vadd.f32 %v6783_v32, %v6135_v59  ;;  %6147 = vst [vmem:[%s9122_s3] sm:$0xff] %v6145_v61 }
 0x31f   : > { %v6146_v7 = vmax.f32 %v6144_v35, 0.0 }
 0x321   : > { %6148 = vst [vmem:[%s9122_s3 + $0x8] sm:$0xff] %v6146_v7 }
 0x322 PF: > { %p10_p11 = scmp.ge.s32.totalorder %s8092_s16, 6   ;;  %s9157_s12 = smov %s8046_s13 }
 0x323   : > { %s9158_s13 = smov %s8101_s19  ;;  %s9159_s14 = smov %s8092_s16 }
 0x324   :  { %12 = sbr.rel (!%p10_p11) target bundleno = 2 (0x2), region = 97 }

</bundles_post_ra>
